<compile_context>
chip_gen: v6e
topology: v6e:2x2x1
jax: 0.10.0
libtpu: 0.0.40
codegen_flags: <defaults>
</compile_context>

<pallas_src>
import functools
import math

import jax
import jax.numpy as jnp
from jax.experimental import pallas as pl
from jax.experimental.pallas import tpu as pltpu


# ---------------------------------------------------------------------------
# pltpu.roll direction probe (resolved once, at trace time, outside jit)
# ---------------------------------------------------------------------------
_ROLL_IMPL = None  # "fwd" (== jnp.roll), "bwd" (opposite), or "jnp" (fallback)


def _resolve_roll_impl():
    global _ROLL_IMPL
    if _ROLL_IMPL is not None:
        return _ROLL_IMPL
    try:
        probe = jnp.tile(jnp.arange(128, dtype=jnp.float32)[None, :], (8, 1))

        def _k(x_ref, o_ref):
            o_ref[...] = pltpu.roll(x_ref[...], shift=3, axis=1)

        out = pl.pallas_call(
            _k, out_shape=jax.ShapeDtypeStruct((8, 128), jnp.float32))(probe)
        if bool(jnp.array_equal(out, jnp.roll(probe, 3, axis=1))):
            _ROLL_IMPL = "fwd"
        elif bool(jnp.array_equal(out, jnp.roll(probe, -3, axis=1))):
            _ROLL_IMPL = "bwd"
        else:
            _ROLL_IMPL = "jnp"
    except Exception:  # conservative fallback (correct, just slower)
        _ROLL_IMPL = "jnp"
    return _ROLL_IMPL


def _lane_roll(x, shift, axis):
    """out[..., p] = x[..., (p - shift) % n]   (jnp.roll convention)."""
    n = x.shape[axis]
    shift = shift % n
    if shift == 0:
        return x
    impl = _ROLL_IMPL or "jnp"
    if impl == "fwd":
        return pltpu.roll(x, shift=shift, axis=axis)
    if impl == "bwd":
        return pltpu.roll(x, shift=n - shift, axis=axis)
    return jnp.roll(x, shift, axis=axis)


# ---------------------------------------------------------------------------
# Kernel
# ---------------------------------------------------------------------------
def _ffn_kernel(x_ref, w1_ref, b1_ref, w2_ref, b2_ref, r_ref, c_ref,
                o_ref, col_ref, mid_ref, *, H, W, neg_slope):
    # x_ref  : (C, N)     one image, channels-first, N = H*W on lanes
    # w*_ref : (C, 9*C)   bf16 im2col weights, tap order k = kh*3 + kw
    # b*_ref : (C, 1)     f32 bias (broadcast along lanes)
    # r_ref/c_ref : (1, N) int32  spatial row / col index of each lane
    # o_ref  : (C, N)
    # col_ref: (9*C, N) bf16 VMEM scratch — im2col buffer shared by both convs
    # mid_ref: (C, N)  f32  VMEM scratch — conv1 activation (never hits HBM)
    C, N = o_ref.shape
    r_idx = r_ref[...]
    c_idx = c_ref[...]

    def conv3x3(act_ref, w_ref, b_ref, dil):
        # Build im2col in flattened (C, H*W) space: 9 lane-rolled, border-masked
        # taps (zero padding of the conv == the mask), then one bf16 MXU matmul.
        for i in range(3):
            for j in range(3):
                k = i * 3 + j
                dh = (i - 1) * dil
                dw = (j - 1) * dil
                a = act_ref[...].astype(jnp.float32)
                if dh == 0 and dw == 0:
                    col_ref[k * C:(k + 1) * C, :] = a.astype(col_ref.dtype)
                    continue
                rolled = _lane_roll(a, -(dh * W + dw), axis=1)
                ok = ((r_idx >= -dh) & (r_idx < H - dh) &
                      (c_idx >= -dw) & (c_idx < W - dw))
                col_ref[k * C:(k + 1) * C, :] = (
                    rolled * ok.astype(jnp.float32)).astype(col_ref.dtype)
        acc = jnp.dot(w_ref[...], col_ref[...],
                      preferred_element_type=jnp.float32)        # (C, N) f32
        acc = acc + b_ref[...]                                   # bias (C, 1)
        return jnp.where(acc >= 0.0, acc, acc * neg_slope)       # LeakyReLU

    mid_ref[...] = conv3x3(x_ref, w1_ref, b1_ref, dil=2)   # conv1: pad=2, dil=2
    o_ref[...] = conv3x3(mid_ref, w2_ref, b2_ref, dil=1).astype(o_ref.dtype)


# ---------------------------------------------------------------------------
# Wrapper
# ---------------------------------------------------------------------------
def feedforward_pallas(x, w1, b1, w2, b2, *, negative_slope=0.2):
    """EDVR FeedForward forward pass.

    x      : (B, C, H, W)   NCHW, like the PyTorch module.
    w1, w2 : (C, C, 3, 3)   PyTorch Conv2d weight layout (out, in, kh, kw).
    b1, b2 : (C,)
    Returns (B, C, H, W).
    """
    B, C, H, W = x.shape
    N = H * W
    _resolve_roll_impl()

    # Free metadata reshapes only — no pad / transpose HBM passes.
    x_flat = x.reshape(B, C, N)

    # (C_out, 9*C_in) bf16 "im2col" weights, tap order k = kh*3 + kw.
    w1b = jnp.transpose(w1, (0, 2, 3, 1)).reshape(C, 9 * C).astype(jnp.bfloat16)
    w2b = jnp.transpose(w2, (0, 2, 3, 1)).reshape(C, 9 * C).astype(jnp.bfloat16)
    b1c = b1.reshape(C, 1).astype(jnp.float32)
    b2c = b2.reshape(C, 1).astype(jnp.float32)

    # Spatial row / column index of every flattened (lane) position.
    pos = jnp.arange(N, dtype=jnp.int32)
    r_idx = (pos // W).reshape(1, N)
    c_idx = (pos % W).reshape(1, N)

    kernel = functools.partial(_ffn_kernel, H=H, W=W, neg_slope=negative_slope)

    itemsize = jnp.dtype(x.dtype).itemsize
    flops = 4 * B * N * 9 * C * C                      # 2 convs x 2 flops/MAC
    bytes_accessed = 2 * B * C * N * itemsize + 2 * (w1b.size + w2b.size)

    out_flat = pl.pallas_call(
        kernel,
        out_shape=jax.ShapeDtypeStruct((B, C, N), x.dtype),
        grid_spec=pltpu.PrefetchScalarGridSpec(
            num_scalar_prefetch=0,
            grid=(B,),
            in_specs=[
                pl.BlockSpec((None, C, N), lambda b: (b, 0, 0)),   # x (one img)
                pl.BlockSpec((C, 9 * C), lambda b: (0, 0)),        # w1 resident
                pl.BlockSpec((C, 1), lambda b: (0, 0)),            # b1
                pl.BlockSpec((C, 9 * C), lambda b: (0, 0)),        # w2 resident
                pl.BlockSpec((C, 1), lambda b: (0, 0)),            # b2
                pl.BlockSpec((1, N), lambda b: (0, 0)),            # r_idx
                pl.BlockSpec((1, N), lambda b: (0, 0)),            # c_idx
            ],
            out_specs=pl.BlockSpec((None, C, N), lambda b: (b, 0, 0)),
            scratch_shapes=[
                pltpu.VMEM((9 * C, N), jnp.bfloat16),   # shared im2col buffer
                pltpu.VMEM((C, N), jnp.float32),        # conv1 activation (mid)
            ],
        ),
        compiler_params=pltpu.CompilerParams(
            dimension_semantics=("parallel",),
            vmem_limit_bytes=32 * 1024 * 1024),
        cost_estimate=pl.CostEstimate(flops=flops, transcendentals=0,
                                      bytes_accessed=bytes_accessed),
    )(x_flat, w1b, b1c, w2b, b2c, r_idx, c_idx)

    return out_flat.reshape(B, C, H, W)


# ---------------------------------------------------------------------------
# Pure-JAX reference
# ---------------------------------------------------------------------------
def _ref_feedforward(x, w1, b1, w2, b2, negative_slope=0.2):
    dn = ("NCHW", "OIHW", "NCHW")
    y = jax.lax.conv_general_dilated(
        x, w1, window_strides=(1, 1), padding=((2, 2), (2, 2)),
        rhs_dilation=(2, 2), dimension_numbers=dn,
        precision=jax.lax.Precision.HIGHEST) + b1[None, :, None, None]
    y = jnp.where(y >= 0, y, negative_slope * y)
    y = jax.lax.conv_general_dilated(
        y, w2, window_strides=(1, 1), padding=((1, 1), (1, 1)),
        dimension_numbers=dn,
        precision=jax.lax.Precision.HIGHEST) + b2[None, :, None, None]
    y = jnp.where(y >= 0, y, negative_slope * y)
    return y


if __name__ == "__main__":
    key = jax.random.PRNGKey(0)
    k_x, k_w1, k_b1, k_w2, k_b2 = jax.random.split(key, 5)

    batch, d_model, height, width = 2, 128, 16, 16     # H*W = 256 lane-dense

    fan_in = d_model * 3 * 3
    bound = 1.0 / math.sqrt(fan_in)
    w1 = jax.random.uniform(k_w1, (d_model, d_model, 3, 3),
                            minval=-bound, maxval=bound, dtype=jnp.float32)
    b1 = jax.random.uniform(k_b1, (d_model,),
                            minval=-bound, maxval=bound, dtype=jnp.float32)
    w2 = jax.random.uniform(k_w2, (d_model, d_model, 3, 3),
                            minval=-bound, maxval=bound, dtype=jnp.float32)
    b2 = jax.random.uniform(k_b2, (d_model,),
                            minval=-bound, maxval=bound, dtype=jnp.float32)
    x = jax.random.normal(k_x, (batch, d_model, height, width),
                          dtype=jnp.float32)

    out = feedforward_pallas(x, w1, b1, w2, b2)
    out = jax.block_until_ready(out)

    # The kernel feeds the MXU bf16 operands (f32 accumulation), so compare
    # against the reference evaluated on bf16-rounded x / weights.
    def _rnd(a):
        return a.astype(jnp.bfloat16).astype(jnp.float32)

    ref = _ref_feedforward(_rnd(x), _rnd(w1), b1, _rnd(w2), b2)
    assert out.shape == (batch, d_model, height, width)
    max_err = float(jnp.max(jnp.abs(out - ref)))
    assert jnp.allclose(out, ref, atol=2e-2, rtol=2e-2), max_err

    print("KERNEL_OK")
</pallas_src>

<mosaic_0001>
module attributes {stable_mosaic.version = 11 : i64} {
  func.func @_k(%arg0: memref<8x128xf32, #tpu.memory_space<vmem>>, %arg1: memref<8x128xf32, #tpu.memory_space<vmem>>) attributes {dimension_semantics = [], scalar_prefetch = 0 : i64, scratch_operands = 0 : i64, tpu.core_type = #tpu.core_type<tc>} {
    %c0 = arith.constant 0 : index
    %c0_0 = arith.constant 0 : index
    %0 = vector.load %arg0[%c0, %c0_0] : memref<8x128xf32, #tpu.memory_space<vmem>>, vector<8x128xf32>
    %c3_i32 = arith.constant 3 : i32
    %1 = tpu.dynamic_rotate %0 by %c3_i32 dim 1 : vector<8x128xf32>, i32 -> vector<8x128xf32>
    %c0_1 = arith.constant 0 : index
    %c0_2 = arith.constant 0 : index
    %2 = vector.load %arg1[%c0_1, %c0_2] : memref<8x128xf32, #tpu.memory_space<vmem>>, vector<8x128xf32>
    tpu.vector_store %arg1[%c0_1, %c0_2], %1 {strides = array<i32>} : memref<8x128xf32, #tpu.memory_space<vmem>>, vector<8x128xf32>,
    return
  }
}

module attributes {stable_mosaic.version = 11 : i64} {
  func.func @_ffn_kernel(%arg0: i32, %arg1: memref<1x128x256xf32, #tpu.memory_space<vmem>>, %arg2: memref<128x1152xbf16, #tpu.memory_space<vmem>>, %arg3: memref<128x1xf32, #tpu.memory_space<vmem>>, %arg4: memref<128x1152xbf16, #tpu.memory_space<vmem>>, %arg5: memref<128x1xf32, #tpu.memory_space<vmem>>, %arg6: memref<1x256xi32, #tpu.memory_space<vmem>>, %arg7: memref<1x256xi32, #tpu.memory_space<vmem>>, %arg8: memref<1x128x256xf32, #tpu.memory_space<vmem>>, %arg9: memref<1152x256xbf16, #tpu.memory_space<vmem>>, %arg10: memref<128x256xf32, #tpu.memory_space<vmem>>) attributes {dimension_semantics = [#tpu.dimension_semantics<parallel>], iteration_bounds = array<i64: 2>, scalar_prefetch = 0 : i64, scratch_operands = 2 : i64, tpu.core_type = #tpu.core_type<tc>, window_params = [{transform_indices = @transform_0, window_bounds = array<i64: 1, 128, 256>}, {pipeline_mode = #tpu.pipeline_mode<synchronous>, transform_indices = @transform_1, window_bounds = array<i64: 128, 1152>}, {pipeline_mode = #tpu.pipeline_mode<synchronous>, transform_indices = @transform_2, window_bounds = array<i64: 128, 1>}, {pipeline_mode = #tpu.pipeline_mode<synchronous>, transform_indices = @transform_3, window_bounds = array<i64: 128, 1152>}, {pipeline_mode = #tpu.pipeline_mode<synchronous>, transform_indices = @transform_4, window_bounds = array<i64: 128, 1>}, {pipeline_mode = #tpu.pipeline_mode<synchronous>, transform_indices = @transform_5, window_bounds = array<i64: 1, 256>}, {pipeline_mode = #tpu.pipeline_mode<synchronous>, transform_indices = @transform_6, window_bounds = array<i64: 1, 256>}, {transform_indices = @transform_7, window_bounds = array<i64: 1, 128, 256>}]} {
    %c0 = arith.constant 0 : index
    %c0_0 = arith.constant 0 : index
    %0 = vector.load %arg6[%c0, %c0_0] : memref<1x256xi32, #tpu.memory_space<vmem>>, vector<1x256xi32>
    %c0_1 = arith.constant 0 : index
    %c0_2 = arith.constant 0 : index
    %1 = vector.load %arg7[%c0_1, %c0_2] : memref<1x256xi32, #tpu.memory_space<vmem>>, vector<1x256xi32>
    %c0_3 = arith.constant 0 : index
    %c0_4 = arith.constant 0 : index
    %c0_5 = arith.constant 0 : index
    %2 = vector.load %arg1[%c0_3, %c0_4, %c0_5] : memref<1x128x256xf32, #tpu.memory_space<vmem>>, vector<1x128x256xf32>
    %3 = vector.shape_cast %2 : vector<1x128x256xf32> to vector<128x256xf32>
    %4 = vector.extract_strided_slice %3 {offsets = [0, 222], sizes = [128, 34], strides = [1, 1]} : vector<128x256xf32> to vector<128x34xf32>
    %5 = vector.extract_strided_slice %3 {offsets = [0, 0], sizes = [128, 222], strides = [1, 1]} : vector<128x256xf32> to vector<128x222xf32>
    %6 = tpu.concatenate %4, %5 in 1 : vector<128x34xf32>, vector<128x222xf32> -> vector<128x256xf32>
    %c2_i32 = arith.constant 2 : i32
    %7 = vector.broadcast %c2_i32 : i32 to vector<1x256xi32>
    %8 = arith.cmpi sge, %0, %7 : vector<1x256xi32>
    %c18_i32 = arith.constant 18 : i32
    %9 = vector.broadcast %c18_i32 : i32 to vector<1x256xi32>
    %10 = arith.cmpi slt, %0, %9 : vector<1x256xi32>
    %11 = arith.andi %8, %10 : vector<1x256xi1>
    %c2_i32_6 = arith.constant 2 : i32
    %12 = vector.broadcast %c2_i32_6 : i32 to vector<1x256xi32>
    %13 = arith.cmpi sge, %1, %12 : vector<1x256xi32>
    %14 = arith.andi %11, %13 : vector<1x256xi1>
    %c18_i32_7 = arith.constant 18 : i32
    %15 = vector.broadcast %c18_i32_7 : i32 to vector<1x256xi32>
    %16 = arith.cmpi slt, %1, %15 : vector<1x256xi32>
    %17 = arith.andi %14, %16 : vector<1x256xi1>
    %18 = arith.extui %17 : vector<1x256xi1> to vector<1x256xi32>
    %19 = arith.sitofp %18 : vector<1x256xi32> to vector<1x256xf32>
    %20 = vector.broadcast %19 : vector<1x256xf32> to vector<128x256xf32>
    %21 = arith.mulf %6, %20 : vector<128x256xf32>
    %22 = arith.truncf %21 : vector<128x256xf32> to vector<128x256xbf16>
    %c0_8 = arith.constant 0 : index
    %c0_9 = arith.constant 0 : index
    %23 = vector.load %arg9[%c0_8, %c0_9] : memref<1152x256xbf16, #tpu.memory_space<vmem>>, vector<128x256xbf16>
    tpu.vector_store %arg9[%c0_8, %c0_9], %22 {strides = array<i32>} : memref<1152x256xbf16, #tpu.memory_space<vmem>>, vector<128x256xbf16>,
    %c0_10 = arith.constant 0 : index
    %c0_11 = arith.constant 0 : index
    %c0_12 = arith.constant 0 : index
    %24 = vector.load %arg1[%c0_10, %c0_11, %c0_12] : memref<1x128x256xf32, #tpu.memory_space<vmem>>, vector<1x128x256xf32>
    %25 = vector.shape_cast %24 : vector<1x128x256xf32> to vector<128x256xf32>
    %26 = vector.extract_strided_slice %25 {offsets = [0, 224], sizes = [128, 32], strides = [1, 1]} : vector<128x256xf32> to vector<128x32xf32>
    %27 = vector.extract_strided_slice %25 {offsets = [0, 0], sizes = [128, 224], strides = [1, 1]} : vector<128x256xf32> to vector<128x224xf32>
    %28 = tpu.concatenate %26, %27 in 1 : vector<128x32xf32>, vector<128x224xf32> -> vector<128x256xf32>
    %c2_i32_13 = arith.constant 2 : i32
    %29 = vector.broadcast %c2_i32_13 : i32 to vector<1x256xi32>
    %30 = arith.cmpi sge, %0, %29 : vector<1x256xi32>
    %c18_i32_14 = arith.constant 18 : i32
    %31 = vector.broadcast %c18_i32_14 : i32 to vector<1x256xi32>
    %32 = arith.cmpi slt, %0, %31 : vector<1x256xi32>
    %33 = arith.andi %30, %32 : vector<1x256xi1>
    %c0_i32 = arith.constant 0 : i32
    %34 = vector.broadcast %c0_i32 : i32 to vector<1x256xi32>
    %35 = arith.cmpi sge, %1, %34 : vector<1x256xi32>
    %36 = arith.andi %33, %35 : vector<1x256xi1>
    %c16_i32 = arith.constant 16 : i32
    %37 = vector.broadcast %c16_i32 : i32 to vector<1x256xi32>
    %38 = arith.cmpi slt, %1, %37 : vector<1x256xi32>
    %39 = arith.andi %36, %38 : vector<1x256xi1>
    %40 = arith.extui %39 : vector<1x256xi1> to vector<1x256xi32>
    %41 = arith.sitofp %40 : vector<1x256xi32> to vector<1x256xf32>
    %42 = vector.broadcast %41 : vector<1x256xf32> to vector<128x256xf32>
    %43 = arith.mulf %28, %42 : vector<128x256xf32>
    %44 = arith.truncf %43 : vector<128x256xf32> to vector<128x256xbf16>
    %c128 = arith.constant 128 : index
    %c0_15 = arith.constant 0 : index
    %45 = vector.load %arg9[%c128, %c0_15] : memref<1152x256xbf16, #tpu.memory_space<vmem>>, vector<128x256xbf16>
    tpu.vector_store %arg9[%c128, %c0_15], %44 {strides = array<i32>} : memref<1152x256xbf16, #tpu.memory_space<vmem>>, vector<128x256xbf16>,
    %c0_16 = arith.constant 0 : index
    %c0_17 = arith.constant 0 : index
    %c0_18 = arith.constant 0 : index
    %46 = vector.load %arg1[%c0_16, %c0_17, %c0_18] : memref<1x128x256xf32, #tpu.memory_space<vmem>>, vector<1x128x256xf32>
    %47 = vector.shape_cast %46 : vector<1x128x256xf32> to vector<128x256xf32>
    %48 = vector.extract_strided_slice %47 {offsets = [0, 226], sizes = [128, 30], strides = [1, 1]} : vector<128x256xf32> to vector<128x30xf32>
    %49 = vector.extract_strided_slice %47 {offsets = [0, 0], sizes = [128, 226], strides = [1, 1]} : vector<128x256xf32> to vector<128x226xf32>
    %50 = tpu.concatenate %48, %49 in 1 : vector<128x30xf32>, vector<128x226xf32> -> vector<128x256xf32>
    %c2_i32_19 = arith.constant 2 : i32
    %51 = vector.broadcast %c2_i32_19 : i32 to vector<1x256xi32>
    %52 = arith.cmpi sge, %0, %51 : vector<1x256xi32>
    %c18_i32_20 = arith.constant 18 : i32
    %53 = vector.broadcast %c18_i32_20 : i32 to vector<1x256xi32>
    %54 = arith.cmpi slt, %0, %53 : vector<1x256xi32>
    %55 = arith.andi %52, %54 : vector<1x256xi1>
    %c-2_i32 = arith.constant -2 : i32
    %56 = vector.broadcast %c-2_i32 : i32 to vector<1x256xi32>
    %57 = arith.cmpi sge, %1, %56 : vector<1x256xi32>
    %58 = arith.andi %55, %57 : vector<1x256xi1>
    %c14_i32 = arith.constant 14 : i32
    %59 = vector.broadcast %c14_i32 : i32 to vector<1x256xi32>
    %60 = arith.cmpi slt, %1, %59 : vector<1x256xi32>
    %61 = arith.andi %58, %60 : vector<1x256xi1>
    %62 = arith.extui %61 : vector<1x256xi1> to vector<1x256xi32>
    %63 = arith.sitofp %62 : vector<1x256xi32> to vector<1x256xf32>
    %64 = vector.broadcast %63 : vector<1x256xf32> to vector<128x256xf32>
    %65 = arith.mulf %50, %64 : vector<128x256xf32>
    %66 = arith.truncf %65 : vector<128x256xf32> to vector<128x256xbf16>
    %c256 = arith.constant 256 : index
    %c0_21 = arith.constant 0 : index
    %67 = vector.load %arg9[%c256, %c0_21] : memref<1152x256xbf16, #tpu.memory_space<vmem>>, vector<128x256xbf16>
    tpu.vector_store %arg9[%c256, %c0_21], %66 {strides = array<i32>} : memref<1152x256xbf16, #tpu.memory_space<vmem>>, vector<128x256xbf16>,
    %c0_22 = arith.constant 0 : index
    %c0_23 = arith.constant 0 : index
    %c0_24 = arith.constant 0 : index
    %68 = vector.load %arg1[%c0_22, %c0_23, %c0_24] : memref<1x128x256xf32, #tpu.memory_space<vmem>>, vector<1x128x256xf32>
    %69 = vector.shape_cast %68 : vector<1x128x256xf32> to vector<128x256xf32>
    %70 = vector.extract_strided_slice %69 {offsets = [0, 254], sizes = [128, 2], strides = [1, 1]} : vector<128x256xf32> to vector<128x2xf32>
    %71 = vector.extract_strided_slice %69 {offsets = [0, 0], sizes = [128, 254], strides = [1, 1]} : vector<128x256xf32> to vector<128x254xf32>
    %72 = tpu.concatenate %70, %71 in 1 : vector<128x2xf32>, vector<128x254xf32> -> vector<128x256xf32>
    %c0_i32_25 = arith.constant 0 : i32
    %73 = vector.broadcast %c0_i32_25 : i32 to vector<1x256xi32>
    %74 = arith.cmpi sge, %0, %73 : vector<1x256xi32>
    %c16_i32_26 = arith.constant 16 : i32
    %75 = vector.broadcast %c16_i32_26 : i32 to vector<1x256xi32>
    %76 = arith.cmpi slt, %0, %75 : vector<1x256xi32>
    %77 = arith.andi %74, %76 : vector<1x256xi1>
    %c2_i32_27 = arith.constant 2 : i32
    %78 = vector.broadcast %c2_i32_27 : i32 to vector<1x256xi32>
    %79 = arith.cmpi sge, %1, %78 : vector<1x256xi32>
    %80 = arith.andi %77, %79 : vector<1x256xi1>
    %c18_i32_28 = arith.constant 18 : i32
    %81 = vector.broadcast %c18_i32_28 : i32 to vector<1x256xi32>
    %82 = arith.cmpi slt, %1, %81 : vector<1x256xi32>
    %83 = arith.andi %80, %82 : vector<1x256xi1>
    %84 = arith.extui %83 : vector<1x256xi1> to vector<1x256xi32>
    %85 = arith.sitofp %84 : vector<1x256xi32> to vector<1x256xf32>
    %86 = vector.broadcast %85 : vector<1x256xf32> to vector<128x256xf32>
    %87 = arith.mulf %72, %86 : vector<128x256xf32>
    %88 = arith.truncf %87 : vector<128x256xf32> to vector<128x256xbf16>
    %c384 = arith.constant 384 : index
    %c0_29 = arith.constant 0 : index
    %89 = vector.load %arg9[%c384, %c0_29] : memref<1152x256xbf16, #tpu.memory_space<vmem>>, vector<128x256xbf16>
    tpu.vector_store %arg9[%c384, %c0_29], %88 {strides = array<i32>} : memref<1152x256xbf16, #tpu.memory_space<vmem>>, vector<128x256xbf16>,
    %c0_30 = arith.constant 0 : index
    %c0_31 = arith.constant 0 : index
    %c0_32 = arith.constant 0 : index
    %90 = vector.load %arg1[%c0_30, %c0_31, %c0_32] : memref<1x128x256xf32, #tpu.memory_space<vmem>>, vector<1x128x256xf32>
    %91 = vector.shape_cast %90 : vector<1x128x256xf32> to vector<128x256xf32>
    %92 = arith.truncf %91 : vector<128x256xf32> to vector<128x256xbf16>
    %c512 = arith.constant 512 : index
    %c0_33 = arith.constant 0 : index
    %93 = vector.load %arg9[%c512, %c0_33] : memref<1152x256xbf16, #tpu.memory_space<vmem>>, vector<128x256xbf16>
    tpu.vector_store %arg9[%c512, %c0_33], %92 {strides = array<i32>} : memref<1152x256xbf16, #tpu.memory_space<vmem>>, vector<128x256xbf16>,
    %c0_34 = arith.constant 0 : index
    %c0_35 = arith.constant 0 : index
    %c0_36 = arith.constant 0 : index
    %94 = vector.load %arg1[%c0_34, %c0_35, %c0_36] : memref<1x128x256xf32, #tpu.memory_space<vmem>>, vector<1x128x256xf32>
    %95 = vector.shape_cast %94 : vector<1x128x256xf32> to vector<128x256xf32>
    %96 = vector.extract_strided_slice %95 {offsets = [0, 2], sizes = [128, 254], strides = [1, 1]} : vector<128x256xf32> to vector<128x254xf32>
    %97 = vector.extract_strided_slice %95 {offsets = [0, 0], sizes = [128, 2], strides = [1, 1]} : vector<128x256xf32> to vector<128x2xf32>
    %98 = tpu.concatenate %96, %97 in 1 : vector<128x254xf32>, vector<128x2xf32> -> vector<128x256xf32>
    %c0_i32_37 = arith.constant 0 : i32
    %99 = vector.broadcast %c0_i32_37 : i32 to vector<1x256xi32>
    %100 = arith.cmpi sge, %0, %99 : vector<1x256xi32>
    %c16_i32_38 = arith.constant 16 : i32
    %101 = vector.broadcast %c16_i32_38 : i32 to vector<1x256xi32>
    %102 = arith.cmpi slt, %0, %101 : vector<1x256xi32>
    %103 = arith.andi %100, %102 : vector<1x256xi1>
    %c-2_i32_39 = arith.constant -2 : i32
    %104 = vector.broadcast %c-2_i32_39 : i32 to vector<1x256xi32>
    %105 = arith.cmpi sge, %1, %104 : vector<1x256xi32>
    %106 = arith.andi %103, %105 : vector<1x256xi1>
    %c14_i32_40 = arith.constant 14 : i32
    %107 = vector.broadcast %c14_i32_40 : i32 to vector<1x256xi32>
    %108 = arith.cmpi slt, %1, %107 : vector<1x256xi32>
    %109 = arith.andi %106, %108 : vector<1x256xi1>
    %110 = arith.extui %109 : vector<1x256xi1> to vector<1x256xi32>
    %111 = arith.sitofp %110 : vector<1x256xi32> to vector<1x256xf32>
    %112 = vector.broadcast %111 : vector<1x256xf32> to vector<128x256xf32>
    %113 = arith.mulf %98, %112 : vector<128x256xf32>
    %114 = arith.truncf %113 : vector<128x256xf32> to vector<128x256xbf16>
    %c640 = arith.constant 640 : index
    %c0_41 = arith.constant 0 : index
    %115 = vector.load %arg9[%c640, %c0_41] : memref<1152x256xbf16, #tpu.memory_space<vmem>>, vector<128x256xbf16>
    tpu.vector_store %arg9[%c640, %c0_41], %114 {strides = array<i32>} : memref<1152x256xbf16, #tpu.memory_space<vmem>>, vector<128x256xbf16>,
    %c0_42 = arith.constant 0 : index
    %c0_43 = arith.constant 0 : index
    %c0_44 = arith.constant 0 : index
    %116 = vector.load %arg1[%c0_42, %c0_43, %c0_44] : memref<1x128x256xf32, #tpu.memory_space<vmem>>, vector<1x128x256xf32>
    %117 = vector.shape_cast %116 : vector<1x128x256xf32> to vector<128x256xf32>
    %118 = vector.extract_strided_slice %117 {offsets = [0, 30], sizes = [128, 226], strides = [1, 1]} : vector<128x256xf32> to vector<128x226xf32>
    %119 = vector.extract_strided_slice %117 {offsets = [0, 0], sizes = [128, 30], strides = [1, 1]} : vector<128x256xf32> to vector<128x30xf32>
    %120 = tpu.concatenate %118, %119 in 1 : vector<128x226xf32>, vector<128x30xf32> -> vector<128x256xf32>
    %c-2_i32_45 = arith.constant -2 : i32
    %121 = vector.broadcast %c-2_i32_45 : i32 to vector<1x256xi32>
    %122 = arith.cmpi sge, %0, %121 : vector<1x256xi32>
    %c14_i32_46 = arith.constant 14 : i32
    %123 = vector.broadcast %c14_i32_46 : i32 to vector<1x256xi32>
    %124 = arith.cmpi slt, %0, %123 : vector<1x256xi32>
    %125 = arith.andi %122, %124 : vector<1x256xi1>
    %c2_i32_47 = arith.constant 2 : i32
    %126 = vector.broadcast %c2_i32_47 : i32 to vector<1x256xi32>
    %127 = arith.cmpi sge, %1, %126 : vector<1x256xi32>
    %128 = arith.andi %125, %127 : vector<1x256xi1>
    %c18_i32_48 = arith.constant 18 : i32
    %129 = vector.broadcast %c18_i32_48 : i32 to vector<1x256xi32>
    %130 = arith.cmpi slt, %1, %129 : vector<1x256xi32>
    %131 = arith.andi %128, %130 : vector<1x256xi1>
    %132 = arith.extui %131 : vector<1x256xi1> to vector<1x256xi32>
    %133 = arith.sitofp %132 : vector<1x256xi32> to vector<1x256xf32>
    %134 = vector.broadcast %133 : vector<1x256xf32> to vector<128x256xf32>
    %135 = arith.mulf %120, %134 : vector<128x256xf32>
    %136 = arith.truncf %135 : vector<128x256xf32> to vector<128x256xbf16>
    %c768 = arith.constant 768 : index
    %c0_49 = arith.constant 0 : index
    %137 = vector.load %arg9[%c768, %c0_49] : memref<1152x256xbf16, #tpu.memory_space<vmem>>, vector<128x256xbf16>
    tpu.vector_store %arg9[%c768, %c0_49], %136 {strides = array<i32>} : memref<1152x256xbf16, #tpu.memory_space<vmem>>, vector<128x256xbf16>,
    %c0_50 = arith.constant 0 : index
    %c0_51 = arith.constant 0 : index
    %c0_52 = arith.constant 0 : index
    %138 = vector.load %arg1[%c0_50, %c0_51, %c0_52] : memref<1x128x256xf32, #tpu.memory_space<vmem>>, vector<1x128x256xf32>
    %139 = vector.shape_cast %138 : vector<1x128x256xf32> to vector<128x256xf32>
    %140 = vector.extract_strided_slice %139 {offsets = [0, 32], sizes = [128, 224], strides = [1, 1]} : vector<128x256xf32> to vector<128x224xf32>
    %141 = vector.extract_strided_slice %139 {offsets = [0, 0], sizes = [128, 32], strides = [1, 1]} : vector<128x256xf32> to vector<128x32xf32>
    %142 = tpu.concatenate %140, %141 in 1 : vector<128x224xf32>, vector<128x32xf32> -> vector<128x256xf32>
    %c-2_i32_53 = arith.constant -2 : i32
    %143 = vector.broadcast %c-2_i32_53 : i32 to vector<1x256xi32>
    %144 = arith.cmpi sge, %0, %143 : vector<1x256xi32>
    %c14_i32_54 = arith.constant 14 : i32
    %145 = vector.broadcast %c14_i32_54 : i32 to vector<1x256xi32>
    %146 = arith.cmpi slt, %0, %145 : vector<1x256xi32>
    %147 = arith.andi %144, %146 : vector<1x256xi1>
    %c0_i32_55 = arith.constant 0 : i32
    %148 = vector.broadcast %c0_i32_55 : i32 to vector<1x256xi32>
    %149 = arith.cmpi sge, %1, %148 : vector<1x256xi32>
    %150 = arith.andi %147, %149 : vector<1x256xi1>
    %c16_i32_56 = arith.constant 16 : i32
    %151 = vector.broadcast %c16_i32_56 : i32 to vector<1x256xi32>
    %152 = arith.cmpi slt, %1, %151 : vector<1x256xi32>
    %153 = arith.andi %150, %152 : vector<1x256xi1>
    %154 = arith.extui %153 : vector<1x256xi1> to vector<1x256xi32>
    %155 = arith.sitofp %154 : vector<1x256xi32> to vector<1x256xf32>
    %156 = vector.broadcast %155 : vector<1x256xf32> to vector<128x256xf32>
    %157 = arith.mulf %142, %156 : vector<128x256xf32>
    %158 = arith.truncf %157 : vector<128x256xf32> to vector<128x256xbf16>
    %c896 = arith.constant 896 : index
    %c0_57 = arith.constant 0 : index
    %159 = vector.load %arg9[%c896, %c0_57] : memref<1152x256xbf16, #tpu.memory_space<vmem>>, vector<128x256xbf16>
    tpu.vector_store %arg9[%c896, %c0_57], %158 {strides = array<i32>} : memref<1152x256xbf16, #tpu.memory_space<vmem>>, vector<128x256xbf16>,
    %c0_58 = arith.constant 0 : index
    %c0_59 = arith.constant 0 : index
    %c0_60 = arith.constant 0 : index
    %160 = vector.load %arg1[%c0_58, %c0_59, %c0_60] : memref<1x128x256xf32, #tpu.memory_space<vmem>>, vector<1x128x256xf32>
    %161 = vector.shape_cast %160 : vector<1x128x256xf32> to vector<128x256xf32>
    %162 = vector.extract_strided_slice %161 {offsets = [0, 34], sizes = [128, 222], strides = [1, 1]} : vector<128x256xf32> to vector<128x222xf32>
    %163 = vector.extract_strided_slice %161 {offsets = [0, 0], sizes = [128, 34], strides = [1, 1]} : vector<128x256xf32> to vector<128x34xf32>
    %164 = tpu.concatenate %162, %163 in 1 : vector<128x222xf32>, vector<128x34xf32> -> vector<128x256xf32>
    %c-2_i32_61 = arith.constant -2 : i32
    %165 = vector.broadcast %c-2_i32_61 : i32 to vector<1x256xi32>
    %166 = arith.cmpi sge, %0, %165 : vector<1x256xi32>
    %c14_i32_62 = arith.constant 14 : i32
    %167 = vector.broadcast %c14_i32_62 : i32 to vector<1x256xi32>
    %168 = arith.cmpi slt, %0, %167 : vector<1x256xi32>
    %169 = arith.andi %166, %168 : vector<1x256xi1>
    %c-2_i32_63 = arith.constant -2 : i32
    %170 = vector.broadcast %c-2_i32_63 : i32 to vector<1x256xi32>
    %171 = arith.cmpi sge, %1, %170 : vector<1x256xi32>
    %172 = arith.andi %169, %171 : vector<1x256xi1>
    %c14_i32_64 = arith.constant 14 : i32
    %173 = vector.broadcast %c14_i32_64 : i32 to vector<1x256xi32>
    %174 = arith.cmpi slt, %1, %173 : vector<1x256xi32>
    %175 = arith.andi %172, %174 : vector<1x256xi1>
    %176 = arith.extui %175 : vector<1x256xi1> to vector<1x256xi32>
    %177 = arith.sitofp %176 : vector<1x256xi32> to vector<1x256xf32>
    %178 = vector.broadcast %177 : vector<1x256xf32> to vector<128x256xf32>
    %179 = arith.mulf %164, %178 : vector<128x256xf32>
    %180 = arith.truncf %179 : vector<128x256xf32> to vector<128x256xbf16>
    %c1024 = arith.constant 1024 : index
    %c0_65 = arith.constant 0 : index
    %181 = vector.load %arg9[%c1024, %c0_65] : memref<1152x256xbf16, #tpu.memory_space<vmem>>, vector<128x256xbf16>
    tpu.vector_store %arg9[%c1024, %c0_65], %180 {strides = array<i32>} : memref<1152x256xbf16, #tpu.memory_space<vmem>>, vector<128x256xbf16>,
    %c0_66 = arith.constant 0 : index
    %c0_67 = arith.constant 0 : index
    %182 = vector.load %arg2[%c0_66, %c0_67] : memref<128x1152xbf16, #tpu.memory_space<vmem>>, vector<128x1152xbf16>
    %c0_68 = arith.constant 0 : index
    %c0_69 = arith.constant 0 : index
    %183 = vector.load %arg9[%c0_68, %c0_69] : memref<1152x256xbf16, #tpu.memory_space<vmem>>, vector<1152x256xbf16>
    %cst = arith.constant dense<0.000000e+00> : vector<128x256xf32>
    %184 = tpu.matmul %182, %183, %cst {dimension_numbers = #tpu.dot_dimension_numbers<[1], [0], [0], [1], [0, 0, 1, 1], [], []>} : vector<128x1152xbf16>, vector<1152x256xbf16>, vector<128x256xf32> -> vector<128x256xf32>
    %c0_70 = arith.constant 0 : index
    %c0_71 = arith.constant 0 : index
    %185 = vector.load %arg3[%c0_70, %c0_71] : memref<128x1xf32, #tpu.memory_space<vmem>>, vector<128x1xf32>
    %186 = vector.broadcast %185 : vector<128x1xf32> to vector<128x256xf32>
    %187 = arith.addf %184, %186 : vector<128x256xf32>
    %cst_72 = arith.constant 0.000000e+00 : f32
    %188 = vector.broadcast %cst_72 : f32 to vector<128x256xf32>
    %189 = arith.cmpf oge, %187, %188 : vector<128x256xf32>
    %cst_73 = arith.constant 2.000000e-01 : f32
    %190 = vector.broadcast %cst_73 : f32 to vector<128x256xf32>
    %191 = arith.mulf %187, %190 : vector<128x256xf32>
    %192 = arith.select %189, %187, %191 : vector<128x256xi1>, vector<128x256xf32>
    %c0_74 = arith.constant 0 : index
    %c0_75 = arith.constant 0 : index
    %193 = vector.load %arg10[%c0_74, %c0_75] : memref<128x256xf32, #tpu.memory_space<vmem>>, vector<128x256xf32>
    tpu.vector_store %arg10[%c0_74, %c0_75], %192 {strides = array<i32>} : memref<128x256xf32, #tpu.memory_space<vmem>>, vector<128x256xf32>,
    %c0_76 = arith.constant 0 : index
    %c0_77 = arith.constant 0 : index
    %194 = vector.load %arg10[%c0_76, %c0_77] : memref<128x256xf32, #tpu.memory_space<vmem>>, vector<128x256xf32>
    %195 = vector.extract_strided_slice %194 {offsets = [0, 239], sizes = [128, 17], strides = [1, 1]} : vector<128x256xf32> to vector<128x17xf32>
    %196 = vector.extract_strided_slice %194 {offsets = [0, 0], sizes = [128, 239], strides = [1, 1]} : vector<128x256xf32> to vector<128x239xf32>
    %197 = tpu.concatenate %195, %196 in 1 : vector<128x17xf32>, vector<128x239xf32> -> vector<128x256xf32>
    %c1_i32 = arith.constant 1 : i32
    %198 = vector.broadcast %c1_i32 : i32 to vector<1x256xi32>
    %199 = arith.cmpi sge, %0, %198 : vector<1x256xi32>
    %c17_i32 = arith.constant 17 : i32
    %200 = vector.broadcast %c17_i32 : i32 to vector<1x256xi32>
    %201 = arith.cmpi slt, %0, %200 : vector<1x256xi32>
    %202 = arith.andi %199, %201 : vector<1x256xi1>
    %c1_i32_78 = arith.constant 1 : i32
    %203 = vector.broadcast %c1_i32_78 : i32 to vector<1x256xi32>
    %204 = arith.cmpi sge, %1, %203 : vector<1x256xi32>
    %205 = arith.andi %202, %204 : vector<1x256xi1>
    %c17_i32_79 = arith.constant 17 : i32
    %206 = vector.broadcast %c17_i32_79 : i32 to vector<1x256xi32>
    %207 = arith.cmpi slt, %1, %206 : vector<1x256xi32>
    %208 = arith.andi %205, %207 : vector<1x256xi1>
    %209 = arith.extui %208 : vector<1x256xi1> to vector<1x256xi32>
    %210 = arith.sitofp %209 : vector<1x256xi32> to vector<1x256xf32>
    %211 = vector.broadcast %210 : vector<1x256xf32> to vector<128x256xf32>
    %212 = arith.mulf %197, %211 : vector<128x256xf32>
    %213 = arith.truncf %212 : vector<128x256xf32> to vector<128x256xbf16>
    %c0_80 = arith.constant 0 : index
    %c0_81 = arith.constant 0 : index
    %214 = vector.load %arg9[%c0_80, %c0_81] : memref<1152x256xbf16, #tpu.memory_space<vmem>>, vector<128x256xbf16>
    tpu.vector_store %arg9[%c0_80, %c0_81], %213 {strides = array<i32>} : memref<1152x256xbf16, #tpu.memory_space<vmem>>, vector<128x256xbf16>,
    %c0_82 = arith.constant 0 : index
    %c0_83 = arith.constant 0 : index
    %215 = vector.load %arg10[%c0_82, %c0_83] : memref<128x256xf32, #tpu.memory_space<vmem>>, vector<128x256xf32>
    %216 = vector.extract_strided_slice %215 {offsets = [0, 240], sizes = [128, 16], strides = [1, 1]} : vector<128x256xf32> to vector<128x16xf32>
    %217 = vector.extract_strided_slice %215 {offsets = [0, 0], sizes = [128, 240], strides = [1, 1]} : vector<128x256xf32> to vector<128x240xf32>
    %218 = tpu.concatenate %216, %217 in 1 : vector<128x16xf32>, vector<128x240xf32> -> vector<128x256xf32>
    %c1_i32_84 = arith.constant 1 : i32
    %219 = vector.broadcast %c1_i32_84 : i32 to vector<1x256xi32>
    %220 = arith.cmpi sge, %0, %219 : vector<1x256xi32>
    %c17_i32_85 = arith.constant 17 : i32
    %221 = vector.broadcast %c17_i32_85 : i32 to vector<1x256xi32>
    %222 = arith.cmpi slt, %0, %221 : vector<1x256xi32>
    %223 = arith.andi %220, %222 : vector<1x256xi1>
    %c0_i32_86 = arith.constant 0 : i32
    %224 = vector.broadcast %c0_i32_86 : i32 to vector<1x256xi32>
    %225 = arith.cmpi sge, %1, %224 : vector<1x256xi32>
    %226 = arith.andi %223, %225 : vector<1x256xi1>
    %c16_i32_87 = arith.constant 16 : i32
    %227 = vector.broadcast %c16_i32_87 : i32 to vector<1x256xi32>
    %228 = arith.cmpi slt, %1, %227 : vector<1x256xi32>
    %229 = arith.andi %226, %228 : vector<1x256xi1>
    %230 = arith.extui %229 : vector<1x256xi1> to vector<1x256xi32>
    %231 = arith.sitofp %230 : vector<1x256xi32> to vector<1x256xf32>
    %232 = vector.broadcast %231 : vector<1x256xf32> to vector<128x256xf32>
    %233 = arith.mulf %218, %232 : vector<128x256xf32>
    %234 = arith.truncf %233 : vector<128x256xf32> to vector<128x256xbf16>
    %c128_88 = arith.constant 128 : index
    %c0_89 = arith.constant 0 : index
    %235 = vector.load %arg9[%c128_88, %c0_89] : memref<1152x256xbf16, #tpu.memory_space<vmem>>, vector<128x256xbf16>
    tpu.vector_store %arg9[%c128_88, %c0_89], %234 {strides = array<i32>} : memref<1152x256xbf16, #tpu.memory_space<vmem>>, vector<128x256xbf16>,
    %c0_90 = arith.constant 0 : index
    %c0_91 = arith.constant 0 : index
    %236 = vector.load %arg10[%c0_90, %c0_91] : memref<128x256xf32, #tpu.memory_space<vmem>>, vector<128x256xf32>
    %237 = vector.extract_strided_slice %236 {offsets = [0, 241], sizes = [128, 15], strides = [1, 1]} : vector<128x256xf32> to vector<128x15xf32>
    %238 = vector.extract_strided_slice %236 {offsets = [0, 0], sizes = [128, 241], strides = [1, 1]} : vector<128x256xf32> to vector<128x241xf32>
    %239 = tpu.concatenate %237, %238 in 1 : vector<128x15xf32>, vector<128x241xf32> -> vector<128x256xf32>
    %c1_i32_92 = arith.constant 1 : i32
    %240 = vector.broadcast %c1_i32_92 : i32 to vector<1x256xi32>
    %241 = arith.cmpi sge, %0, %240 : vector<1x256xi32>
    %c17_i32_93 = arith.constant 17 : i32
    %242 = vector.broadcast %c17_i32_93 : i32 to vector<1x256xi32>
    %243 = arith.cmpi slt, %0, %242 : vector<1x256xi32>
    %244 = arith.andi %241, %243 : vector<1x256xi1>
    %c-1_i32 = arith.constant -1 : i32
    %245 = vector.broadcast %c-1_i32 : i32 to vector<1x256xi32>
    %246 = arith.cmpi sge, %1, %245 : vector<1x256xi32>
    %247 = arith.andi %244, %246 : vector<1x256xi1>
    %c15_i32 = arith.constant 15 : i32
    %248 = vector.broadcast %c15_i32 : i32 to vector<1x256xi32>
    %249 = arith.cmpi slt, %1, %248 : vector<1x256xi32>
    %250 = arith.andi %247, %249 : vector<1x256xi1>
    %251 = arith.extui %250 : vector<1x256xi1> to vector<1x256xi32>
    %252 = arith.sitofp %251 : vector<1x256xi32> to vector<1x256xf32>
    %253 = vector.broadcast %252 : vector<1x256xf32> to vector<128x256xf32>
    %254 = arith.mulf %239, %253 : vector<128x256xf32>
    %255 = arith.truncf %254 : vector<128x256xf32> to vector<128x256xbf16>
    %c256_94 = arith.constant 256 : index
    %c0_95 = arith.constant 0 : index
    %256 = vector.load %arg9[%c256_94, %c0_95] : memref<1152x256xbf16, #tpu.memory_space<vmem>>, vector<128x256xbf16>
    tpu.vector_store %arg9[%c256_94, %c0_95], %255 {strides = array<i32>} : memref<1152x256xbf16, #tpu.memory_space<vmem>>, vector<128x256xbf16>,
    %c0_96 = arith.constant 0 : index
    %c0_97 = arith.constant 0 : index
    %257 = vector.load %arg10[%c0_96, %c0_97] : memref<128x256xf32, #tpu.memory_space<vmem>>, vector<128x256xf32>
    %258 = vector.extract_strided_slice %257 {offsets = [0, 255], sizes = [128, 1], strides = [1, 1]} : vector<128x256xf32> to vector<128x1xf32>
    %259 = vector.extract_strided_slice %257 {offsets = [0, 0], sizes = [128, 255], strides = [1, 1]} : vector<128x256xf32> to vector<128x255xf32>
    %260 = tpu.concatenate %258, %259 in 1 : vector<128x1xf32>, vector<128x255xf32> -> vector<128x256xf32>
    %c0_i32_98 = arith.constant 0 : i32
    %261 = vector.broadcast %c0_i32_98 : i32 to vector<1x256xi32>
    %262 = arith.cmpi sge, %0, %261 : vector<1x256xi32>
    %c16_i32_99 = arith.constant 16 : i32
    %263 = vector.broadcast %c16_i32_99 : i32 to vector<1x256xi32>
    %264 = arith.cmpi slt, %0, %263 : vector<1x256xi32>
    %265 = arith.andi %262, %264 : vector<1x256xi1>
    %c1_i32_100 = arith.constant 1 : i32
    %266 = vector.broadcast %c1_i32_100 : i32 to vector<1x256xi32>
    %267 = arith.cmpi sge, %1, %266 : vector<1x256xi32>
    %268 = arith.andi %265, %267 : vector<1x256xi1>
    %c17_i32_101 = arith.constant 17 : i32
    %269 = vector.broadcast %c17_i32_101 : i32 to vector<1x256xi32>
    %270 = arith.cmpi slt, %1, %269 : vector<1x256xi32>
    %271 = arith.andi %268, %270 : vector<1x256xi1>
    %272 = arith.extui %271 : vector<1x256xi1> to vector<1x256xi32>
    %273 = arith.sitofp %272 : vector<1x256xi32> to vector<1x256xf32>
    %274 = vector.broadcast %273 : vector<1x256xf32> to vector<128x256xf32>
    %275 = arith.mulf %260, %274 : vector<128x256xf32>
    %276 = arith.truncf %275 : vector<128x256xf32> to vector<128x256xbf16>
    %c384_102 = arith.constant 384 : index
    %c0_103 = arith.constant 0 : index
    %277 = vector.load %arg9[%c384_102, %c0_103] : memref<1152x256xbf16, #tpu.memory_space<vmem>>, vector<128x256xbf16>
    tpu.vector_store %arg9[%c384_102, %c0_103], %276 {strides = array<i32>} : memref<1152x256xbf16, #tpu.memory_space<vmem>>, vector<128x256xbf16>,
    %c0_104 = arith.constant 0 : index
    %c0_105 = arith.constant 0 : index
    %278 = vector.load %arg10[%c0_104, %c0_105] : memref<128x256xf32, #tpu.memory_space<vmem>>, vector<128x256xf32>
    %279 = arith.truncf %278 : vector<128x256xf32> to vector<128x256xbf16>
    %c512_106 = arith.constant 512 : index
    %c0_107 = arith.constant 0 : index
    %280 = vector.load %arg9[%c512_106, %c0_107] : memref<1152x256xbf16, #tpu.memory_space<vmem>>, vector<128x256xbf16>
    tpu.vector_store %arg9[%c512_106, %c0_107], %279 {strides = array<i32>} : memref<1152x256xbf16, #tpu.memory_space<vmem>>, vector<128x256xbf16>,
    %c0_108 = arith.constant 0 : index
    %c0_109 = arith.constant 0 : index
    %281 = vector.load %arg10[%c0_108, %c0_109] : memref<128x256xf32, #tpu.memory_space<vmem>>, vector<128x256xf32>
    %282 = vector.extract_strided_slice %281 {offsets = [0, 1], sizes = [128, 255], strides = [1, 1]} : vector<128x256xf32> to vector<128x255xf32>
    %283 = vector.extract_strided_slice %281 {offsets = [0, 0], sizes = [128, 1], strides = [1, 1]} : vector<128x256xf32> to vector<128x1xf32>
    %284 = tpu.concatenate %282, %283 in 1 : vector<128x255xf32>, vector<128x1xf32> -> vector<128x256xf32>
    %c0_i32_110 = arith.constant 0 : i32
    %285 = vector.broadcast %c0_i32_110 : i32 to vector<1x256xi32>
    %286 = arith.cmpi sge, %0, %285 : vector<1x256xi32>
    %c16_i32_111 = arith.constant 16 : i32
    %287 = vector.broadcast %c16_i32_111 : i32 to vector<1x256xi32>
    %288 = arith.cmpi slt, %0, %287 : vector<1x256xi32>
    %289 = arith.andi %286, %288 : vector<1x256xi1>
    %c-1_i32_112 = arith.constant -1 : i32
    %290 = vector.broadcast %c-1_i32_112 : i32 to vector<1x256xi32>
    %291 = arith.cmpi sge, %1, %290 : vector<1x256xi32>
    %292 = arith.andi %289, %291 : vector<1x256xi1>
    %c15_i32_113 = arith.constant 15 : i32
    %293 = vector.broadcast %c15_i32_113 : i32 to vector<1x256xi32>
    %294 = arith.cmpi slt, %1, %293 : vector<1x256xi32>
    %295 = arith.andi %292, %294 : vector<1x256xi1>
    %296 = arith.extui %295 : vector<1x256xi1> to vector<1x256xi32>
    %297 = arith.sitofp %296 : vector<1x256xi32> to vector<1x256xf32>
    %298 = vector.broadcast %297 : vector<1x256xf32> to vector<128x256xf32>
    %299 = arith.mulf %284, %298 : vector<128x256xf32>
    %300 = arith.truncf %299 : vector<128x256xf32> to vector<128x256xbf16>
    %c640_114 = arith.constant 640 : index
    %c0_115 = arith.constant 0 : index
    %301 = vector.load %arg9[%c640_114, %c0_115] : memref<1152x256xbf16, #tpu.memory_space<vmem>>, vector<128x256xbf16>
    tpu.vector_store %arg9[%c640_114, %c0_115], %300 {strides = array<i32>} : memref<1152x256xbf16, #tpu.memory_space<vmem>>, vector<128x256xbf16>,
    %c0_116 = arith.constant 0 : index
    %c0_117 = arith.constant 0 : index
    %302 = vector.load %arg10[%c0_116, %c0_117] : memref<128x256xf32, #tpu.memory_space<vmem>>, vector<128x256xf32>
    %303 = vector.extract_strided_slice %302 {offsets = [0, 15], sizes = [128, 241], strides = [1, 1]} : vector<128x256xf32> to vector<128x241xf32>
    %304 = vector.extract_strided_slice %302 {offsets = [0, 0], sizes = [128, 15], strides = [1, 1]} : vector<128x256xf32> to vector<128x15xf32>
    %305 = tpu.concatenate %303, %304 in 1 : vector<128x241xf32>, vector<128x15xf32> -> vector<128x256xf32>
    %c-1_i32_118 = arith.constant -1 : i32
    %306 = vector.broadcast %c-1_i32_118 : i32 to vector<1x256xi32>
    %307 = arith.cmpi sge, %0, %306 : vector<1x256xi32>
    %c15_i32_119 = arith.constant 15 : i32
    %308 = vector.broadcast %c15_i32_119 : i32 to vector<1x256xi32>
    %309 = arith.cmpi slt, %0, %308 : vector<1x256xi32>
    %310 = arith.andi %307, %309 : vector<1x256xi1>
    %c1_i32_120 = arith.constant 1 : i32
    %311 = vector.broadcast %c1_i32_120 : i32 to vector<1x256xi32>
    %312 = arith.cmpi sge, %1, %311 : vector<1x256xi32>
    %313 = arith.andi %310, %312 : vector<1x256xi1>
    %c17_i32_121 = arith.constant 17 : i32
    %314 = vector.broadcast %c17_i32_121 : i32 to vector<1x256xi32>
    %315 = arith.cmpi slt, %1, %314 : vector<1x256xi32>
    %316 = arith.andi %313, %315 : vector<1x256xi1>
    %317 = arith.extui %316 : vector<1x256xi1> to vector<1x256xi32>
    %318 = arith.sitofp %317 : vector<1x256xi32> to vector<1x256xf32>
    %319 = vector.broadcast %318 : vector<1x256xf32> to vector<128x256xf32>
    %320 = arith.mulf %305, %319 : vector<128x256xf32>
    %321 = arith.truncf %320 : vector<128x256xf32> to vector<128x256xbf16>
    %c768_122 = arith.constant 768 : index
    %c0_123 = arith.constant 0 : index
    %322 = vector.load %arg9[%c768_122, %c0_123] : memref<1152x256xbf16, #tpu.memory_space<vmem>>, vector<128x256xbf16>
    tpu.vector_store %arg9[%c768_122, %c0_123], %321 {strides = array<i32>} : memref<1152x256xbf16, #tpu.memory_space<vmem>>, vector<128x256xbf16>,
    %c0_124 = arith.constant 0 : index
    %c0_125 = arith.constant 0 : index
    %323 = vector.load %arg10[%c0_124, %c0_125] : memref<128x256xf32, #tpu.memory_space<vmem>>, vector<128x256xf32>
    %324 = vector.extract_strided_slice %323 {offsets = [0, 16], sizes = [128, 240], strides = [1, 1]} : vector<128x256xf32> to vector<128x240xf32>
    %325 = vector.extract_strided_slice %323 {offsets = [0, 0], sizes = [128, 16], strides = [1, 1]} : vector<128x256xf32> to vector<128x16xf32>
    %326 = tpu.concatenate %324, %325 in 1 : vector<128x240xf32>, vector<128x16xf32> -> vector<128x256xf32>
    %c-1_i32_126 = arith.constant -1 : i32
    %327 = vector.broadcast %c-1_i32_126 : i32 to vector<1x256xi32>
    %328 = arith.cmpi sge, %0, %327 : vector<1x256xi32>
    %c15_i32_127 = arith.constant 15 : i32
    %329 = vector.broadcast %c15_i32_127 : i32 to vector<1x256xi32>
    %330 = arith.cmpi slt, %0, %329 : vector<1x256xi32>
    %331 = arith.andi %328, %330 : vector<1x256xi1>
    %c0_i32_128 = arith.constant 0 : i32
    %332 = vector.broadcast %c0_i32_128 : i32 to vector<1x256xi32>
    %333 = arith.cmpi sge, %1, %332 : vector<1x256xi32>
    %334 = arith.andi %331, %333 : vector<1x256xi1>
    %c16_i32_129 = arith.constant 16 : i32
    %335 = vector.broadcast %c16_i32_129 : i32 to vector<1x256xi32>
    %336 = arith.cmpi slt, %1, %335 : vector<1x256xi32>
    %337 = arith.andi %334, %336 : vector<1x256xi1>
    %338 = arith.extui %337 : vector<1x256xi1> to vector<1x256xi32>
    %339 = arith.sitofp %338 : vector<1x256xi32> to vector<1x256xf32>
    %340 = vector.broadcast %339 : vector<1x256xf32> to vector<128x256xf32>
    %341 = arith.mulf %326, %340 : vector<128x256xf32>
    %342 = arith.truncf %341 : vector<128x256xf32> to vector<128x256xbf16>
    %c896_130 = arith.constant 896 : index
    %c0_131 = arith.constant 0 : index
    %343 = vector.load %arg9[%c896_130, %c0_131] : memref<1152x256xbf16, #tpu.memory_space<vmem>>, vector<128x256xbf16>
    tpu.vector_store %arg9[%c896_130, %c0_131], %342 {strides = array<i32>} : memref<1152x256xbf16, #tpu.memory_space<vmem>>, vector<128x256xbf16>,
    %c0_132 = arith.constant 0 : index
    %c0_133 = arith.constant 0 : index
    %344 = vector.load %arg10[%c0_132, %c0_133] : memref<128x256xf32, #tpu.memory_space<vmem>>, vector<128x256xf32>
    %345 = vector.extract_strided_slice %344 {offsets = [0, 17], sizes = [128, 239], strides = [1, 1]} : vector<128x256xf32> to vector<128x239xf32>
    %346 = vector.extract_strided_slice %344 {offsets = [0, 0], sizes = [128, 17], strides = [1, 1]} : vector<128x256xf32> to vector<128x17xf32>
    %347 = tpu.concatenate %345, %346 in 1 : vector<128x239xf32>, vector<128x17xf32> -> vector<128x256xf32>
    %c-1_i32_134 = arith.constant -1 : i32
    %348 = vector.broadcast %c-1_i32_134 : i32 to vector<1x256xi32>
    %349 = arith.cmpi sge, %0, %348 : vector<1x256xi32>
    %c15_i32_135 = arith.constant 15 : i32
    %350 = vector.broadcast %c15_i32_135 : i32 to vector<1x256xi32>
    %351 = arith.cmpi slt, %0, %350 : vector<1x256xi32>
    %352 = arith.andi %349, %351 : vector<1x256xi1>
    %c-1_i32_136 = arith.constant -1 : i32
    %353 = vector.broadcast %c-1_i32_136 : i32 to vector<1x256xi32>
    %354 = arith.cmpi sge, %1, %353 : vector<1x256xi32>
    %355 = arith.andi %352, %354 : vector<1x256xi1>
    %c15_i32_137 = arith.constant 15 : i32
    %356 = vector.broadcast %c15_i32_137 : i32 to vector<1x256xi32>
    %357 = arith.cmpi slt, %1, %356 : vector<1x256xi32>
    %358 = arith.andi %355, %357 : vector<1x256xi1>
    %359 = arith.extui %358 : vector<1x256xi1> to vector<1x256xi32>
    %360 = arith.sitofp %359 : vector<1x256xi32> to vector<1x256xf32>
    %361 = vector.broadcast %360 : vector<1x256xf32> to vector<128x256xf32>
    %362 = arith.mulf %347, %361 : vector<128x256xf32>
    %363 = arith.truncf %362 : vector<128x256xf32> to vector<128x256xbf16>
    %c1024_138 = arith.constant 1024 : index
    %c0_139 = arith.constant 0 : index
    %364 = vector.load %arg9[%c1024_138, %c0_139] : memref<1152x256xbf16, #tpu.memory_space<vmem>>, vector<128x256xbf16>
    tpu.vector_store %arg9[%c1024_138, %c0_139], %363 {strides = array<i32>} : memref<1152x256xbf16, #tpu.memory_space<vmem>>, vector<128x256xbf16>,
    %c0_140 = arith.constant 0 : index
    %c0_141 = arith.constant 0 : index
    %365 = vector.load %arg4[%c0_140, %c0_141] : memref<128x1152xbf16, #tpu.memory_space<vmem>>, vector<128x1152xbf16>
    %c0_142 = arith.constant 0 : index
    %c0_143 = arith.constant 0 : index
    %366 = vector.load %arg9[%c0_142, %c0_143] : memref<1152x256xbf16, #tpu.memory_space<vmem>>, vector<1152x256xbf16>
    %cst_144 = arith.constant dense<0.000000e+00> : vector<128x256xf32>
    %367 = tpu.matmul %365, %366, %cst_144 {dimension_numbers = #tpu.dot_dimension_numbers<[1], [0], [0], [1], [0, 0, 1, 1], [], []>} : vector<128x1152xbf16>, vector<1152x256xbf16>, vector<128x256xf32> -> vector<128x256xf32>
    %c0_145 = arith.constant 0 : index
    %c0_146 = arith.constant 0 : index
    %368 = vector.load %arg5[%c0_145, %c0_146] : memref<128x1xf32, #tpu.memory_space<vmem>>, vector<128x1xf32>
    %369 = vector.broadcast %368 : vector<128x1xf32> to vector<128x256xf32>
    %370 = arith.addf %367, %369 : vector<128x256xf32>
    %cst_147 = arith.constant 0.000000e+00 : f32
    %371 = vector.broadcast %cst_147 : f32 to vector<128x256xf32>
    %372 = arith.cmpf oge, %370, %371 : vector<128x256xf32>
    %cst_148 = arith.constant 2.000000e-01 : f32
    %373 = vector.broadcast %cst_148 : f32 to vector<128x256xf32>
    %374 = arith.mulf %370, %373 : vector<128x256xf32>
    %375 = arith.select %372, %370, %374 : vector<128x256xi1>, vector<128x256xf32>
    %c0_149 = arith.constant 0 : index
    %c0_150 = arith.constant 0 : index
    %c0_151 = arith.constant 0 : index
    %376 = vector.load %arg8[%c0_149, %c0_150, %c0_151] : memref<1x128x256xf32, #tpu.memory_space<vmem>>, vector<1x128x256xf32>
    %377 = vector.shape_cast %376 : vector<1x128x256xf32> to vector<128x256xf32>
    %378 = vector.shape_cast %375 : vector<128x256xf32> to vector<1x128x256xf32>
    tpu.vector_store %arg8[%c0_149, %c0_150, %c0_151], %378 {strides = array<i32>} : memref<1x128x256xf32, #tpu.memory_space<vmem>>, vector<1x128x256xf32>,
    return
  }
  func.func @transform_0(%arg0: i32) -> (i32, i32, i32) {
    %c0_i32 = arith.constant 0 : i32
    %c0_i32_0 = arith.constant 0 : i32
    %c0_i32_1 = arith.constant 0 : i32
    return %arg0, %c0_i32, %c0_i32_0 : i32, i32, i32
  }
  func.func @transform_1(%arg0: i32) -> (i32, i32) {
    %c0_i32 = arith.constant 0 : i32
    %c0_i32_0 = arith.constant 0 : i32
    %c0_i32_1 = arith.constant 0 : i32
    return %c0_i32, %c0_i32_0 : i32, i32
  }
  func.func @transform_2(%arg0: i32) -> (i32, i32) {
    %c0_i32 = arith.constant 0 : i32
    %c0_i32_0 = arith.constant 0 : i32
    %c0_i32_1 = arith.constant 0 : i32
    return %c0_i32, %c0_i32_0 : i32, i32
  }
  func.func @transform_3(%arg0: i32) -> (i32, i32) {
    %c0_i32 = arith.constant 0 : i32
    %c0_i32_0 = arith.constant 0 : i32
    %c0_i32_1 = arith.constant 0 : i32
    return %c0_i32, %c0_i32_0 : i32, i32
  }
  func.func @transform_4(%arg0: i32) -> (i32, i32) {
    %c0_i32 = arith.constant 0 : i32
    %c0_i32_0 = arith.constant 0 : i32
    %c0_i32_1 = arith.constant 0 : i32
    return %c0_i32, %c0_i32_0 : i32, i32
  }
  func.func @transform_5(%arg0: i32) -> (i32, i32) {
    %c0_i32 = arith.constant 0 : i32
    %c0_i32_0 = arith.constant 0 : i32
    %c0_i32_1 = arith.constant 0 : i32
    return %c0_i32, %c0_i32_0 : i32, i32
  }
  func.func @transform_6(%arg0: i32) -> (i32, i32) {
    %c0_i32 = arith.constant 0 : i32
    %c0_i32_0 = arith.constant 0 : i32
    %c0_i32_1 = arith.constant 0 : i32
    return %c0_i32, %c0_i32_0 : i32, i32
  }
  func.func @transform_7(%arg0: i32) -> (i32, i32, i32) {
    %c0_i32 = arith.constant 0 : i32
    %c0_i32_0 = arith.constant 0 : i32
    %c0_i32_1 = arith.constant 0 : i32
    return %arg0, %c0_i32, %c0_i32_0 : i32, i32, i32
  }
}

</mosaic_0001>

<bundles_post_ra>
// kernel: tpu_custom_call.1
= control target key start
LH: loop header
LB: loop body
LE: loop exit
PB: predicated region body
PF: predicated region fallthrough
CT: control target
= control target key end

     0   :  { %6 = vsyncpa [#allocation3], 0  ;;  %s106_s0 = inlined_call_operand.hbm [shape: f32[8,128], index: 0, kind: input, shape index: {}]   ;;  %s107_s1 = inlined_call_operand.hbm [shape: f32[8,128], index: 1, kind: output, shape index: {}]  }
   0x1   :  { %7 = vsyncpa [#allocation4], 0  ;;  %s87_s6 = smov [#allocation2]  }
   0x2   :  { %s14_s7 = sshll.u32 %s87_s6, 4  ;;  %s15_s7 = int_to_ptr.vmem [resolvable:$true] %s14_s7 }
   0x3   :  { %s51_s8 = scalar_lea.vmem %s15_s7, 128  ;;  %p56_p1 = scmp.lt.s32.totalorder %s15_s7, %s15_s7 }
   0x4   :  { %p52_p0 = scmp.ne.s32.totalorder %s15_s7, %s51_s8  ;;  %p57_p2 = scmp.lt.s32.totalorder %s51_s8, %s51_s8 }
   0x6   :  { %p58_p3 = por %p57_p2, %p56_p1 }
   0x8   :  { %p59_p4 = pnand %p58_p3, %p52_p0 }
   0xa   :  { %62 = shalt.err (!%p59_p4)
}
   0xb   :  { %17 = dma.hbm_to_vmem [thread:$0]  %s106_s0, 128, %s15_s7, [#allocation3]  }
   0xc   :  { %83 = dma.done.wait [#allocation3], 128  }
   0xd   :  { %84 = vsyncadd [#allocation3], 4294967168  ;;  %v21_v0 = vld [vmem:[#allocation2] sm:$0xff]  ;;  %s88_s11 = smov 3   ;;  %s89_s12 = smov [#allocation5]  }
   0xe   :  { %22 = vrot.lane.b32.xlu0 %v21_v0, %s88_s11  ;;  %s31_s13 = sshll.u32 %s89_s12, 4  ;;  %s32_s13 = int_to_ptr.vmem [resolvable:$true] %s31_s13 }
   0xf   :  { %s63_s14 = scalar_lea.vmem %s32_s13, 128  ;;  %p68_p6 = scmp.lt.s32.totalorder %s32_s13, %s32_s13 }
  0x10   :  { %p64_p5 = scmp.ne.s32.totalorder %s32_s13, %s63_s14  ;;  %p69_p7 = scmp.lt.s32.totalorder %s63_s14, %s63_s14 }
  0x12   :  { %p70_p8 = por %p69_p7, %p68_p6 }
  0x14   :  { %p71_p9 = pnand %p70_p8, %p64_p5 }
  0x80   :  { %v23_v1 = vpop.permute.xlu0 %22 }
  0x81   :  { %24 = vst [vmem:[#allocation5] sm:$0xff] %v23_v1 }
  0x82   :  { %74 = shalt.err (!%p71_p9)
}
  0x83   :  { %34 = dma.vmem_to_hbm [thread:$0]  %s32_s13, 128, %s107_s1, [#allocation4]  }
  0x84   :  { %85 = dma.done.wait [#allocation4], 128  }
  0x85   :  { %86 = vsyncadd [#allocation4], 4294967168 }
  0x86   :  { %38 = vsyncpa [#allocation3], 1 }
  0x87   :  { %39 = vsyncpa [#allocation4], 1 }

// kernel: tpu_custom_call.1
= control target key start
LH: loop header
LB: loop body
LE: loop exit
PB: predicated region body
PF: predicated region fallthrough
CT: control target
= control target key end

     0   :  { %s16828_s0 = inlined_call_operand.hbm [shape: f32[2,128,256], index: 0, kind: input, shape index: {}]   ;;  %s16829_s1 = inlined_call_operand.hbm [shape: bf16[128,1152], index: 1, kind: input, shape index: {}]   ;;  %s16830_s2 = inlined_call_operand.vmem [shape: f32[128,1], index: 2, kind: input, shape index: {}]   ;;  %s16831_s3 = inlined_call_operand.hbm [shape: bf16[128,1152], index: 3, kind: input, shape index: {}]   ;;  %s16832_s4 = inlined_call_operand.vmem [shape: f32[128,1], index: 4, kind: input, shape index: {}]   ;;  %s16833_s5 = inlined_call_operand.vmem [shape: s32[1,256], index: 5, kind: input, shape index: {}]   ;;  %s16834_s6 = inlined_call_operand.vmem [shape: s32[1,256], index: 6, kind: input, shape index: {}]   ;;  %s16835_s7 = inlined_call_operand.hbm [shape: f32[2,128,256], index: 7, kind: output, shape index: {}]  }
   0x1   :  { %16939 = sst [smem:[#allocation61_spill]] %s16829_s1 }
   0x2   :  { %12 = vsyncpa [#allocation5], 0 }
   0x3   :  { %14 = vsyncpa [#allocation5 + $0x1], 0 }
   0x4   :  { %15 = vsyncpa [#allocation8], 0 }
   0x5   :  { %16 = vsyncpa [#allocation6], 0 }
   0x6   :  { %18 = vsyncpa [#allocation6 + $0x1], 0  ;;  %s12698_s24 = smov 0   ;;  %s12700_s25 = smov 0  }
   0x7   :  { %s12702_s26 = smov 0   ;;  %s12704_s27 = smov 0  }
   0x8 LB: > { %s12719_s28 = sadd.s32 4294967295, %s12629_s27   ;;  %s10838_s29 = sadd.s32 4294967294, %s12629_s27   ;;  %s12629_s27 = sphi %s12704_s27, %s17234_s27   ;;  %s12625_s26 = sphi %s12702_s26, %s17233_s26   ;;  %s12621_s25 = sphi %s12700_s25, %s17232_s25   ;;  %s12617_s24 = sphi %s12698_s24, %s17231_s24  }
   0x9   : > { %p44_p0 = scmp.ne.s32.totalorder %s12621_s25, %s12617_s24  ;;  %p16836_p1 = scmp.eq.s32.totalorder %s12719_s28, 0 }
   0xa   : > { %p200_p3 = scmp.eq.s32.totalorder %s10838_s29, 1  ;;  %p10839_p5 = scmp.ge.s32.totalorder %s12629_s27, 1 }
   0xb   : > { %p12728_p4 = por %p16836_p1, %p44_p0  ;;  %p207_p7 = scmp.lt.s32.totalorder %s12629_s27, 3 }
   0xc   : > { %p12733_p6 = por %p200_p3, %p44_p0  ;;  %s12631_s10 = smov [#allocation7]  }
   0xd   : > { %s16940_s30 = scalar_select %p12728_p4, 1, 0 }
   0xe   : > { %s16941_s8 = scalar_select %p12733_p6, 1, 0 }
   0xf   : > { %p12738_p8 = pnand %p10839_p5, %p207_p7  ;;  %s219_s11 = sshll.u32 %s12631_s10, 4  ;;  %s220_s11 = int_to_ptr.vmem [resolvable:$true] %s219_s11 }
  0x10   : > { %s12632_s13 = smov [#allocation9]   ;;  %s12492_s15 = scalar_lea.vmem %s220_s11, 9216 }
  0x11   : > { %s16942_s9 = scalar_select %p12738_p8, 1, 0 }
  0x12   : > { %p12182_p9 = pneg %p12738_p8  ;;  %s235_s14 = sshll.u32 %s12632_s13, 4  ;;  %s236_s14 = int_to_ptr.vmem [resolvable:$true] %s235_s14 }
  0x13   : > { %p12493_p13 = scmp.ne.s32.totalorder %s220_s11, %s12492_s15  ;;  %p12500_p5 = scmp.lt.s32.totalorder %s220_s11, %s220_s11 }
  0x14   : > { %p12747_p11 = pnand %p12182_p9, %p16836_p1  ;;  %p12501_p7 = scmp.lt.s32.totalorder %s12492_s15, %s12492_s15 }
  0x16   : > { %p12483_p12 = pneg %p12747_p11  ;;  %p12502_p10 = por %p12501_p7, %p12500_p5 }
  0x18   : > { %p12495_p0 = pnand %p12493_p13, %p12483_p12 }
  0x1a   : > { %p12496_p3 = pneg %p12495_p0 }
  0x1c   : > { %p12503_p9 = pnand %p12502_p10, %p12496_p3 }
  0x1e   : > { %12506 = shalt.err (!%p12503_p9)
}
  0x1f   : > { %s12633_s16 = smov 576   ;;  %s12634_s17 = smov 36  }
  0x20   : > { %s16944_s1 = sld [smem:[#allocation61_spill]]  ;;  %s12518_s20 = scalar_lea.vmem %s236_s14, 9216 }
  0x21   : > { %p12519_p1 = scmp.ne.s32.totalorder %s236_s14, %s12518_s20  ;;  %p12526_p2 = scmp.lt.s32.totalorder %s236_s14, %s236_s14 }
  0x22   : > { %p12527_p6 = scmp.lt.s32.totalorder %s12518_s20, %s12518_s20 }
  0x23   : > { %p12521_p13 = pnand %p12519_p1, %p12483_p12 }
  0x24   : > { %p12528_p5 = por %p12527_p6, %p12526_p2 }
  0x25   : > { %p12522_p0 = pneg %p12521_p13 }
  0x26   : > { %12185 = dma.hbm_to_vmem [thread:$0]  (!%p12747_p11), %s16944_s1, 9216, %s220_s11, [#allocation8], %s12633_s16, %s12633_s16, %s12634_s17  }
  0x27   : > { %p12529_p10 = pnand %p12528_p5, %p12522_p0 }
  0x29   : > { %12532 = shalt.err (!%p12529_p10)
}
  0x2a   : > { %12188 = dma.hbm_to_vmem [thread:$0]  (!%p12747_p11), %s16831_s3, 9216, %s236_s14, [#allocation8], %s12633_s16, %s12633_s16, %s12634_s17  }
  0x2b   : > { %s12770_s23 = sadd.s32 1, %s12629_s27   ;;  %s31_s29 = sadd.s32 1, %s12625_s26 }
  0x2c   : > { %s28_s10 = ssub.s32 %s12629_s27, %s12770_s23  ;;  %p38_p1 = scmp.ne.s32.totalorder %s12625_s26, %s12621_s25 }
  0x2d   : > { %p29_p2 = scmp.eq.s32.totalorder %s28_s10, 0  ;;  %p39_p6 = scmp.eq.s32.totalorder %s12629_s27, 0 }
  0x2e   : > { %p16945_p12 = scmp.eq.s32.totalorder %s12719_s28, 1  ;;  %p12199_p7 = scmp.lt.s32.totalorder %s12629_s27, 2 }
  0x2f   : > { %s12786_s12 = scalar_select %p29_p2, %s12625_s26, %s31_s29  }
  0x30   : > { %p12780_p3 = por %p16945_p12, %p38_p1  ;;  %p40_p9 = por %p39_p6, %p38_p1 }
  0x31   : > { %s258_s13 = sand.u32 1, %s12625_s26   ;;  %s11592_s14 = sshll.u32 %s12629_s27, 12 }
  0x32   : > { %s16946_s11 = scalar_select %p12780_p3, 1, 0 }
  0x33   : > { %s10843_s15 = sshll.u32 %s258_s13, 8  ;;  %s12793_s18 = scalar_lea.hbm %s16828_s0, %s11592_s14 }
  0x34   : > { %s262_s19 = scalar_lea.vmem [#allocation4], %s10843_s15  ;;  %p12797_p11 = pnand %p12199_p7, %p40_p9 }
  0x35   : > { %s269_s20 = sshll.u32 %s262_s19, 4  ;;  %s12801_s22 = scalar_lea.sflag [#allocation5], %s258_s13  ;;  %s12795_s20 = int_to_ptr.vmem [resolvable:$true] %s269_s20 }
  0x36   : > { %s12533_s29 = scalar_lea.hbm %s12793_s18, 4096  ;;  %p12535_p0 = pneg %p12797_p11 }
  0x37   : > { %p12534_p13 = scmp.ne.s32.totalorder %s12793_s18, %s12533_s29  ;;  %s12538_s15 = scalar_lea.hbm %s16828_s0, 8192 }
  0x38   : > { %p12539_p1 = scmp.lt.s32.totalorder %s12793_s18, %s16828_s0  ;;  %p12540_p2 = scmp.lt.s32.totalorder %s12538_s15, %s12533_s29 }
  0x39   : > { %p12536_p5 = pnand %p12535_p0, %p12534_p13 }
  0x3a   : > { %p12541_p6 = por %p12540_p2, %p12539_p1 }
  0x3b   : > { %p12537_p10 = pneg %p12536_p5 }
  0x3d   : > { %p12542_p12 = pnand %p12541_p6, %p12537_p10 }
  0x3f   : > { %12545 = shalt.err (!%p12542_p12)
}
  0x40   : > { %s12546_s13 = scalar_lea.vmem %s12795_s20, 4096  ;;  %s12635_s19 = smov [#allocation4]  }
  0x41   : > { %p12547_p7 = scmp.ne.s32.totalorder %s12795_s20, %s12546_s13  ;;  %s12551_s1 = sshll.u32 %s12635_s19, 4  ;;  %s12552_s1 = int_to_ptr.vmem [resolvable:$false] %s12551_s1 }
  0x42   : > { %s12553_s10 = scalar_lea.vmem %s12552_s1, 8192  ;;  %p12554_p5 = scmp.lt.s32.totalorder %s12795_s20, %s12552_s1 }
  0x43   : > { %p12549_p9 = pnand %p12547_p7, %p12535_p0  ;;  %p12555_p3 = scmp.lt.s32.totalorder %s12553_s10, %s12546_s13 }
  0x45   : > { %p12550_p13 = pneg %p12549_p9  ;;  %p12556_p4 = por %p12555_p3, %p12554_p5 }
  0x47   : > { %p12557_p8 = pnand %p12556_p4, %p12550_p13 }
  0x49   : > { %12560 = shalt.err (!%p12557_p8)
}
  0x4a   : > { %s12636_s29 = smov 256   ;;  %s12637_s14 = smov 16  }
  0x4b   : > { %12192 = dma.hbm_to_vmem [thread:$0]  (!%p12797_p11), %s12793_s18, 4096, %s12795_s20, %s12801_s22, %s12636_s29, %s12636_s29, %s12637_s14  }
  0x4c   : > { %p16948_p0 = scmp.ne.s32.totalorder %s16942_s9, 0 }
  0x4e   : > { %281 = sbr.rel (%p16948_p0) target bundleno = 1858 (0x742), region = 48 }
  0x53   : > { %s12825_s15 = sand.u32 1, %s12621_s25   ;;  %p16949_p4 = scmp.ne.s32.totalorder %s16940_s30, 0 }
  0x54   : > { %s10847_s1 = sshll.u32 %s12825_s15, 8  ;;  %s284_s16 = scalar_lea.sflag [#allocation5], %s12825_s15 }
  0x55   : > { %s12831_s17 = scalar_lea.vmem [#allocation4], %s10847_s1 }
  0x56   : > { %12604 = dma.done.wait (%p16949_p4), %s284_s16, 4096  }
  0x57   : > { %12606 = vsyncadd (%p16949_p4), %s284_s16, 4294963200  ;;  %p16950_p8 = scmp.eq.s32.totalorder %s12719_s28, 0 }
  0x59   : > { %12608 = dma.done.wait (%p16950_p8), [#allocation8], 18432   ;;  %p16951_p3 = pmov %p16950_p8 }
  0x5a   : > { %v12842_v0 = vld [vmem:[%s12831_s17 + $0x28] sm:$0xff]  ;;  %s12638_s30 = smov 34   ;;  %v12852_v2 = vld [vmem:[%s12831_s17 + $0x38] sm:$0xff]  ;;  %v12918_v16 = vld [vmem:[%s12831_s17 + $0x10] sm:$0xff]  ;;  %s12639_s9 = smov 32   ;;  %v548_v58 = vlaneseq  ;;  %v16959_v59 = vmov 0 }
  0x5b   : > { %12610 = vsyncadd (%p16951_p3), [#allocation8], 4294948864  ;;  %v12845_v1 = vld [vmem:[%s12831_s17 + $0x8] sm:$0xff]  ;;  %381 = vrot.lane.b32.xlu1 %v12842_v0, %s12638_s30  ;;  %v12855_v3 = vld [vmem:[%s12831_s17 + $0x18] sm:$0xff]  ;;  %s12640_s18 = smov 30   ;;  %vm473_vm7 = vcmask 277504  }
  0x5c   : > { %377 = vrot.lane.b32.xlu0 %v12845_v1, %s12638_s30  ;;  %v12862_v4 = vld [vmem:[%s12831_s17 + $0x58] sm:$0xff]  ;;  %v12865_v5 = vld [vmem:[%s12831_s17 + $0x48] sm:$0xff]  ;;  %v12921_v17 = vld [vmem:[%s12831_s17] sm:$0xff]  ;;  %v549_v62 = vshrl.u32 %v548_v58, 7  ;;  %s12642_s19 = smov 2   ;;  %s12643_s10 = smov 126  }
  0x5d   : > { %v12872_v6 = vld [vmem:[%s12831_s17 + $0x78] sm:$0xff]  ;;  %v12875_v7 = vld [vmem:[%s12831_s17 + $0x68] sm:$0xff]  ;;  %v12928_v18 = vld [vmem:[%s12831_s17 + $0x30] sm:$0xff]  ;;  %vm846_vm12 = vcmask 261120   ;;  %s12644_s16 = smov 98   ;;  %s12650_s29 = smov 15  }
  0x5e   : > { %v12882_v8 = vld [vmem:[%s12831_s17 + $0x98] sm:$0xff]  ;;  %v12885_v9 = vld [vmem:[%s12831_s17 + $0x88] sm:$0xff]  ;;  %v12931_v19 = vld [vmem:[%s12831_s17 + $0x20] sm:$0xff]  ;;  %s12653_s20 = smov 113   ;;  %s12654_s21 = smov 112  }
  0x5f   : > { %383 = vrot.lane.b32.xlu1 %v12852_v2, %s12638_s30  ;;  %v12888_v10 = vld [vmem:[%s12831_s17 + $0xb8] sm:$0xff]  ;;  %v12895_v11 = vld [vmem:[%s12831_s17 + $0xa8] sm:$0xff]  ;;  %v12938_v20 = vld [vmem:[%s12831_s17 + $0x50] sm:$0xff]  ;;  %s12655_s22 = smov 111   ;;  %p17228_p10 = scmp.ne.s32.totalorder %s16946_s11, 0 }
  0x60   : > { %379 = vrot.lane.b32.xlu0 %v12855_v3, %s12638_s30  ;;  %16952 = vst [vmem:[#allocation14_spill] sm:$0xff] %v12895_v11  ;;  %v12898_v12 = vld [vmem:[%s12831_s17 + $0xd8] sm:$0xff]  ;;  %v12901_v13 = vld [vmem:[%s12831_s17 + $0xc8] sm:$0xff]  ;;  %v12941_v21 = vld [vmem:[%s12831_s17 + $0x40] sm:$0xff] }
  0x61   : > { %16953 = vst [vmem:[#allocation15_spill] sm:$0xff] %v12898_v12  ;;  %16954 = vst [vmem:[#allocation16_spill] sm:$0xff] %v12901_v13  ;;  %v12908_v14 = vld [vmem:[%s12831_s17 + $0xf8] sm:$0xff]  ;;  %v12911_v15 = vld [vmem:[%s12831_s17 + $0xe8] sm:$0xff] }
  0x62   : > { %16955 = vst [vmem:[#allocation17_spill] sm:$0xff] %v12908_v14  ;;  %16956 = vst [vmem:[#allocation18_spill] sm:$0xff] %v12911_v15  ;;  %v12948_v22 = vld [vmem:[%s12831_s17 + $0x70] sm:$0xff]  ;;  %v12951_v23 = vld [vmem:[%s12831_s17 + $0x60] sm:$0xff] }
  0x63   : > { %387 = vrot.lane.b32.xlu1 %v12862_v4, %s12638_s30  ;;  %v12958_v24 = vld [vmem:[%s12831_s17 + $0x90] sm:$0xff]  ;;  %v12961_v25 = vld [vmem:[%s12831_s17 + $0x80] sm:$0xff] }
  0x64   : > { %385 = vrot.lane.b32.xlu0 %v12865_v5, %s12638_s30  ;;  %16957 = vst [vmem:[#allocation19_spill] sm:$0xff] %v12961_v25  ;;  %v12968_v26 = vld [vmem:[%s12831_s17 + $0xb0] sm:$0xff]  ;;  %v12971_v27 = vld [vmem:[%s12831_s17 + $0xa0] sm:$0xff] }
  0x65   : > { %v12978_v28 = vld [vmem:[%s12831_s17 + $0xd0] sm:$0xff]  ;;  %v12981_v29 = vld [vmem:[%s12831_s17 + $0xc0] sm:$0xff] }
  0x66   : > { %v12988_v30 = vld [vmem:[%s12831_s17 + $0xf0] sm:$0xff]  ;;  %v12991_v31 = vld [vmem:[%s12831_s17 + $0xe0] sm:$0xff] }
  0x67   : > { %391 = vrot.lane.b32.xlu1 %v12872_v6, %s12638_s30  ;;  %v327_v52 = vld [vmem:[%s16833_s5] sm:$0x3] }
  0x68   : > { %389 = vrot.lane.b32.xlu0 %v12875_v7, %s12638_s30  ;;  %v13137_v55 = vld [vmem:[%s16834_s6] sm:$0x3]  ;;  %vm538_vm0 = vcmp.ge.s32.totalorder %v327_v52, 2  ;;  %vm539_vm1 = vcmp.lt.s32.totalorder %v327_v52, 18  ;;  %v13173_v52 = vsub.s32 0, %v549_v62 }
  0x69   : > { %16958 = vst [vmem:[#allocation20_spill] sm:$0xff] %v13137_v55  ;;  %vm13145_vm2 = vmand %vm538_vm0, %vm539_vm1  ;;  %vm541_vm3 = vcmp.ge.s32.totalorder %v13137_v55, 2  ;;  %vm543_vm5 = vcmp.lt.s32.totalorder %v13137_v55, 18  ;;  %vm1216_vm1 = vcmask 244736  }
  0x6a   : > { %v16960_v59 = vsel %vm13145_vm2, 4294967295, %v16959_v59  ;;  %vm542_vm4 = vmand %vm13145_vm2, %vm541_vm3  ;;  %16963 = vst [vmem:[#allocation23_spill] sm:$0xff] %v13173_v52 }
  0x6b   : > { %395 = vrot.lane.b32.xlu1 %v12882_v8, %s12638_s30  ;;  %16961 = vst [vmem:[#allocation21_spill] sm:$0xff] %v16960_v59  ;;  %vm544_vm6 = vmand %vm542_vm4, %vm543_vm5 }
  0x6c   : > { %393 = vrot.lane.b32.xlu0 %v12885_v9, %s12638_s30 }
  0x6f   : > { %399 = vrot.lane.b32.xlu1 %v12888_v10, %s12638_s30 }
  0x70   : > { %397 = vrot.lane.b32.xlu0 %v12895_v11, %s12638_s30 }
  0x73   : > { %403 = vrot.lane.b32.xlu1 %v12898_v12, %s12638_s30 }
  0x74   : > { %401 = vrot.lane.b32.xlu0 %v12901_v13, %s12638_s30 }
  0x77   : > { %407 = vrot.lane.b32.xlu1 %v12908_v14, %s12638_s30 }
  0x78   : > { %405 = vrot.lane.b32.xlu0 %v12911_v15, %s12638_s30 }
  0x7b   : > { %443 = vrot.lane.b32.xlu1 %v12918_v16, %s12638_s30 }
  0x7c   : > { %441 = vrot.lane.b32.xlu0 %v12921_v17, %s12638_s30 }
  0x7f   : > { %447 = vrot.lane.b32.xlu1 %v12928_v18, %s12638_s30 }
  0x80   : > { %445 = vrot.lane.b32.xlu0 %v12931_v19, %s12638_s30 }
  0x83   : > { %451 = vrot.lane.b32.xlu1 %v12938_v20, %s12638_s30 }
  0x84   : > { %449 = vrot.lane.b32.xlu0 %v12941_v21, %s12638_s30 }
  0x87   : > { %455 = vrot.lane.b32.xlu1 %v12948_v22, %s12638_s30 }
  0x88   : > { %453 = vrot.lane.b32.xlu0 %v12951_v23, %s12638_s30 }
  0x8b   : > { %459 = vrot.lane.b32.xlu1 %v12958_v24, %s12638_s30 }
  0x8c   : > { %457 = vrot.lane.b32.xlu0 %v12961_v25, %s12638_s30 }
  0x8f   : > { %463 = vrot.lane.b32.xlu1 %v12968_v26, %s12638_s30 }
  0x90   : > { %461 = vrot.lane.b32.xlu0 %v12971_v27, %s12638_s30 }
  0x93   : > { %467 = vrot.lane.b32.xlu1 %v12978_v28, %s12638_s30 }
  0x94   : > { %465 = vrot.lane.b32.xlu0 %v12981_v29, %s12638_s30 }
  0x97   : > { %471 = vrot.lane.b32.xlu1 %v12988_v30, %s12638_s30 }
  0x98   : > { %469 = vrot.lane.b32.xlu0 %v12991_v31, %s12638_s30  ;;  %s12645_s30 = smov 96  }
  0x9b   : > { %752 = vrot.lane.b32.xlu1 %v12855_v3, %s12639_s9 }
  0x9c   : > { %750 = vrot.lane.b32.xlu0 %v12845_v1, %s12639_s9 }
  0x9f   : > { %756 = vrot.lane.b32.xlu1 %v12852_v2, %s12639_s9 }
  0xa0   : > { %754 = vrot.lane.b32.xlu0 %v12842_v0, %s12639_s9 }
  0xa3   : > { %760 = vrot.lane.b32.xlu1 %v12862_v4, %s12639_s9 }
  0xa4   : > { %758 = vrot.lane.b32.xlu0 %v12865_v5, %s12639_s9 }
  0xa7   : > { %764 = vrot.lane.b32.xlu1 %v12872_v6, %s12639_s9 }
  0xa8   : > { %762 = vrot.lane.b32.xlu0 %v12875_v7, %s12639_s9 }
  0xab   : > { %768 = vrot.lane.b32.xlu1 %v12882_v8, %s12639_s9 }
  0xac   : > { %766 = vrot.lane.b32.xlu0 %v12885_v9, %s12639_s9 }
  0xaf   : > { %772 = vrot.lane.b32.xlu1 %v12888_v10, %s12639_s9 }
  0xb0   : > { %770 = vrot.lane.b32.xlu0 %v12895_v11, %s12639_s9 }
  0xb3   : > { %776 = vrot.lane.b32.xlu1 %v12898_v12, %s12639_s9 }
  0xb4   : > { %774 = vrot.lane.b32.xlu0 %v12901_v13, %s12639_s9 }
  0xb7   : > { %780 = vrot.lane.b32.xlu1 %v12908_v14, %s12639_s9 }
  0xb8   : > { %778 = vrot.lane.b32.xlu0 %v12911_v15, %s12639_s9 }
  0xbb   : > { %816 = vrot.lane.b32.xlu1 %v12918_v16, %s12639_s9 }
  0xbc   : > { %814 = vrot.lane.b32.xlu0 %v12921_v17, %s12639_s9 }
  0xbf   : > { %820 = vrot.lane.b32.xlu1 %v12928_v18, %s12639_s9 }
  0xc0   : > { %818 = vrot.lane.b32.xlu0 %v12931_v19, %s12639_s9 }
  0xc3   : > { %824 = vrot.lane.b32.xlu1 %v12938_v20, %s12639_s9 }
  0xc4   : > { %822 = vrot.lane.b32.xlu0 %v12941_v21, %s12639_s9 }
  0xc7   : > { %828 = vrot.lane.b32.xlu1 %v12948_v22, %s12639_s9 }
  0xc8   : > { %826 = vrot.lane.b32.xlu0 %v12951_v23, %s12639_s9 }
  0xcb   : > { %832 = vrot.lane.b32.xlu1 %v12958_v24, %s12639_s9 }
  0xcc   : > { %830 = vrot.lane.b32.xlu0 %v12961_v25, %s12639_s9 }
  0xcd   : > { %v13053_v32 = vpop.permute.xlu1 %381 }
  0xce   : > { %v13055_v33 = vpop.permute.xlu0 %377 }
  0xcf   : > { %836 = vrot.lane.b32.xlu1 %v12968_v26, %s12639_s9 }
  0xd0   : > { %834 = vrot.lane.b32.xlu0 %v12971_v27, %s12639_s9 }
  0xd1   : > { %v13061_v34 = vpop.permute.xlu1 %383 }
  0xd2   : > { %v13063_v35 = vpop.permute.xlu0 %379 }
  0xd3   : > { %840 = vrot.lane.b32.xlu1 %v12978_v28, %s12639_s9 }
  0xd4   : > { %838 = vrot.lane.b32.xlu0 %v12981_v29, %s12639_s9 }
  0xd5   : > { %v13069_v36 = vpop.permute.xlu1 %387 }
  0xd6   : > { %v13071_v37 = vpop.permute.xlu0 %385 }
  0xd7   : > { %844 = vrot.lane.b32.xlu1 %v12988_v30, %s12639_s9 }
  0xd8   : > { %842 = vrot.lane.b32.xlu0 %v12991_v31, %s12639_s9  ;;  %s12646_s9 = smov 94  }
  0xd9   : > { %v13077_v38 = vpop.permute.xlu1 %391 }
  0xda   : > { %v13079_v39 = vpop.permute.xlu0 %389 }
  0xdb   : > { %1122 = vrot.lane.b32.xlu1 %v12855_v3, %s12640_s18 }
  0xdc   : > { %1120 = vrot.lane.b32.xlu0 %v12845_v1, %s12640_s18 }
  0xdd   : > { %v13085_v40 = vpop.permute.xlu1 %395 }
  0xde   : > { %v13087_v41 = vpop.permute.xlu0 %393 }
  0xdf   : > { %1126 = vrot.lane.b32.xlu1 %v12852_v2, %s12640_s18 }
  0xe0   : > { %1124 = vrot.lane.b32.xlu0 %v12842_v0, %s12640_s18 }
  0xe1   : > { %v13093_v42 = vpop.permute.xlu1 %399 }
  0xe2   : > { %v13095_v43 = vpop.permute.xlu0 %397 }
  0xe3   : > { %1130 = vrot.lane.b32.xlu1 %v12862_v4, %s12640_s18 }
  0xe4   : > { %1128 = vrot.lane.b32.xlu0 %v12865_v5, %s12640_s18 }
  0xe5   : > { %v404_v44 = vpop.permute.xlu1 %403 }
  0xe6   : > { %v402_v45 = vpop.permute.xlu0 %401 }
  0xe7   : > { %1134 = vrot.lane.b32.xlu1 %v12872_v6, %s12640_s18 }
  0xe8   : > { %1132 = vrot.lane.b32.xlu0 %v12875_v7, %s12640_s18 }
  0xe9   : > { %v408_v46 = vpop.permute.xlu1 %407 }
  0xea   : > { %v406_v47 = vpop.permute.xlu0 %405 }
  0xeb   : > { %1138 = vrot.lane.b32.xlu1 %v12882_v8, %s12640_s18 }
  0xec   : > { %1136 = vrot.lane.b32.xlu0 %v12885_v9, %s12640_s18 }
  0xed   : > { %v13109_v48 = vpop.permute.xlu1 %443 }
  0xee   : > { %v13111_v49 = vpop.permute.xlu0 %441 }
  0xef   : > { %1142 = vrot.lane.b32.xlu1 %v12888_v10, %s12640_s18 }
  0xf0   : > { %1140 = vrot.lane.b32.xlu0 %v12895_v11, %s12640_s18 }
  0xf1   : > { %v13117_v50 = vpop.permute.xlu1 %447 }
  0xf2   : > { %v13119_v51 = vpop.permute.xlu0 %445 }
  0xf3   : > { %1146 = vrot.lane.b32.xlu1 %v12898_v12, %s12640_s18 }
  0xf4   : > { %1144 = vrot.lane.b32.xlu0 %v12901_v13, %s12640_s18  ;;  %v16848_v13 = vmov 0.0  }
  0xf5   : > { %v13128_v53 = vpop.permute.xlu1 %451  ;;  %v10851_v58 = vsel %vm544_vm6, 1.0, %v16848_v13 }
  0xf6   : > { %v13130_v54 = vpop.permute.xlu0 %449 }
  0xf7   : > { %1150 = vrot.lane.b32.xlu1 %v12908_v14, %s12640_s18 }
  0xf8   : > { %1148 = vrot.lane.b32.xlu0 %v12911_v15, %s12640_s18 }
  0xf9   : > { %v13141_v56 = vpop.permute.xlu1 %455 }
  0xfa   : > { %v13143_v57 = vpop.permute.xlu0 %453 }
  0xfb   : > { %1186 = vrot.lane.b32.xlu1 %v12918_v16, %s12640_s18 }
  0xfc   : > { %1184 = vrot.lane.b32.xlu0 %v12921_v17, %s12640_s18  ;;  %v13169_v17 = vsub.s32 1, %v549_v62 }
  0xfd   : > { %v13154_v60 = vpop.permute.xlu1 %459 }
  0xfe   : > { %v13156_v61 = vpop.permute.xlu0 %457  ;;  %16962 = vst [vmem:[#allocation22_spill] sm:$0xff] %v13169_v17  ;;  %v13181_v55 = vrot.slane %v10851_v58, %v13169_v17 }
  0xff   : > { %1190 = vrot.lane.b32.xlu1 %v12928_v18, %s12640_s18 }
 0x100   : > { %1188 = vrot.lane.b32.xlu0 %v12931_v19, %s12640_s18 }
 0x101   : > { %v464_v63 = vpop.permute.xlu1 %463 }
 0x102   : > { %v462_v16 = vpop.permute.xlu0 %461 }
 0x103   : > { %1194 = vrot.lane.b32.xlu1 %v12938_v20, %s12640_s18  ;;  %v13186_v20 = vrot.slane %v10851_v58, %v13173_v52 }
 0x104   : > { %1192 = vrot.lane.b32.xlu0 %v12941_v21, %s12640_s18 }
 0x105   : > { %v468_v18 = vpop.permute.xlu1 %467 }
 0x106   : > { %v466_v19 = vpop.permute.xlu0 %465  ;;  %v487_v12 = vsel %vm473_vm7, %v468_v18, %v404_v44  ;;  %v535_v21 = vsel %vm473_vm7, %v404_v44, %v468_v18  ;;  %v484_v18 = vsel %vm473_vm7, %v462_v16, %v13095_v43 }
 0x107   : > { %v486_v59 = vsel %vm473_vm7, %v466_v19, %v402_v45  ;;  %1198 = vrot.lane.b32.xlu1 %v12948_v22, %s12640_s18  ;;  %v585_v62 = vmul.f32 %v13181_v55, %v487_v12  ;;  %v534_v13 = vsel %vm473_vm7, %v402_v45, %v466_v19  ;;  %v584_v19 = vmul.f32 %v13186_v20, %v535_v21 }
 0x108   : > { %1196 = vrot.lane.b32.xlu0 %v12951_v23, %s12640_s18  ;;  %v583_v15 = vmul.f32 %v13181_v55, %v486_v59  ;;  %v485_v59 = vsel %vm473_vm7, %v464_v63, %v13093_v42 }
 0x109   : > { %v472_v14 = vpop.permute.xlu1 %471 }
 0x10a   : > { %v470_v17 = vpop.permute.xlu0 %469  ;;  %v537_v11 = vsel %vm473_vm7, %v408_v46, %v472_v14  ;;  %v489_v52 = vsel %vm473_vm7, %v472_v14, %v408_v46 }
 0x10b   : > { %v536_v22 = vsel %vm473_vm7, %v406_v47, %v470_v17  ;;  %v488_v58 = vsel %vm473_vm7, %v470_v17, %v406_v47  ;;  %1202 = vrot.lane.b32.xlu1 %v12958_v24, %s12640_s18  ;;  %v589_v12 = vmul.f32 %v13181_v55, %v489_v52  ;;  %v588_v45 = vmul.f32 %v13186_v20, %v537_v11 }
 0x10c   : > { %v587_v23 = vmul.f32 %v13181_v55, %v488_v58  ;;  %v586_v44 = vmul.f32 %v13186_v20, %v536_v22  ;;  %1200 = vrot.lane.b32.xlu0 %v12961_v25, %s12640_s18  ;;  %v533_v52 = vsel %vm473_vm7, %v13093_v42, %v464_v63  ;;  %v532_v11 = vsel %vm473_vm7, %v13095_v43, %v462_v16 }
 0x10d   : > { %v13210_v14 = vpop.permute.xlu1 %752  ;;  %v582_v22 = vmul.f32 %v13186_v20, %v534_v13  ;;  %v581_v58 = vmul.f32 %v13181_v55, %v485_v59  ;;  %v579_v25 = vmul.f32 %v13181_v55, %v484_v18  ;;  %v483_v42 = vsel %vm473_vm7, %v13154_v60, %v13085_v40 }
 0x10e   : > { %v13212_v46 = vpop.permute.xlu0 %750  ;;  %v11897_v47 = vpack.c.bf16 %v589_v12, %v587_v23  ;;  %v11896_v17 = vpack.c.bf16 %v588_v45, %v586_v44  ;;  %v11895_v23 = vpack.c.bf16 %v585_v62, %v583_v15  ;;  %v482_v43 = vsel %vm473_vm7, %v13156_v61, %v13087_v41 }
 0x10f   : > { %1206 = vrot.lane.b32.xlu1 %v12968_v26, %s12640_s18  ;;  %v531_v15 = vsel %vm473_vm7, %v13085_v40, %v13154_v60  ;;  %v580_v16 = vmul.f32 %v13186_v20, %v533_v52  ;;  %v578_v21 = vmul.f32 %v13186_v20, %v532_v11  ;;  %v11894_v62 = vpack.c.bf16 %v584_v19, %v582_v22  ;;  %v12264_v52 = vld [vmem:[#allocation7 + $0x4] ss:$36 sps:$4 sm:$0xff]  }
 0x110   : > { %4840 = vmatprep.subr.bf16.mxu0 %v11897_v47  ;;  %1204 = vrot.lane.b32.xlu0 %v12971_v27, %s12640_s18  ;;  %v577_v12 = vmul.f32 %v13181_v55, %v483_v42  ;;  %v530_v44 = vsel %vm473_vm7, %v13087_v41, %v13156_v61  ;;  %v575_v45 = vmul.f32 %v13181_v55, %v482_v43 }
 0x111   : > { %4841 = vmatpush1.bf16.msra.mxu0 %v11896_v17  ;;  %v13232_v13 = vpop.permute.xlu1 %756  ;;  %v11893_v59 = vpack.c.bf16 %v581_v58, %v579_v25  ;;  %v481_v40 = vsel %vm473_vm7, %v13141_v56, %v13077_v38  ;;  %v480_v60 = vsel %vm473_vm7, %v13143_v57, %v13079_v39  ;;  %v529_v25 = vsel %vm473_vm7, %v13077_v38, %v13141_v56 }
 0x112   : > { %v13234_v63 = vpop.permute.xlu0 %754  ;;  %4842 = vmatprep.subr.bf16.mxu0 %v11895_v23  ;;  %v576_v61 = vmul.f32 %v13186_v20, %v531_v15  ;;  %v574_v47 = vmul.f32 %v13186_v20, %v530_v44  ;;  %v11892_v17 = vpack.c.bf16 %v580_v16, %v578_v21  ;;  %v573_v11 = vmul.f32 %v13181_v55, %v481_v40 }
 0x113   : > { %1214 = vrot.lane.b32.xlu1 %v12988_v30, %s12640_s18  ;;  %v528_v19 = vsel %vm473_vm7, %v13079_v39, %v13143_v57  ;;  %v571_v22 = vmul.f32 %v13181_v55, %v480_v60  ;;  %v11891_v58 = vpack.c.bf16 %v577_v12, %v575_v45  ;;  %v479_v38 = vsel %vm473_vm7, %v13128_v53, %v13069_v36 }
 0x114   : > { %1212 = vrot.lane.b32.xlu0 %v12991_v31, %s12640_s18  ;;  %v478_v56 = vsel %vm473_vm7, %v13130_v54, %v13071_v37  ;;  %4872 = vmatprep.mubr.bf16.mxu0 %v12264_v52  ;;  %v527_v57 = vsel %vm473_vm7, %v13069_v36, %v13128_v53  ;;  %v572_v42 = vmul.f32 %v13186_v20, %v529_v25 }
 0x115   : > { %4843 = vmatpush1.bf16.msra.mxu0 %v11894_v62  ;;  %v13256_v18 = vpop.permute.xlu1 %760  ;;  %v570_v43 = vmul.f32 %v13186_v20, %v528_v19  ;;  %v11890_v15 = vpack.c.bf16 %v576_v61, %v574_v47  ;;  %v569_v16 = vmul.f32 %v13181_v55, %v479_v38  ;;  %v526_v21 = vsel %vm473_vm7, %v13071_v37, %v13130_v54 }
 0x116   : > { %v13258_v41 = vpop.permute.xlu0 %758  ;;  %4844 = vmatprep.subr.bf16.mxu0 %v11893_v59  ;;  %v567_v62 = vmul.f32 %v13181_v55, %v478_v56  ;;  %v11889_v12 = vpack.c.bf16 %v573_v11, %v571_v22  ;;  %v477_v36 = vsel %vm473_vm7, %v13117_v50, %v13061_v34  ;;  %v476_v53 = vsel %vm473_vm7, %v13119_v51, %v13053_v32 }
 0x117   : > { %1210 = vrot.lane.b32.xlu1 %v12978_v28, %s12640_s18  ;;  %v568_v44 = vmul.f32 %v13186_v20, %v527_v57  ;;  %v566_v45 = vmul.f32 %v13186_v20, %v526_v21  ;;  %v11888_v59 = vpack.c.bf16 %v572_v42, %v570_v43  ;;  %v565_v40 = vmul.f32 %v13181_v55, %v477_v36  ;;  %v16969_v36 = vld [vmem:[#allocation15_spill] sm:$0xff] }
 0x118   : > { %1208 = vrot.lane.b32.xlu0 %v12981_v29, %s12640_s18  ;;  %v563_v60 = vmul.f32 %v13181_v55, %v476_v53  ;;  %v11887_v25 = vpack.c.bf16 %v569_v16, %v567_v62  ;;  %v16970_v53 = vmov 0.0   ;;  %s12652_s18 = smov 127  }
 0x119   : > { %4845 = vmatpush1.bf16.msra.mxu0 %v11892_v17  ;;  %v13280_v23 = vpop.permute.xlu1 %764  ;;  %v11886_v17 = vpack.c.bf16 %v568_v44, %v566_v45  ;;  %v16971_v44 = vld [vmem:[#allocation16_spill] sm:$0xff] }
 0x11a   : > { %v13282_v39 = vpop.permute.xlu0 %762  ;;  %4846 = vmatprep.subr.bf16.mxu0 %v11891_v58  ;;  %v11885_v19 = vpack.c.bf16 %v565_v40, %v563_v60 }
 0x11b   : > { %1492 = vrot.lane.b32.xlu1 %v12855_v3, %s12642_s19  ;;  %v525_v3 = vsel %vm473_vm7, %v13061_v34, %v13117_v50  ;;  %v475_v34 = vsel %vm473_vm7, %v13109_v48, %v13063_v35  ;;  %v474_v50 = vsel %vm473_vm7, %v13111_v49, %v13055_v33 }
 0x11c   : > { %1490 = vrot.lane.b32.xlu0 %v12845_v1, %s12642_s19  ;;  %v524_v1 = vsel %vm473_vm7, %v13053_v32, %v13119_v51  ;;  %v564_v51 = vmul.f32 %v13186_v20, %v525_v3  ;;  %v561_v52 = vmul.f32 %v13181_v55, %v475_v34  ;;  %v559_v11 = vmul.f32 %v13181_v55, %v474_v50 }
 0x11d   : > { %4847 = vmatpush1.bf16.msra.mxu0 %v11890_v15  ;;  %v13304_v37 = vpop.permute.xlu1 %768  ;;  %v562_v47 = vmul.f32 %v13186_v20, %v524_v1  ;;  %v16967_v15 = vld [vmem:[#allocation20_spill] sm:$0xff]  ;;  %v16972_v1 = vld [vmem:[#allocation22_spill] sm:$0xff] }
 0x11e   : > { %v13306_v54 = vpop.permute.xlu0 %766  ;;  %4848 = vmatprep.subr.bf16.mxu0 %v11889_v12  ;;  %vm911_vm8 = vcmp.ge.s32.totalorder %v16967_v15, 0  ;;  %vm913_vm10 = vcmp.lt.s32.totalorder %v16967_v15, 16  ;;  %vm1281_vm13 = vcmp.ge.s32.totalorder %v16967_v15, 4294967294  ;;  %vm1283_vm15 = vcmp.lt.s32.totalorder %v16967_v15, 14 }
 0x11f   : > { %1496 = vrot.lane.b32.xlu1 %v12852_v2, %s12642_s19  ;;  %v523_v2 = vsel %vm473_vm7, %v13063_v35, %v13109_v48  ;;  %v11884_v38 = vpack.c.bf16 %v564_v51, %v562_v47  ;;  %vm912_vm9 = vmand %vm13145_vm2, %vm911_vm8 }
 0x120   : > { %1494 = vrot.lane.b32.xlu0 %v12842_v0, %s12642_s19  ;;  %v522_v0 = vsel %vm473_vm7, %v13055_v33, %v13111_v49  ;;  %v560_v22 = vmul.f32 %v13186_v20, %v523_v2  ;;  %v11883_v33 = vpack.c.bf16 %v561_v52, %v559_v11  ;;  %vm914_vm11 = vmand %vm912_vm9, %vm913_vm10 }
 0x121   : > { %4849 = vmatpush1.bf16.msra.mxu0 %v11888_v59  ;;  %v13328_v61 = vpop.permute.xlu1 %772  ;;  %v558_v58 = vmul.f32 %v13186_v20, %v522_v0  ;;  %v10868_v3 = vsel %vm914_vm11, 1.0, %v16970_v53  ;;  %vm1282_vm14 = vmand %vm13145_vm2, %vm1281_vm13  ;;  %vm1586_vm11 = vcmask 15360  }
 0x122   : > { %v13330_v32 = vpop.permute.xlu0 %770  ;;  %4850 = vmatprep.subr.bf16.mxu0 %v11887_v25  ;;  %v13410_v60 = vrot.slane %v10868_v3, %v16972_v1  ;;  %v16973_v25 = vld [vmem:[#allocation23_spill] sm:$0xff]  ;;  %vm1284_vm0 = vmand %vm1282_vm14, %vm1283_vm15 }
 0x123   : > { %1500 = vrot.lane.b32.xlu1 %v12862_v4, %s12642_s19  ;;  %v13415_v34 = vrot.slane %v10868_v3, %v16973_v25 }
 0x124   : > { %1498 = vrot.lane.b32.xlu0 %v12865_v5, %s12642_s19  ;;  %v11882_v5 = vpack.c.bf16 %v560_v22, %v558_v58 }
 0x125   : > { %4851 = vmatpush1.bf16.msra.mxu0 %v11886_v17  ;;  %v777_v35 = vpop.permute.xlu1 %776 }
 0x126   : > { %v775_v48 = vpop.permute.xlu0 %774  ;;  %4852 = vmatprep.subr.bf16.mxu0 %v11885_v19 }
 0x127   : > { %1504 = vrot.lane.b32.xlu1 %v12872_v6, %s12642_s19  ;;  %v16964_v6 = vld [vmem:[#allocation14_spill] sm:$0xff] }
 0x128   : > { %1502 = vrot.lane.b32.xlu0 %v12875_v7, %s12642_s19 }
 0x129   : > { %4853 = vmatpush1.bf16.msra.mxu0 %v11884_v38  ;;  %v781_v4 = vpop.permute.xlu1 %780 }
 0x12a   : > { %v779_v49 = vpop.permute.xlu0 %778  ;;  %4854 = vmatprep.subr.bf16.mxu0 %v11883_v33 }
 0x12b   : > { %1508 = vrot.lane.b32.xlu1 %v12882_v8, %s12642_s19  ;;  %v16965_v8 = vld [vmem:[#allocation17_spill] sm:$0xff] }
 0x12c   : > { %1506 = vrot.lane.b32.xlu0 %v12885_v9, %s12642_s19  ;;  %v16966_v9 = vld [vmem:[#allocation18_spill] sm:$0xff] }
 0x12d   : > { %4855 = vmatpush1.bf16.msra.mxu0 %v11882_v5  ;;  %v13356_v55 = vpop.permute.xlu1 %816 }
 0x12e   : > { %v13358_v20 = vpop.permute.xlu0 %814 }
 0x12f   : > { %1512 = vrot.lane.b32.xlu1 %v12888_v10, %s12642_s19 }
 0x130   : > { %1510 = vrot.lane.b32.xlu0 %v16964_v6, %s12642_s19 }
 0x131   : > { %v13364_v7 = vpop.permute.xlu1 %820 }
 0x132   : > { %v13366_v56 = vpop.permute.xlu0 %818 }
 0x133   : > { %1520 = vrot.lane.b32.xlu1 %v16965_v8, %s12642_s19 }
 0x134   : > { %1518 = vrot.lane.b32.xlu0 %v16966_v9, %s12642_s19 }
 0x135   : > { %v13372_v57 = vpop.permute.xlu1 %824 }
 0x136   : > { %v13374_v42 = vpop.permute.xlu0 %822 }
 0x137   : > { %1584 = vrot.lane.b32.xlu1 %v12988_v30, %s12642_s19 }
 0x138   : > { %1582 = vrot.lane.b32.xlu0 %v12991_v31, %s12642_s19 }
 0x139   : > { %v13380_v10 = vpop.permute.xlu1 %828 }
 0x13a   : > { %v13382_v43 = vpop.permute.xlu0 %826 }
 0x13b   : > { %2079 = vrot.lane.b32.xlu1 %v16966_v9, %s12643_s10 }
 0x13c   : > { %2077 = vrot.lane.b32.xlu0 %v12991_v31, %s12643_s10 }
 0x13d   : > { %v833_v16 = vpop.permute.xlu1 %832 }
 0x13e   : > { %v13389_v21 = vpop.permute.xlu0 %830 }
 0x13f   : > { %2083 = vrot.lane.b32.xlu1 %v16965_v8, %s12643_s10 }
 0x140   : > { %2081 = vrot.lane.b32.xlu0 %v12988_v30, %s12643_s10 }
 0x141   : > { %v837_v31 = vpop.permute.xlu1 %836 }
 0x142   : > { %v835_v12 = vpop.permute.xlu0 %834  ;;  %v858_v33 = vsel %vm846_vm12, %v837_v31, %v13328_v61  ;;  %v906_v9 = vsel %vm846_vm12, %v13328_v61, %v837_v31  ;;  %v855_v61 = vsel %vm846_vm12, %v13389_v21, %v13306_v54 }
 0x143   : > { %1516 = vrot.lane.b32.xlu1 %v16969_v36, %s12642_s19  ;;  %v905_v3 = vsel %vm846_vm12, %v13330_v32, %v835_v12 }
 0x144   : > { %1514 = vrot.lane.b32.xlu0 %v16971_v44, %s12642_s19 }
 0x145   : > { %v841_v45 = vpop.permute.xlu1 %840 }
 0x146   : > { %v839_v59 = vpop.permute.xlu0 %838  ;;  %v860_v40 = vsel %vm846_vm12, %v841_v45, %v777_v35  ;;  %v908_v50 = vsel %vm846_vm12, %v777_v35, %v841_v45 }
 0x147   : > { %v859_v30 = vsel %vm846_vm12, %v839_v59, %v775_v48  ;;  %1580 = vrot.lane.b32.xlu1 %v12978_v28, %s12642_s19  ;;  %v955_v2 = vmul.f32 %v13410_v60, %v860_v40  ;;  %v907_v51 = vsel %vm846_vm12, %v775_v48, %v839_v59  ;;  %v951_v59 = vmul.f32 %v13410_v60, %v858_v33 }
 0x148   : > { %1578 = vrot.lane.b32.xlu0 %v12981_v29, %s12642_s19  ;;  %v953_v47 = vmul.f32 %v13410_v60, %v859_v30  ;;  %v952_v45 = vmul.f32 %v13415_v34, %v907_v51  ;;  %v856_v30 = vsel %vm846_vm12, %v833_v16, %v13304_v37  ;;  %v900_v33 = vsel %vm846_vm12, %v13256_v18, %v13372_v57 }
 0x149   : > { %v845_v17 = vpop.permute.xlu1 %844  ;;  %v947_v51 = vmul.f32 %v13410_v60, %v856_v30 }
 0x14a   : > { %v843_v52 = vpop.permute.xlu0 %842  ;;  %v862_v0 = vsel %vm846_vm12, %v845_v17, %v781_v4  ;;  %v910_v11 = vsel %vm846_vm12, %v781_v4, %v845_v17  ;;  %v857_v4 = vsel %vm846_vm12, %v835_v12, %v13330_v32  ;;  %v11911_v40 = vpack.c.bf16 %v955_v2, %v953_v47 }
 0x14b   : > { %v861_v19 = vsel %vm846_vm12, %v843_v52, %v779_v49  ;;  %v909_v22 = vsel %vm846_vm12, %v779_v49, %v843_v52  ;;  %v958_v58 = vmul.f32 %v13415_v34, %v910_v11  ;;  %v959_v35 = vmul.f32 %v13410_v60, %v862_v0  ;;  %2071 = vrot.lane.b32.xlu1 %v16971_v44, %s12643_s10 }
 0x14c   : > { %v956_v38 = vmul.f32 %v13415_v34, %v909_v22  ;;  %v957_v48 = vmul.f32 %v13410_v60, %v861_v19  ;;  %2069 = vrot.lane.b32.xlu0 %v12981_v29, %s12643_s10  ;;  %v954_v44 = vmul.f32 %v13415_v34, %v908_v50  ;;  %v949_v29 = vmul.f32 %v13410_v60, %v857_v4 }
 0x14d   : > { %v13439_v49 = vpop.permute.xlu1 %1122  ;;  %v904_v12 = vsel %vm846_vm12, %v13304_v37, %v833_v16  ;;  %v948_v50 = vmul.f32 %v13415_v34, %v905_v3  ;;  %v945_v47 = vmul.f32 %v13410_v60, %v855_v61  ;;  %v854_v37 = vsel %vm846_vm12, %v13380_v10, %v13280_v23 }
 0x14e   : > { %v13441_v5 = vpop.permute.xlu0 %1120  ;;  %v11913_v6 = vpack.c.bf16 %v959_v35, %v957_v48  ;;  %v11912_v8 = vpack.c.bf16 %v958_v58, %v956_v38  ;;  %v11910_v2 = vpack.c.bf16 %v954_v44, %v952_v45  ;;  %v11909_v17 = vpack.c.bf16 %v951_v59, %v949_v29  ;;  %v12470_v38 = vld [vmem:[%s12831_s17 + $0xa8] sm:$0xff]  ;;  %v12471_v44 = vld [vmem:[%s12831_s17 + $0xb8] sm:$0xff] }
 0x14f   : > { %2075 = vrot.lane.b32.xlu1 %v16969_v36, %s12643_s10  ;;  %v950_v36 = vmul.f32 %v13415_v34, %v906_v9  ;;  %v853_v16 = vsel %vm846_vm12, %v13382_v43, %v13282_v39  ;;  %v902_v52 = vsel %vm846_vm12, %v13280_v23, %v13380_v10  ;;  %v946_v0 = vmul.f32 %v13415_v34, %v904_v12 }
 0x150   : > { %4856 = vmatprep.subr.bf16.mxu0 %v11913_v6  ;;  %2073 = vrot.lane.b32.xlu0 %v12978_v28, %s12643_s10  ;;  %v903_v28 = vsel %vm846_vm12, %v13306_v54, %v13389_v21  ;;  %v943_v22 = vmul.f32 %v13410_v60, %v854_v37  ;;  %v901_v58 = vsel %vm846_vm12, %v13282_v39, %v13382_v43 }
 0x151   : > { %4857 = vmatpush2.bf16.msra.mxu0 %v11912_v8  ;;  %v13460_v32 = vpop.permute.xlu1 %1126  ;;  %v944_v11 = vmul.f32 %v13415_v34, %v903_v28  ;;  %v11908_v19 = vpack.c.bf16 %v950_v36, %v948_v50  ;;  %v941_v35 = vmul.f32 %v13410_v60, %v853_v16  ;;  %v11907_v48 = vpack.c.bf16 %v947_v51, %v945_v47  ;;  %v16974_v50 = vld [vmem:[#allocation19_spill] sm:$0xff] }
 0x152   : > { %v13462_v31 = vpop.permute.xlu0 %1124  ;;  %4858 = vmatprep.subr.bf16.mxu0 %v11911_v40  ;;  %v852_v23 = vsel %vm846_vm12, %v13372_v57, %v13256_v18  ;;  %v851_v10 = vsel %vm846_vm12, %v13374_v42, %v13258_v41  ;;  %v942_v4 = vmul.f32 %v13415_v34, %v902_v52  ;;  %v940_v6 = vmul.f32 %v13415_v34, %v901_v58 }
 0x153   : > { %1576 = vrot.lane.b32.xlu1 %v12968_v26, %s12642_s19  ;;  %v11906_v8 = vpack.c.bf16 %v946_v0, %v944_v11  ;;  %v939_v9 = vmul.f32 %v13410_v60, %v852_v23  ;;  %v937_v3 = vmul.f32 %v13410_v60, %v851_v10  ;;  %v11905_v45 = vpack.c.bf16 %v943_v22, %v941_v35  ;;  %v13582_v0 = vld [vmem:[%s12831_s17 + $0x90] sm:$0xff]  ;;  %v13592_v22 = vld [vmem:[%s12831_s17 + $0xf8] sm:$0xff] }
 0x154   : > { %1574 = vrot.lane.b32.xlu0 %v12971_v27, %s12642_s19  ;;  %v850_v18 = vsel %vm846_vm12, %v13364_v7, %v13232_v13  ;;  %v849_v57 = vsel %vm846_vm12, %v13366_v56, %v13234_v63  ;;  %v938_v29 = vmul.f32 %v13415_v34, %v900_v33  ;;  %v11904_v30 = vpack.c.bf16 %v942_v4, %v940_v6  ;;  %v13611_v33 = vld [vmem:[%s12831_s17 + $0xe0] sm:$0xff]  ;;  %v13614_v4 = vld [vmem:[%s12831_s17 + $0xf0] sm:$0xff]  ;;  %v13619_v6 = vld [vmem:[%s12831_s17 + $0xc8] sm:$0xff] }
 0x155   : > { %4859 = vmatpush2.bf16.msra.mxu0 %v11910_v2  ;;  %v13483_v54 = vpop.permute.xlu1 %1130  ;;  %v935_v61 = vmul.f32 %v13410_v60, %v850_v18  ;;  %v933_v12 = vmul.f32 %v13410_v60, %v849_v57  ;;  %v11903_v36 = vpack.c.bf16 %v939_v9, %v937_v3  ;;  %v895_v37 = vsel %vm846_vm12, %v13212_v46, %v13358_v20  ;;  %v13627_v9 = vld [vmem:[%s12831_s17 + $0x68] sm:$0xff]  ;;  %v13638_v57 = vld [vmem:[%s12831_s17 + $0xc0] sm:$0xff] }
 0x156   : > { %v13485_v21 = vpop.permute.xlu0 %1128  ;;  %4860 = vmatprep.subr.bf16.mxu0 %v11909_v17  ;;  %16977 = vst [vmem:[#allocation18_spill] sm:$0xff] %v13582_v0  ;;  %16980 = vst [vmem:[#allocation16_spill] sm:$0xff] %v13627_v9 }
 0x157   : > { %2063 = vrot.lane.b32.xlu1 %v12470_v38, %s12643_s10  ;;  %v13604_v38 = vld [vmem:[%s12831_s17 + $0x60] sm:$0xff] }
 0x158   : > { %2061 = vrot.lane.b32.xlu0 %v12971_v27, %s12643_s10  ;;  %v899_v27 = vsel %vm846_vm12, %v13258_v41, %v13374_v42  ;;  %v898_v42 = vsel %vm846_vm12, %v13232_v13, %v13364_v7  ;;  %v848_v13 = vsel %vm846_vm12, %v13356_v55, %v13210_v14  ;;  %v847_v7 = vsel %vm846_vm12, %v13358_v20, %v13212_v46 }
 0x159   : > { %4861 = vmatpush2.bf16.msra.mxu0 %v11908_v19  ;;  %v13507_v39 = vpop.permute.xlu1 %1134  ;;  %v936_v40 = vmul.f32 %v13415_v34, %v899_v27  ;;  %v934_v2 = vmul.f32 %v13415_v34, %v898_v42  ;;  %v931_v17 = vmul.f32 %v13410_v60, %v848_v13  ;;  %v929_v16 = vmul.f32 %v13410_v60, %v847_v7  ;;  %v13589_v19 = vld [vmem:[%s12831_s17 + $0xe8] sm:$0xff]  ;;  %v12262_v27 = vld [vmem:[#allocation7] ss:$36 sps:$4 sm:$0xff]   ;;  %v13641_v42 = vld [vmem:[%s12831_s17 + $0xd0] sm:$0xff] }
 0x15a   : > { %v13509_v43 = vpop.permute.xlu0 %1132  ;;  %4862 = vmatprep.subr.bf16.mxu0 %v11907_v48  ;;  %v928_v20 = vmul.f32 %v13415_v34, %v895_v37  ;;  %16979 = vst [vmem:[#allocation15_spill] sm:$0xff] %v13604_v38  ;;  %v11961_v48 = vpack.c.bf16 %v13592_v22, %v13589_v19  ;;  %16981 = vst [vmem:[#allocation19_spill] sm:$0xff] %v13641_v42  ;;  %v13665_v13 = vld [vmem:[%s12831_s17 + $0xa0] sm:$0xff]  ;;  %v13668_v7 = vld [vmem:[%s12831_s17 + $0xb0] sm:$0xff] }
 0x15b   : > { %2067 = vrot.lane.b32.xlu1 %v12471_v44, %s12643_s10  ;;  %v11902_v47 = vpack.c.bf16 %v938_v29, %v936_v40  ;;  %v11899_v58 = vpack.c.bf16 %v931_v17, %v929_v16  ;;  %v11960_v44 = vpack.c.bf16 %v13614_v4, %v13611_v33  ;;  %v13646_v29 = vld [vmem:[%s12831_s17 + $0xa8] sm:$0xff]  ;;  %v13649_v40 = vld [vmem:[%s12831_s17 + $0xb8] sm:$0xff]  ;;  %16985 = vst [vmem:[#allocation27_spill] sm:$0xff] %v13665_v13  ;;  %16986 = vst [vmem:[#allocation28_spill] sm:$0xff] %v13668_v7 }
 0x15c   : > { %2065 = vrot.lane.b32.xlu0 %v12968_v26, %s12643_s10  ;;  %v897_v26 = vsel %vm846_vm12, %v13234_v63, %v13366_v56  ;;  %v13556_v63 = vld [vmem:[%s12831_s17 + $0x88] sm:$0xff]  ;;  %16982 = vst [vmem:[#allocation24_spill] sm:$0xff] %v13646_v29  ;;  %16983 = vst [vmem:[#allocation25_spill] sm:$0xff] %v13649_v40  ;;  %v13689_v37 = vld [vmem:[%s12831_s17 + $0x80] sm:$0xff] }
 0x15d   : > { %4863 = vmatpush2.bf16.msra.mxu0 %v11906_v8  ;;  %v13531_v59 = vpop.permute.xlu1 %1138  ;;  %16975 = vst [vmem:[#allocation14_spill] sm:$0xff] %v13556_v63  ;;  %v932_v51 = vmul.f32 %v13415_v34, %v897_v26  ;;  %v13622_v8 = vld [vmem:[%s12831_s17 + $0xd8] sm:$0xff]  ;;  %v11958_v26 = vpack.c.bf16 %v13641_v42, %v13638_v57  ;;  %16989 = vst [vmem:[#allocation31_spill] sm:$0xff] %v13689_v37  ;;  %v13696_v16 = vld [vmem:[%s12831_s17 + $0x48] sm:$0xff] }
 0x15e   : > { %v13533_v41 = vpop.permute.xlu0 %1136  ;;  %4864 = vmatprep.subr.bf16.mxu0 %v11905_v45  ;;  %v11959_v18 = vpack.c.bf16 %v13622_v8, %v13619_v6  ;;  %16990 = vst [vmem:[#allocation32_spill] sm:$0xff] %v13696_v16 }
 0x15f   : > { %1572 = vrot.lane.b32.xlu1 %v12958_v24, %s12642_s19  ;;  %v896_v24 = vsel %vm846_vm12, %v13210_v14, %v13356_v55  ;;  %v11901_v14 = vpack.c.bf16 %v935_v61, %v933_v12  ;;  %v13577_v55 = vld [vmem:[%s12831_s17 + $0x98] sm:$0xff]  ;;  %v11900_v11 = vpack.c.bf16 %v934_v2, %v932_v51  ;;  %v13680_v2 = vld [vmem:[%s12831_s17 + $0x40] sm:$0xff]  ;;  %v11956_v51 = vpack.c.bf16 %v13668_v7, %v13665_v13  ;;  %v13785_v7 = vld [vmem:[%s12831_s17 + $0x10] sm:$0xff] }
 0x160   : > { %1570 = vrot.lane.b32.xlu0 %v16974_v50, %s12642_s19  ;;  %16976 = vst [vmem:[#allocation17_spill] sm:$0xff] %v13577_v55  ;;  %v930_v46 = vmul.f32 %v13415_v34, %v896_v24  ;;  %v13599_v34 = vld [vmem:[%s12831_s17 + $0x70] sm:$0xff]  ;;  %16988 = vst [vmem:[#allocation30_spill] sm:$0xff] %v13680_v2  ;;  %v11955_v17 = vpack.c.bf16 %v13577_v55, %v13556_v63 }
 0x161   : > { %4865 = vmatpush2.bf16.msra.mxu0 %v11904_v30  ;;  %v13558_v56 = vpop.permute.xlu1 %1142  ;;  %16978 = vst [vmem:[#allocation21_spill] sm:$0xff] %v13599_v34  ;;  %v13654_v30 = vld [vmem:[%s12831_s17 + $0x78] sm:$0xff] }
 0x162   : > { %4866 = vmatprep.subr.bf16.mxu0 %v11903_v36  ;;  %v13565_v28 = vpop.permute.xlu0 %1140  ;;  %v11898_v10 = vpack.c.bf16 %v930_v46, %v928_v20  ;;  %16984 = vst [vmem:[#allocation26_spill] sm:$0xff] %v13654_v30  ;;  %v11957_v36 = vpack.c.bf16 %v13649_v40, %v13646_v29  ;;  %v11954_v46 = vpack.c.bf16 %v13582_v0, %v13689_v37 }
 0x163   : > { %2055 = vrot.lane.b32.xlu1 %v13556_v63, %s12643_s10 }
 0x164   : > { %2053 = vrot.lane.b32.xlu0 %v16974_v50, %s12643_s10  ;;  %v13675_v50 = vld [vmem:[%s12831_s17 + $0x50] sm:$0xff] }
 0x165   : > { %4867 = vmatpush2.bf16.msra.mxu0 %v11902_v47  ;;  %v13579_v52 = vpop.permute.xlu1 %1146  ;;  %16987 = vst [vmem:[#allocation29_spill] sm:$0xff] %v13675_v50 }
 0x166   : > { %4868 = vmatprep.subr.bf16.mxu0 %v11901_v14  ;;  %v13586_v60 = vpop.permute.xlu0 %1144 }
 0x167   : > { %2059 = vrot.lane.b32.xlu1 %v13577_v55, %s12643_s10 }
 0x168   : > { %2057 = vrot.lane.b32.xlu0 %v13582_v0, %s12643_s10 }
 0x169   : > { %4869 = vmatpush2.bf16.msra.mxu0 %v11900_v11  ;;  %v13601_v35 = vpop.permute.xlu1 %1150  ;;  %v11953_v11 = vpack.c.bf16 %v13654_v30, %v13627_v9 }
 0x16a   : > { %4870 = vmatprep.subr.bf16.mxu0 %v11899_v58  ;;  %v13608_v23 = vpop.permute.xlu0 %1148  ;;  %v13717_v58 = vld [vmem:[%s12831_s17 + $0x58] sm:$0xff] }
 0x16b   : > { %1568 = vrot.lane.b32.xlu1 %v13599_v34, %s12642_s19  ;;  %16991 = vst [vmem:[#allocation33_spill] sm:$0xff] %v13717_v58  ;;  %v11951_v62 = vpack.c.bf16 %v13717_v58, %v13696_v16 }
 0x16c   : > { %1566 = vrot.lane.b32.xlu0 %v13604_v38, %s12642_s19 }
 0x16d   : > { %4871 = vmatpush2.bf16.msra.mxu0 %v11898_v10  ;;  %v13629_v3 = vpop.permute.xlu1 %1186  ;;  %v11952_v10 = vpack.c.bf16 %v13599_v34, %v13604_v38 }
 0x16e   : > { %5066 = vmatprep.subr.bf16.mxu0 %v11961_v48  ;;  %v13633_v45 = vpop.permute.xlu0 %1184 }
 0x16f   : > { %2047 = vrot.lane.b32.xlu1 %v13627_v9, %s12643_s10 }
 0x170   : > { %2045 = vrot.lane.b32.xlu0 %v13604_v38, %s12643_s10  ;;  %4873 = vmatmul.mubr.bf16.vlgmr.msra.gmra.mxu0 %v12262_v27 }
 0x171   : > { %v13656_v61 = vpop.permute.xlu1 %1190  ;;  %5067 = vmatpush1.bf16.msra.mxu0 %v11960_v44  ;;  %v13734_v44 = vld [vmem:[%s12831_s17 + $0x30] sm:$0xff] }
 0x172   : > { %v13660_v12 = vpop.permute.xlu0 %1188  ;;  %5068 = vmatprep.subr.bf16.mxu0 %v11959_v18 }
 0x173   : > { %2051 = vrot.lane.b32.xlu1 %v13654_v30, %s12643_s10 }
 0x174   : > { %2049 = vrot.lane.b32.xlu0 %v13599_v34, %s12643_s10 }
 0x175   : > { %v13677_v24 = vpop.permute.xlu1 %1194  ;;  %5069 = vmatpush1.bf16.msra.mxu0 %v11958_v26  ;;  %v13737_v26 = vld [vmem:[%s12831_s17 + $0x20] sm:$0xff] }
 0x176   : > { %v13684_v47 = vpop.permute.xlu0 %1192  ;;  %5070 = vmatprep.subr.bf16.mxu0 %v11957_v36  ;;  %16992 = vst [vmem:[#allocation34_spill] sm:$0xff] %v13737_v26  ;;  %v13740_v36 = vld [vmem:[%s12831_s17 + $0x28] sm:$0xff]  ;;  %v11948_v34 = vpack.c.bf16 %v13734_v44, %v13737_v26 }
 0x177   : > { %1564 = vrot.lane.b32.xlu1 %v13675_v50, %s12642_s19  ;;  %16993 = vst [vmem:[#allocation35_spill] sm:$0xff] %v13740_v36 }
 0x178   : > { %1562 = vrot.lane.b32.xlu0 %v13680_v2, %s12642_s19 }
 0x179   : > { %v13699_v14 = vpop.permute.xlu1 %1198  ;;  %5071 = vmatpush1.bf16.msra.mxu0 %v11956_v51  ;;  %v13743_v51 = vld [vmem:[%s12831_s17 + $0x38] sm:$0xff] }
 0x17a   : > { %v13703_v20 = vpop.permute.xlu0 %1196  ;;  %5072 = vmatprep.subr.bf16.mxu0 %v11955_v17  ;;  %v11950_v17 = vpack.c.bf16 %v13675_v50, %v13680_v2 }
 0x17b   : > { %2039 = vrot.lane.b32.xlu1 %v13696_v16, %s12643_s10 }
 0x17c   : > { %2037 = vrot.lane.b32.xlu0 %v13680_v2, %s12643_s10  ;;  %v13761_v2 = vld [vmem:[%s12831_s17 + $0x8] sm:$0xff] }
 0x17d   : > { %v13719_v48 = vpop.permute.xlu1 %1202  ;;  %5073 = vmatpush1.bf16.msra.mxu0 %v11954_v46  ;;  %v10885_v46 = vsel %vm1284_vm0, 1.0, %v16970_v53  ;;  %vm2085_vm0 = vcmask 1031168  }
 0x17e   : > { %v13723_v27 = vpop.permute.xlu0 %1200  ;;  %5074 = vmatprep.subr.bf16.mxu0 %v11953_v11  ;;  %v13755_v16 = vrot.slane %v10885_v46, %v16973_v25 }
 0x17f   : > { %2043 = vrot.lane.b32.xlu1 %v13717_v58, %s12643_s10  ;;  %v11949_v58 = vpack.c.bf16 %v13743_v51, %v13740_v36 }
 0x180   : > { %2041 = vrot.lane.b32.xlu0 %v13675_v50, %s12643_s10 }
 0x181   : > { %v1207_v18 = vpop.permute.xlu1 %1206  ;;  %5075 = vmatpush1.bf16.msra.mxu0 %v11952_v10  ;;  %v13758_v10 = vrot.slane %v10885_v46, %v16972_v1 }
 0x182   : > { %v1205_v11 = vpop.permute.xlu0 %1204  ;;  %5076 = vmatprep.subr.bf16.mxu0 %v11951_v62  ;;  %v13764_v62 = vld [vmem:[%s12831_s17 + $0x18] sm:$0xff]  ;;  %v1228_v30 = vsel %vm1216_vm1, %v1207_v18, %v13558_v56 }
 0x183   : > { %1560 = vrot.lane.b32.xlu1 %v13734_v44, %s12642_s19  ;;  %v11947_v0 = vpack.c.bf16 %v13764_v62, %v13761_v2  ;;  %v1275_v40 = vsel %vm1216_vm1, %v13565_v28, %v1205_v11 }
 0x184   : > { %1558 = vrot.lane.b32.xlu0 %v13737_v26, %s12642_s19 }
 0x185   : > { %v1215_v50 = vpop.permute.xlu1 %1214  ;;  %5077 = vmatpush1.bf16.msra.mxu0 %v11950_v17 }
 0x186   : > { %v1280_v38 = vsel %vm1216_vm1, %v13601_v35, %v1215_v50  ;;  %v1213_v9 = vpop.permute.xlu0 %1212  ;;  %v1232_v46 = vsel %vm1216_vm1, %v1215_v50, %v13601_v35  ;;  %5078 = vmatprep.subr.bf16.mxu0 %v11949_v58  ;;  %v13788_v35 = vld [vmem:[%s12831_s17] sm:$0xff]  ;;  %v1226_v50 = vsel %vm1216_vm1, %v13719_v48, %v13531_v59 }
 0x187   : > { %v1279_v17 = vsel %vm1216_vm1, %v13608_v23, %v1213_v9  ;;  %2031 = vrot.lane.b32.xlu1 %v13740_v36, %s12643_s10  ;;  %v1231_v55 = vsel %vm1216_vm1, %v1213_v9, %v13608_v23  ;;  %v1329_v37 = vmul.f32 %v13758_v10, %v1232_v46  ;;  %v1328_v63 = vmul.f32 %v13755_v16, %v1280_v38 }
 0x188   : > { %2029 = vrot.lane.b32.xlu0 %v13737_v26, %s12643_s10  ;;  %v1327_v58 = vmul.f32 %v13758_v10, %v1231_v55  ;;  %v1326_v36 = vmul.f32 %v13755_v16, %v1279_v17  ;;  %v11946_v23 = vpack.c.bf16 %v13785_v7, %v13788_v35  ;;  %v1276_v38 = vsel %vm1216_vm1, %v13558_v56, %v1207_v18 }
 0x189   : > { %v1321_v9 = vmul.f32 %v13758_v10, %v1228_v30  ;;  %v1227_v46 = vsel %vm1216_vm1, %v1205_v11, %v13565_v28  ;;  %v1211_v13 = vpop.permute.xlu1 %1210  ;;  %5079 = vmatpush1.bf16.msra.mxu0 %v11948_v34  ;;  %v1317_v11 = vmul.f32 %v13758_v10, %v1226_v50 }
 0x18a   : > { %v1230_v55 = vsel %vm1216_vm1, %v1211_v13, %v13579_v52  ;;  %v1278_v17 = vsel %vm1216_vm1, %v13579_v52, %v1211_v13  ;;  %v1209_v26 = vpop.permute.xlu0 %1208  ;;  %v11929_v29 = vpack.c.bf16 %v1329_v37, %v1327_v58  ;;  %v11928_v42 = vpack.c.bf16 %v1328_v63, %v1326_v36  ;;  %5080 = vmatprep.subr.bf16.mxu0 %v11947_v0 }
 0x18b   : > { %v1324_v56 = vmul.f32 %v13755_v16, %v1278_v17  ;;  %v1325_v30 = vmul.f32 %v13758_v10, %v1230_v55  ;;  %v1229_v18 = vsel %vm1216_vm1, %v1209_v26, %v13586_v60  ;;  %v1277_v28 = vsel %vm1216_vm1, %v13586_v60, %v1209_v26  ;;  %2035 = vrot.lane.b32.xlu1 %v13743_v51, %s12643_s10 }
 0x18c   : > { %v1319_v34 = vmul.f32 %v13758_v10, %v1227_v46  ;;  %v1322_v52 = vmul.f32 %v13755_v16, %v1277_v28  ;;  %v1323_v63 = vmul.f32 %v13758_v10, %v1229_v18  ;;  %2033 = vrot.lane.b32.xlu0 %v13734_v44, %s12643_s10  ;;  %4953 = vmatprep.subr.bf16.mxu1 %v11929_v29 }
 0x18d   : > { %v1225_v0 = vsel %vm1216_vm1, %v13723_v27, %v13533_v41  ;;  %4954 = vmatpush1.bf16.msra.mxu1 %v11928_v42  ;;  %v13826_v13 = vpop.permute.xlu1 %1492  ;;  %5081 = vmatpush1.bf16.msra.mxu0 %v11946_v23  ;;  %v1274_v36 = vsel %vm1216_vm1, %v13531_v59, %v13719_v48  ;;  %v1320_v29 = vmul.f32 %v13755_v16, %v1276_v38 }
 0x18e   : > { %v13828_v60 = vpop.permute.xlu0 %1490  ;;  %v11927_v37 = vpack.c.bf16 %v1325_v30, %v1323_v63  ;;  %v11926_v26 = vpack.c.bf16 %v1324_v56, %v1322_v52  ;;  %v1318_v58 = vmul.f32 %v13755_v16, %v1275_v40  ;;  %v1273_v42 = vsel %vm1216_vm1, %v13533_v41, %v13723_v27 }
 0x18f   : > { %1556 = vrot.lane.b32.xlu1 %v13785_v7, %s12642_s19  ;;  %v1315_v23 = vmul.f32 %v13758_v10, %v1225_v0  ;;  %v11925_v59 = vpack.c.bf16 %v1321_v9, %v1319_v34  ;;  %v1224_v48 = vsel %vm1216_vm1, %v13699_v14, %v13507_v39  ;;  %v1223_v40 = vsel %vm1216_vm1, %v13703_v20, %v13509_v43 }
 0x190   : > { %1554 = vrot.lane.b32.xlu0 %v13788_v35, %s12642_s19  ;;  %4955 = vmatprep.subr.bf16.mxu1 %v11927_v37  ;;  %v1222_v41 = vsel %vm1216_vm1, %v13677_v24, %v13483_v54  ;;  %v1272_v38 = vsel %vm1216_vm1, %v13507_v39, %v13699_v14  ;;  %v1316_v9 = vmul.f32 %v13755_v16, %v1274_v36  ;;  %s12648_s19 = smov 17  }
 0x191   : > { %4956 = vmatpush1.bf16.msra.mxu1 %v11926_v26  ;;  %v13850_v50 = vpop.permute.xlu1 %1496  ;;  %v1314_v46 = vmul.f32 %v13755_v16, %v1273_v42  ;;  %v11924_v55 = vpack.c.bf16 %v1320_v29, %v1318_v58  ;;  %v1313_v17 = vmul.f32 %v13758_v10, %v1224_v48  ;;  %v1271_v56 = vsel %vm1216_vm1, %v13509_v43, %v13703_v20  ;;  %v13884_v43 = vld [vmem:[%s16833_s5] sm:$0x3]  ;;  %v12267_v20 = vld [vmem:[#allocation7 + $0xc] ss:$36 sps:$4 sm:$0xff]  }
 0x192   : > { %v13855_v27 = vpop.permute.xlu0 %1494  ;;  %4957 = vmatprep.subr.bf16.mxu1 %v11925_v59  ;;  %v1311_v30 = vmul.f32 %v13758_v10, %v1223_v40  ;;  %v11923_v39 = vpack.c.bf16 %v1317_v11, %v1315_v23  ;;  %v1221_v14 = vsel %vm1216_vm1, %v13684_v47, %v13485_v21  ;;  %v1270_v28 = vsel %vm1216_vm1, %v13483_v54, %v13677_v24  ;;  %v12268_v24 = vld [vmem:[#allocation7 + $0x4c] ss:$36 sps:$4 sm:$0xff]  }
 0x193   : > { %2023 = vrot.lane.b32.xlu1 %v13761_v2, %s12643_s10  ;;  %vm1651_vm2 = vcmp.ge.s32.totalorder %v13884_v43, 0  ;;  %v1309_v52 = vmul.f32 %v13758_v10, %v1222_v41  ;;  %v1312_v63 = vmul.f32 %v13755_v16, %v1272_v38  ;;  %v1310_v0 = vmul.f32 %v13755_v16, %v1271_v56  ;;  %4985 = vmatprep.mubr.bf16.mxu1 %v12267_v20  ;;  %v12270_v11 = vld [vmem:[#allocation7 + $0x48] ss:$36 sps:$4 sm:$0xff]  }
 0x194   : > { %2021 = vrot.lane.b32.xlu0 %v13788_v35, %s12643_s10  ;;  %v11922_v54 = vpack.c.bf16 %v1316_v9, %v1314_v46  ;;  %v1269_v37 = vsel %vm1216_vm1, %v13485_v21, %v13684_v47  ;;  %v1307_v26 = vmul.f32 %v13758_v10, %v1221_v14  ;;  %v11921_v36 = vpack.c.bf16 %v1313_v17, %v1311_v30  ;;  %v12271_v14 = vld [vmem:[#allocation7 + $0x94] ss:$36 sps:$4 sm:$0xff]  }
 0x195   : > { %4958 = vmatpush1.bf16.msra.mxu1 %v11924_v55  ;;  %v13874_v18 = vpop.permute.xlu1 %1500  ;;  %vm1652_vm4 = vcmp.lt.s32.totalorder %v13884_v43, 16  ;;  %v1220_v29 = vsel %vm1216_vm1, %v13656_v61, %v13460_v32  ;;  %v1219_v58 = vsel %vm1216_vm1, %v13660_v12, %v13462_v31  ;;  %4882 = vmatprep.mubr.bf16.mxu0 %v12268_v24  ;;  %v1268_v42 = vsel %vm1216_vm1, %v13460_v32, %v13656_v61 }
 0x196   : > { %v13879_v34 = vpop.permute.xlu0 %1498  ;;  %4959 = vmatprep.subr.bf16.mxu1 %v11923_v39  ;;  %4883 = vmatmul.mubr.bf16.gmra.mxu0 %v12270_v11  ;;  %v1308_v23 = vmul.f32 %v13755_v16, %v1270_v28  ;;  %v1306_v59 = vmul.f32 %v13755_v16, %v1269_v37  ;;  %v11920_v48 = vpack.c.bf16 %v1312_v63, %v1310_v0  ;;  %vm13920_vm6 = vmand %vm1651_vm2, %vm1652_vm4  ;;  %v16994_v40 = vmov 0 }
 0x197   : > { %2027 = vrot.lane.b32.xlu1 %v13764_v62, %s12643_s10  ;;  %v16995_v40 = vsel %vm13920_vm6, 4294967295, %v16994_v40  ;;  %v1305_v41 = vmul.f32 %v13758_v10, %v1220_v29  ;;  %v1267_v32 = vsel %vm1216_vm1, %v13462_v31, %v13660_v12  ;;  %v1303_v61 = vmul.f32 %v13758_v10, %v1219_v58  ;;  %vm13945_vm7 = vmand %vm13920_vm6, %vm541_vm3  ;;  %4892 = vmatprep.mubr.bf16.mxu0 %v12271_v14  ;;  %v12274_v29 = vld [vmem:[#allocation7 + $0xdc] ss:$36 sps:$4 sm:$0xff]   ;;  %v16999_v58 = vld [vmem:[#allocation19_spill] sm:$0xff] }
 0x198   : > { %2025 = vrot.lane.b32.xlu0 %v13785_v7, %s12643_s10  ;;  %16996 = vst [vmem:[#allocation36_spill] sm:$0xff] %v16995_v40  ;;  %v11919_v38 = vpack.c.bf16 %v1309_v52, %v1307_v26  ;;  %v1218_v9 = vsel %vm1216_vm1, %v13629_v3, %v13439_v49  ;;  %v1217_v46 = vsel %vm1216_vm1, %v13633_v45, %v13441_v5  ;;  %vm1655_vm9 = vmand %vm13945_vm7, %vm543_vm5  ;;  %vm2535_vm2 = vcmp.lt.s32.totalorder %v13884_v43, 14  ;;  %s12649_s10 = smov 16  }
 0x199   : > { %4960 = vmatpush1.bf16.msra.mxu1 %v11922_v54  ;;  %v13905_v21 = vpop.permute.xlu1 %1504  ;;  %v1266_v12 = vsel %vm1216_vm1, %v13439_v49, %v13629_v3  ;;  %v1304_v56 = vmul.f32 %v13755_v16, %v1268_v42  ;;  %v1302_v30 = vmul.f32 %v13755_v16, %v1267_v32  ;;  %v11918_v39 = vpack.c.bf16 %v1308_v23, %v1306_v59  ;;  %v12273_v3 = vld [vmem:[#allocation7 + $0x90] ss:$36 sps:$4 sm:$0xff]   ;;  %vm2166_vm12 = vmand %vm13920_vm6, %vm1281_vm13  ;;  %v12276_v42 = vld [vmem:[#allocation7 + $0xd8] ss:$36 sps:$4 sm:$0xff]  }
 0x19a   : > { %v13907_v47 = vpop.permute.xlu0 %1502  ;;  %4961 = vmatprep.subr.bf16.mxu1 %v11921_v36  ;;  %v1301_v28 = vmul.f32 %v13758_v10, %v1218_v9  ;;  %v1265_v20 = vsel %vm1216_vm1, %v13441_v5, %v13633_v45  ;;  %v1299_v52 = vmul.f32 %v13758_v10, %v1217_v46  ;;  %v11917_v49 = vpack.c.bf16 %v1305_v41, %v1303_v61  ;;  %vm2167_vm14 = vmand %vm2166_vm12, %vm1283_vm15  ;;  %v17000_v46 = vld [vmem:[#allocation24_spill] sm:$0xff] }
 0x19b   : > { %2447 = vrot.lane.b32.xlu1 %v13589_v19, %s12644_s16  ;;  %v1300_v5 = vmul.f32 %v13755_v16, %v1266_v12  ;;  %v1298_v45 = vmul.f32 %v13755_v16, %v1265_v20  ;;  %v11916_v10 = vpack.c.bf16 %v1304_v56, %v1302_v30  ;;  %v10902_v24 = vsel %vm1655_vm9, 1.0, %v16970_v53  ;;  %v17001_v56 = vld [vmem:[#allocation27_spill] sm:$0xff] }
 0x19c   : > { %2445 = vrot.lane.b32.xlu0 %v13611_v33, %s12644_s16  ;;  %v11915_v54 = vpack.c.bf16 %v1301_v28, %v1299_v52  ;;  %v13981_v16 = vrot.slane %v10902_v24, %v16973_v25  ;;  %v13984_v11 = vrot.slane %v10902_v24, %v16972_v1  ;;  %v17002_v52 = vld [vmem:[#allocation25_spill] sm:$0xff]  ;;  %vm2534_vm1 = vcmp.ge.s32.totalorder %v13884_v43, 4294967294 }
 0x19d   : > { %4962 = vmatpush1.bf16.msra.mxu1 %v11920_v48  ;;  %v13937_v55 = vpop.permute.xlu1 %1508  ;;  %v11914_v36 = vpack.c.bf16 %v1300_v5, %v1298_v45  ;;  %v17003_v45 = vld [vmem:[#allocation28_spill] sm:$0xff]  ;;  %vm14239_vm4 = vmand %vm2534_vm1, %vm2535_vm2  ;;  %v12475_v43 = vld [vmem:[%s12831_s17 + $0xb8] sm:$0xff]  ;;  %vm2824_vm12 = vcmask 785408  }
 0x19e   : > { %v13939_v17 = vpop.permute.xlu0 %1506  ;;  %4963 = vmatprep.subr.bf16.mxu1 %v11919_v38  ;;  %4893 = vmatmul.mubr.bf16.gmra.mxu0 %v12273_v3  ;;  %vm2537_vm7 = vmand %vm14239_vm4, %vm541_vm3 }
 0x19f   : > { %2451 = vrot.lane.b32.xlu1 %v13592_v22, %s12644_s16  ;;  %4902 = vmatprep.mubr.bf16.mxu0 %v12274_v29  ;;  %vm2538_vm3 = vmand %vm2537_vm7, %vm543_vm5  ;;  %vm2453_vm5 = vcmask 801792  }
 0x1a0   : > { %2449 = vrot.lane.b32.xlu0 %v13614_v4, %s12644_s16  ;;  %vm2905_vm9 = vmand %vm14239_vm4, %vm911_vm8 }
 0x1a1   : > { %4964 = vmatpush1.bf16.msra.mxu1 %v11918_v39  ;;  %v13963_v63 = vpop.permute.xlu1 %1512  ;;  %v10935_v39 = vsel %vm2167_vm14, 1.0, %v16970_v53  ;;  %vm3273_vm14 = vmand %vm14239_vm4, %vm1281_vm13  ;;  %vm3192_vm13 = vcmask 769024  }
 0x1a2   : > { %v13969_v0 = vpop.permute.xlu0 %1510  ;;  %4965 = vmatprep.subr.bf16.mxu1 %v11917_v49  ;;  %v12277_v49 = vld [vmem:[#allocation7 + $0x124] ss:$36 sps:$4 sm:$0xff]   ;;  %v14010_v3 = vrot.slane %v10935_v39, %v16973_v25  ;;  %v14013_v5 = vrot.slane %v10935_v39, %v16972_v1 }
 0x1a3   : > { %2439 = vrot.lane.b32.xlu1 %v13619_v6, %s12644_s16  ;;  %v17007_v39 = vld [vmem:[#allocation18_spill] sm:$0xff] }
 0x1a4   : > { %2437 = vrot.lane.b32.xlu0 %v13638_v57, %s12644_s16 }
 0x1a5   : > { %4966 = vmatpush1.bf16.msra.mxu1 %v11916_v10  ;;  %v1521_v37 = vpop.permute.xlu1 %1520  ;;  %v12279_v10 = vld [vmem:[#allocation7 + $0x120] ss:$36 sps:$4 sm:$0xff]  }
 0x1a6   : > { %v1519_v26 = vpop.permute.xlu0 %1518  ;;  %4967 = vmatprep.subr.bf16.mxu1 %v11915_v54  ;;  %4903 = vmatmul.mubr.bf16.gmra.mxu0 %v12276_v42  ;;  %v17004_v42 = vld [vmem:[#allocation14_spill] sm:$0xff] }
 0x1a7   : > { %2443 = vrot.lane.b32.xlu1 %v13622_v8, %s12644_s16  ;;  %4912 = vmatprep.mubr.bf16.mxu0 %v12277_v49 }
 0x1a8   : > { %2441 = vrot.lane.b32.xlu0 %v16999_v58, %s12644_s16 }
 0x1a9   : > { %4968 = vmatpush1.bf16.msra.mxu1 %v11914_v36  ;;  %v1585_v23 = vpop.permute.xlu1 %1584 }
 0x1aa   : > { %v1602_v59 = vsel %vm1586_vm11, %v1585_v23, %v1521_v37  ;;  %v1650_v48 = vsel %vm1586_vm11, %v1521_v37, %v1585_v23  ;;  %v1583_v41 = vpop.permute.xlu0 %1582 }
 0x1ab   : > { %v1699_v32 = vmul.f32 %v13981_v16, %v1650_v48  ;;  %v1700_v61 = vmul.f32 %v13984_v11, %v1602_v59  ;;  %v1601_v38 = vsel %vm1586_vm11, %v1583_v41, %v1519_v26  ;;  %v1649_v9 = vsel %vm1586_vm11, %v1519_v26, %v1583_v41  ;;  %2431 = vrot.lane.b32.xlu1 %v17000_v46, %s12644_s16 }
 0x1ac   : > { %v1697_v31 = vmul.f32 %v13981_v16, %v1649_v9  ;;  %v1698_v12 = vmul.f32 %v13984_v11, %v1601_v38  ;;  %2429 = vrot.lane.b32.xlu0 %v17001_v56, %s12644_s16 }
 0x1ad   : > { %v2080_v30 = vpop.permute.xlu1 %2079 }
 0x1ae   : > { %v2078_v14 = vpop.permute.xlu0 %2077  ;;  %v11945_v28 = vpack.c.bf16 %v1700_v61, %v1698_v12  ;;  %v11944_v20 = vpack.c.bf16 %v1699_v32, %v1697_v31  ;;  %4913 = vmatmul.mubr.bf16.gmra.mxu0 %v12279_v10  ;;  %v17005_v32 = vld [vmem:[#allocation31_spill] sm:$0xff]  ;;  %v17006_v12 = vld [vmem:[#allocation17_spill] sm:$0xff] }
 0x1af   : > { %2435 = vrot.lane.b32.xlu1 %v17002_v52, %s12644_s16  ;;  %v2100_v54 = vsel %vm2085_vm0, %v2078_v14, %v2080_v30  ;;  %v2164_v24 = vsel %vm2085_vm0, %v2080_v30, %v2078_v14  ;;  %v12280_v30 = vld [vmem:[#allocation7 + $0x16c] ss:$36 sps:$4 sm:$0xff]  }
 0x1b0   : > { %2433 = vrot.lane.b32.xlu0 %v17003_v45, %s12644_s16  ;;  %4969 = vmatprep.subr.bf16.mxu1 %v11945_v28  ;;  %v2209_v23 = vmul.f32 %v14010_v3, %v2100_v54  ;;  %v2210_v59 = vmul.f32 %v14013_v5, %v2164_v24  ;;  %v12282_v14 = vld [vmem:[#allocation7 + $0x168] ss:$36 sps:$4 sm:$0xff]  }
 0x1b1   : > { %4970 = vmatpush2.bf16.msra.mxu1 %v11944_v20  ;;  %v2084_v37 = vpop.permute.xlu1 %2083  ;;  %4922 = vmatprep.mubr.bf16.mxu0 %v12280_v30 }
 0x1b2   : > { %v2082_v26 = vpop.permute.xlu0 %2081 }
 0x1b3   : > { %v2101_v36 = vsel %vm2085_vm0, %v2082_v26, %v2084_v37  ;;  %v2165_v29 = vsel %vm2085_vm0, %v2084_v37, %v2082_v26  ;;  %2423 = vrot.lane.b32.xlu1 %v17004_v42, %s12644_s16 }
 0x1b4   : > { %v2211_v48 = vmul.f32 %v14010_v3, %v2101_v36  ;;  %v2212_v41 = vmul.f32 %v14013_v5, %v2165_v29  ;;  %2421 = vrot.lane.b32.xlu0 %v17005_v32, %s12644_s16  ;;  %v17008_v36 = vld [vmem:[#allocation16_spill] sm:$0xff] }
 0x1b5   : > { %v1517_v61 = vpop.permute.xlu1 %1516 }
 0x1b6   : > { %v11976_v38 = vpack.c.bf16 %v2211_v48, %v2209_v23  ;;  %v1515_v9 = vpop.permute.xlu0 %1514  ;;  %v11977_v31 = vpack.c.bf16 %v2212_v41, %v2210_v59  ;;  %4923 = vmatmul.mubr.bf16.gmra.mxu0 %v12282_v14  ;;  %v17009_v23 = vld [vmem:[#allocation15_spill] sm:$0xff] }
 0x1b7   : > { %2427 = vrot.lane.b32.xlu1 %v17006_v12, %s12644_s16 }
 0x1b8   : > { %2425 = vrot.lane.b32.xlu0 %v17007_v39, %s12644_s16  ;;  %5082 = vmatprep.subr.bf16.mxu0 %v11977_v31  ;;  %v12285_v31 = vld [vmem:[#allocation7 + $0x1b0] ss:$36 sps:$4 sm:$0xff]  }
 0x1b9   : > { %5083 = vmatpush2.bf16.msra.mxu0 %v11976_v38  ;;  %v1581_v28 = vpop.permute.xlu1 %1580  ;;  %v12283_v38 = vld [vmem:[#allocation7 + $0x1b4] ss:$36 sps:$4 sm:$0xff]  }
 0x1ba   : > { %v1600_v20 = vsel %vm1586_vm11, %v1581_v28, %v1517_v61  ;;  %v1648_v49 = vsel %vm1586_vm11, %v1517_v61, %v1581_v28  ;;  %v1579_v10 = vpop.permute.xlu0 %1578  ;;  %v17010_v61 = vld [vmem:[#allocation26_spill] sm:$0xff]  ;;  %4932 = vmatprep.mubr.bf16.mxu0 %v12283_v38 }
 0x1bb   : > { %v1695_v54 = vmul.f32 %v13981_v16, %v1648_v49  ;;  %v1696_v24 = vmul.f32 %v13984_v11, %v1600_v20  ;;  %v1599_v37 = vsel %vm1586_vm11, %v1579_v10, %v1515_v9  ;;  %v1647_v26 = vsel %vm1586_vm11, %v1515_v9, %v1579_v10  ;;  %2415 = vrot.lane.b32.xlu1 %v17008_v36, %s12644_s16  ;;  %v17011_v9 = vld [vmem:[#allocation21_spill] sm:$0xff]  ;;  %v17012_v49 = vld [vmem:[#allocation32_spill] sm:$0xff] }
 0x1bc   : > { %v1693_v29 = vmul.f32 %v13981_v16, %v1647_v26  ;;  %v1694_v42 = vmul.f32 %v13984_v11, %v1599_v37  ;;  %2413 = vrot.lane.b32.xlu0 %v17009_v23, %s12644_s16  ;;  %v17013_v26 = vld [vmem:[#allocation30_spill] sm:$0xff] }
 0x1bd   : > { %v2072_v59 = vpop.permute.xlu1 %2071 }
 0x1be   : > { %v2070_v48 = vpop.permute.xlu0 %2069  ;;  %v11943_v41 = vpack.c.bf16 %v1696_v24, %v1694_v42  ;;  %v11942_v32 = vpack.c.bf16 %v1695_v54, %v1693_v29  ;;  %4933 = vmatmul.mubr.bf16.gmra.mxu0 %v12285_v31  ;;  %v12286_v31 = vld [vmem:[#allocation7 + $0x1fc] ss:$36 sps:$4 sm:$0xff]  }
 0x1bf   : > { %2419 = vrot.lane.b32.xlu1 %v17010_v61, %s12644_s16  ;;  %v2098_v12 = vsel %vm2085_vm0, %v2070_v48, %v2072_v59  ;;  %v2162_v30 = vsel %vm2085_vm0, %v2072_v59, %v2070_v48  ;;  %4942 = vmatprep.mubr.bf16.mxu0 %v12286_v31 }
 0x1c0   : > { %2417 = vrot.lane.b32.xlu0 %v17011_v9, %s12644_s16  ;;  %4971 = vmatprep.subr.bf16.mxu1 %v11943_v41  ;;  %v2205_v10 = vmul.f32 %v14010_v3, %v2098_v12  ;;  %v2206_v54 = vmul.f32 %v14013_v5, %v2162_v30  ;;  %v17014_v9 = vld [vmem:[#allocation33_spill] sm:$0xff] }
 0x1c1   : > { %4972 = vmatpush2.bf16.msra.mxu1 %v11942_v32  ;;  %v2076_v39 = vpop.permute.xlu1 %2075  ;;  %v17015_v30 = vld [vmem:[#allocation29_spill] sm:$0xff] }
 0x1c2   : > { %v2074_v14 = vpop.permute.xlu0 %2073 }
 0x1c3   : > { %v2099_v28 = vsel %vm2085_vm0, %v2074_v14, %v2076_v39  ;;  %v2163_v20 = vsel %vm2085_vm0, %v2076_v39, %v2074_v14  ;;  %2407 = vrot.lane.b32.xlu1 %v17012_v49, %s12644_s16  ;;  %v12288_v39 = vld [vmem:[#allocation7 + $0x1f8] ss:$36 sps:$4 sm:$0xff]  }
 0x1c4   : > { %v2207_v24 = vmul.f32 %v14010_v3, %v2099_v28  ;;  %v2208_v37 = vmul.f32 %v14013_v5, %v2163_v20  ;;  %2405 = vrot.lane.b32.xlu0 %v17013_v26, %s12644_s16 }
 0x1c5   : > { %v1577_v36 = vpop.permute.xlu1 %1576 }
 0x1c6   : > { %v11974_v29 = vpack.c.bf16 %v2207_v24, %v2205_v10  ;;  %v1598_v42 = vsel %vm1586_vm11, %v1577_v36, %v13963_v63  ;;  %v1646_v23 = vsel %vm1586_vm11, %v13963_v63, %v1577_v36  ;;  %v1575_v59 = vpop.permute.xlu0 %1574  ;;  %v11975_v48 = vpack.c.bf16 %v2208_v37, %v2206_v54  ;;  %4943 = vmatmul.mubr.bf16.gmra.mxu0 %v12288_v39  ;;  %v17017_v10 = vld [vmem:[#allocation34_spill] sm:$0xff] }
 0x1c7   : > { %v1691_v41 = vmul.f32 %v13981_v16, %v1646_v23  ;;  %v1692_v32 = vmul.f32 %v13984_v11, %v1598_v42  ;;  %v1597_v61 = vsel %vm1586_vm11, %v1575_v59, %v13969_v0  ;;  %v1645_v38 = vsel %vm1586_vm11, %v13969_v0, %v1575_v59  ;;  %2411 = vrot.lane.b32.xlu1 %v17014_v9, %s12644_s16  ;;  %v17016_v0 = vld [vmem:[#allocation35_spill] sm:$0xff]  ;;  %v12291_v42 = vld [vmem:[#allocation7 + $0x14] ss:$36 sps:$4 sm:$0xff]  }
 0x1c8   : > { %v1689_v12 = vmul.f32 %v13981_v16, %v1645_v38  ;;  %v1690_v63 = vmul.f32 %v13984_v11, %v1597_v61  ;;  %2409 = vrot.lane.b32.xlu0 %v17015_v30, %s12644_s16  ;;  %5084 = vmatprep.subr.bf16.mxu0 %v11975_v48 }
 0x1c9   : > { %5085 = vmatpush2.bf16.msra.mxu0 %v11974_v29  ;;  %v2064_v14 = vpop.permute.xlu1 %2063  ;;  %5098 = vmatprep.mubr.bf16.mxu0 %v12291_v42 }
 0x1ca   : > { %v2062_v28 = vpop.permute.xlu0 %2061  ;;  %v11941_v20 = vpack.c.bf16 %v1692_v32, %v1690_v63  ;;  %v11940_v49 = vpack.c.bf16 %v1691_v41, %v1689_v12 }
 0x1cb   : > { %2399 = vrot.lane.b32.xlu1 %v17016_v0, %s12644_s16  ;;  %v2096_v54 = vsel %vm2085_vm0, %v2062_v28, %v2064_v14  ;;  %v2160_v24 = vsel %vm2085_vm0, %v2064_v14, %v2062_v28 }
 0x1cc   : > { %2397 = vrot.lane.b32.xlu0 %v17017_v10, %s12644_s16  ;;  %4973 = vmatprep.subr.bf16.mxu1 %v11941_v20  ;;  %v2201_v23 = vmul.f32 %v14010_v3, %v2096_v54  ;;  %v2202_v59 = vmul.f32 %v14013_v5, %v2160_v24 }
 0x1cd   : > { %4974 = vmatpush2.bf16.msra.mxu1 %v11940_v49  ;;  %v2068_v37 = vpop.permute.xlu1 %2067 }
 0x1ce   : > { %v2066_v26 = vpop.permute.xlu0 %2065 }
 0x1cf   : > { %v2097_v36 = vsel %vm2085_vm0, %v2066_v26, %v2068_v37  ;;  %v2161_v29 = vsel %vm2085_vm0, %v2068_v37, %v2066_v26  ;;  %2403 = vrot.lane.b32.xlu1 %v13743_v51, %s12644_s16 }
 0x1d0   : > { %v2203_v48 = vmul.f32 %v14010_v3, %v2097_v36  ;;  %v2204_v41 = vmul.f32 %v14013_v5, %v2161_v29  ;;  %2401 = vrot.lane.b32.xlu0 %v13734_v44, %s12644_s16 }
 0x1d1   : > { %v1573_v32 = vpop.permute.xlu1 %1572 }
 0x1d2   : > { %v11972_v61 = vpack.c.bf16 %v2203_v48, %v2201_v23  ;;  %v1596_v38 = vsel %vm1586_vm11, %v1573_v32, %v13937_v55  ;;  %v1644_v51 = vsel %vm1586_vm11, %v13937_v55, %v1573_v32  ;;  %v1571_v9 = vpop.permute.xlu0 %1570  ;;  %v11973_v31 = vpack.c.bf16 %v2204_v41, %v2202_v59 }
 0x1d3   : > { %v1687_v12 = vmul.f32 %v13981_v16, %v1644_v51  ;;  %v1688_v63 = vmul.f32 %v13984_v11, %v1596_v38  ;;  %v1595_v30 = vsel %vm1586_vm11, %v1571_v9, %v13939_v17  ;;  %v1643_v44 = vsel %vm1586_vm11, %v13939_v17, %v1571_v9  ;;  %2391 = vrot.lane.b32.xlu1 %v13761_v2, %s12644_s16 }
 0x1d4   : > { %v1685_v39 = vmul.f32 %v13981_v16, %v1643_v44  ;;  %v1686_v14 = vmul.f32 %v13984_v11, %v1595_v30  ;;  %2389 = vrot.lane.b32.xlu0 %v13788_v35, %s12644_s16  ;;  %5086 = vmatprep.subr.bf16.mxu0 %v11973_v31 }
 0x1d5   : > { %5087 = vmatpush2.bf16.msra.mxu0 %v11972_v61  ;;  %v2056_v55 = vpop.permute.xlu1 %2055 }
 0x1d6   : > { %v2054_v28 = vpop.permute.xlu0 %2053  ;;  %v11939_v20 = vpack.c.bf16 %v1688_v63, %v1686_v14  ;;  %v11938_v49 = vpack.c.bf16 %v1687_v12, %v1685_v39 }
 0x1d7   : > { %2395 = vrot.lane.b32.xlu1 %v13764_v62, %s12644_s16  ;;  %v2094_v2 = vsel %vm2085_vm0, %v2054_v28, %v2056_v55  ;;  %v2158_v17 = vsel %vm2085_vm0, %v2056_v55, %v2054_v28 }
 0x1d8   : > { %2393 = vrot.lane.b32.xlu0 %v13785_v7, %s12644_s16  ;;  %4975 = vmatprep.subr.bf16.mxu1 %v11939_v20  ;;  %v2197_v62 = vmul.f32 %v14010_v3, %v2094_v2  ;;  %v2198_v7 = vmul.f32 %v14013_v5, %v2158_v17  ;;  %s12656_s16 = smov [#allocation10]  }
 0x1d9   : > { %4976 = vmatpush2.bf16.msra.mxu1 %v11938_v49  ;;  %v2060_v0 = vpop.permute.xlu1 %2059 }
 0x1da   : > { %v2058_v35 = vpop.permute.xlu0 %2057 }
 0x1db   : > { %v2095_v10 = vsel %vm2085_vm0, %v2058_v35, %v2060_v0  ;;  %v2159_v54 = vsel %vm2085_vm0, %v2060_v0, %v2058_v35  ;;  %2818 = vrot.lane.b32.xlu1 %v13589_v19, %s12645_s30 }
 0x1dc   : > { %v2199_v24 = vmul.f32 %v14010_v3, %v2095_v10  ;;  %v2200_v37 = vmul.f32 %v14013_v5, %v2159_v54  ;;  %2816 = vrot.lane.b32.xlu0 %v13611_v33, %s12645_s30 }
 0x1dd   : > { %v1569_v26 = vpop.permute.xlu1 %1568 }
 0x1de   : > { %v11970_v36 = vpack.c.bf16 %v2199_v24, %v2197_v62  ;;  %v1594_v29 = vsel %vm1586_vm11, %v1569_v26, %v13905_v21  ;;  %v1642_v42 = vsel %vm1586_vm11, %v13905_v21, %v1569_v26  ;;  %v1567_v23 = vpop.permute.xlu0 %1566  ;;  %v11971_v59 = vpack.c.bf16 %v2200_v37, %v2198_v7 }
 0x1df   : > { %v1683_v48 = vmul.f32 %v13981_v16, %v1642_v42  ;;  %v1684_v41 = vmul.f32 %v13984_v11, %v1594_v29  ;;  %v1593_v32 = vsel %vm1586_vm11, %v1567_v23, %v13907_v47  ;;  %v1641_v61 = vsel %vm1586_vm11, %v13907_v47, %v1567_v23  ;;  %2822 = vrot.lane.b32.xlu1 %v13592_v22, %s12645_s30 }
 0x1e0   : > { %v1681_v38 = vmul.f32 %v13981_v16, %v1641_v61  ;;  %v1682_v51 = vmul.f32 %v13984_v11, %v1593_v32  ;;  %2820 = vrot.lane.b32.xlu0 %v13614_v4, %s12645_s30  ;;  %5088 = vmatprep.subr.bf16.mxu0 %v11971_v59 }
 0x1e1   : > { %5089 = vmatpush2.bf16.msra.mxu0 %v11970_v36  ;;  %v2048_v21 = vpop.permute.xlu1 %2047 }
 0x1e2   : > { %v2046_v9 = vpop.permute.xlu0 %2045  ;;  %v11937_v31 = vpack.c.bf16 %v1684_v41, %v1682_v51  ;;  %v11936_v12 = vpack.c.bf16 %v1683_v48, %v1681_v38 }
 0x1e3   : > { %3186 = vrot.lane.b32.xlu1 %v13589_v19, %s12646_s9  ;;  %v2092_v47 = vsel %vm2085_vm0, %v2046_v9, %v2048_v21  ;;  %v2156_v63 = vsel %vm2085_vm0, %v2048_v21, %v2046_v9 }
 0x1e4   : > { %3184 = vrot.lane.b32.xlu0 %v13611_v33, %s12646_s9  ;;  %4977 = vmatprep.subr.bf16.mxu1 %v11937_v31  ;;  %v2193_v19 = vmul.f32 %v14010_v3, %v2092_v47  ;;  %v2194_v55 = vmul.f32 %v14013_v5, %v2156_v63 }
 0x1e5   : > { %4978 = vmatpush2.bf16.msra.mxu1 %v11936_v12  ;;  %v2052_v30 = vpop.permute.xlu1 %2051 }
 0x1e6   : > { %v2050_v44 = vpop.permute.xlu0 %2049 }
 0x1e7   : > { %v2093_v39 = vsel %vm2085_vm0, %v2050_v44, %v2052_v30  ;;  %v2157_v14 = vsel %vm2085_vm0, %v2052_v30, %v2050_v44  ;;  %3190 = vrot.lane.b32.xlu1 %v13592_v22, %s12646_s9 }
 0x1e8   : > { %v2195_v33 = vmul.f32 %v14010_v3, %v2093_v39  ;;  %v2196_v28 = vmul.f32 %v14013_v5, %v2157_v14  ;;  %3188 = vrot.lane.b32.xlu0 %v13614_v4, %s12646_s9 }
 0x1e9   : > { %v1565_v20 = vpop.permute.xlu1 %1564 }
 0x1ea   : > { %v11968_v49 = vpack.c.bf16 %v2195_v33, %v2193_v19  ;;  %v1592_v2 = vsel %vm1586_vm11, %v1565_v20, %v13874_v18  ;;  %v1640_v17 = vsel %vm1586_vm11, %v13874_v18, %v1565_v20  ;;  %v1563_v22 = vpop.permute.xlu0 %1562  ;;  %v11969_v0 = vpack.c.bf16 %v2196_v28, %v2194_v55 }
 0x1eb   : > { %v1679_v35 = vmul.f32 %v13981_v16, %v1640_v17  ;;  %v1680_v10 = vmul.f32 %v13984_v11, %v1592_v2  ;;  %v1591_v54 = vsel %vm1586_vm11, %v1563_v22, %v13879_v34  ;;  %v1639_v4 = vsel %vm1586_vm11, %v13879_v34, %v1563_v22  ;;  %2810 = vrot.lane.b32.xlu1 %v13619_v6, %s12645_s30 }
 0x1ec   : > { %v1677_v62 = vmul.f32 %v13981_v16, %v1639_v4  ;;  %v1678_v7 = vmul.f32 %v13984_v11, %v1591_v54  ;;  %2808 = vrot.lane.b32.xlu0 %v13638_v57, %s12645_s30  ;;  %5090 = vmatprep.subr.bf16.mxu0 %v11969_v0 }
 0x1ed   : > { %5091 = vmatpush2.bf16.msra.mxu0 %v11968_v49  ;;  %v2040_v18 = vpop.permute.xlu1 %2039 }
 0x1ee   : > { %v2038_v24 = vpop.permute.xlu0 %2037  ;;  %v11935_v37 = vpack.c.bf16 %v1680_v10, %v1678_v7  ;;  %v11934_v26 = vpack.c.bf16 %v1679_v35, %v1677_v62  ;;  %v12473_v62 = vld [vmem:[%s12831_s17 + $0xa8] sm:$0xff] }
 0x1ef   : > { %2814 = vrot.lane.b32.xlu1 %v13622_v8, %s12645_s30  ;;  %v2090_v34 = vsel %vm2085_vm0, %v2038_v24, %v2040_v18  ;;  %v2154_v36 = vsel %vm2085_vm0, %v2040_v18, %v2038_v24  ;;  %v12474_v24 = vld [vmem:[%s12831_s17 + $0xa0] sm:$0xff] }
 0x1f0   : > { %2812 = vrot.lane.b32.xlu0 %v16999_v58, %s12645_s30  ;;  %4979 = vmatprep.subr.bf16.mxu1 %v11935_v37  ;;  %v2189_v48 = vmul.f32 %v14010_v3, %v2090_v34  ;;  %v2190_v41 = vmul.f32 %v14013_v5, %v2154_v36  ;;  %v2713_v36 = vld [vmem:[%s12831_s17 + $0x88] sm:$0xff] }
 0x1f1   : > { %4980 = vmatpush2.bf16.msra.mxu1 %v11934_v26  ;;  %v2044_v29 = vpop.permute.xlu1 %2043 }
 0x1f2   : > { %v2042_v42 = vpop.permute.xlu0 %2041 }
 0x1f3   : > { %v2091_v23 = vsel %vm2085_vm0, %v2042_v42, %v2044_v29  ;;  %v2155_v59 = vsel %vm2085_vm0, %v2044_v29, %v2042_v42  ;;  %3178 = vrot.lane.b32.xlu1 %v13619_v6, %s12646_s9  ;;  %v12265_v29 = vld [vmem:[#allocation7 + $0x8] ss:$36 sps:$4 sm:$0xff]  }
 0x1f4   : > { %v2191_v32 = vmul.f32 %v14010_v3, %v2091_v23  ;;  %v2192_v61 = vmul.f32 %v14013_v5, %v2155_v59  ;;  %3176 = vrot.lane.b32.xlu0 %v13638_v57, %s12646_s9  ;;  %v12292_v59 = vld [vmem:[#allocation7 + $0x54] ss:$36 sps:$4 sm:$0xff]  }
 0x1f5   : > { %v1561_v38 = vpop.permute.xlu1 %1560 }
 0x1f6   : > { %v11966_v51 = vpack.c.bf16 %v2191_v32, %v2189_v48  ;;  %v1590_v21 = vsel %vm1586_vm11, %v1561_v38, %v13850_v50  ;;  %v1638_v9 = vsel %vm1586_vm11, %v13850_v50, %v1561_v38  ;;  %v1559_v6 = vpop.permute.xlu0 %1558  ;;  %v11967_v31 = vpack.c.bf16 %v2192_v61, %v2190_v41 }
 0x1f7   : > { %v1675_v12 = vmul.f32 %v13981_v16, %v1638_v9  ;;  %v1676_v47 = vmul.f32 %v13984_v11, %v1590_v21  ;;  %v1589_v63 = vsel %vm1586_vm11, %v1559_v6, %v13855_v27  ;;  %v1637_v57 = vsel %vm1586_vm11, %v13855_v27, %v1559_v6  ;;  %3182 = vrot.lane.b32.xlu1 %v13622_v8, %s12646_s9  ;;  %v12477_v9 = vld [vmem:[%s12831_s17 + $0x80] sm:$0xff] }
 0x1f8   : > { %v1673_v30 = vmul.f32 %v13981_v16, %v1637_v57  ;;  %v1674_v44 = vmul.f32 %v13984_v11, %v1589_v63  ;;  %3180 = vrot.lane.b32.xlu0 %v16999_v58, %s12646_s9  ;;  %5092 = vmatprep.subr.bf16.mxu0 %v11967_v31  ;;  %v10952_v6 = vsel %vm2538_vm3, 1.0, %v16970_v53  ;;  %v2715_v31 = vld [vmem:[%s12831_s17 + $0x98] sm:$0xff] }
 0x1f9   : > { %5093 = vmatpush2.bf16.msra.mxu0 %v11966_v51  ;;  %v2032_v50 = vpop.permute.xlu1 %2031 }
 0x1fa   : > { %v2030_v39 = vpop.permute.xlu0 %2029  ;;  %v11933_v14 = vpack.c.bf16 %v1676_v47, %v1674_v44  ;;  %v11932_v19 = vpack.c.bf16 %v1675_v12, %v1673_v30  ;;  %v2714_v47 = vld [vmem:[%s12831_s17 + $0x90] sm:$0xff]  ;;  %v14273_v44 = vrot.slane %v10952_v6, %v16973_v25 }
 0x1fb   : > { %2802 = vrot.lane.b32.xlu1 %v17000_v46, %s12645_s30  ;;  %v2088_v8 = vsel %vm2085_vm0, %v2030_v39, %v2032_v50  ;;  %v2152_v27 = vsel %vm2085_vm0, %v2032_v50, %v2030_v39  ;;  %v12289_v50 = vld [vmem:[#allocation7 + $0x10] ss:$36 sps:$4 sm:$0xff]  }
 0x1fc   : > { %2800 = vrot.lane.b32.xlu0 %v17001_v56, %s12645_s30  ;;  %4981 = vmatprep.subr.bf16.mxu1 %v11933_v14  ;;  %v2185_v46 = vmul.f32 %v14010_v3, %v2088_v8  ;;  %v2186_v56 = vmul.f32 %v14013_v5, %v2152_v27  ;;  %v12295_v8 = vld [vmem:[#allocation7 + $0x5c] ss:$36 sps:$4 sm:$0xff]  }
 0x1fd   : > { %4982 = vmatpush2.bf16.msra.mxu1 %v11932_v19  ;;  %v2036_v55 = vpop.permute.xlu1 %2035  ;;  %v12294_v19 = vld [vmem:[#allocation7 + $0x50] ss:$36 sps:$4 sm:$0xff]  }
 0x1fe   : > { %v2034_v58 = vpop.permute.xlu0 %2033 }
 0x1ff   : > { %v2089_v33 = vsel %vm2085_vm0, %v2034_v58, %v2036_v55  ;;  %v2153_v28 = vsel %vm2085_vm0, %v2036_v55, %v2034_v58  ;;  %2806 = vrot.lane.b32.xlu1 %v17002_v52, %s12645_s30  ;;  %v12298_v55 = vld [vmem:[#allocation7 + $0x9c] ss:$36 sps:$4 sm:$0xff]  }
 0x200   : > { %v2187_v20 = vmul.f32 %v14010_v3, %v2089_v33  ;;  %v2188_v49 = vmul.f32 %v14013_v5, %v2153_v28  ;;  %2804 = vrot.lane.b32.xlu0 %v17003_v45, %s12645_s30 }
 0x201   : > { %v1557_v2 = vpop.permute.xlu1 %1556 }
 0x202   : > { %v11964_v17 = vpack.c.bf16 %v2187_v20, %v2185_v46  ;;  %v1588_v52 = vsel %vm1586_vm11, %v1557_v2, %v13826_v13  ;;  %v1636_v22 = vsel %vm1586_vm11, %v13826_v13, %v1557_v2  ;;  %v1555_v0 = vpop.permute.xlu0 %1554  ;;  %v11965_v35 = vpack.c.bf16 %v2188_v49, %v2186_v56 }
 0x203   : > { %v1671_v10 = vmul.f32 %v13981_v16, %v1636_v22  ;;  %v1672_v54 = vmul.f32 %v13984_v11, %v1588_v52  ;;  %v1587_v4 = vsel %vm1586_vm11, %v1555_v0, %v13828_v60  ;;  %v1635_v45 = vsel %vm1586_vm11, %v13828_v60, %v1555_v0  ;;  %3170 = vrot.lane.b32.xlu1 %v12473_v62, %s12646_s9  ;;  %v2709_v0 = vld [vmem:[%s12831_s17 + $0x68] sm:$0xff]  ;;  %vm2906_vm11 = vmand %vm2905_vm9, %vm913_vm10 }
 0x204   : > { %v1669_v7 = vmul.f32 %v13981_v16, %v1635_v45  ;;  %v1670_v18 = vmul.f32 %v13984_v11, %v1587_v4  ;;  %3168 = vrot.lane.b32.xlu0 %v12474_v24, %s12646_s9  ;;  %5094 = vmatprep.subr.bf16.mxu0 %v11965_v35  ;;  %v12476_v11 = vld [vmem:[%s12831_s17 + $0xb0] sm:$0xff]  ;;  %v12297_v35 = vld [vmem:[#allocation7 + $0x58] ss:$36 sps:$4 sm:$0xff]   ;;  %v2708_v4 = vld [vmem:[%s12831_s17 + $0x60] sm:$0xff] }
 0x205   : > { %5095 = vmatpush2.bf16.msra.mxu0 %v11964_v17  ;;  %v2024_v60 = vpop.permute.xlu1 %2023  ;;  %v12300_v45 = vld [vmem:[#allocation7 + $0x98] ss:$36 sps:$4 sm:$0xff]   ;;  %v12301_v62 = vld [vmem:[#allocation7 + $0xa4] ss:$36 sps:$4 sm:$0xff]  }
 0x206   : > { %v2022_v37 = vpop.permute.xlu0 %2021  ;;  %v11931_v26 = vpack.c.bf16 %v1672_v54, %v1670_v18  ;;  %v11930_v34 = vpack.c.bf16 %v1671_v10, %v1669_v7  ;;  %v16885_v7 = vmov 0   ;;  %v12304_v24 = vld [vmem:[#allocation7 + $0xe4] ss:$36 sps:$4 sm:$0xff]  }
 0x207   : > { %3174 = vrot.lane.b32.xlu1 %v12475_v43, %s12646_s9  ;;  %v2086_v16 = vsel %vm2085_vm0, %v2022_v37, %v2024_v60  ;;  %v2150_v42 = vsel %vm2085_vm0, %v2024_v60, %v2022_v37  ;;  %12260 = vset.pattern.permute.xlu0 %v16885_v7 }
 0x208   : > { %3172 = vrot.lane.b32.xlu0 %v12476_v11, %s12646_s9  ;;  %4983 = vmatprep.subr.bf16.mxu1 %v11931_v26  ;;  %v2181_v41 = vmul.f32 %v14010_v3, %v2086_v16  ;;  %v2182_v38 = vmul.f32 %v14013_v5, %v2150_v42  ;;  %v2711_v11 = vld [vmem:[%s12831_s17 + $0x78] sm:$0xff] }
 0x209   : > { %4984 = vmatpush2.bf16.msra.mxu1 %v11930_v34  ;;  %v2028_v23 = vpop.permute.xlu1 %2027  ;;  %12261 = vset.pattern.permute.xlu1 %v16885_v7 }
 0x20a   : > { %v2026_v48 = vpop.permute.xlu0 %2025 }
 0x20b   : > { %v2087_v32 = vsel %vm2085_vm0, %v2026_v48, %v2028_v23  ;;  %v2151_v61 = vsel %vm2085_vm0, %v2028_v23, %v2026_v48  ;;  %2794 = vrot.lane.b32.xlu1 %v2713_v36, %s12645_s30  ;;  %vm3274_vm0 = vmand %vm3273_vm14, %vm1283_vm15 }
 0x20c   : > { %v2183_v51 = vmul.f32 %v14010_v3, %v2087_v32  ;;  %v2184_v21 = vmul.f32 %v14013_v5, %v2151_v61  ;;  %2792 = vrot.lane.b32.xlu0 %v12477_v9, %s12645_s30  ;;  %4986 = vmatmul.mubr.bf16.vlgmr.msra.gmra.mxu1 %v12265_v29  ;;  %v14278_v5 = vrot.slane %v10952_v6, %v16972_v1  ;;  %v2710_v29 = vld [vmem:[%s12831_s17 + $0x70] sm:$0xff] }
 0x20d   : > { %v2448_v12 = vpop.permute.xlu1 %2447  ;;  %4995 = vmatprep.mubr.bf16.mxu1 %v12292_v59 }
 0x20e   : > { %v11962_v63 = vpack.c.bf16 %v2183_v51, %v2181_v41  ;;  %v2446_v57 = vpop.permute.xlu0 %2445  ;;  %v11963_v30 = vpack.c.bf16 %v2184_v21, %v2182_v38  ;;  %v12303_v41 = vld [vmem:[#allocation7 + $0xa0] ss:$36 sps:$4 sm:$0xff]   ;;  %v12307_v51 = vld [vmem:[#allocation7 + $0xec] ss:$36 sps:$4 sm:$0xff]  }
 0x20f   : > { %2798 = vrot.lane.b32.xlu1 %v2715_v31, %s12645_s30  ;;  %v2468_v3 = vsel %vm2453_vm5, %v2446_v57, %v2448_v12  ;;  %v2532_v39 = vsel %vm2453_vm5, %v2448_v12, %v2446_v57  ;;  %v12306_v38 = vld [vmem:[#allocation7 + $0xe0] ss:$36 sps:$4 sm:$0xff]  }
 0x210   : > { %2796 = vrot.lane.b32.xlu0 %v2714_v47, %s12645_s30  ;;  %5096 = vmatprep.subr.bf16.mxu0 %v11963_v30  ;;  %v2580_v58 = vmul.f32 %v14273_v44, %v2468_v3  ;;  %v2581_v46 = vmul.f32 %v14278_v5, %v2532_v39 }
 0x211   : > { %5097 = vmatpush2.bf16.msra.mxu0 %v11962_v63  ;;  %v2452_v14 = vpop.permute.xlu1 %2451 }
 0x212   : > { %v2450_v27 = vpop.permute.xlu0 %2449 }
 0x213   : > { %v2469_v33 = vsel %vm2453_vm5, %v2450_v27, %v2452_v14  ;;  %v2533_v28 = vsel %vm2453_vm5, %v2452_v14, %v2450_v27  ;;  %3162 = vrot.lane.b32.xlu1 %v2713_v36, %s12646_s9 }
 0x214   : > { %v2582_v56 = vmul.f32 %v14273_v44, %v2469_v33  ;;  %v2583_v20 = vmul.f32 %v14278_v5, %v2533_v28  ;;  %3160 = vrot.lane.b32.xlu0 %v12477_v9, %s12646_s9  ;;  %5099 = vmatmul.mubr.bf16.vlgmr.msra.gmra.mxu0 %v12289_v50  ;;  %v12310_v9 = vld [vmem:[#allocation7 + $0x12c] ss:$36 sps:$4 sm:$0xff]   ;;  %v12313_v28 = vld [vmem:[#allocation7 + $0x134] ss:$36 sps:$4 sm:$0xff]  }
 0x215   : > { %v2440_v49 = vpop.permute.xlu1 %2439  ;;  %4996 = vmatmul.mubr.bf16.gmra.mxu1 %v12294_v19  ;;  %5108 = vmatprep.mubr.bf16.mxu0 %v12295_v8  ;;  %v2705_v19 = vld [vmem:[%s12831_s17 + $0x48] sm:$0xff] }
 0x216   : > { %v11992_v2 = vpack.c.bf16 %v2582_v56, %v2580_v58  ;;  %v2438_v17 = vpop.permute.xlu0 %2437  ;;  %v11993_v52 = vpack.c.bf16 %v2583_v20, %v2581_v46  ;;  %5005 = vmatprep.mubr.bf16.mxu1 %v12298_v55  ;;  %v12309_v8 = vld [vmem:[#allocation7 + $0xe8] ss:$36 sps:$4 sm:$0xff]   ;;  %v2704_v58 = vld [vmem:[%s12831_s17 + $0x40] sm:$0xff]  ;;  %v12316_v56 = vld [vmem:[#allocation7 + $0x174] ss:$36 sps:$4 sm:$0xff]  }
 0x217   : > { %3166 = vrot.lane.b32.xlu1 %v2715_v31, %s12646_s9  ;;  %v2466_v22 = vsel %vm2453_vm5, %v2438_v17, %v2440_v49  ;;  %v2530_v10 = vsel %vm2453_vm5, %v2440_v49, %v2438_v17  ;;  %v12312_v33 = vld [vmem:[#allocation7 + $0x128] ss:$36 sps:$4 sm:$0xff]  }
 0x218   : > { %3164 = vrot.lane.b32.xlu0 %v2714_v47, %s12646_s9  ;;  %5179 = vmatprep.subr.bf16.mxu1 %v11993_v52  ;;  %v2576_v60 = vmul.f32 %v14273_v44, %v2466_v22  ;;  %v2577_v34 = vmul.f32 %v14278_v5, %v2530_v10  ;;  %v2706_v10 = vld [vmem:[%s12831_s17 + $0x50] sm:$0xff] }
 0x219   : > { %5180 = vmatpush1.bf16.msra.mxu1 %v11992_v2  ;;  %v2444_v54 = vpop.permute.xlu1 %2443 }
 0x21a   : > { %v2442_v18 = vpop.permute.xlu0 %2441 }
 0x21b   : > { %v2467_v37 = vsel %vm2453_vm5, %v2442_v18, %v2444_v54  ;;  %v2531_v26 = vsel %vm2453_vm5, %v2444_v54, %v2442_v18  ;;  %2786 = vrot.lane.b32.xlu1 %v2709_v0, %s12645_s30  ;;  %v12315_v18 = vld [vmem:[#allocation7 + $0x130] ss:$36 sps:$4 sm:$0xff]  }
 0x21c   : > { %v2578_v43 = vmul.f32 %v14273_v44, %v2467_v37  ;;  %v2579_v16 = vmul.f32 %v14278_v5, %v2531_v26  ;;  %2784 = vrot.lane.b32.xlu0 %v2708_v4, %s12645_s30  ;;  %5109 = vmatmul.mubr.bf16.gmra.mxu0 %v12297_v35  ;;  %v12318_v37 = vld [vmem:[#allocation7 + $0x170] ss:$36 sps:$4 sm:$0xff]   ;;  %v12319_v26 = vld [vmem:[#allocation7 + $0x17c] ss:$36 sps:$4 sm:$0xff]  }
 0x21d   : > { %v2432_v36 = vpop.permute.xlu1 %2431  ;;  %5006 = vmatmul.mubr.bf16.gmra.mxu1 %v12300_v45  ;;  %5118 = vmatprep.mubr.bf16.mxu0 %v12301_v62 }
 0x21e   : > { %v11990_v42 = vpack.c.bf16 %v2578_v43, %v2576_v60  ;;  %v2430_v23 = vpop.permute.xlu0 %2429  ;;  %v11991_v59 = vpack.c.bf16 %v2579_v16, %v2577_v34  ;;  %5015 = vmatprep.mubr.bf16.mxu1 %v12304_v24  ;;  %v12322_v43 = vld [vmem:[#allocation7 + $0x1bc] ss:$36 sps:$4 sm:$0xff]  }
 0x21f   : > { %2790 = vrot.lane.b32.xlu1 %v2711_v11, %s12645_s30  ;;  %v2464_v48 = vsel %vm2453_vm5, %v2430_v23, %v2432_v36  ;;  %v2528_v32 = vsel %vm2453_vm5, %v2432_v36, %v2430_v23 }
 0x220   : > { %2788 = vrot.lane.b32.xlu0 %v2710_v29, %s12645_s30  ;;  %5181 = vmatprep.subr.bf16.mxu1 %v11991_v59  ;;  %v2572_v6 = vmul.f32 %v14273_v44, %v2464_v48  ;;  %v2573_v47 = vmul.f32 %v14278_v5, %v2528_v32 }
 0x221   : > { %5182 = vmatpush1.bf16.msra.mxu1 %v11990_v42  ;;  %v2436_v61 = vpop.permute.xlu1 %2435 }
 0x222   : > { %v2434_v21 = vpop.permute.xlu0 %2433 }
 0x223   : > { %v2465_v31 = vsel %vm2453_vm5, %v2434_v21, %v2436_v61  ;;  %v2529_v12 = vsel %vm2453_vm5, %v2436_v61, %v2434_v21  ;;  %3154 = vrot.lane.b32.xlu1 %v2709_v0, %s12646_s9  ;;  %v2707_v0 = vld [vmem:[%s12831_s17 + $0x58] sm:$0xff] }
 0x224   : > { %v2574_v63 = vmul.f32 %v14273_v44, %v2465_v31  ;;  %v2575_v57 = vmul.f32 %v14278_v5, %v2529_v12  ;;  %3152 = vrot.lane.b32.xlu0 %v2708_v4, %s12646_s9  ;;  %5119 = vmatmul.mubr.bf16.gmra.mxu0 %v12303_v41  ;;  %v12324_v31 = vld [vmem:[#allocation7 + $0x1b8] ss:$36 sps:$4 sm:$0xff]   ;;  %v12325_v12 = vld [vmem:[#allocation7 + $0x1c4] ss:$36 sps:$4 sm:$0xff]  }
 0x225   : > { %v2424_v30 = vpop.permute.xlu1 %2423  ;;  %5016 = vmatmul.mubr.bf16.gmra.mxu1 %v12306_v38  ;;  %5128 = vmatprep.mubr.bf16.mxu0 %v12307_v51  ;;  %v2701_v38 = vld [vmem:[%s12831_s17 + $0x28] sm:$0xff]  ;;  %v12321_v51 = vld [vmem:[#allocation7 + $0x178] ss:$36 sps:$4 sm:$0xff]  }
 0x226   : > { %v11988_v3 = vpack.c.bf16 %v2574_v63, %v2572_v6  ;;  %v2422_v50 = vpop.permute.xlu0 %2421  ;;  %v11989_v39 = vpack.c.bf16 %v2575_v57, %v2573_v47  ;;  %5025 = vmatprep.mubr.bf16.mxu1 %v12310_v9  ;;  %v2700_v6 = vld [vmem:[%s12831_s17 + $0x20] sm:$0xff] }
 0x227   : > { %3158 = vrot.lane.b32.xlu1 %v2711_v11, %s12646_s9  ;;  %v2462_v14 = vsel %vm2453_vm5, %v2422_v50, %v2424_v30  ;;  %v2526_v27 = vsel %vm2453_vm5, %v2424_v30, %v2422_v50  ;;  %v12328_v63 = vld [vmem:[#allocation7 + $0x204] ss:$36 sps:$4 sm:$0xff]  }
 0x228   : > { %3156 = vrot.lane.b32.xlu0 %v2710_v29, %s12646_s9  ;;  %5183 = vmatprep.subr.bf16.mxu1 %v11989_v39  ;;  %v2568_v20 = vmul.f32 %v14273_v44, %v2462_v14  ;;  %v2569_v17 = vmul.f32 %v14278_v5, %v2526_v27  ;;  %v2702_v27 = vld [vmem:[%s12831_s17 + $0x30] sm:$0xff] }
 0x229   : > { %5184 = vmatpush1.bf16.msra.mxu1 %v11988_v3  ;;  %v2428_v55 = vpop.permute.xlu1 %2427 }
 0x22a   : > { %v2426_v46 = vpop.permute.xlu0 %2425 }
 0x22b   : > { %v2463_v49 = vsel %vm2453_vm5, %v2426_v46, %v2428_v55  ;;  %v2527_v2 = vsel %vm2453_vm5, %v2428_v55, %v2426_v46  ;;  %2778 = vrot.lane.b32.xlu1 %v2705_v19, %s12645_s30  ;;  %v12327_v46 = vld [vmem:[#allocation7 + $0x1c0] ss:$36 sps:$4 sm:$0xff]  }
 0x22c   : > { %v2570_v52 = vmul.f32 %v14273_v44, %v2463_v49  ;;  %v2571_v22 = vmul.f32 %v14278_v5, %v2527_v2  ;;  %2776 = vrot.lane.b32.xlu0 %v2704_v58, %s12645_s30  ;;  %5129 = vmatmul.mubr.bf16.gmra.mxu0 %v12309_v8  ;;  %v12330_v49 = vld [vmem:[#allocation7 + $0x200] ss:$36 sps:$4 sm:$0xff]   ;;  %v12331_v2 = vld [vmem:[#allocation7 + $0x20c] ss:$36 sps:$4 sm:$0xff]  }
 0x22d   : > { %v2416_v35 = vpop.permute.xlu1 %2415  ;;  %5026 = vmatmul.mubr.bf16.gmra.mxu1 %v12312_v33  ;;  %5138 = vmatprep.mubr.bf16.mxu0 %v12313_v28 }
 0x22e   : > { %v11986_v54 = vpack.c.bf16 %v2570_v52, %v2568_v20  ;;  %v2414_v4 = vpop.permute.xlu0 %2413  ;;  %v11987_v45 = vpack.c.bf16 %v2571_v22, %v2569_v17  ;;  %5035 = vmatprep.mubr.bf16.mxu1 %v12316_v56 }
 0x22f   : > { %2782 = vrot.lane.b32.xlu1 %v2707_v0, %s12645_s30  ;;  %v2460_v62 = vsel %vm2453_vm5, %v2414_v4, %v2416_v35  ;;  %v2524_v24 = vsel %vm2453_vm5, %v2416_v35, %v2414_v4 }
 0x230   : > { %2780 = vrot.lane.b32.xlu0 %v2706_v10, %s12645_s30  ;;  %5185 = vmatprep.subr.bf16.mxu1 %v11987_v45  ;;  %v2564_v16 = vmul.f32 %v14273_v44, %v2460_v62  ;;  %v2565_v29 = vmul.f32 %v14278_v5, %v2524_v24 }
 0x231   : > { %5186 = vmatpush1.bf16.msra.mxu1 %v11986_v54  ;;  %v2420_v60 = vpop.permute.xlu1 %2419 }
 0x232   : > { %v2418_v34 = vpop.permute.xlu0 %2417 }
 0x233   : > { %v2461_v11 = vsel %vm2453_vm5, %v2418_v34, %v2420_v60  ;;  %v2525_v36 = vsel %vm2453_vm5, %v2420_v60, %v2418_v34  ;;  %3146 = vrot.lane.b32.xlu1 %v2705_v19, %s12646_s9  ;;  %v2703_v19 = vld [vmem:[%s12831_s17 + $0x38] sm:$0xff]  ;;  %v2697_v60 = vld [vmem:[%s12831_s17 + $0x8] sm:$0xff] }
 0x234   : > { %v2566_v42 = vmul.f32 %v14273_v44, %v2461_v11  ;;  %v2567_v23 = vmul.f32 %v14278_v5, %v2525_v36  ;;  %3144 = vrot.lane.b32.xlu0 %v2704_v58, %s12646_s9  ;;  %5139 = vmatmul.mubr.bf16.gmra.mxu0 %v12315_v18 }
 0x235   : > { %v2408_v59 = vpop.permute.xlu1 %2407  ;;  %5036 = vmatmul.mubr.bf16.gmra.mxu1 %v12318_v37  ;;  %5148 = vmatprep.mubr.bf16.mxu0 %v12319_v26  ;;  %v12333_v37 = vld [vmem:[#allocation7 + $0x208] ss:$36 sps:$4 sm:$0xff]  }
 0x236   : > { %v11984_v48 = vpack.c.bf16 %v2566_v42, %v2564_v16  ;;  %v2406_v41 = vpop.permute.xlu0 %2405  ;;  %v11985_v32 = vpack.c.bf16 %v2567_v23, %v2565_v29  ;;  %5045 = vmatprep.mubr.bf16.mxu1 %v12322_v43  ;;  %v2696_v43 = vld [vmem:[%s12831_s17] sm:$0xff] }
 0x237   : > { %3150 = vrot.lane.b32.xlu1 %v2707_v0, %s12646_s9  ;;  %v2458_v61 = vsel %vm2453_vm5, %v2406_v41, %v2408_v59  ;;  %v2522_v21 = vsel %vm2453_vm5, %v2408_v59, %v2406_v41  ;;  %v12336_v16 = vld [vmem:[#allocation7 + $0x1c] ss:$36 sps:$4 sm:$0xff]  }
 0x238   : > { %3148 = vrot.lane.b32.xlu0 %v2706_v10, %s12646_s9  ;;  %5187 = vmatprep.subr.bf16.mxu1 %v11985_v32  ;;  %v2560_v57 = vmul.f32 %v14273_v44, %v2458_v61  ;;  %v2561_v50 = vmul.f32 %v14278_v5, %v2522_v21  ;;  %v2699_v41 = vld [vmem:[%s12831_s17 + $0x18] sm:$0xff]  ;;  %v10969_v61 = vsel %vm2906_vm11, 1.0, %v16970_v53 }
 0x239   : > { %5188 = vmatpush1.bf16.msra.mxu1 %v11984_v48  ;;  %v2412_v9 = vpop.permute.xlu1 %2411 }
 0x23a   : > { %v2410_v47 = vpop.permute.xlu0 %2409 }
 0x23b   : > { %v2459_v30 = vsel %vm2453_vm5, %v2410_v47, %v2412_v9  ;;  %v2523_v3 = vsel %vm2453_vm5, %v2412_v9, %v2410_v47  ;;  %2770 = vrot.lane.b32.xlu1 %v2701_v38, %s12645_s30 }
 0x23c   : > { %v2562_v39 = vmul.f32 %v14273_v44, %v2459_v30  ;;  %v2563_v14 = vmul.f32 %v14278_v5, %v2523_v3  ;;  %2768 = vrot.lane.b32.xlu0 %v2700_v6, %s12645_s30  ;;  %5149 = vmatmul.mubr.bf16.gmra.mxu0 %v12321_v51 }
 0x23d   : > { %v2400_v8 = vpop.permute.xlu1 %2399  ;;  %5046 = vmatmul.mubr.bf16.gmra.mxu1 %v12324_v31  ;;  %5158 = vmatprep.mubr.bf16.mxu0 %v12325_v12 }
 0x23e   : > { %v11982_v55 = vpack.c.bf16 %v2562_v39, %v2560_v57  ;;  %v2398_v58 = vpop.permute.xlu0 %2397  ;;  %v11983_v33 = vpack.c.bf16 %v2563_v14, %v2561_v50  ;;  %5055 = vmatprep.mubr.bf16.mxu1 %v12328_v63  ;;  %v14424_v39 = vpop.f32.mrf.mxu0 }
 0x23f   : > { %2774 = vrot.lane.b32.xlu1 %v2703_v19, %s12645_s30  ;;  %v2456_v28 = vsel %vm2453_vm5, %v2398_v58, %v2400_v8  ;;  %v2520_v56 = vsel %vm2453_vm5, %v2400_v8, %v2398_v58 }
 0x240   : > { %2772 = vrot.lane.b32.xlu0 %v2702_v27, %s12645_s30  ;;  %5189 = vmatprep.subr.bf16.mxu1 %v11983_v33  ;;  %v2556_v52 = vmul.f32 %v14273_v44, %v2456_v28  ;;  %v2557_v35 = vmul.f32 %v14278_v5, %v2520_v56  ;;  %v3657_v28 = vld [vmem:[%s16830_s2 + $0x8] sm:$0xff] }
 0x241   : > { %5190 = vmatpush1.bf16.msra.mxu1 %v11982_v55  ;;  %v2404_v20 = vpop.permute.xlu1 %2403 }
 0x242   : > { %v2402_v17 = vpop.permute.xlu0 %2401 }
 0x243   : > { %v2457_v22 = vsel %vm2453_vm5, %v2402_v17, %v2404_v20  ;;  %v2521_v0 = vsel %vm2453_vm5, %v2404_v20, %v2402_v17  ;;  %3138 = vrot.lane.b32.xlu1 %v2701_v38, %s12646_s9  ;;  %v2698_v38 = vld [vmem:[%s12831_s17 + $0x10] sm:$0xff]  ;;  %s12651_s17 = smov 1  }
 0x244   : > { %v2558_v10 = vmul.f32 %v14273_v44, %v2457_v22  ;;  %v2559_v54 = vmul.f32 %v14278_v5, %v2521_v0  ;;  %3136 = vrot.lane.b32.xlu0 %v2700_v6, %s12646_s9  ;;  %5159 = vmatmul.mubr.bf16.gmra.mxu0 %v12327_v46  ;;  %v14438_v46 = vpop.f32.mrf.mxu0 }
 0x245   : > { %v2392_v4 = vpop.permute.xlu1 %2391  ;;  %5056 = vmatmul.mubr.bf16.gmra.mxu1 %v12330_v49  ;;  %5168 = vmatprep.mubr.bf16.mxu0 %v12331_v2  ;;  %v3656_v2 = vld [vmem:[%s16830_s2] sm:$0xff] }
 0x246   : > { %v11980_v45 = vpack.c.bf16 %v2558_v10, %v2556_v52  ;;  %v2390_v62 = vpop.permute.xlu0 %2389  ;;  %v11981_v18 = vpack.c.bf16 %v2559_v54, %v2557_v35  ;;  %5211 = vmatprep.mubr.bf16.mxu1 %v12336_v16 }
 0x247   : > { %3142 = vrot.lane.b32.xlu1 %v2703_v19, %s12646_s9  ;;  %v2454_v24 = vsel %vm2453_vm5, %v2390_v62, %v2392_v4  ;;  %v2518_v26 = vsel %vm2453_vm5, %v2392_v4, %v2390_v62  ;;  %v10986_v19 = vsel %vm3274_vm0, 1.0, %v16970_v53  ;;  %v3658_v4 = vld [vmem:[%s16830_s2 + $0x10] sm:$0xff]  ;;  %v12353_v53 = vld [vmem:[#allocation7 + $0x184] ss:$36 sps:$4 sm:$0xff]  }
 0x248   : > { %3140 = vrot.lane.b32.xlu0 %v2702_v27, %s12646_s9  ;;  %5191 = vmatprep.subr.bf16.mxu1 %v11981_v18  ;;  %v2552_v36 = vmul.f32 %v14273_v44, %v2454_v24  ;;  %v2553_v23 = vmul.f32 %v14278_v5, %v2518_v26  ;;  %v14429_v58 = vrot.slane %v10986_v19, %v16973_v25  ;;  %v3659_v18 = vld [vmem:[%s16830_s2 + $0x18] sm:$0xff]  ;;  %v3660_v26 = vld [vmem:[%s16830_s2 + $0x20] sm:$0xff] }
 0x249   : > { %5192 = vmatpush1.bf16.msra.mxu1 %v11980_v45  ;;  %v2396_v34 = vpop.permute.xlu1 %2395  ;;  %v14432_v33 = vrot.slane %v10986_v19, %v16972_v1  ;;  %v14454_v45 = vpop.f32.mrf.mxu0 }
 0x24a   : > { %v2394_v11 = vpop.permute.xlu0 %2393 }
 0x24b   : > { %v2455_v29 = vsel %vm2453_vm5, %v2394_v11, %v2396_v34  ;;  %v2519_v42 = vsel %vm2453_vm5, %v2396_v34, %v2394_v11  ;;  %2762 = vrot.lane.b32.xlu1 %v2697_v60, %s12645_s30  ;;  %v14462_v34 = vpop.f32.mrf.mxu0 }
 0x24c   : > { %v2554_v59 = vmul.f32 %v14273_v44, %v2455_v29  ;;  %v2555_v48 = vmul.f32 %v14278_v5, %v2519_v42  ;;  %2760 = vrot.lane.b32.xlu0 %v2696_v43, %s12645_s30  ;;  %5169 = vmatmul.mubr.bf16.gmra.mxu0 %v12333_v37  ;;  %v14406_v44 = vrot.slane %v10969_v61, %v16973_v25 }
 0x24d   : > { %v2819_v32 = vpop.permute.xlu1 %2818  ;;  %5324 = vmatprep.mubr.bf16.mxu0 %v16885_v7  ;;  %v14409_v5 = vrot.slane %v10969_v61, %v16972_v1  ;;  %v3662_v61 = vld [vmem:[%s16830_s2 + $0x30] sm:$0xff]  ;;  %v12351_v1 = vld [vmem:[#allocation7 + $0x138] ss:$36 sps:$4 sm:$0xff]  }
 0x24e   : > { %v11978_v51 = vpack.c.bf16 %v2554_v59, %v2552_v36  ;;  %v2817_v21 = vpop.permute.xlu0 %2816  ;;  %v11979_v9 = vpack.c.bf16 %v2555_v48, %v2553_v23  ;;  %v3661_v36 = vld [vmem:[%s16830_s2 + $0x28] sm:$0xff] }
 0x24f   : > { %2766 = vrot.lane.b32.xlu1 %v2699_v41, %s12645_s30  ;;  %v2839_v6 = vsel %vm2824_vm12, %v2817_v21, %v2819_v32  ;;  %v2903_v31 = vsel %vm2824_vm12, %v2819_v32, %v2817_v21  ;;  %v3663_v21 = vld [vmem:[%s16830_s2 + $0x38] sm:$0xff] }
 0x250   : > { %2764 = vrot.lane.b32.xlu0 %v2698_v38, %s12645_s30  ;;  %5193 = vmatprep.subr.bf16.mxu1 %v11979_v9  ;;  %v2948_v57 = vmul.f32 %v14406_v44, %v2839_v6  ;;  %v2949_v30 = vmul.f32 %v14409_v5, %v2903_v31  ;;  %s12565_s30 = sshll.u32 %s12656_s16, 4  ;;  %s12566_s30 = int_to_ptr.vmem [resolvable:$false] %s12565_s30 }
 0x251   : > { %5194 = vmatpush1.bf16.msra.mxu1 %v11978_v51  ;;  %v2823_v12 = vpop.permute.xlu1 %2822 }
 0x252   : > { %v2821_v47 = vpop.permute.xlu0 %2820 }
 0x253   : > { %v2840_v13 = vsel %vm2824_vm12, %v2821_v47, %v2823_v12  ;;  %v2904_v63 = vsel %vm2824_vm12, %v2823_v12, %v2821_v47  ;;  %3130 = vrot.lane.b32.xlu1 %v2697_v60, %s12646_s9  ;;  %v3664_v12 = vld [vmem:[%s16830_s2 + $0x40] sm:$0xff] }
 0x254   : > { %v2950_v3 = vmul.f32 %v14406_v44, %v2840_v13  ;;  %v2951_v50 = vmul.f32 %v14409_v5, %v2904_v63  ;;  %3128 = vrot.lane.b32.xlu0 %v2696_v43, %s12646_s9 }
 0x255   : > { %v3187_v14 = vpop.permute.xlu1 %3186 }
 0x256   : > { %v12008_v8 = vpack.c.bf16 %v2950_v3, %v2948_v57  ;;  %v3185_v27 = vpop.permute.xlu0 %3184  ;;  %v12009_v55 = vpack.c.bf16 %v2951_v50, %v2949_v30  ;;  %v3665_v30 = vld [vmem:[%s16830_s2 + $0x48] sm:$0xff] }
 0x257   : > { %3134 = vrot.lane.b32.xlu1 %v2699_v41, %s12646_s9  ;;  %v3207_v56 = vsel %vm3192_vm13, %v3185_v27, %v3187_v14  ;;  %v3271_v20 = vsel %vm3192_vm13, %v3187_v14, %v3185_v27 }
 0x258   : > { %3132 = vrot.lane.b32.xlu0 %v2698_v38, %s12646_s9  ;;  %5195 = vmatprep.subr.bf16.mxu1 %v12009_v55  ;;  %v3316_v0 = vmul.f32 %v14429_v58, %v3207_v56  ;;  %v3317_v35 = vmul.f32 %v14432_v33, %v3271_v20  ;;  %v14478_v38 = vpop.f32.mrf.mxu0  ;;  %s12567_s9 = scalar_lea.vmem %s12566_s30, 8192 }
 0x259   : > { %5196 = vmatpush2.bf16.msra.mxu1 %v12008_v8  ;;  %v3191_v49 = vpop.permute.xlu1 %3190 }
 0x25a   : > { %v3189_v17 = vpop.permute.xlu0 %3188  ;;  %v14486_v47 = vpop.f32.mrf.mxu0 }
 0x25b   : > { %v3208_v52 = vsel %vm3192_vm13, %v3189_v17, %v3191_v49  ;;  %v3272_v22 = vsel %vm3192_vm13, %v3191_v49, %v3189_v17  ;;  %3679 = vperm.xlu1 %12261, %v3657_v28   ;;  %v3666_v28 = vld [vmem:[%s16830_s2 + $0x50] sm:$0xff]  ;;  %v3667_v49 = vld [vmem:[%s16830_s2 + $0x58] sm:$0xff] }
 0x25c   : > { %v3318_v10 = vmul.f32 %v14429_v58, %v3208_v52  ;;  %v3319_v54 = vmul.f32 %v14432_v33, %v3272_v22  ;;  %3674 = vperm.xlu0 %12260, %v3656_v2   ;;  %v14502_v56 = vpop.f32.mrf.mxu0  ;;  %v3670_v22 = vld [vmem:[%s16830_s2 + $0x70] sm:$0xff] }
 0x25d   : > { %v2811_v62 = vpop.permute.xlu1 %2810 }
 0x25e   : > { %v12024_v24 = vpack.c.bf16 %v3318_v10, %v3316_v0  ;;  %v2809_v60 = vpop.permute.xlu0 %2808  ;;  %v12025_v37 = vpack.c.bf16 %v3319_v54, %v3317_v35  ;;  %v14510_v0 = vpop.f32.mrf.mxu0 }
 0x25f   : > { %3684 = vperm.xlu1 %12261, %v3658_v4   ;;  %v2837_v43 = vsel %vm2824_vm12, %v2809_v60, %v2811_v62  ;;  %v2901_v16 = vsel %vm2824_vm12, %v2811_v62, %v2809_v60  ;;  %v3671_v4 = vld [vmem:[%s16830_s2 + $0x78] sm:$0xff] }
 0x260   : > { %5292 = vmatprep.subr.bf16.mxu0 %v12025_v37  ;;  %3689 = vperm.xlu0 %12260, %v3659_v18   ;;  %v2944_v59 = vmul.f32 %v14406_v44, %v2837_v43  ;;  %v2945_v48 = vmul.f32 %v14409_v5, %v2901_v16  ;;  %v3668_v16 = vld [vmem:[%s16830_s2 + $0x60] sm:$0xff] }
 0x261   : > { %5293 = vmatpush1.bf16.msra.mxu0 %v12024_v24  ;;  %v2815_v11 = vpop.permute.xlu1 %2814 }
 0x262   : > { %v2813_v29 = vpop.permute.xlu0 %2812 }
 0x263   : > { %v2838_v42 = vsel %vm2824_vm12, %v2813_v29, %v2815_v11  ;;  %v2902_v23 = vsel %vm2824_vm12, %v2815_v11, %v2813_v29  ;;  %3694 = vperm.xlu1 %12261, %v3660_v26   ;;  %v14526_v11 = vpop.f32.mrf.mxu0  ;;  %v3669_v29 = vld [vmem:[%s16830_s2 + $0x68] sm:$0xff] }
 0x264   : > { %v2946_v41 = vmul.f32 %v14406_v44, %v2838_v42  ;;  %v2947_v32 = vmul.f32 %v14409_v5, %v2902_v23  ;;  %3699 = vperm.xlu0 %12260, %v3661_v36  }
 0x265   : > { %v3179_v51 = vpop.permute.xlu1 %3178 }
 0x266   : > { %v12006_v9 = vpack.c.bf16 %v2946_v41, %v2944_v59  ;;  %v3177_v6 = vpop.permute.xlu0 %3176  ;;  %v12007_v31 = vpack.c.bf16 %v2947_v32, %v2945_v48  ;;  %v14531_v48 = vpop.f32.mrf.mxu0 }
 0x267   : > { %3704 = vperm.xlu1 %12261, %v3662_v61   ;;  %v3205_v13 = vsel %vm3192_vm13, %v3177_v6, %v3179_v51  ;;  %v3269_v63 = vsel %vm3192_vm13, %v3179_v51, %v3177_v6 }
 0x268   : > { %5197 = vmatprep.subr.bf16.mxu1 %v12007_v31  ;;  %3709 = vperm.xlu0 %12260, %v3663_v21   ;;  %v3312_v19 = vmul.f32 %v14429_v58, %v3205_v13  ;;  %v3313_v8 = vmul.f32 %v14432_v33, %v3269_v63  ;;  %v14541_v63 = vpop.f32.mrf.mxu0 }
 0x269   : > { %5198 = vmatpush2.bf16.msra.mxu1 %v12006_v9  ;;  %v3183_v57 = vpop.permute.xlu1 %3182 }
 0x26a   : > { %v3181_v3 = vpop.permute.xlu0 %3180 }
 0x26b   : > { %v3206_v50 = vsel %vm3192_vm13, %v3181_v3, %v3183_v57  ;;  %v3270_v14 = vsel %vm3192_vm13, %v3183_v57, %v3181_v3  ;;  %3714 = vperm.xlu1 %12261, %v3664_v12  }
 0x26c   : > { %v3314_v27 = vmul.f32 %v14429_v58, %v3206_v50  ;;  %v3315_v55 = vmul.f32 %v14432_v33, %v3270_v14  ;;  %3719 = vperm.xlu0 %12260, %v3665_v30   ;;  %v14543_v14 = vpop.f32.mrf.mxu0 }
 0x26d   : > { %v2803_v20 = vpop.permute.xlu1 %2802 }
 0x26e   : > { %v12022_v2 = vpack.c.bf16 %v3314_v27, %v3312_v19  ;;  %v2801_v17 = vpop.permute.xlu0 %2800  ;;  %v12023_v52 = vpack.c.bf16 %v3315_v55, %v3313_v8 }
 0x26f   : > { %3724 = vperm.xlu1 %12261, %v3666_v28   ;;  %v2835_v35 = vsel %vm2824_vm12, %v2801_v17, %v2803_v20  ;;  %v2899_v10 = vsel %vm2824_vm12, %v2803_v20, %v2801_v17 }
 0x270   : > { %5294 = vmatprep.subr.bf16.mxu0 %v12023_v52  ;;  %3729 = vperm.xlu0 %12260, %v3667_v49   ;;  %v2940_v60 = vmul.f32 %v14406_v44, %v2835_v35  ;;  %v2941_v37 = vmul.f32 %v14409_v5, %v2899_v10 }
 0x271   : > { %5295 = vmatpush1.bf16.msra.mxu0 %v12022_v2  ;;  %v2807_v54 = vpop.permute.xlu1 %2806 }
 0x272   : > { %v2805_v62 = vpop.permute.xlu0 %2804 }
 0x273   : > { %v2836_v18 = vsel %vm2824_vm12, %v2805_v62, %v2807_v54  ;;  %v2900_v24 = vsel %vm2824_vm12, %v2807_v54, %v2805_v62  ;;  %3744 = vperm.xlu1 %12261, %v3670_v22   ;;  %v14553_v22 = vpop.f32.mrf.mxu0 }
 0x274   : > { %v2942_v26 = vmul.f32 %v14406_v44, %v2836_v18  ;;  %v2943_v43 = vmul.f32 %v14409_v5, %v2900_v24  ;;  %3749 = vperm.xlu0 %12260, %v3671_v4  }
 0x275   : > { %v3171_v36 = vpop.permute.xlu1 %3170  ;;  %v14555_v62 = vpop.f32.mrf.mxu0 }
 0x276   : > { %v12004_v42 = vpack.c.bf16 %v2942_v26, %v2940_v60  ;;  %v3169_v23 = vpop.permute.xlu0 %3168  ;;  %v12005_v59 = vpack.c.bf16 %v2943_v43, %v2941_v37 }
 0x277   : > { %3734 = vperm.xlu1 %12261, %v3668_v16   ;;  %v3203_v41 = vsel %vm3192_vm13, %v3169_v23, %v3171_v36  ;;  %v3267_v32 = vsel %vm3192_vm13, %v3171_v36, %v3169_v23  ;;  %v14565_v23 = vpop.f32.mrf.mxu0 }
 0x278   : > { %5199 = vmatprep.subr.bf16.mxu1 %v12005_v59  ;;  %3739 = vperm.xlu0 %12260, %v3669_v29   ;;  %v3308_v6 = vmul.f32 %v14429_v58, %v3203_v41  ;;  %v3309_v31 = vmul.f32 %v14432_v33, %v3267_v32 }
 0x279   : > { %5200 = vmatpush2.bf16.msra.mxu1 %v12004_v42  ;;  %v3175_v61 = vpop.permute.xlu1 %3174 }
 0x27a   : > { %v3173_v51 = vpop.permute.xlu0 %3172 }
 0x27b   : > { %v3204_v21 = vsel %vm3192_vm13, %v3173_v51, %v3175_v61  ;;  %v3268_v9 = vsel %vm3192_vm13, %v3175_v61, %v3173_v51  ;;  %v14567_v51 = vpop.f32.mrf.mxu0 }
 0x27c   : > { %v3310_v12 = vmul.f32 %v14429_v58, %v3204_v21  ;;  %v3311_v13 = vmul.f32 %v14432_v33, %v3268_v9 }
 0x27d   : > { %v2795_v57 = vpop.permute.xlu1 %2794 }
 0x27e   : > { %v12020_v30 = vpack.c.bf16 %v3310_v12, %v3308_v6  ;;  %v2793_v3 = vpop.permute.xlu0 %2792  ;;  %v12021_v50 = vpack.c.bf16 %v3311_v13, %v3309_v31 }
 0x27f   : > { %v2833_v19 = vsel %vm2824_vm12, %v2793_v3, %v2795_v57  ;;  %v2897_v8 = vsel %vm2824_vm12, %v2795_v57, %v2793_v3 }
 0x280   : > { %5296 = vmatprep.subr.bf16.mxu0 %v12021_v50  ;;  %v2936_v49 = vmul.f32 %v14406_v44, %v2833_v19  ;;  %v2937_v2 = vmul.f32 %v14409_v5, %v2897_v8  ;;  %v14577_v19 = vpop.f32.mrf.mxu0 }
 0x281   : > { %5297 = vmatpush1.bf16.msra.mxu0 %v12020_v30  ;;  %v2799_v27 = vpop.permute.xlu1 %2798 }
 0x282   : > { %v2797_v55 = vpop.permute.xlu0 %2796 }
 0x283   : > { %v2834_v28 = vsel %vm2824_vm12, %v2797_v55, %v2799_v27  ;;  %v2898_v20 = vsel %vm2824_vm12, %v2799_v27, %v2797_v55 }
 0x284   : > { %v2938_v17 = vmul.f32 %v14406_v44, %v2834_v28  ;;  %v2939_v52 = vmul.f32 %v14409_v5, %v2898_v20  ;;  %v14579_v20 = vpop.f32.mrf.mxu0 }
 0x285   : > { %v3163_v35 = vpop.permute.xlu1 %3162 }
 0x286   : > { %v12002_v10 = vpack.c.bf16 %v2938_v17, %v2936_v49  ;;  %v3161_v54 = vpop.permute.xlu0 %3160  ;;  %v12003_v4 = vpack.c.bf16 %v2939_v52, %v2937_v2 }
 0x287   : > { %v3201_v18 = vsel %vm3192_vm13, %v3161_v54, %v3163_v35  ;;  %v3265_v24 = vsel %vm3192_vm13, %v3163_v35, %v3161_v54 }
 0x288   : > { %5201 = vmatprep.subr.bf16.mxu1 %v12003_v4  ;;  %v3304_v16 = vmul.f32 %v14429_v58, %v3201_v18  ;;  %v3305_v36 = vmul.f32 %v14432_v33, %v3265_v24 }
 0x289   : > { %5202 = vmatpush2.bf16.msra.mxu1 %v12002_v10  ;;  %v3167_v60 = vpop.permute.xlu1 %3166 }
 0x28a   : > { %v3165_v37 = vpop.permute.xlu0 %3164 }
 0x28b   : > { %v3202_v26 = vsel %vm3192_vm13, %v3165_v37, %v3167_v60  ;;  %v3266_v43 = vsel %vm3192_vm13, %v3167_v60, %v3165_v37  ;;  %v14589_v60 = vpop.f32.mrf.mxu0 }
 0x28c   : > { %v3306_v29 = vmul.f32 %v14429_v58, %v3202_v26  ;;  %v3307_v42 = vmul.f32 %v14432_v33, %v3266_v43 }
 0x28d   : > { %v2787_v59 = vpop.permute.xlu1 %2786 }
 0x28e   : > { %v12018_v41 = vpack.c.bf16 %v3306_v29, %v3304_v16  ;;  %v2785_v32 = vpop.permute.xlu0 %2784  ;;  %v12019_v61 = vpack.c.bf16 %v3307_v42, %v3305_v36  ;;  %v14591_v36 = vpop.f32.mrf.mxu0 }
 0x28f   : > { %v2831_v21 = vsel %vm2824_vm12, %v2785_v32, %v2787_v59  ;;  %v2895_v9 = vsel %vm2824_vm12, %v2787_v59, %v2785_v32 }
 0x290   : > { %5298 = vmatprep.subr.bf16.mxu0 %v12019_v61  ;;  %v2932_v57 = vmul.f32 %v14406_v44, %v2831_v21  ;;  %v2933_v30 = vmul.f32 %v14409_v5, %v2895_v9 }
 0x291   : > { %5299 = vmatpush1.bf16.msra.mxu0 %v12018_v41  ;;  %v2791_v6 = vpop.permute.xlu1 %2790 }
 0x292   : > { %v2789_v31 = vpop.permute.xlu0 %2788 }
 0x293   : > { %v2832_v12 = vsel %vm2824_vm12, %v2789_v31, %v2791_v6  ;;  %v2896_v13 = vsel %vm2824_vm12, %v2791_v6, %v2789_v31 }
 0x294   : > { %v2934_v3 = vmul.f32 %v14406_v44, %v2832_v12  ;;  %v2935_v50 = vmul.f32 %v14409_v5, %v2896_v13  ;;  %v14601_v12 = vpop.f32.mrf.mxu0 }
 0x295   : > { %v3155_v8 = vpop.permute.xlu1 %3154 }
 0x296   : > { %v12000_v27 = vpack.c.bf16 %v2934_v3, %v2932_v57  ;;  %v3153_v55 = vpop.permute.xlu0 %3152  ;;  %v12001_v28 = vpack.c.bf16 %v2935_v50, %v2933_v30  ;;  %v14603_v50 = vpop.f32.mrf.mxu0 }
 0x297   : > { %v3199_v49 = vsel %vm3192_vm13, %v3153_v55, %v3155_v8  ;;  %v3263_v2 = vsel %vm3192_vm13, %v3155_v8, %v3153_v55  ;;  %17020 = vst [vmem:[#allocation19_spill] sm:$0xff] %v14603_v50  ;;  %v12361_v50 = vld [vmem:[#allocation7 + $0x214] ss:$36 sps:$4 sm:$0xff]  }
 0x298   : > { %5203 = vmatprep.subr.bf16.mxu1 %v12001_v28  ;;  %v3300_v54 = vmul.f32 %v14429_v58, %v3199_v49  ;;  %v3301_v4 = vmul.f32 %v14432_v33, %v3263_v2 }
 0x299   : > { %5204 = vmatpush2.bf16.msra.mxu1 %v12000_v27  ;;  %v3159_v17 = vpop.permute.xlu1 %3158 }
 0x29a   : > { %v3157_v52 = vpop.permute.xlu0 %3156 }
 0x29b   : > { %v3200_v35 = vsel %vm3192_vm13, %v3157_v52, %v3159_v17  ;;  %v3264_v10 = vsel %vm3192_vm13, %v3159_v17, %v3157_v52 }
 0x29c   : > { %v3302_v18 = vmul.f32 %v14429_v58, %v3200_v35  ;;  %v3303_v24 = vmul.f32 %v14432_v33, %v3264_v10 }
 0x29d   : > { %v2779_v37 = vpop.permute.xlu1 %2778 }
 0x29e   : > { %v12016_v26 = vpack.c.bf16 %v3302_v18, %v3300_v54  ;;  %v2777_v43 = vpop.permute.xlu0 %2776  ;;  %v12017_v16 = vpack.c.bf16 %v3303_v24, %v3301_v4  ;;  %v14613_v54 = vpop.f32.mrf.mxu0 }
 0x29f   : > { %v2829_v29 = vsel %vm2824_vm12, %v2777_v43, %v2779_v37  ;;  %v2893_v42 = vsel %vm2824_vm12, %v2779_v37, %v2777_v43 }
 0x2a0   : > { %5300 = vmatprep.subr.bf16.mxu0 %v12017_v16  ;;  %v2928_v21 = vmul.f32 %v14406_v44, %v2829_v29  ;;  %v2929_v9 = vmul.f32 %v14409_v5, %v2893_v42 }
 0x2a1   : > { %5301 = vmatpush1.bf16.msra.mxu0 %v12016_v26  ;;  %v2783_v59 = vpop.permute.xlu1 %2782  ;;  %v14615_v26 = vpop.f32.mrf.mxu0 }
 0x2a2   : > { %v2781_v41 = vpop.permute.xlu0 %2780  ;;  %17021 = vst [vmem:[#allocation24_spill] sm:$0xff] %v14615_v26 }
 0x2a3   : > { %v2830_v32 = vsel %vm2824_vm12, %v2781_v41, %v2783_v59  ;;  %v2894_v61 = vsel %vm2824_vm12, %v2783_v59, %v2781_v41 }
 0x2a4   : > { %v2930_v6 = vmul.f32 %v14406_v44, %v2830_v32  ;;  %v2931_v31 = vmul.f32 %v14409_v5, %v2894_v61 }
 0x2a5   : > { %v3147_v13 = vpop.permute.xlu1 %3146 }
 0x2a6   : > { %v11998_v57 = vpack.c.bf16 %v2930_v6, %v2928_v21  ;;  %v3145_v30 = vpop.permute.xlu0 %3144  ;;  %v11999_v3 = vpack.c.bf16 %v2931_v31, %v2929_v9  ;;  %v14625_v6 = vpop.f32.mrf.mxu0 }
 0x2a7   : > { %v3197_v8 = vsel %vm3192_vm13, %v3145_v30, %v3147_v13  ;;  %v3261_v27 = vsel %vm3192_vm13, %v3147_v13, %v3145_v30 }
 0x2a8   : > { %5205 = vmatprep.subr.bf16.mxu1 %v11999_v3  ;;  %v3296_v17 = vmul.f32 %v14429_v58, %v3197_v8  ;;  %v3297_v52 = vmul.f32 %v14432_v33, %v3261_v27  ;;  %v14627_v3 = vpop.f32.mrf.mxu0 }
 0x2a9   : > { %5206 = vmatpush2.bf16.msra.mxu1 %v11998_v57  ;;  %v3151_v55 = vpop.permute.xlu1 %3150  ;;  %17022 = vst [vmem:[#allocation27_spill] sm:$0xff] %v14627_v3  ;;  %v12359_v3 = vld [vmem:[#allocation7 + $0x1c8] ss:$36 sps:$4 sm:$0xff]  }
 0x2aa   : > { %v3149_v28 = vpop.permute.xlu0 %3148 }
 0x2ab   : > { %v3198_v49 = vsel %vm3192_vm13, %v3149_v28, %v3151_v55  ;;  %v3262_v2 = vsel %vm3192_vm13, %v3151_v55, %v3149_v28 }
 0x2ac   : > { %v3298_v35 = vmul.f32 %v14429_v58, %v3198_v49  ;;  %v3299_v10 = vmul.f32 %v14432_v33, %v3262_v2 }
 0x2ad   : > { %v2771_v4 = vpop.permute.xlu1 %2770 }
 0x2ae   : > { %v12014_v18 = vpack.c.bf16 %v3298_v35, %v3296_v17  ;;  %v2769_v24 = vpop.permute.xlu0 %2768  ;;  %v12015_v37 = vpack.c.bf16 %v3299_v10, %v3297_v52 }
 0x2af   : > { %v2827_v43 = vsel %vm2824_vm12, %v2769_v24, %v2771_v4  ;;  %v2891_v16 = vsel %vm2824_vm12, %v2771_v4, %v2769_v24  ;;  %v14637_v4 = vpop.f32.mrf.mxu0 }
 0x2b0   : > { %5302 = vmatprep.subr.bf16.mxu0 %v12015_v37  ;;  %v2924_v32 = vmul.f32 %v14406_v44, %v2827_v43  ;;  %v2925_v61 = vmul.f32 %v14409_v5, %v2891_v16 }
 0x2b1   : > { %5303 = vmatpush1.bf16.msra.mxu0 %v12014_v18  ;;  %v2775_v29 = vpop.permute.xlu1 %2774  ;;  %v14639_v16 = vpop.f32.mrf.mxu0 }
 0x2b2   : > { %v2773_v42 = vpop.permute.xlu0 %2772  ;;  %17023 = vst [vmem:[#allocation25_spill] sm:$0xff] %v14639_v16 }
 0x2b3   : > { %v2828_v59 = vsel %vm2824_vm12, %v2773_v42, %v2775_v29  ;;  %v2892_v41 = vsel %vm2824_vm12, %v2775_v29, %v2773_v42 }
 0x2b4   : > { %v2926_v21 = vmul.f32 %v14406_v44, %v2828_v59  ;;  %v2927_v9 = vmul.f32 %v14409_v5, %v2892_v41 }
 0x2b5   : > { %v3139_v31 = vpop.permute.xlu1 %3138 }
 0x2b6   : > { %v11996_v13 = vpack.c.bf16 %v2926_v21, %v2924_v32  ;;  %v3137_v57 = vpop.permute.xlu0 %3136  ;;  %v11997_v30 = vpack.c.bf16 %v2927_v9, %v2925_v61 }
 0x2b7   : > { %v3195_v8 = vsel %vm3192_vm13, %v3137_v57, %v3139_v31  ;;  %v3259_v27 = vsel %vm3192_vm13, %v3139_v31, %v3137_v57  ;;  %v14649_v57 = vpop.f32.mrf.mxu0 }
 0x2b8   : > { %5207 = vmatprep.subr.bf16.mxu1 %v11997_v30  ;;  %v3292_v17 = vmul.f32 %v14429_v58, %v3195_v8  ;;  %v3293_v52 = vmul.f32 %v14432_v33, %v3259_v27 }
 0x2b9   : > { %5208 = vmatpush2.bf16.msra.mxu1 %v11996_v13  ;;  %v3143_v55 = vpop.permute.xlu1 %3142 }
 0x2ba   : > { %v3141_v28 = vpop.permute.xlu0 %3140 }
 0x2bb   : > { %v3196_v49 = vsel %vm3192_vm13, %v3141_v28, %v3143_v55  ;;  %v3260_v2 = vsel %vm3192_vm13, %v3143_v55, %v3141_v28  ;;  %v12334_v28 = vld [vmem:[#allocation7 + $0x18] ss:$36 sps:$4 sm:$0xff]  }
 0x2bc   : > { %v3294_v35 = vmul.f32 %v14429_v58, %v3196_v49  ;;  %v3295_v10 = vmul.f32 %v14432_v33, %v3260_v2  ;;  %v14651_v49 = vpop.f32.mrf.mxu0 }
 0x2bd   : > { %v2763_v18 = vpop.permute.xlu1 %2762  ;;  %17024 = vst [vmem:[#allocation28_spill] sm:$0xff] %v14651_v49 }
 0x2be   : > { %v12012_v24 = vpack.c.bf16 %v3294_v35, %v3292_v17  ;;  %v2761_v37 = vpop.permute.xlu0 %2760  ;;  %v12013_v43 = vpack.c.bf16 %v3295_v10, %v3293_v52  ;;  %v12337_v35 = vld [vmem:[#allocation7 + $0x64] ss:$36 sps:$4 sm:$0xff]  }
 0x2bf   : > { %v2825_v29 = vsel %vm2824_vm12, %v2761_v37, %v2763_v18  ;;  %v2889_v42 = vsel %vm2824_vm12, %v2763_v18, %v2761_v37 }
 0x2c0   : > { %5304 = vmatprep.subr.bf16.mxu0 %v12013_v43  ;;  %v2920_v21 = vmul.f32 %v14406_v44, %v2825_v29  ;;  %v2921_v9 = vmul.f32 %v14409_v5, %v2889_v42  ;;  %v14661_v29 = vpop.f32.mrf.mxu0 }
 0x2c1   : > { %5305 = vmatpush1.bf16.msra.mxu0 %v12012_v24  ;;  %v2767_v59 = vpop.permute.xlu1 %2766 }
 0x2c2   : > { %v2765_v41 = vpop.permute.xlu0 %2764 }
 0x2c3   : > { %v2826_v32 = vsel %vm2824_vm12, %v2765_v41, %v2767_v59  ;;  %v2890_v61 = vsel %vm2824_vm12, %v2767_v59, %v2765_v41 }
 0x2c4   : > { %v2922_v31 = vmul.f32 %v14406_v44, %v2826_v32  ;;  %v2923_v13 = vmul.f32 %v14409_v5, %v2890_v61  ;;  %v12339_v61 = vld [vmem:[#allocation7 + $0x60] ss:$36 sps:$4 sm:$0xff]  }
 0x2c5   : > { %v3131_v30 = vpop.permute.xlu1 %3130 }
 0x2c6   : > { %v11994_v8 = vpack.c.bf16 %v2922_v31, %v2920_v21  ;;  %v3129_v27 = vpop.permute.xlu0 %3128  ;;  %v11995_v55 = vpack.c.bf16 %v2923_v13, %v2921_v9  ;;  %v12340_v21 = vld [vmem:[#allocation7 + $0x20] ss:$36 sps:$4 sm:$0xff]   ;;  %v14665_v9 = vpop.f32.mrf.mxu0  ;;  %v12341_v13 = vld [vmem:[#allocation7 + $0xac] ss:$36 sps:$4 sm:$0xff]  }
 0x2c7   : > { %v3193_v2 = vsel %vm3192_vm13, %v3129_v27, %v3131_v30  ;;  %v3257_v17 = vsel %vm3192_vm13, %v3131_v30, %v3129_v27  ;;  %17025 = vst [vmem:[#allocation14_spill] sm:$0xff] %v14665_v9  ;;  %v12357_v9 = vld [vmem:[#allocation7 + $0x1cc] ss:$36 sps:$4 sm:$0xff]  }
 0x2c8   : > { %5209 = vmatprep.subr.bf16.mxu1 %v11995_v55  ;;  %v3288_v18 = vmul.f32 %v14429_v58, %v3193_v2  ;;  %v3289_v24 = vmul.f32 %v14432_v33, %v3257_v17  ;;  %v12343_v17 = vld [vmem:[#allocation7 + $0xa8] ss:$36 sps:$4 sm:$0xff]  }
 0x2c9   : > { %5210 = vmatpush2.bf16.msra.mxu1 %v11994_v8  ;;  %v3135_v52 = vpop.permute.xlu1 %3134 }
 0x2ca   : > { %v3133_v44 = vpop.permute.xlu0 %3132 }
 0x2cb   : > { %v3194_v5 = vsel %vm3192_vm13, %v3133_v44, %v3135_v52  ;;  %v3258_v10 = vsel %vm3192_vm13, %v3135_v52, %v3133_v44  ;;  %v12344_v52 = vld [vmem:[#allocation7 + $0x68] ss:$36 sps:$4 sm:$0xff]  }
 0x2cc   : > { %v3290_v37 = vmul.f32 %v14429_v58, %v3194_v5  ;;  %v3291_v43 = vmul.f32 %v14432_v33, %v3258_v10  ;;  %5212 = vmatmul.mubr.bf16.vlgmr.msra.gmra.mxu1 %v12334_v28  ;;  %v4987_v42 = vpop.f32.mrf.mxu1  ;;  %v12345_v5 = vld [vmem:[#allocation7 + $0xf4] ss:$36 sps:$4 sm:$0xff]  }
 0x2cd   : > { %5221 = vmatprep.mubr.bf16.mxu1 %v12337_v35 }
 0x2ce   : > { %v12010_v59 = vpack.c.bf16 %v3290_v37, %v3288_v18  ;;  %v12011_v41 = vpack.c.bf16 %v3291_v43, %v3289_v24  ;;  %v14663_v32 = vpop.f32.mrf.mxu1 }
 0x2d0   : > { %5306 = vmatprep.subr.bf16.mxu0 %v12011_v41  ;;  %v4991_v31 = vpop.f32.mrf.mxu1 }
 0x2d1   : > { %5307 = vmatpush1.bf16.msra.mxu0 %v12010_v59 }
 0x2d2   : > { %v14667_v58 = vpop.f32.mrf.mxu1 }
 0x2d4   : > { %5222 = vmatmul.mubr.bf16.gmra.mxu1 %v12339_v61  ;;  %5325 = vmatmul.mubr.bf16.vlgmr.msra.gmra.mxu0 %v12340_v21  ;;  %v5100_v33 = vpop.f32.mrf.mxu0 }
 0x2d5   : > { %5231 = vmatprep.mubr.bf16.mxu1 %v12341_v13  ;;  %5334 = vmatprep.mubr.bf16.mxu0 %v16885_v7  ;;  %v4997_v30 = vpop.f32.mrf.mxu1 }
 0x2d6   : > { %v14670_v8 = vpop.permute.xlu1 %3679  ;;  %v14672_v27 = vpop.f32.mrf.mxu0 }
 0x2d7   : > { %v14674_v55 = vpop.permute.xlu0 %3674  ;;  %v4879_v28 = vadd.f32 %v14454_v45, %v14670_v8  ;;  %v14678_v2 = vpop.f32.mrf.mxu1 }
 0x2d8   : > { %v4875_v35 = vadd.f32 %v14424_v39, %v14674_v55  ;;  %v5104_v44 = vpop.f32.mrf.mxu0 }
 0x2d9   : > { %v4992_v10 = vadd.f32 %v4991_v31, %v4879_v28  ;;  %v5001_v18 = vpop.f32.mrf.mxu1 }
 0x2da   : > { %v14682_v24 = vpop.f32.mrf.mxu0  ;;  %v14684_v37 = vpop.permute.xlu1 %3684  ;;  %v4988_v43 = vadd.f32 %v4987_v42, %v4875_v35 }
 0x2db   : > { %v14686_v59 = vadd.f32 %v5104_v44, %v4992_v10  ;;  %v4885_v45 = vadd.f32 %v14478_v38, %v14684_v37  ;;  %v14690_v41 = vpop.permute.xlu0 %3689  ;;  %v14692_v61 = vpop.f32.mrf.mxu1  ;;  %v12348_v10 = vld [vmem:[#allocation7 + $0xb0] ss:$36 sps:$4 sm:$0xff]  }
 0x2dc   : > { %5232 = vmatmul.mubr.bf16.gmra.mxu1 %v12343_v17  ;;  %5335 = vmatmul.mubr.bf16.gmra.mxu0 %v12344_v52  ;;  %v5110_v39 = vpop.f32.mrf.mxu0  ;;  %v4889_v21 = vadd.f32 %v14502_v56, %v14690_v41  ;;  %v14697_v42 = vadd.f32 %v5100_v33, %v4988_v43  ;;  %v12349_v33 = vld [vmem:[#allocation7 + $0x13c] ss:$36 sps:$4 sm:$0xff]  }
 0x2dd   : > { %17026 = vst [vmem:[#allocation31_spill] sm:$0xff] %v14686_v59  ;;  %5241 = vmatprep.mubr.bf16.mxu1 %v12345_v5  ;;  %5344 = vmatprep.mubr.bf16.mxu0 %v16885_v7  ;;  %v5007_v31 = vpop.f32.mrf.mxu1  ;;  %v4998_v13 = vadd.f32 %v4997_v30, %v4885_v45  ;;  %v12347_v5 = vld [vmem:[#allocation7 + $0xf0] ss:$36 sps:$4 sm:$0xff]  }
 0x2de   : > { %17027 = vst [vmem:[#allocation17_spill] sm:$0xff] %v14697_v42  ;;  %v5002_v28 = vadd.f32 %v5001_v18, %v4889_v21  ;;  %v14699_v35 = vpop.f32.mrf.mxu0  ;;  %v14701_v38 = vpop.permute.xlu1 %3694 }
 0x2df   : > { %v14703_v44 = vpop.f32.mrf.mxu1  ;;  %v4895_v17 = vadd.f32 %v14526_v11, %v14701_v38  ;;  %v14707_v52 = vpop.permute.xlu0 %3699  ;;  %v14709_v56 = vadd.f32 %v5110_v39, %v4998_v13  ;;  %v17030_v13 = vmov 0  }
 0x2e0   : > { %v5114_v7 = vpop.f32.mrf.mxu0  ;;  %v4899_v30 = vadd.f32 %v14541_v63, %v14707_v52 }
 0x2e1   : > { %17028 = vst [vmem:[#allocation18_spill] sm:$0xff] %v14709_v56  ;;  %v14711_v43 = vadd.f32 %v5114_v7, %v5002_v28  ;;  %v5011_v18 = vpop.f32.mrf.mxu1  ;;  %v5008_v45 = vadd.f32 %v5007_v31, %v4895_v17 }
 0x2e2   : > { %v14715_v21 = vpop.f32.mrf.mxu0  ;;  %v14717_v40 = vpop.permute.xlu1 %3704  ;;  %v5012_v15 = vadd.f32 %v5011_v18, %v4899_v30 }
 0x2e3   : > { %17029 = vst [vmem:[#allocation16_spill] sm:$0xff] %v14711_v43  ;;  %v14719_v11 = vpop.f32.mrf.mxu1  ;;  %v4905_v28 = vadd.f32 %v14553_v22, %v14717_v40  ;;  %v14728_v17 = vpop.permute.xlu0 %3709 }
 0x2e4   : > { %5242 = vmatmul.mubr.bf16.gmra.mxu1 %v12347_v5  ;;  %5345 = vmatmul.mubr.bf16.gmra.mxu0 %v12348_v10  ;;  %v5120_v39 = vpop.f32.mrf.mxu0  ;;  %v12352_v5 = vld [vmem:[#allocation7 + $0xf8] ss:$36 sps:$4 sm:$0xff]   ;;  %v4909_v30 = vadd.f32 %v14565_v23, %v14728_v17 }
 0x2e5   : > { %5251 = vmatprep.mubr.bf16.mxu1 %v12349_v33  ;;  %5354 = vmatprep.mubr.bf16.mxu0 %v17030_v13  ;;  %v5017_v7 = vpop.f32.mrf.mxu1  ;;  %v14724_v63 = vadd.f32 %v5120_v39, %v5008_v45 }
 0x2e6   : > { %v14726_v31 = vpop.f32.mrf.mxu0  ;;  %v5018_v43 = vadd.f32 %v5017_v7, %v4905_v28  ;;  %v14738_v45 = vpop.permute.xlu1 %3714 }
 0x2e7   : > { %17031 = vst [vmem:[#allocation15_spill] sm:$0xff] %v14724_v63  ;;  %v14730_v25 = vpop.f32.mrf.mxu1  ;;  %v14745_v23 = vpop.permute.xlu0 %3719 }
 0x2e8   : > { %v5124_v10 = vpop.f32.mrf.mxu0 }
 0x2e9   : > { %v14732_v33 = vadd.f32 %v5124_v10, %v5012_v15  ;;  %v5021_v18 = vpop.f32.mrf.mxu1  ;;  %v4915_v10 = vadd.f32 %v14577_v19, %v14738_v45 }
 0x2ea   : > { %v14736_v22 = vpop.f32.mrf.mxu0  ;;  %v5022_v56 = vadd.f32 %v5021_v18, %v4909_v30  ;;  %v4919_v30 = vadd.f32 %v14589_v60, %v14745_v23 }
 0x2eb   : > { %17032 = vst [vmem:[#allocation26_spill] sm:$0xff] %v14732_v33  ;;  %v14740_v39 = vpop.f32.mrf.mxu1  ;;  %v14751_v33 = vpop.permute.xlu1 %3724 }
 0x2ec   : > { %5252 = vmatmul.mubr.bf16.gmra.mxu1 %v12351_v1  ;;  %5355 = vmatmul.mubr.bf16.gmra.mxu0 %v12352_v5  ;;  %v5130_v63 = vpop.f32.mrf.mxu0  ;;  %v12355_v1 = vld [vmem:[#allocation7 + $0x180] ss:$36 sps:$4 sm:$0xff]   ;;  %v4925_v60 = vadd.f32 %v14601_v12, %v14751_v33 }
 0x2ed   : > { %5261 = vmatprep.mubr.bf16.mxu1 %v12353_v53  ;;  %5364 = vmatprep.mubr.bf16.mxu0 %v17030_v13  ;;  %v5027_v15 = vpop.f32.mrf.mxu1  ;;  %v14747_v7 = vadd.f32 %v5130_v63, %v5018_v43  ;;  %v12356_v5 = vld [vmem:[#allocation7 + $0x140] ss:$36 sps:$4 sm:$0xff]   ;;  %v14761_v43 = vpop.permute.xlu0 %3729 }
 0x2ee   : > { %v14749_v28 = vpop.f32.mrf.mxu0  ;;  %v5028_v18 = vadd.f32 %v5027_v15, %v4915_v10  ;;  %17035 = vst [vmem:[#allocation30_spill] sm:$0xff] %v14761_v43 }
 0x2ef   : > { %17033 = vst [vmem:[#allocation21_spill] sm:$0xff] %v14747_v7  ;;  %v14753_v59 = vpop.f32.mrf.mxu1  ;;  %v14765_v16 = vpop.permute.xlu1 %3744 }
 0x2f0   : > { %v5134_v53 = vpop.f32.mrf.mxu0  ;;  %17037 = vst [vmem:[#allocation29_spill] sm:$0xff] %v14765_v16 }
 0x2f1   : > { %v14755_v42 = vadd.f32 %v5134_v53, %v5022_v56  ;;  %v5031_v19 = vpop.f32.mrf.mxu1  ;;  %v14776_v26 = vpop.permute.xlu0 %3749 }
 0x2f2   : > { %v14759_v49 = vpop.f32.mrf.mxu0  ;;  %v5032_v56 = vadd.f32 %v5031_v19, %v4919_v30  ;;  %v4929_v30 = vadd.f32 %v14613_v54, %v14761_v43 }
 0x2f3   : > { %17034 = vst [vmem:[#allocation32_spill] sm:$0xff] %v14755_v42  ;;  %v14763_v63 = vpop.f32.mrf.mxu1 }
 0x2f4   : > { %17036 = vst [vmem:[#allocation33_spill] sm:$0xff] %v14763_v63  ;;  %5262 = vmatmul.mubr.bf16.gmra.mxu1 %v12355_v1  ;;  %5365 = vmatmul.mubr.bf16.gmra.mxu0 %v12356_v5  ;;  %v5140_v7 = vpop.f32.mrf.mxu0  ;;  %v12360_v1 = vld [vmem:[#allocation7 + $0x188] ss:$36 sps:$4 sm:$0xff]  }
 0x2f5   : > { %5271 = vmatprep.mubr.bf16.mxu1 %v12357_v9  ;;  %5374 = vmatprep.mubr.bf16.mxu0 %v17030_v13  ;;  %v5037_v53 = vpop.f32.mrf.mxu1  ;;  %v14770_v15 = vadd.f32 %v5140_v7, %v5028_v18  ;;  %v14784_v7 = vpop.permute.xlu1 %3734 }
 0x2f6   : > { %v14772_v10 = vpop.f32.mrf.mxu0  ;;  %v5038_v63 = vadd.f32 %v5037_v53, %v4925_v60  ;;  %v14795_v60 = vpop.permute.xlu0 %3739 }
 0x2f7   : > { %17038 = vst [vmem:[#allocation35_spill] sm:$0xff] %v14770_v15  ;;  %v14774_v42 = vpop.f32.mrf.mxu1 }
 0x2f8   : > { %17039 = vst [vmem:[#allocation34_spill] sm:$0xff] %v14774_v42  ;;  %v5144_v5 = vpop.f32.mrf.mxu0 }
 0x2f9   : > { %v14778_v9 = vadd.f32 %v5144_v5, %v5032_v56  ;;  %v5041_v19 = vpop.f32.mrf.mxu1  ;;  %v4935_v5 = vadd.f32 %v14625_v6, %v14784_v7 }
 0x2fa   : > { %v14782_v12 = vpop.f32.mrf.mxu0  ;;  %v5042_v42 = vadd.f32 %v5041_v19, %v4929_v30 }
 0x2fb   : > { %17040 = vst [vmem:[#allocation37_spill] sm:$0xff] %v14778_v9  ;;  %17041 = vst [vmem:[#allocation38_spill] sm:$0xff] %v14782_v12  ;;  %v14786_v18 = vpop.f32.mrf.mxu1 }
 0x2fc   : > { %17042 = vst [vmem:[#allocation39_spill] sm:$0xff] %v14786_v18  ;;  %5272 = vmatmul.mubr.bf16.gmra.mxu1 %v12359_v3  ;;  %5375 = vmatmul.mubr.bf16.gmra.mxu0 %v12360_v1  ;;  %v5150_v15 = vpop.f32.mrf.mxu0  ;;  %v12363_v18 = vld [vmem:[#allocation7 + $0x210] ss:$36 sps:$4 sm:$0xff]  }
 0x2fd   : > { %5281 = vmatprep.mubr.bf16.mxu1 %v12361_v50  ;;  %5384 = vmatprep.mubr.bf16.mxu0 %v17030_v13  ;;  %v5047_v56 = vpop.f32.mrf.mxu1  ;;  %v14791_v54 = vadd.f32 %v5150_v15, %v5038_v63  ;;  %v12364_v3 = vld [vmem:[#allocation7 + $0x1d0] ss:$36 sps:$4 sm:$0xff]   ;;  %v4939_v50 = vadd.f32 %v14637_v4, %v14795_v60  ;;  %v12365_v4 = vld [vmem:[#allocation7 + $0x218] ss:$36 sps:$4 sm:$0xff]  }
 0x2fe   : > { %v14793_v53 = vpop.f32.mrf.mxu0  ;;  %v5048_v19 = vadd.f32 %v5047_v56, %v4935_v5 }
 0x2ff   : > { %17043 = vst [vmem:[#allocation40_spill] sm:$0xff] %v14791_v54  ;;  %v14797_v9 = vpop.f32.mrf.mxu1  ;;  %v4945_v54 = vadd.f32 %v14649_v57, %v14765_v16 }
 0x300   : > { %v5154_v1 = vpop.f32.mrf.mxu0 }
 0x301   : > { %v14799_v43 = vadd.f32 %v5154_v1, %v5042_v42  ;;  %v5051_v30 = vpop.f32.mrf.mxu1 }
 0x302   : > { %v14803_v12 = vpop.f32.mrf.mxu0  ;;  %v5052_v15 = vadd.f32 %v5051_v30, %v4939_v50 }
 0x303   : > { %17044 = vst [vmem:[#allocation41_spill] sm:$0xff] %v14799_v43  ;;  %17045 = vst [vmem:[#allocation42_spill] sm:$0xff] %v14803_v12  ;;  %v14805_v6 = vpop.f32.mrf.mxu1 }
 0x304   : > { %5282 = vmatmul.mubr.bf16.gmra.mxu1 %v12363_v18  ;;  %5385 = vmatmul.mubr.bf16.gmra.mxu0 %v12364_v3  ;;  %v5160_v63 = vpop.f32.mrf.mxu0  ;;  %v4949_v3 = vadd.f32 %v14661_v29, %v14776_v26 }
 0x305   : > { %5394 = vmatprep.mubr.bf16.mxu0 %v17030_v13  ;;  %v5057_v42 = vpop.f32.mrf.mxu1  ;;  %v14810_v1 = vadd.f32 %v5160_v63, %v5048_v19 }
 0x306   : > { %v14812_v43 = vpop.f32.mrf.mxu0  ;;  %v5058_v18 = vadd.f32 %v5057_v42, %v4945_v54  ;;  %v4877_v54 = vadd.f32 %v14438_v46, %v14674_v55  ;;  %v4881_v42 = vadd.f32 %v14462_v34, %v14670_v8  ;;  %v4887_v46 = vadd.f32 %v14486_v47, %v14684_v37 }
 0x307   : > { %17046 = vst [vmem:[#allocation43_spill] sm:$0xff] %v14810_v1  ;;  %v14814_v5 = vpop.f32.mrf.mxu1 }
 0x308   : > { %v5164_v56 = vpop.f32.mrf.mxu0  ;;  %17047 = vst [vmem:[#allocation44_spill] sm:$0xff] %v14814_v5 }
 0x309   : > { %v14816_v12 = vadd.f32 %v5164_v56, %v5052_v15  ;;  %v5061_v57 = vpop.f32.mrf.mxu1 }
 0x30a   : > { %v14820_v13 = vpop.f32.mrf.mxu0  ;;  %v5062_v19 = vadd.f32 %v5061_v57, %v4949_v3 }
 0x30b   : > { %v14828_v5 = vpop.f32.mrf.mxu1 }
 0x30c   : > { %5395 = vmatmul.mubr.bf16.gmra.mxu0 %v12365_v4  ;;  %v5170_v50 = vpop.f32.mrf.mxu0  ;;  %v4990_v4 = vadd.f32 %v14663_v32, %v4877_v54  ;;  %v4891_v54 = vadd.f32 %v14510_v0, %v14690_v41 }
 0x30d   : > { %v14822_v30 = vadd.f32 %v5170_v50, %v5058_v18  ;;  %v4994_v50 = vadd.f32 %v14667_v58, %v4881_v42 }
 0x30e   : > { %v14824_v63 = vpop.f32.mrf.mxu0 }
 0x30f   : > { %17048 = vst [vmem:[#allocation45_spill] sm:$0xff] %v14822_v30  ;;  %v5107_v32 = vadd.f32 %v14682_v24, %v4994_v50  ;;  %v4897_v24 = vadd.f32 %v14531_v48, %v14701_v38 }
 0x310   : > { %v5174_v1 = vpop.f32.mrf.mxu0 }
 0x311   : > { %v14826_v16 = vadd.f32 %v5174_v1, %v5062_v19  ;;  %v5103_v1 = vadd.f32 %v14672_v27, %v4990_v4  ;;  %v5000_v27 = vadd.f32 %v14678_v2, %v4887_v46 }
 0x312   : > { %v14839_v18 = vpop.f32.mrf.mxu0 }
 0x313   : > { %17049 = vst [vmem:[#allocation46_spill] sm:$0xff] %v14826_v16  ;;  %v5113_v41 = vadd.f32 %v14699_v35, %v5000_v27  ;;  %v4901_v35 = vadd.f32 %v14543_v14, %v14707_v52 }
 0x315   : > { %v5014_v14 = vadd.f32 %v14719_v11, %v4901_v35 }
 0x38c   : > { %v14832_v15 = vpop.f32.mrf.mxu1 }
 0x38e   : > { %v5215_v29 = vpop.f32.mrf.mxu1 }
 0x38f   : > { %v5216_v19 = vadd.f32 %v5215_v29, %v5103_v1  ;;  %v5004_v29 = vadd.f32 %v14692_v61, %v4891_v54 }
 0x390   : > { %v14837_v56 = vpop.f32.mrf.mxu1 }
 0x391   : > { %v5117_v48 = vadd.f32 %v14715_v21, %v5004_v29 }
 0x392   : > { %v5219_v3 = vpop.f32.mrf.mxu1 }
 0x393   : > { %v5220_v47 = vadd.f32 %v5219_v3, %v5107_v32 }
 0x394   : > { %v14845_v55 = vpop.f32.mrf.mxu1  ;;  %v14847_v57 = vpop.f32.mrf.mxu0 }
 0x396   : > { %v5225_v34 = vpop.f32.mrf.mxu1  ;;  %v5328_v8 = vpop.f32.mrf.mxu0 }
 0x397   : > { %v5329_v16 = vadd.f32 %v5328_v8, %v5216_v19  ;;  %v5226_v46 = vadd.f32 %v5225_v34, %v5113_v41 }
 0x398   : > { %v14853_v4 = vpop.f32.mrf.mxu1  ;;  %v14855_v58 = vpop.f32.mrf.mxu0 }
 0x399   : > { %vm5406_vm15 = vcmp.ge.f32.partialorder %v5329_v16, 0.0  ;;  %v5438_v37 = vmul.f32 0.2, %v5329_v16 }
 0x39a   : > { %v5229_v42 = vpop.f32.mrf.mxu1  ;;  %v5332_v30 = vpop.f32.mrf.mxu0 }
 0x39b   : > { %v14860_v1 = vsel %vm5406_vm15, %v5329_v16, %v5438_v37  ;;  %v5333_v0 = vadd.f32 %v5332_v30, %v5220_v47  ;;  %v5010_v16 = vadd.f32 %v14703_v44, %v4897_v24  ;;  %v5230_v34 = vadd.f32 %v5229_v42, %v5117_v48 }
 0x39c   : > { %v14863_v2 = vpop.f32.mrf.mxu1  ;;  %v14865_v50 = vpop.f32.mrf.mxu0  ;;  %5581 = vrot.lane.b32.xlu1 %v14860_v1, %s12648_s19  ;;  %v4907_v47 = vadd.f32 %v14555_v62, %v14717_v40  ;;  %v4911_v40 = vadd.f32 %v14567_v51, %v14728_v17 }
 0x39d   : > { %vm5408_vm1 = vcmp.ge.f32.partialorder %v5333_v0, 0.0  ;;  %v5440_v3 = vmul.f32 0.2, %v5333_v0  ;;  %v5123_v44 = vadd.f32 %v14726_v31, %v5010_v16 }
 0x39e   : > { %v5235_v61 = vpop.f32.mrf.mxu1  ;;  %v5338_v19 = vpop.f32.mrf.mxu0  ;;  %v5020_v62 = vadd.f32 %v14730_v25, %v4907_v47  ;;  %v5024_v25 = vadd.f32 %v14740_v39, %v4911_v40 }
 0x39f   : > { %v14871_v38 = vsel %vm5408_vm1, %v5333_v0, %v5440_v3  ;;  %v5339_v30 = vadd.f32 %v5338_v19, %v5226_v46  ;;  %v5236_v0 = vadd.f32 %v5235_v61, %v5123_v44  ;;  %v5127_v46 = vadd.f32 %v14736_v22, %v5014_v14 }
 0x3a0   : > { %v14875_v8 = vpop.f32.mrf.mxu1  ;;  %v14877_v32 = vpop.f32.mrf.mxu0  ;;  %5583 = vrot.lane.b32.xlu0 %v14871_v38, %s12648_s19  ;;  %v5133_v51 = vadd.f32 %v14749_v28, %v5020_v62  ;;  %v4917_v22 = vadd.f32 %v14579_v20, %v14738_v45  ;;  %v5137_v39 = vadd.f32 %v14759_v49, %v5024_v25  ;;  %v17054_v62 = vld [vmem:[#allocation33_spill] sm:$0xff] }
 0x3a1   : > { %vm5410_vm2 = vcmp.ge.f32.partialorder %v5339_v30, 0.0  ;;  %v5442_v54 = vmul.f32 0.2, %v5339_v30 }
 0x3a2   : > { %v5239_v27 = vpop.f32.mrf.mxu1  ;;  %v5342_v21 = vpop.f32.mrf.mxu0  ;;  %v5030_v20 = vadd.f32 %v14753_v59, %v4917_v22 }
 0x3a3   : > { %v5343_v37 = vadd.f32 %v5342_v21, %v5230_v34  ;;  %v14885_v52 = vsel %vm5410_vm2, %v5339_v30, %v5442_v54  ;;  %v5240_v16 = vadd.f32 %v5239_v27, %v5127_v46 }
 0x3a4   : > { %17050 = vst [vmem:[#allocation47_spill] sm:$0xff] %v14885_v52  ;;  %v14887_v29 = vpop.f32.mrf.mxu1  ;;  %v14889_v24 = vpop.f32.mrf.mxu0  ;;  %5585 = vrot.lane.b32.xlu1 %v14885_v52, %s12648_s19 }
 0x3a5   : > { %vm5412_vm4 = vcmp.ge.f32.partialorder %v5343_v37, 0.0  ;;  %v5444_v42 = vmul.f32 0.2, %v5343_v37 }
 0x3a6   : > { %v5245_v41 = vpop.f32.mrf.mxu1  ;;  %v5348_v31 = vpop.f32.mrf.mxu0 }
 0x3a7   : > { %v14896_v11 = vsel %vm5412_vm4, %v5343_v37, %v5444_v42  ;;  %v5349_v3 = vadd.f32 %v5348_v31, %v5236_v0  ;;  %v5246_v27 = vadd.f32 %v5245_v41, %v5133_v51  ;;  %v4921_v37 = vadd.f32 %v14591_v36, %v14745_v23  ;;  %v17055_v36 = vld [vmem:[#allocation19_spill] sm:$0xff] }
 0x3a8   : > { %17051 = vst [vmem:[#allocation48_spill] sm:$0xff] %v14896_v11  ;;  %v14899_v19 = vpop.f32.mrf.mxu1  ;;  %v14901_v61 = vpop.f32.mrf.mxu0  ;;  %5587 = vrot.lane.b32.xlu0 %v14896_v11, %s12648_s19  ;;  %v4927_v23 = vadd.f32 %v17055_v36, %v14751_v33  ;;  %v17058_v33 = vld [vmem:[#allocation34_spill] sm:$0xff]  ;;  %v17062_v36 = vld [vmem:[#allocation27_spill] sm:$0xff] }
 0x3a9   : > { %vm5414_vm7 = vcmp.ge.f32.partialorder %v5349_v3, 0.0  ;;  %v5446_v48 = vmul.f32 0.2, %v5349_v3 }
 0x3aa   : > { %v5249_v35 = vpop.f32.mrf.mxu1  ;;  %v5352_v30 = vpop.f32.mrf.mxu0 }
 0x3ab   : > { %v14907_v17 = vsel %vm5414_vm7, %v5349_v3, %v5446_v48  ;;  %v5353_v34 = vadd.f32 %v5352_v30, %v5240_v16  ;;  %v5250_v31 = vadd.f32 %v5249_v35, %v5137_v39  ;;  %v5034_v3 = vadd.f32 %v17054_v62, %v4921_v37  ;;  %v17060_v39 = vld [vmem:[#allocation30_spill] sm:$0xff] }
 0x3ac   : > { %17052 = vst [vmem:[#allocation49_spill] sm:$0xff] %v14907_v17  ;;  %v14911_v54 = vpop.f32.mrf.mxu1  ;;  %v14913_v21 = vpop.f32.mrf.mxu0  ;;  %5589 = vrot.lane.b32.xlu1 %v14907_v17, %s12648_s19  ;;  %v5143_v48 = vadd.f32 %v14772_v10, %v5030_v20  ;;  %v17061_v10 = vld [vmem:[#allocation24_spill] sm:$0xff] }
 0x3ad   : > { %vm5416_vm3 = vcmp.ge.f32.partialorder %v5353_v34, 0.0  ;;  %v5448_v44 = vmul.f32 0.2, %v5353_v34  ;;  %v4931_v37 = vadd.f32 %v17061_v10, %v17060_v39 }
 0x3ae   : > { %v5255_v47 = vpop.f32.mrf.mxu1  ;;  %v5358_v28 = vpop.f32.mrf.mxu0 }
 0x3af   : > { %v5359_v14 = vadd.f32 %v5358_v28, %v5246_v27  ;;  %v14921_v45 = vsel %vm5416_vm3, %v5353_v34, %v5448_v44  ;;  %v5256_v51 = vadd.f32 %v5255_v47, %v5143_v48  ;;  %v17057_v34 = vld [vmem:[#allocation38_spill] sm:$0xff]  ;;  %v5040_v44 = vadd.f32 %v17058_v33, %v4927_v23  ;;  %v17063_v48 = vld [vmem:[#allocation39_spill] sm:$0xff] }
 0x3b0   : > { %17053 = vst [vmem:[#allocation50_spill] sm:$0xff] %v14921_v45  ;;  %v14923_v0 = vpop.f32.mrf.mxu1  ;;  %v14925_v42 = vpop.f32.mrf.mxu0  ;;  %5591 = vrot.lane.b32.xlu0 %v14921_v45, %s12648_s19  ;;  %v5147_v27 = vadd.f32 %v17057_v34, %v5034_v3  ;;  %v4937_v23 = vadd.f32 %v17062_v36, %v14784_v7 }
 0x3b1   : > { %vm5418_vm5 = vcmp.ge.f32.partialorder %v5359_v14, 0.0  ;;  %v5450_v41 = vmul.f32 0.2, %v5359_v14  ;;  %v5153_v3 = vadd.f32 %v14793_v53, %v5040_v44  ;;  %v17065_v44 = vld [vmem:[#allocation25_spill] sm:$0xff] }
 0x3b2   : > { %v5259_v40 = vpop.f32.mrf.mxu1  ;;  %v5362_v49 = vpop.f32.mrf.mxu0  ;;  %v4941_v7 = vadd.f32 %v17065_v44, %v14795_v60  ;;  %v5050_v39 = vadd.f32 %v14797_v9, %v4937_v23  ;;  %v17068_v23 = vld [vmem:[#allocation29_spill] sm:$0xff] }
 0x3b3   : > { %v14932_v59 = vsel %vm5418_vm5, %v5359_v14, %v5450_v41  ;;  %v5363_v46 = vadd.f32 %v5362_v49, %v5250_v31  ;;  %v5260_v47 = vadd.f32 %v5259_v40, %v5147_v27 }
 0x3b4   : > { %17056 = vst [vmem:[#allocation33_spill] sm:$0xff] %v14932_v59  ;;  %v14935_v16 = vpop.f32.mrf.mxu1  ;;  %v14937_v35 = vpop.f32.mrf.mxu0  ;;  %5593 = vrot.lane.b32.xlu1 %v14932_v59, %s12648_s19  ;;  %v5163_v60 = vadd.f32 %v14812_v43, %v5050_v39  ;;  %v5054_v9 = vadd.f32 %v14805_v6, %v4941_v7  ;;  %v17072_v43 = vld [vmem:[#allocation14_spill] sm:$0xff] }
 0x3b5   : > { %vm5420_vm9 = vcmp.ge.f32.partialorder %v5363_v46, 0.0  ;;  %v5452_v30 = vmul.f32 0.2, %v5363_v46  ;;  %v4951_v6 = vadd.f32 %v17072_v43, %v14776_v26 }
 0x3b6   : > { %v5265_v25 = vpop.f32.mrf.mxu1  ;;  %v5368_v22 = vpop.f32.mrf.mxu0 }
 0x3b7   : > { %v14943_v28 = vsel %vm5420_vm9, %v5363_v46, %v5452_v30  ;;  %v5369_v14 = vadd.f32 %v5368_v22, %v5256_v51  ;;  %v5044_v30 = vadd.f32 %v17063_v48, %v4931_v37  ;;  %v5266_v33 = vadd.f32 %v5265_v25, %v5153_v3 }
 0x3b8   : > { %17059 = vst [vmem:[#allocation19_spill] sm:$0xff] %v14943_v28  ;;  %v14947_v20 = vpop.f32.mrf.mxu1  ;;  %v14949_v31 = vpop.f32.mrf.mxu0  ;;  %5595 = vrot.lane.b32.xlu0 %v14943_v28, %s12648_s19 }
 0x3b9   : > { %vm5422_vm11 = vcmp.ge.f32.partialorder %v5369_v14, 0.0  ;;  %v5454_v41 = vmul.f32 0.2, %v5369_v14 }
 0x3ba   : > { %v5269_v49 = vpop.f32.mrf.mxu1  ;;  %v5372_v62 = vpop.f32.mrf.mxu0 }
 0x3bb   : > { %v5373_v46 = vadd.f32 %v5372_v62, %v5260_v47  ;;  %v14957_v51 = vsel %vm5422_vm11, %v5369_v14, %v5454_v41  ;;  %v17067_v14 = vld [vmem:[#allocation42_spill] sm:$0xff] }
 0x3bc   : > { %17064 = vst [vmem:[#allocation38_spill] sm:$0xff] %v14957_v51  ;;  %v14959_v22 = vpop.f32.mrf.mxu1  ;;  %v14961_v34 = vpop.f32.mrf.mxu0  ;;  %5597 = vrot.lane.b32.xlu1 %v14957_v51, %s12648_s19  ;;  %v5157_v47 = vadd.f32 %v17067_v14, %v5044_v30 }
 0x3bd   : > { %vm5424_vm12 = vcmp.ge.f32.partialorder %v5373_v46, 0.0  ;;  %v5456_v40 = vmul.f32 0.2, %v5373_v46 }
 0x3be   : > { %v5275_v27 = vpop.f32.mrf.mxu1  ;;  %v5378_v53 = vpop.f32.mrf.mxu0  ;;  %v5270_v3 = vadd.f32 %v5269_v49, %v5157_v47  ;;  %v17071_v49 = vld [vmem:[#allocation17_spill] sm:$0xff] }
 0x3bf   : > { %v14968_v10 = vsel %vm5424_vm12, %v5373_v46, %v5456_v40  ;;  %v5379_v37 = vadd.f32 %v5378_v53, %v5266_v33  ;;  %v17069_v46 = vld [vmem:[#allocation28_spill] sm:$0xff]  ;;  %v5214_v14 = vadd.f32 %v14832_v15, %v17071_v49  ;;  %v5276_v47 = vadd.f32 %v5275_v27, %v5163_v60  ;;  %v17076_v49 = vld [vmem:[#allocation18_spill] sm:$0xff] }
 0x3c0   : > { %17066 = vst [vmem:[#allocation34_spill] sm:$0xff] %v14968_v10  ;;  %v14971_v41 = vpop.f32.mrf.mxu1  ;;  %v14973_v25 = vpop.f32.mrf.mxu0  ;;  %5599 = vrot.lane.b32.xlu0 %v14968_v10, %s12648_s19  ;;  %v4947_v33 = vadd.f32 %v17069_v46, %v17068_v23  ;;  %v17074_v10 = vld [vmem:[#allocation31_spill] sm:$0xff] }
 0x3c1   : > { %vm5426_vm14 = vcmp.ge.f32.partialorder %v5379_v37, 0.0  ;;  %v5458_v62 = vmul.f32 0.2, %v5379_v37  ;;  %v5327_v23 = vadd.f32 %v14847_v57, %v5214_v14 }
 0x3c2   : > { %v5279_v36 = vpop.f32.mrf.mxu1  ;;  %v5382_v48 = vpop.f32.mrf.mxu0 }
 0x3c3   : > { %v14981_v30 = vsel %vm5426_vm14, %v5379_v37, %v5458_v62  ;;  %v5383_v40 = vadd.f32 %v5382_v48, %v5270_v3  ;;  %v5167_v62 = vadd.f32 %v14820_v13, %v5054_v9  ;;  %v17073_v3 = vld [vmem:[#allocation44_spill] sm:$0xff]  ;;  %v5064_v13 = vadd.f32 %v14828_v5, %v4951_v6 }
 0x3c4   : > { %17070 = vst [vmem:[#allocation30_spill] sm:$0xff] %v14981_v30  ;;  %v14983_v53 = vpop.f32.mrf.mxu1  ;;  %v14985_v44 = vpop.f32.mrf.mxu0  ;;  %5601 = vrot.lane.b32.xlu1 %v14981_v30, %s12648_s19  ;;  %v5060_v48 = vadd.f32 %v17073_v3, %v4947_v33  ;;  %v5218_v30 = vadd.f32 %v14837_v56, %v17074_v10  ;;  %v5437_v56 = vmul.f32 0.2, %v5327_v23  ;;  %vm5405_vm15 = vcmp.ge.f32.partialorder %v5327_v23, 0.0 }
 0x3c5   : > { %vm5428_vm0 = vcmp.ge.f32.partialorder %v5383_v40, 0.0  ;;  %v5460_v7 = vmul.f32 0.2, %v5383_v40  ;;  %v5280_v27 = vadd.f32 %v5279_v36, %v5167_v62  ;;  %v5224_v36 = vadd.f32 %v14845_v55, %v17076_v49  ;;  %v17077_v62 = vld [vmem:[#allocation16_spill] sm:$0xff] }
 0x3c6   : > { %v5285_v39 = vpop.f32.mrf.mxu1  ;;  %v5388_v37 = vpop.f32.mrf.mxu0  ;;  %v5331_v60 = vadd.f32 %v14855_v58, %v5218_v30  ;;  %v5173_v33 = vadd.f32 %v14824_v63, %v5060_v48  ;;  %v5177_v30 = vadd.f32 %v14839_v18, %v5064_v13  ;;  %v5228_v3 = vadd.f32 %v14853_v4, %v17077_v62  ;;  %v17078_v18 = vld [vmem:[#allocation15_spill] sm:$0xff] }
 0x3c7   : > { %v5389_v46 = vadd.f32 %v5388_v37, %v5276_v47  ;;  %v14998_v51 = vsel %vm5428_vm0, %v5383_v40, %v5460_v7  ;;  %v5337_v63 = vadd.f32 %v14865_v50, %v5224_v36  ;;  %v15019_v7 = vsel %vm5405_vm15, %v5327_v23, %v5437_v56  ;;  %v17080_v56 = vld [vmem:[#allocation21_spill] sm:$0xff] }
 0x3c8   : > { %17075 = vst [vmem:[#allocation24_spill] sm:$0xff] %v14998_v51  ;;  %v15000_v15 = vpop.f32.mrf.mxu0  ;;  %5603 = vrot.lane.b32.xlu0 %v14998_v51, %s12648_s19  ;;  %v15006_v9 = vpop.f32.mrf.mxu1  ;;  %v5286_v5 = vadd.f32 %v5285_v39, %v5173_v33  ;;  %v5439_v47 = vmul.f32 0.2, %v5331_v60  ;;  %vm5407_vm2 = vcmp.ge.f32.partialorder %v5331_v60, 0.0  ;;  %v5234_v50 = vadd.f32 %v14863_v2, %v17078_v18  ;;  %v17079_v2 = vld [vmem:[#allocation26_spill] sm:$0xff]  ;;  %v17086_v18 = vld [vmem:[#allocation40_spill] sm:$0xff] }
 0x3c9   : > { %vm5430_vm13 = vcmp.ge.f32.partialorder %v5389_v46, 0.0  ;;  %v5462_v26 = vmul.f32 0.2, %v5389_v46  ;;  %vm5409_vm7 = vcmp.ge.f32.partialorder %v5337_v63, 0.0 }
 0x3ca   : > { %v5392_v57 = vpop.f32.mrf.mxu0  ;;  %v5289_v43 = vpop.f32.mrf.mxu1  ;;  %v5347_v13 = vadd.f32 %v14889_v24, %v5234_v50  ;;  %v5264_v50 = vadd.f32 %v14935_v16, %v17086_v18  ;;  %v12368_v18 = vld [vmem:[#allocation9 + $0x4] ss:$36 sps:$4 sm:$0xff]  }
 0x3cb   : > { %v15009_v10 = vsel %vm5430_vm13, %v5389_v46, %v5462_v26  ;;  %v5393_v40 = vadd.f32 %v5392_v57, %v5280_v27  ;;  %v5290_v39 = vadd.f32 %v5289_v43, %v5177_v30  ;;  %v15033_v46 = vsel %vm5407_vm2, %v5331_v60, %v5439_v47  ;;  %v17082_v47 = vld [vmem:[#allocation32_spill] sm:$0xff]  ;;  %10071 = vmatprep.mubr.bf16.mxu1 %v12368_v18 }
 0x3cc   : > { %v15013_v14 = vpop.f32.mrf.mxu0  ;;  %5605 = vrot.lane.b32.xlu1 %v15009_v10, %s12648_s19  ;;  %v5441_v27 = vmul.f32 0.2, %v5337_v63  ;;  %v5341_v26 = vadd.f32 %v14877_v32, %v5228_v3  ;;  %v5238_v60 = vadd.f32 %v14875_v8, %v17079_v2  ;;  %v5445_v36 = vmul.f32 0.2, %v5347_v13 }
 0x3cd   : > { %vm5432_vm1 = vcmp.ge.f32.partialorder %v5393_v40, 0.0  ;;  %v5464_v58 = vmul.f32 0.2, %v5393_v40  ;;  %vm5413_vm9 = vcmp.ge.f32.partialorder %v5347_v13, 0.0  ;;  %v5248_v8 = vadd.f32 %v14899_v19, %v17082_v47  ;;  %v17085_v19 = vld [vmem:[#allocation37_spill] sm:$0xff] }
 0x3ce   : > { %v5398_v6 = vpop.f32.mrf.mxu0  ;;  %v15047_v49 = vsel %vm5409_vm7, %v5337_v63, %v5441_v27  ;;  %vm5411_vm5 = vcmp.ge.f32.partialorder %v5341_v26, 0.0  ;;  %v5443_v24 = vmul.f32 0.2, %v5341_v26  ;;  %v5258_v3 = vadd.f32 %v14923_v0, %v17085_v19  ;;  %v17089_v27 = vld [vmem:[#allocation41_spill] sm:$0xff] }
 0x3cf   : > { %v15021_v55 = vsel %vm5432_vm1, %v5393_v40, %v5464_v58  ;;  %v5399_v37 = vadd.f32 %v5398_v6, %v5286_v5  ;;  %v5244_v40 = vadd.f32 %v14887_v29, %v17080_v56  ;;  %17081 = vst [vmem:[#allocation27_spill] sm:$0xff] %v15047_v49  ;;  %v5351_v5 = vadd.f32 %v14901_v61, %v5238_v60  ;;  %v17083_v29 = vld [vmem:[#allocation35_spill] sm:$0xff]  ;;  %v17093_v60 = vld [vmem:[#allocation45_spill] sm:$0xff] }
 0x3d0   : > { %v15025_v48 = vpop.f32.mrf.mxu0  ;;  %5607 = vrot.lane.b32.xlu0 %v15021_v55, %s12648_s19  ;;  %5645 = vrot.lane.b32.xlu1 %v15019_v7, %s12648_s19  ;;  %v5254_v63 = vadd.f32 %v14911_v54, %v17083_v29  ;;  %v15061_v43 = vsel %vm5411_vm5, %v5341_v26, %v5443_v24  ;;  %v5361_v61 = vadd.f32 %v14925_v42, %v5248_v8  ;;  %v17090_v26 = vld [vmem:[#allocation43_spill] sm:$0xff]  ;;  %v17098_v29 = vld [vmem:[#allocation38_spill] sm:$0xff] }
 0x3d1   : > { %vm5434_vm4 = vcmp.ge.f32.partialorder %v5399_v37, 0.0  ;;  %v5466_v23 = vmul.f32 0.2, %v5399_v37  ;;  %v5357_v58 = vadd.f32 %v14913_v21, %v5244_v40  ;;  %v15064_v21 = vsel %vm5413_vm9, %v5347_v13, %v5445_v36 }
 0x3d2   : > { %v5402_v4 = vpop.f32.mrf.mxu0  ;;  %17084 = vst [vmem:[#allocation39_spill] sm:$0xff] %v15064_v21  ;;  %v5447_v6 = vmul.f32 0.2, %v5351_v5  ;;  %v5367_v62 = vadd.f32 %v14937_v35, %v5254_v63  ;;  %vm5415_vm11 = vcmp.ge.f32.partialorder %v5351_v5, 0.0  ;;  %v5451_v54 = vmul.f32 0.2, %v5361_v61 }
 0x3d3   : > { %v15037_v57 = vsel %vm5434_vm4, %v5399_v37, %v5466_v23  ;;  %v5403_v33 = vadd.f32 %v5402_v4, %v5290_v39  ;;  %v5449_v37 = vmul.f32 0.2, %v5357_v58  ;;  %vm5417_vm12 = vcmp.ge.f32.partialorder %v5357_v58, 0.0  ;;  %v17099_v63 = vld [vmem:[#allocation34_spill] sm:$0xff] }
 0x3d4   : > { %5647 = vrot.lane.b32.xlu0 %v15033_v46, %s12648_s19  ;;  %5609 = vrot.lane.b32.xlu1 %v15037_v57, %s12648_s19  ;;  %v5371_v42 = vadd.f32 %v14949_v31, %v5258_v3  ;;  %v5377_v39 = vadd.f32 %v14961_v34, %v5264_v50  ;;  %v15077_v35 = vsel %vm5415_vm11, %v5351_v5, %v5447_v6  ;;  %vm5419_vm14 = vcmp.ge.f32.partialorder %v5361_v61, 0.0 }
 0x3d5   : > { %vm5436_vm3 = vcmp.ge.f32.partialorder %v5403_v33, 0.0  ;;  %v5468_v32 = vmul.f32 0.2, %v5403_v33  ;;  %17087 = vst [vmem:[#allocation25_spill] sm:$0xff] %v15077_v35  ;;  %v15079_v23 = vsel %vm5417_vm12, %v5357_v58, %v5449_v37  ;;  %v5453_v0 = vmul.f32 0.2, %v5367_v62 }
 0x3d6   : > { %17088 = vst [vmem:[#allocation42_spill] sm:$0xff] %v15079_v23  ;;  %vm5421_vm0 = vcmp.ge.f32.partialorder %v5367_v62, 0.0  ;;  %v5268_v16 = vadd.f32 %v14947_v20, %v17089_v27  ;;  %v5274_v31 = vadd.f32 %v14959_v22, %v17090_v26  ;;  %v15089_v34 = vsel %vm5419_vm14, %v5361_v61, %v5451_v54  ;;  %v17100_v61 = vld [vmem:[#allocation30_spill] sm:$0xff] }
 0x3d7   : > { %v15051_v30 = vsel %vm5436_vm3, %v5403_v33, %v5468_v32  ;;  %17091 = vst [vmem:[#allocation29_spill] sm:$0xff] %v15089_v34  ;;  %v5455_v4 = vmul.f32 0.2, %v5371_v42  ;;  %v5457_v13 = vmul.f32 0.2, %v5377_v39  ;;  %v15092_v2 = vsel %vm5421_vm0, %v5367_v62, %v5453_v0 }
 0x3d8   : > { %5611 = vrot.lane.b32.xlu0 %v15051_v30, %s12648_s19  ;;  %5649 = vrot.lane.b32.xlu1 %v15047_v49, %s12648_s19  ;;  %v5381_v33 = vadd.f32 %v14973_v25, %v5268_v16  ;;  %17092 = vst [vmem:[#allocation28_spill] sm:$0xff] %v15092_v2  ;;  %vm5423_vm13 = vcmp.ge.f32.partialorder %v5371_v42, 0.0  ;;  %vm5425_vm15 = vcmp.ge.f32.partialorder %v5377_v39, 0.0  ;;  %v5387_v20 = vadd.f32 %v14985_v44, %v5274_v31 }
 0x3d9   : > { %v5278_v22 = vadd.f32 %v14971_v41, %v14816_v12  ;;  %v5284_v56 = vadd.f32 %v14983_v53, %v17093_v60  ;;  %v15103_v40 = vsel %vm5423_vm13, %v5371_v42, %v5455_v4  ;;  %v15105_v25 = vsel %vm5425_vm15, %v5377_v39, %v5457_v13  ;;  %v17096_v12 = vld [vmem:[#allocation46_spill] sm:$0xff] }
 0x3da   : > { %17094 = vst [vmem:[#allocation17_spill] sm:$0xff] %v15103_v40  ;;  %17095 = vst [vmem:[#allocation14_spill] sm:$0xff] %v15105_v25  ;;  %v5459_v32 = vmul.f32 0.2, %v5381_v33  ;;  %vm5427_vm1 = vcmp.ge.f32.partialorder %v5381_v33, 0.0  ;;  %vm5429_vm2 = vcmp.ge.f32.partialorder %v5387_v20, 0.0  ;;  %v5288_v41 = vadd.f32 %v15006_v9, %v17096_v12 }
 0x3db   : > { %v5461_v24 = vmul.f32 0.2, %v5387_v20  ;;  %v5391_v44 = vadd.f32 %v15000_v15, %v5278_v22  ;;  %v5397_v36 = vadd.f32 %v15013_v14, %v5284_v56  ;;  %vm5677_vm15 = vcmask 138240  }
 0x3dc   : > { %5651 = vrot.lane.b32.xlu0 %v15061_v43, %s12648_s19  ;;  %5653 = vrot.lane.b32.xlu1 %v15064_v21, %s12648_s19  ;;  %v15115_v53 = vsel %vm5427_vm1, %v5381_v33, %v5459_v32  ;;  %v5401_v15 = vadd.f32 %v15025_v48, %v5288_v41 }
 0x3dd   : > { %17097 = vst [vmem:[#allocation44_spill] sm:$0xff] %v15115_v53  ;;  %v15117_v5 = vsel %vm5429_vm2, %v5387_v20, %v5461_v24  ;;  %v5463_v58 = vmul.f32 0.2, %v5391_v44  ;;  %v5465_v47 = vmul.f32 0.2, %v5397_v36  ;;  %vm5431_vm4 = vcmp.ge.f32.partialorder %v5391_v44, 0.0 }
 0x3de   : > { %vm5433_vm7 = vcmp.ge.f32.partialorder %v5397_v36, 0.0  ;;  %v5467_v9 = vmul.f32 0.2, %v5401_v15  ;;  %vm5435_vm3 = vcmp.ge.f32.partialorder %v5401_v15, 0.0 }
 0x3df   : > { %v15124_v14 = vsel %vm5431_vm4, %v5391_v44, %v5463_v58  ;;  %v15126_v8 = vsel %vm5433_vm7, %v5397_v36, %v5465_v47  ;;  %v12478_v44 = vld [vmem:[%s16833_s5] sm:$0x3]  ;;  %vm6050_vm4 = vcmask 130048  }
 0x3e0   : > { %5655 = vrot.lane.b32.xlu0 %v15077_v35, %s12648_s19  ;;  %5657 = vrot.lane.b32.xlu1 %v15079_v23, %s12648_s19  ;;  %v15132_v48 = vsel %vm5435_vm3, %v5401_v15, %v5467_v9  ;;  %vm5742_vm5 = vcmp.ge.s32.totalorder %v12478_v44, 1  ;;  %vm5743_vm9 = vcmp.lt.s32.totalorder %v12478_v44, 17  ;;  %v15290_v58 = vld [vmem:[%s16834_s6] sm:$0x3]  ;;  %v17104_v44 = vmov 0.0  }
 0x3e1   : > { %vm15283_vm11 = vmand %vm5742_vm5, %vm5743_vm9  ;;  %17103 = vst [vmem:[#allocation31_spill] sm:$0xff] %v15290_v58  ;;  %vm5745_vm12 = vcmp.ge.s32.totalorder %v15290_v58, 1  ;;  %vm5747_vm0 = vcmp.lt.s32.totalorder %v15290_v58, 17 }
 0x3e2   : > { %vm5746_vm14 = vmand %vm15283_vm11, %vm5745_vm12 }
 0x3e3   : > { %vm5748_vm13 = vmand %vm5746_vm14, %vm5747_vm0 }
 0x3e4   : > { %5659 = vrot.lane.b32.xlu0 %v15089_v34, %s12648_s19  ;;  %5661 = vrot.lane.b32.xlu1 %v15092_v2, %s12648_s19  ;;  %vm6115_vm1 = vmand %vm15283_vm11, %vm911_vm8 }
 0x3e5   : > { %vm6116_vm2 = vmand %vm6115_vm1, %vm913_vm10 }
 0x3e6   : > { %vm6853_vm14 = vmand %vm13920_vm6, %vm5745_vm12 }
 0x3e8   : > { %5663 = vrot.lane.b32.xlu0 %v15103_v40, %s12648_s19  ;;  %5665 = vrot.lane.b32.xlu1 %v15105_v25, %s12648_s19 }
 0x3ec   : > { %5667 = vrot.lane.b32.xlu0 %v15115_v53, %s12648_s19  ;;  %5669 = vrot.lane.b32.xlu1 %v15117_v5, %s12648_s19 }
 0x3f0   : > { %5671 = vrot.lane.b32.xlu0 %v15124_v14, %s12648_s19  ;;  %5673 = vrot.lane.b32.xlu1 %v15126_v8, %s12648_s19 }
 0x3f4   : > { %5675 = vrot.lane.b32.xlu0 %v15132_v48, %s12648_s19  ;;  %5954 = vrot.lane.b32.xlu1 %v14860_v1, %s12649_s10 }
 0x3f8   : > { %5956 = vrot.lane.b32.xlu0 %v14871_v38, %s12649_s10  ;;  %5958 = vrot.lane.b32.xlu1 %v14885_v52, %s12649_s10 }
 0x3fc   : > { %5960 = vrot.lane.b32.xlu0 %v14896_v11, %s12649_s10  ;;  %5962 = vrot.lane.b32.xlu1 %v14907_v17, %s12649_s10 }
 0x400   : > { %5964 = vrot.lane.b32.xlu0 %v14921_v45, %s12649_s10  ;;  %5966 = vrot.lane.b32.xlu1 %v14932_v59, %s12649_s10 }
 0x404   : > { %5968 = vrot.lane.b32.xlu0 %v14943_v28, %s12649_s10  ;;  %5970 = vrot.lane.b32.xlu1 %v17098_v29, %s12649_s10 }
 0x408   : > { %5972 = vrot.lane.b32.xlu0 %v17099_v63, %s12649_s10  ;;  %5974 = vrot.lane.b32.xlu1 %v17100_v61, %s12649_s10 }
 0x40c   : > { %5976 = vrot.lane.b32.xlu0 %v14998_v51, %s12649_s10  ;;  %5978 = vrot.lane.b32.xlu1 %v15009_v10, %s12649_s10 }
 0x40e   : > { %v15186_v6 = vpop.permute.xlu1 %5581 }
 0x410   : > { %5980 = vrot.lane.b32.xlu0 %v15021_v55, %s12649_s10  ;;  %5982 = vrot.lane.b32.xlu1 %v15037_v57, %s12649_s10 }
 0x412   : > { %v15192_v37 = vpop.permute.xlu0 %5583 }
 0x414   : > { %5984 = vrot.lane.b32.xlu0 %v15051_v30, %s12649_s10  ;;  %6046 = vrot.lane.b32.xlu1 %v15126_v8, %s12649_s10 }
 0x416   : > { %v15194_v62 = vpop.permute.xlu1 %5585 }
 0x418   : > { %6048 = vrot.lane.b32.xlu0 %v15132_v48, %s12649_s10  ;;  %6042 = vrot.lane.b32.xlu1 %v15117_v5, %s12649_s10 }
 0x41a   : > { %v15200_v19 = vpop.permute.xlu0 %5587 }
 0x41c   : > { %6044 = vrot.lane.b32.xlu0 %v15124_v14, %s12649_s10  ;;  %6038 = vrot.lane.b32.xlu1 %v15105_v25, %s12649_s10 }
 0x41e   : > { %v15202_v3 = vpop.permute.xlu1 %5589 }
 0x420   : > { %6040 = vrot.lane.b32.xlu0 %v15115_v53, %s12649_s10  ;;  %6034 = vrot.lane.b32.xlu1 %v15092_v2, %s12649_s10 }
 0x422   : > { %v15208_v50 = vpop.permute.xlu0 %5591 }
 0x424   : > { %6036 = vrot.lane.b32.xlu0 %v15103_v40, %s12649_s10  ;;  %6030 = vrot.lane.b32.xlu1 %v15079_v23, %s12649_s10 }
 0x426   : > { %v15210_v54 = vpop.permute.xlu1 %5593 }
 0x428   : > { %6032 = vrot.lane.b32.xlu0 %v15089_v34, %s12649_s10  ;;  %6026 = vrot.lane.b32.xlu1 %v15064_v21, %s12649_s10 }
 0x42a   : > { %v15216_v42 = vpop.permute.xlu0 %5595 }
 0x42c   : > { %6028 = vrot.lane.b32.xlu0 %v15077_v35, %s12649_s10  ;;  %6022 = vrot.lane.b32.xlu1 %v15047_v49, %s12649_s10 }
 0x42e   : > { %v15218_v39 = vpop.permute.xlu1 %5597 }
 0x430   : > { %6024 = vrot.lane.b32.xlu0 %v15061_v43, %s12649_s10  ;;  %6018 = vrot.lane.b32.xlu1 %v15019_v7, %s12649_s10 }
 0x432   : > { %v15224_v0 = vpop.permute.xlu0 %5599 }
 0x434   : > { %6020 = vrot.lane.b32.xlu0 %v15033_v46, %s12649_s10  ;;  %6350 = vrot.lane.b32.xlu1 %v15037_v57, %s12650_s29 }
 0x436   : > { %v15226_v27 = vpop.permute.xlu1 %5601 }
 0x438   : > { %6352 = vrot.lane.b32.xlu0 %v15051_v30, %s12650_s29  ;;  %6414 = vrot.lane.b32.xlu1 %v15126_v8, %s12650_s29 }
 0x43a   : > { %v15232_v16 = vpop.permute.xlu0 %5603 }
 0x43c   : > { %6416 = vrot.lane.b32.xlu0 %v15132_v48, %s12650_s29  ;;  %6346 = vrot.lane.b32.xlu1 %v15009_v10, %s12650_s29 }
 0x43e   : > { %v15234_v26 = vpop.permute.xlu1 %5605 }
 0x440   : > { %6348 = vrot.lane.b32.xlu0 %v15021_v55, %s12650_s29  ;;  %6410 = vrot.lane.b32.xlu1 %v15117_v5, %s12650_s29 }
 0x442   : > { %v5608_v31 = vpop.permute.xlu0 %5607  ;;  %v15240_v4 = vpop.permute.xlu1 %5645 }
 0x444   : > { %6412 = vrot.lane.b32.xlu0 %v15124_v14, %s12650_s29  ;;  %6342 = vrot.lane.b32.xlu1 %v17100_v61, %s12650_s29 }
 0x446   : > { %v15246_v13 = vpop.permute.xlu0 %5647  ;;  %v5610_v33 = vpop.permute.xlu1 %5609 }
 0x448   : > { %6344 = vrot.lane.b32.xlu0 %v14998_v51, %s12650_s29  ;;  %6406 = vrot.lane.b32.xlu1 %v15105_v25, %s12650_s29 }
 0x44a   : > { %v5612_v20 = vpop.permute.xlu0 %5611  ;;  %v15252_v22 = vpop.permute.xlu1 %5649 }
 0x44c   : > { %6408 = vrot.lane.b32.xlu0 %v15115_v53, %s12650_s29  ;;  %6338 = vrot.lane.b32.xlu1 %v17098_v29, %s12650_s29 }
 0x44e   : > { %v15258_v60 = vpop.permute.xlu0 %5651  ;;  %v15260_v56 = vpop.permute.xlu1 %5653 }
 0x450   : > { %6340 = vrot.lane.b32.xlu0 %v17099_v63, %s12650_s29  ;;  %6402 = vrot.lane.b32.xlu1 %v15092_v2, %s12650_s29 }
 0x452   : > { %v15266_v32 = vpop.permute.xlu0 %5655  ;;  %v15268_v24 = vpop.permute.xlu1 %5657 }
 0x454   : > { %6404 = vrot.lane.b32.xlu0 %v15103_v40, %s12650_s29  ;;  %6334 = vrot.lane.b32.xlu1 %v14932_v59, %s12650_s29 }
 0x456   : > { %v15277_v36 = vpop.permute.xlu0 %5659  ;;  %v15279_v12 = vpop.permute.xlu1 %5661 }
 0x458   : > { %6336 = vrot.lane.b32.xlu0 %v14943_v28, %s12650_s29  ;;  %6398 = vrot.lane.b32.xlu1 %v15079_v23, %s12650_s29  ;;  %v11219_v23 = vsel %vm5748_vm13, 1.0, %v17104_v44  ;;  %vm6854_vm13 = vmand %vm6853_vm14, %vm5747_vm0 }
 0x45a   : > { %v5664_v47 = vpop.permute.xlu0 %5663  ;;  %v5666_v15 = vpop.permute.xlu1 %5665 }
 0x45c   : > { %6400 = vrot.lane.b32.xlu0 %v15089_v34, %s12650_s29  ;;  %6330 = vrot.lane.b32.xlu1 %v14907_v17, %s12650_s29  ;;  %v17105_v17 = vld [vmem:[#allocation22_spill] sm:$0xff] }
 0x45d   : > { %v15315_v40 = vrot.slane %v11219_v23, %v17105_v17 }
 0x45e   : > { %v5668_v9 = vpop.permute.xlu0 %5667  ;;  %v5670_v18 = vpop.permute.xlu1 %5669 }
 0x45f   : > { %v5690_v29 = vsel %vm5677_vm15, %v5670_v18, %v15234_v26 }
 0x460   : > { %6332 = vrot.lane.b32.xlu0 %v14921_v45, %s12650_s29  ;;  %6394 = vrot.lane.b32.xlu1 %v15064_v21, %s12650_s29  ;;  %v17106_v21 = vld [vmem:[#allocation23_spill] sm:$0xff] }
 0x461   : > { %v15322_v63 = vrot.slane %v11219_v23, %v17106_v21 }
 0x462   : > { %v5672_v28 = vpop.permute.xlu0 %5671  ;;  %v5674_v59 = vpop.permute.xlu1 %5673 }
 0x463   : > { %v5691_v34 = vsel %vm5677_vm15, %v5672_v28, %v5608_v31  ;;  %v5692_v2 = vsel %vm5677_vm15, %v5674_v59, %v5610_v33  ;;  %v5740_v45 = vsel %vm5677_vm15, %v5610_v33, %v5674_v59 }
 0x464   : > { %6396 = vrot.lane.b32.xlu0 %v15077_v35, %s12650_s29  ;;  %6326 = vrot.lane.b32.xlu1 %v14885_v52, %s12650_s29  ;;  %v5739_v35 = vsel %vm5677_vm15, %v5608_v31, %v5672_v28  ;;  %v5789_v25 = vmul.f32 %v15315_v40, %v5691_v34  ;;  %v5790_v33 = vmul.f32 %v15322_v63, %v5740_v45 }
 0x465   : > { %v5791_v52 = vmul.f32 %v15315_v40, %v5692_v2  ;;  %v5689_v28 = vsel %vm5677_vm15, %v5668_v9, %v15232_v16  ;;  %v5738_v34 = vsel %vm5677_vm15, %v15234_v26, %v5670_v18  ;;  %v5787_v45 = vmul.f32 %v15315_v40, %v5690_v29 }
 0x466   : > { %v5676_v58 = vpop.permute.xlu0 %5675  ;;  %v15326_v53 = vpop.permute.xlu1 %5954  ;;  %v5687_v26 = vsel %vm5677_vm15, %v5664_v47, %v15224_v0 }
 0x467   : > { %v5693_v51 = vsel %vm5677_vm15, %v5676_v58, %v5612_v20  ;;  %v5741_v59 = vsel %vm5677_vm15, %v5612_v20, %v5676_v58  ;;  %v5688_v58 = vsel %vm5677_vm15, %v5666_v15, %v15226_v27  ;;  %v12039_v29 = vpack.c.bf16 %v5789_v25, %v5787_v45 }
 0x468   : > { %v5792_v23 = vmul.f32 %v15322_v63, %v5741_v59  ;;  %v5793_v61 = vmul.f32 %v15315_v40, %v5693_v51  ;;  %6328 = vrot.lane.b32.xlu0 %v14896_v11, %s12650_s29  ;;  %6390 = vrot.lane.b32.xlu1 %v15047_v49, %s12650_s29  ;;  %v5788_v59 = vmul.f32 %v15322_v63, %v5739_v35 }
 0x469   : > { %v5737_v11 = vsel %vm5677_vm15, %v15232_v16, %v5668_v9  ;;  %v5785_v49 = vmul.f32 %v15315_v40, %v5689_v28  ;;  %v5736_v35 = vsel %vm5677_vm15, %v15226_v27, %v5666_v15  ;;  %v5686_v25 = vsel %vm5677_vm15, %v15279_v12, %v15218_v39 }
 0x46a   : > { %v12040_v31 = vpack.c.bf16 %v5792_v23, %v5790_v33  ;;  %v15345_v2 = vpop.permute.xlu0 %5956  ;;  %v15347_v20 = vpop.permute.xlu1 %5958  ;;  %v12041_v51 = vpack.c.bf16 %v5793_v61, %v5791_v52  ;;  %v5786_v52 = vmul.f32 %v15322_v63, %v5738_v34  ;;  %v5783_v61 = vmul.f32 %v15315_v40, %v5688_v58 }
 0x46b   : > { %v5784_v18 = vmul.f32 %v15322_v63, %v5737_v11  ;;  %v5735_v23 = vsel %vm5677_vm15, %v15224_v0, %v5664_v47  ;;  %v5781_v28 = vmul.f32 %v15315_v40, %v5687_v26  ;;  %v5685_v15 = vsel %vm5677_vm15, %v15277_v36, %v15216_v42 }
 0x46c   : > { %6392 = vrot.lane.b32.xlu0 %v15061_v43, %s12650_s29  ;;  %10039 = vmatprep.subr.bf16.mxu1 %v12041_v51  ;;  %v12038_v33 = vpack.c.bf16 %v5788_v59, %v5786_v52  ;;  %v12037_v27 = vpack.c.bf16 %v5785_v49, %v5783_v61  ;;  %v5782_v34 = vmul.f32 %v15322_v63, %v5736_v35 }
 0x46d   : > { %6322 = vrot.lane.b32.xlu1 %v14860_v1, %s12650_s29  ;;  %10040 = vmatpush1.bf16.msra.mxu1 %v12040_v31  ;;  %v5734_v11 = vsel %vm5677_vm15, %v15218_v39, %v15279_v12  ;;  %v5779_v0 = vmul.f32 %v15315_v40, %v5686_v25  ;;  %v5684_v45 = vsel %vm5677_vm15, %v15268_v24, %v15210_v54 }
 0x46e   : > { %v15365_v16 = vpop.permute.xlu0 %5960  ;;  %10041 = vmatprep.subr.bf16.mxu1 %v12039_v29  ;;  %v15367_v9 = vpop.permute.xlu1 %5962  ;;  %v5780_v31 = vmul.f32 %v15322_v63, %v5735_v23  ;;  %v12036_v51 = vpack.c.bf16 %v5784_v18, %v5782_v34  ;;  %v5733_v58 = vsel %vm5677_vm15, %v15216_v42, %v15277_v36  ;;  %v5777_v39 = vmul.f32 %v15315_v40, %v5685_v15 }
 0x46f   : > { %v12035_v12 = vpack.c.bf16 %v5781_v28, %v5779_v0  ;;  %v5683_v59 = vsel %vm5677_vm15, %v15266_v32, %v15208_v50  ;;  %v5778_v29 = vmul.f32 %v15322_v63, %v5734_v11  ;;  %v5732_v42 = vsel %vm5677_vm15, %v15210_v54, %v15268_v24 }
 0x470   : > { %6324 = vrot.lane.b32.xlu0 %v14871_v38, %s12650_s29  ;;  %v5775_v36 = vmul.f32 %v15315_v40, %v5684_v45  ;;  %v5682_v35 = vsel %vm5677_vm15, %v15260_v56, %v15202_v3  ;;  %v5776_v61 = vmul.f32 %v15322_v63, %v5733_v58  ;;  %v5731_v18 = vsel %vm5677_vm15, %v15208_v50, %v15266_v32 }
 0x471   : > { %6386 = vrot.lane.b32.xlu1 %v15019_v7, %s12650_s29  ;;  %10042 = vmatpush1.bf16.msra.mxu1 %v12038_v33  ;;  %v12034_v25 = vpack.c.bf16 %v5780_v31, %v5778_v29  ;;  %v5773_v54 = vmul.f32 %v15315_v40, %v5683_v59  ;;  %v5681_v33 = vsel %vm5677_vm15, %v15258_v60, %v15200_v19 }
 0x472   : > { %v15388_v47 = vpop.permute.xlu0 %5964  ;;  %10043 = vmatprep.subr.bf16.mxu1 %v12037_v27  ;;  %v15390_v49 = vpop.permute.xlu1 %5966  ;;  %v12033_v24 = vpack.c.bf16 %v5777_v39, %v5775_v36  ;;  %v5774_v23 = vmul.f32 %v15322_v63, %v5732_v42  ;;  %v5730_v50 = vsel %vm5677_vm15, %v15202_v3, %v15260_v56  ;;  %v5771_v32 = vmul.f32 %v15315_v40, %v5682_v35 }
 0x473   : > { %v5680_v15 = vsel %vm5677_vm15, %v15252_v22, %v15194_v62  ;;  %v5772_v34 = vmul.f32 %v15322_v63, %v5731_v18  ;;  %v5729_v0 = vsel %vm5677_vm15, %v15200_v19, %v15258_v60  ;;  %v5769_v3 = vmul.f32 %v15315_v40, %v5681_v33 }
 0x474   : > { %6388 = vrot.lane.b32.xlu0 %v15033_v46, %s12650_s29  ;;  %v12032_v11 = vpack.c.bf16 %v5776_v61, %v5774_v23  ;;  %v12031_v56 = vpack.c.bf16 %v5773_v54, %v5771_v32  ;;  %v5679_v45 = vsel %vm5677_vm15, %v15246_v13, %v15192_v37  ;;  %v5770_v31 = vmul.f32 %v15322_v63, %v5730_v50 }
 0x475   : > { %6720 = vrot.lane.b32.xlu1 %v15037_v57, %s12651_s17  ;;  %10044 = vmatpush1.bf16.msra.mxu1 %v12036_v51  ;;  %v5728_v19 = vsel %vm5677_vm15, %v15194_v62, %v15252_v22  ;;  %v5767_v60 = vmul.f32 %v15315_v40, %v5680_v15  ;;  %v5768_v59 = vmul.f32 %v15322_v63, %v5729_v0 }
 0x476   : > { %v15412_v26 = vpop.permute.xlu0 %5968  ;;  %10045 = vmatprep.subr.bf16.mxu1 %v12035_v12  ;;  %v15414_v52 = vpop.permute.xlu1 %5970  ;;  %v5678_v12 = vsel %vm5677_vm15, %v15240_v4, %v15186_v6  ;;  %v12030_v29 = vpack.c.bf16 %v5772_v34, %v5770_v31  ;;  %v5727_v62 = vsel %vm5677_vm15, %v15192_v37, %v15246_v13  ;;  %v5765_v22 = vmul.f32 %v15315_v40, %v5679_v45 }
 0x477   : > { %v12029_v42 = vpack.c.bf16 %v5769_v3, %v5767_v60  ;;  %v5766_v36 = vmul.f32 %v15322_v63, %v5728_v19  ;;  %v5726_v35 = vsel %vm5677_vm15, %v15186_v6, %v15240_v4  ;;  %v5763_v37 = vmul.f32 %v15315_v40, %v5678_v12 }
 0x478   : > { %6722 = vrot.lane.b32.xlu0 %v15051_v30, %s12651_s17  ;;  %v5762_v33 = vmul.f32 %v15322_v63, %v5726_v35  ;;  %vm6788_vm15 = vcmask 7168  }
 0x479   : > { %6784 = vrot.lane.b32.xlu1 %v15126_v8, %s12651_s17  ;;  %10046 = vmatpush1.bf16.msra.mxu1 %v12034_v25  ;;  %v5764_v25 = vmul.f32 %v15322_v63, %v5727_v62  ;;  %v12028_v18 = vpack.c.bf16 %v5768_v59, %v5766_v36  ;;  %v12027_v54 = vpack.c.bf16 %v5765_v22, %v5763_v37 }
 0x47a   : > { %v15436_v28 = vpop.permute.xlu0 %5972  ;;  %10047 = vmatprep.subr.bf16.mxu1 %v12033_v24  ;;  %v15438_v27 = vpop.permute.xlu1 %5974  ;;  %v11236_v24 = vsel %vm6116_vm2, 1.0, %v17104_v44  ;;  %vm7284_vm2 = vcmask 1039360  }
 0x47b   : > { %v12026_v4 = vpack.c.bf16 %v5764_v25, %v5762_v33  ;;  %v15493_v23 = vrot.slane %v11236_v24, %v17106_v21  ;;  %v15496_v50 = vrot.slane %v11236_v24, %v17105_v17 }
 0x47c   : > { %6786 = vrot.lane.b32.xlu0 %v15132_v48, %s12651_s17 }
 0x47d   : > { %7276 = vrot.lane.b32.xlu1 %v15126_v8, %s12652_s18  ;;  %10048 = vmatpush1.bf16.msra.mxu1 %v12032_v11 }
 0x47e   : > { %v15460_v51 = vpop.permute.xlu0 %5976  ;;  %10049 = vmatprep.subr.bf16.mxu1 %v12031_v56  ;;  %v5979_v58 = vpop.permute.xlu1 %5978 }
 0x480   : > { %7278 = vrot.lane.b32.xlu0 %v15037_v57, %s12652_s18 }
 0x481   : > { %7280 = vrot.lane.b32.xlu1 %v15132_v48, %s12652_s18  ;;  %10050 = vmatpush1.bf16.msra.mxu1 %v12030_v29 }
 0x482   : > { %v5981_v13 = vpop.permute.xlu0 %5980  ;;  %10051 = vmatprep.subr.bf16.mxu1 %v12029_v42  ;;  %v5983_v61 = vpop.permute.xlu1 %5982 }
 0x484   : > { %7282 = vrot.lane.b32.xlu0 %v15051_v30, %s12652_s18 }
 0x485   : > { %6716 = vrot.lane.b32.xlu1 %v15009_v10, %s12651_s17  ;;  %10052 = vmatpush1.bf16.msra.mxu1 %v12028_v18 }
 0x486   : > { %v5985_v40 = vpop.permute.xlu0 %5984  ;;  %10053 = vmatprep.subr.bf16.mxu1 %v12027_v54  ;;  %v6047_v6 = vpop.permute.xlu1 %6046 }
 0x487   : > { %v6113_v32 = vsel %vm6050_vm4, %v5983_v61, %v6047_v6  ;;  %v6065_v63 = vsel %vm6050_vm4, %v6047_v6, %v5983_v61 }
 0x488   : > { %6718 = vrot.lane.b32.xlu0 %v15021_v55, %s12651_s17  ;;  %v6158_v11 = vmul.f32 %v15493_v23, %v6113_v32  ;;  %v6159_v56 = vmul.f32 %v15496_v50, %v6065_v63 }
 0x489   : > { %6780 = vrot.lane.b32.xlu1 %v15117_v5, %s12651_s17  ;;  %10054 = vmatpush1.bf16.msra.mxu1 %v12026_v4 }
 0x48a   : > { %v6049_v15 = vpop.permute.xlu0 %6048  ;;  %v6043_v34 = vpop.permute.xlu1 %6042 }
 0x48b   : > { %v6066_v0 = vsel %vm6050_vm4, %v6049_v15, %v5985_v40  ;;  %v6114_v3 = vsel %vm6050_vm4, %v5985_v40, %v6049_v15  ;;  %v6111_v19 = vsel %vm6050_vm4, %v5979_v58, %v6043_v34  ;;  %v6063_v60 = vsel %vm6050_vm4, %v6043_v34, %v5979_v58  ;;  %v17108_v34 = vld [vmem:[#allocation30_spill] sm:$0xff] }
 0x48c   : > { %v6160_v45 = vmul.f32 %v15493_v23, %v6114_v3  ;;  %v6161_v31 = vmul.f32 %v15496_v50, %v6066_v0  ;;  %6782 = vrot.lane.b32.xlu0 %v15124_v14, %s12651_s17  ;;  %v6154_v22 = vmul.f32 %v15493_v23, %v6111_v19  ;;  %v6155_v35 = vmul.f32 %v15496_v50, %v6063_v60 }
 0x48d   : > { %7268 = vrot.lane.b32.xlu1 %v15117_v5, %s12652_s18 }
 0x48e   : > { %v12056_v12 = vpack.c.bf16 %v6160_v45, %v6158_v11  ;;  %v6045_v59 = vpop.permute.xlu0 %6044  ;;  %v6039_v29 = vpop.permute.xlu1 %6038  ;;  %v12057_v62 = vpack.c.bf16 %v6161_v31, %v6159_v56 }
 0x48f   : > { %v6064_v42 = vsel %vm6050_vm4, %v6045_v59, %v5981_v13  ;;  %v6112_v36 = vsel %vm6050_vm4, %v5981_v13, %v6045_v59  ;;  %v6109_v58 = vsel %vm6050_vm4, %v15438_v27, %v6039_v29  ;;  %v6061_v25 = vsel %vm6050_vm4, %v6039_v29, %v15438_v27  ;;  %v17109_v59 = vld [vmem:[#allocation24_spill] sm:$0xff] }
 0x490   : > { %v6156_v37 = vmul.f32 %v15493_v23, %v6112_v36  ;;  %v6157_v61 = vmul.f32 %v15496_v50, %v6064_v42  ;;  %7270 = vrot.lane.b32.xlu0 %v15009_v10, %s12652_s18  ;;  %10055 = vmatprep.subr.bf16.mxu1 %v12057_v62  ;;  %v6150_v33 = vmul.f32 %v15493_v23, %v6109_v58  ;;  %v17110_v62 = vld [vmem:[#allocation14_spill] sm:$0xff] }
 0x491   : > { %7272 = vrot.lane.b32.xlu1 %v15124_v14, %s12652_s18  ;;  %10056 = vmatpush2.bf16.msra.mxu1 %v12056_v12  ;;  %v6151_v4 = vmul.f32 %v15496_v50, %v6061_v25 }
 0x492   : > { %v12054_v13 = vpack.c.bf16 %v6156_v37, %v6154_v22  ;;  %v6041_v18 = vpop.permute.xlu0 %6040  ;;  %v6035_v54 = vpop.permute.xlu1 %6034  ;;  %v12055_v24 = vpack.c.bf16 %v6157_v61, %v6155_v35 }
 0x493   : > { %v6062_v40 = vsel %vm6050_vm4, %v6041_v18, %v15460_v51  ;;  %v6110_v6 = vsel %vm6050_vm4, %v15460_v51, %v6041_v18  ;;  %v6107_v63 = vsel %vm6050_vm4, %v15414_v52, %v6035_v54  ;;  %v6059_v15 = vsel %vm6050_vm4, %v6035_v54, %v15414_v52  ;;  %v17111_v18 = vld [vmem:[#allocation44_spill] sm:$0xff] }
 0x494   : > { %v6152_v27 = vmul.f32 %v15493_v23, %v6110_v6  ;;  %v6153_v32 = vmul.f32 %v15496_v50, %v6062_v40  ;;  %7274 = vrot.lane.b32.xlu0 %v15021_v55, %s12652_s18  ;;  %10057 = vmatprep.subr.bf16.mxu1 %v12055_v24  ;;  %v6146_v56 = vmul.f32 %v15493_v23, %v6107_v63 }
 0x495   : > { %6712 = vrot.lane.b32.xlu1 %v17108_v34, %s12651_s17  ;;  %10058 = vmatpush2.bf16.msra.mxu1 %v12054_v13  ;;  %v6147_v19 = vmul.f32 %v15496_v50, %v6059_v15 }
 0x496   : > { %v12052_v51 = vpack.c.bf16 %v6152_v27, %v6150_v33  ;;  %v6037_v11 = vpop.permute.xlu0 %6036  ;;  %v6031_v0 = vpop.permute.xlu1 %6030  ;;  %v12053_v3 = vpack.c.bf16 %v6153_v32, %v6151_v4  ;;  %v17112_v32 = vld [vmem:[#allocation31_spill] sm:$0xff] }
 0x497   : > { %v6060_v45 = vsel %vm6050_vm4, %v6037_v11, %v15436_v28  ;;  %v6108_v31 = vsel %vm6050_vm4, %v15436_v28, %v6037_v11  ;;  %v6105_v12 = vsel %vm6050_vm4, %v15390_v49, %v6031_v0  ;;  %v6057_v29 = vsel %vm6050_vm4, %v6031_v0, %v15390_v49 }
 0x498   : > { %v6148_v52 = vmul.f32 %v15493_v23, %v6108_v31  ;;  %v6149_v60 = vmul.f32 %v15496_v50, %v6060_v45  ;;  %6714 = vrot.lane.b32.xlu0 %v17109_v59, %s12651_s17  ;;  %10059 = vmatprep.subr.bf16.mxu1 %v12053_v3  ;;  %v6142_v35 = vmul.f32 %v15493_v23, %v6105_v12  ;;  %vm6483_vm7 = vcmp.ge.s32.totalorder %v17112_v32, 4294967295 }
 0x499   : > { %6776 = vrot.lane.b32.xlu1 %v17110_v62, %s12651_s17  ;;  %10060 = vmatpush2.bf16.msra.mxu1 %v12052_v51  ;;  %v6143_v58 = vmul.f32 %v15496_v50, %v6057_v29  ;;  %vm15604_vm3 = vmand %vm15283_vm11, %vm6483_vm7  ;;  %vm6485_vm5 = vcmp.lt.s32.totalorder %v17112_v32, 15  ;;  %vm6418_vm11 = vcmask 121856  }
 0x49a   : > { %v12050_v28 = vpack.c.bf16 %v6148_v52, %v6146_v56  ;;  %v6033_v22 = vpop.permute.xlu0 %6032  ;;  %v6027_v42 = vpop.permute.xlu1 %6026  ;;  %v12051_v36 = vpack.c.bf16 %v6149_v60, %v6147_v19  ;;  %vm6486_vm9 = vmand %vm15604_vm3, %vm6485_vm5 }
 0x49b   : > { %v6058_v37 = vsel %vm6050_vm4, %v6033_v22, %v15412_v26  ;;  %v6106_v61 = vsel %vm6050_vm4, %v15412_v26, %v6033_v22  ;;  %v6103_v13 = vsel %vm6050_vm4, %v15367_v9, %v6027_v42  ;;  %v6055_v54 = vsel %vm6050_vm4, %v6027_v42, %v15367_v9  ;;  %vm7365_vm1 = vmand %vm13920_vm6, %vm6483_vm7 }
 0x49c   : > { %v6144_v49 = vmul.f32 %v15493_v23, %v6106_v61  ;;  %v6145_v25 = vmul.f32 %v15496_v50, %v6058_v37  ;;  %6778 = vrot.lane.b32.xlu0 %v17111_v18, %s12651_s17  ;;  %10061 = vmatprep.subr.bf16.mxu1 %v12051_v36  ;;  %v6138_v6 = vmul.f32 %v15493_v23, %v6103_v13  ;;  %v17117_v13 = vld [vmem:[#allocation28_spill] sm:$0xff]  ;;  %vm7366_vm6 = vmand %vm7365_vm1, %vm6485_vm5 }
 0x49d   : > { %7260 = vrot.lane.b32.xlu1 %v17110_v62, %s12652_s18  ;;  %10062 = vmatpush2.bf16.msra.mxu1 %v12050_v28  ;;  %v6139_v9 = vmul.f32 %v15496_v50, %v6055_v54  ;;  %v11253_v54 = vsel %vm6486_vm9, 1.0, %v17104_v44 }
 0x49e   : > { %v12048_v26 = vpack.c.bf16 %v6144_v49, %v6142_v35  ;;  %v6029_v24 = vpop.permute.xlu0 %6028  ;;  %v6023_v33 = vpop.permute.xlu1 %6022  ;;  %v12049_v40 = vpack.c.bf16 %v6145_v25, %v6143_v58  ;;  %v17116_v25 = vld [vmem:[#allocation34_spill] sm:$0xff] }
 0x49f   : > { %v6056_v4 = vsel %vm6050_vm4, %v6029_v24, %v15388_v47  ;;  %v6104_v27 = vsel %vm6050_vm4, %v15388_v47, %v6029_v24  ;;  %v6101_v51 = vsel %vm6050_vm4, %v15347_v20, %v6023_v33  ;;  %v6053_v11 = vsel %vm6050_vm4, %v6023_v33, %v15347_v20 }
 0x4a0   : > { %v6140_v63 = vmul.f32 %v15493_v23, %v6104_v27  ;;  %v6141_v15 = vmul.f32 %v15496_v50, %v6056_v4  ;;  %7262 = vrot.lane.b32.xlu0 %v17108_v34, %s12652_s18  ;;  %10063 = vmatprep.subr.bf16.mxu1 %v12049_v40  ;;  %v6134_v45 = vmul.f32 %v15493_v23, %v6101_v51 }
 0x4a1   : > { %7264 = vrot.lane.b32.xlu1 %v17111_v18, %s12652_s18  ;;  %10064 = vmatpush2.bf16.msra.mxu1 %v12048_v26  ;;  %v6135_v52 = vmul.f32 %v15496_v50, %v6053_v11  ;;  %v15638_v40 = vrot.slane %v11253_v54, %v17106_v21  ;;  %v12105_v27 = vpack.c.bf16 %v15051_v30, %v15037_v57 }
 0x4a2   : > { %v12046_v47 = vpack.c.bf16 %v6140_v63, %v6138_v6  ;;  %v6025_v0 = vpop.permute.xlu0 %6024  ;;  %v6019_v3 = vpop.permute.xlu1 %6018  ;;  %v12047_v56 = vpack.c.bf16 %v6141_v15, %v6139_v9  ;;  %v12366_v9 = vld [vmem:[#allocation9] ss:$36 sps:$4 sm:$0xff]  }
 0x4a3   : > { %v6054_v31 = vsel %vm6050_vm4, %v6025_v0, %v15365_v16  ;;  %v6102_v19 = vsel %vm6050_vm4, %v15365_v16, %v6025_v0  ;;  %v6099_v29 = vsel %vm6050_vm4, %v15326_v53, %v6019_v3  ;;  %v6051_v41 = vsel %vm6050_vm4, %v6019_v3, %v15326_v53  ;;  %v17115_v16 = vld [vmem:[#allocation38_spill] sm:$0xff] }
 0x4a4   : > { %v6136_v60 = vmul.f32 %v15493_v23, %v6102_v19  ;;  %v6137_v12 = vmul.f32 %v15496_v50, %v6054_v31  ;;  %7266 = vrot.lane.b32.xlu0 %v17109_v59, %s12652_s18  ;;  %10065 = vmatprep.subr.bf16.mxu1 %v12047_v56  ;;  %v6130_v35 = vmul.f32 %v15493_v23, %v6099_v29 }
 0x4a5   : > { %6708 = vrot.lane.b32.xlu1 %v17115_v16, %s12651_s17  ;;  %10066 = vmatpush2.bf16.msra.mxu1 %v12046_v47  ;;  %v6131_v61 = vmul.f32 %v15496_v50, %v6051_v41  ;;  %v12104_v47 = vpack.c.bf16 %v15132_v48, %v15126_v8  ;;  %v12103_v31 = vpack.c.bf16 %v15021_v55, %v15009_v10 }
 0x4a6   : > { %v12044_v28 = vpack.c.bf16 %v6136_v60, %v6134_v45  ;;  %v6021_v22 = vpop.permute.xlu0 %6020  ;;  %v6351_v42 = vpop.permute.xlu1 %6350  ;;  %v12045_v36 = vpack.c.bf16 %v6137_v12, %v6135_v52  ;;  %v12102_v12 = vpack.c.bf16 %v15124_v14, %v15117_v5 }
 0x4a7   : > { %v6052_v37 = vsel %vm6050_vm4, %v6021_v22, %v15345_v2  ;;  %v6100_v53 = vsel %vm6050_vm4, %v15345_v2, %v6021_v22  ;;  %v12101_v22 = vpack.c.bf16 %v17109_v59, %v17108_v34 }
 0x4a8   : > { %v6132_v58 = vmul.f32 %v15493_v23, %v6100_v53  ;;  %v6133_v49 = vmul.f32 %v15496_v50, %v6052_v37  ;;  %6710 = vrot.lane.b32.xlu0 %v17116_v25, %s12651_s17  ;;  %10067 = vmatprep.subr.bf16.mxu1 %v12045_v36  ;;  %v15641_v23 = vrot.slane %v11253_v54, %v17105_v17  ;;  %v17118_v50 = vld [vmem:[#allocation17_spill] sm:$0xff] }
 0x4a9   : > { %6772 = vrot.lane.b32.xlu1 %v17117_v13, %s12651_s17  ;;  %10068 = vmatpush2.bf16.msra.mxu1 %v12044_v28  ;;  %v17119_v28 = vld [vmem:[#allocation33_spill] sm:$0xff]  ;;  %v12100_v53 = vpack.c.bf16 %v17111_v18, %v17110_v62 }
 0x4aa   : > { %v12042_v26 = vpack.c.bf16 %v6132_v58, %v6130_v35  ;;  %v6353_v24 = vpop.permute.xlu0 %6352  ;;  %v6415_v2 = vpop.permute.xlu1 %6414  ;;  %v12043_v33 = vpack.c.bf16 %v6133_v49, %v6131_v61  ;;  %v12369_v61 = vld [vmem:[#allocation9 + $0x4c] ss:$36 sps:$4 sm:$0xff]  }
 0x4ab   : > { %v6433_v6 = vsel %vm6418_vm11, %v6415_v2, %v6351_v42  ;;  %v6481_v4 = vsel %vm6418_vm11, %v6351_v42, %v6415_v2  ;;  %v12371_v2 = vld [vmem:[#allocation9 + $0x48] ss:$36 sps:$4 sm:$0xff]  }
 0x4ac   : > { %6774 = vrot.lane.b32.xlu0 %v17118_v50, %s12651_s17  ;;  %10069 = vmatprep.subr.bf16.mxu1 %v12043_v33  ;;  %v6528_v0 = vmul.f32 %v15638_v40, %v6481_v4  ;;  %v6529_v3 = vmul.f32 %v15641_v23, %v6433_v6  ;;  %v17121_v33 = vld [vmem:[#allocation42_spill] sm:$0xff]  ;;  %v12099_v6 = vpack.c.bf16 %v17116_v25, %v17115_v16 }
 0x4ad   : > { %7252 = vrot.lane.b32.xlu1 %v17117_v13, %s12652_s18  ;;  %10070 = vmatpush2.bf16.msra.mxu1 %v12042_v26 }
 0x4ae   : > { %v6417_v63 = vpop.permute.xlu0 %6416  ;;  %v6347_v15 = vpop.permute.xlu1 %6346  ;;  %10265 = vmatprep.subr.bf16.mxu1 %v12105_v27 }
 0x4af   : > { %v6434_v51 = vsel %vm6418_vm11, %v6417_v63, %v6353_v24  ;;  %v6482_v11 = vsel %vm6418_vm11, %v6353_v24, %v6417_v63  ;;  %v17120_v24 = vld [vmem:[#allocation19_spill] sm:$0xff] }
 0x4b0   : > { %v6530_v56 = vmul.f32 %v15638_v40, %v6482_v11  ;;  %v6531_v45 = vmul.f32 %v15641_v23, %v6434_v51  ;;  %7254 = vrot.lane.b32.xlu0 %v17115_v16, %s12652_s18  ;;  %10072 = vmatmul.mubr.bf16.vlgmr.msra.gmra.mxu1 %v12366_v9  ;;  %v12098_v51 = vpack.c.bf16 %v17118_v50, %v17117_v13 }
 0x4b1   : > { %7256 = vrot.lane.b32.xlu1 %v17118_v50, %s12652_s18  ;;  %10266 = vmatpush1.bf16.msra.mxu1 %v12104_v47 }
 0x4b2   : > { %v12072_v19 = vpack.c.bf16 %v6530_v56, %v6528_v0  ;;  %v6349_v20 = vpop.permute.xlu0 %6348  ;;  %v6411_v52 = vpop.permute.xlu1 %6410  ;;  %v12073_v60 = vpack.c.bf16 %v6531_v45, %v6529_v3  ;;  %10267 = vmatprep.subr.bf16.mxu1 %v12103_v31  ;;  %10081 = vmatprep.mubr.bf16.mxu1 %v12369_v61  ;;  %v12097_v0 = vpack.c.bf16 %v17120_v24, %v17119_v28 }
 0x4b3   : > { %v6431_v29 = vsel %vm6418_vm11, %v6411_v52, %v6347_v15  ;;  %v6479_v41 = vsel %vm6418_vm11, %v6347_v15, %v6411_v52  ;;  %v17122_v15 = vld [vmem:[#allocation29_spill] sm:$0xff] }
 0x4b4   : > { %7258 = vrot.lane.b32.xlu0 %v17116_v25, %s12652_s18  ;;  %10152 = vmatprep.subr.bf16.mxu0 %v12073_v60  ;;  %v6524_v58 = vmul.f32 %v15638_v40, %v6479_v41  ;;  %v6525_v49 = vmul.f32 %v15641_v23, %v6431_v29  ;;  %v12374_v41 = vld [vmem:[#allocation9 + $0x90] ss:$36 sps:$4 sm:$0xff]  }
 0x4b5   : > { %6704 = vrot.lane.b32.xlu1 %v17119_v28, %s12651_s17  ;;  %10153 = vmatpush1.bf16.msra.mxu0 %v12072_v19  ;;  %v12096_v19 = vpack.c.bf16 %v17122_v15, %v17121_v33 }
 0x4b6   : > { %10268 = vmatpush1.bf16.msra.mxu1 %v12102_v12  ;;  %v6413_v42 = vpop.permute.xlu0 %6412  ;;  %v6343_v36 = vpop.permute.xlu1 %6342 }
 0x4b7   : > { %v6432_v35 = vsel %vm6418_vm11, %v6413_v42, %v6349_v20  ;;  %v6480_v37 = vsel %vm6418_vm11, %v6349_v20, %v6413_v42  ;;  %10269 = vmatprep.subr.bf16.mxu1 %v12101_v22  ;;  %v12372_v20 = vld [vmem:[#allocation9 + $0x94] ss:$36 sps:$4 sm:$0xff]   ;;  %v17124_v42 = vld [vmem:[#allocation50_spill] sm:$0xff] }
 0x4b8   : > { %v6526_v54 = vmul.f32 %v15638_v40, %v6480_v37  ;;  %v6527_v26 = vmul.f32 %v15641_v23, %v6432_v35  ;;  %6706 = vrot.lane.b32.xlu0 %v17120_v24, %s12651_s17  ;;  %10082 = vmatmul.mubr.bf16.gmra.mxu1 %v12371_v2  ;;  %v17123_v22 = vld [vmem:[#allocation49_spill] sm:$0xff] }
 0x4b9   : > { %6768 = vrot.lane.b32.xlu1 %v17121_v33, %s12651_s17  ;;  %10091 = vmatprep.mubr.bf16.mxu1 %v12372_v20  ;;  %v12377_v20 = vld [vmem:[#allocation9 + $0xd8] ss:$36 sps:$4 sm:$0xff]  }
 0x4ba   : > { %v12070_v4 = vpack.c.bf16 %v6526_v54, %v6524_v58  ;;  %10270 = vmatpush1.bf16.msra.mxu1 %v12100_v53  ;;  %v6345_v27 = vpop.permute.xlu0 %6344  ;;  %v6407_v9 = vpop.permute.xlu1 %6406  ;;  %v12071_v63 = vpack.c.bf16 %v6527_v26, %v6525_v49  ;;  %v17125_v58 = vld [vmem:[#allocation39_spill] sm:$0xff]  ;;  %v17126_v49 = vld [vmem:[#allocation25_spill] sm:$0xff] }
 0x4bb   : > { %10271 = vmatprep.subr.bf16.mxu1 %v12099_v6  ;;  %v6429_v11 = vsel %vm6418_vm11, %v6407_v9, %v6343_v36  ;;  %v6477_v47 = vsel %vm6418_vm11, %v6343_v36, %v6407_v9  ;;  %v12095_v36 = vpack.c.bf16 %v17124_v42, %v17123_v22  ;;  %v12094_v54 = vpack.c.bf16 %v17126_v49, %v17125_v58  ;;  %v17127_v6 = vld [vmem:[#allocation47_spill] sm:$0xff] }
 0x4bc   : > { %6770 = vrot.lane.b32.xlu0 %v17122_v15, %s12651_s17  ;;  %10154 = vmatprep.subr.bf16.mxu0 %v12071_v63  ;;  %v6520_v52 = vmul.f32 %v15638_v40, %v6477_v47  ;;  %v6521_v60 = vmul.f32 %v15641_v23, %v6429_v11  ;;  %v17129_v47 = vld [vmem:[#allocation27_spill] sm:$0xff] }
 0x4bd   : > { %7244 = vrot.lane.b32.xlu1 %v17121_v33, %s12652_s18  ;;  %10155 = vmatpush1.bf16.msra.mxu0 %v12070_v4  ;;  %v17128_v4 = vld [vmem:[#allocation48_spill] sm:$0xff] }
 0x4be   : > { %10272 = vmatpush1.bf16.msra.mxu1 %v12098_v51  ;;  %v6409_v3 = vpop.permute.xlu0 %6408  ;;  %v6339_v56 = vpop.permute.xlu1 %6338 }
 0x4bf   : > { %v6430_v45 = vsel %vm6418_vm11, %v6409_v3, %v6345_v27  ;;  %v6478_v31 = vsel %vm6418_vm11, %v6345_v27, %v6409_v3  ;;  %10273 = vmatprep.subr.bf16.mxu1 %v12097_v0  ;;  %v12093_v27 = vpack.c.bf16 %v17128_v4, %v17127_v6  ;;  %v12092_v0 = vpack.c.bf16 %v15061_v43, %v17129_v47  ;;  %v12375_v3 = vld [vmem:[#allocation9 + $0xdc] ss:$36 sps:$4 sm:$0xff]  }
 0x4c0   : > { %v6522_v12 = vmul.f32 %v15638_v40, %v6478_v31  ;;  %v6523_v29 = vmul.f32 %v15641_v23, %v6430_v45  ;;  %7246 = vrot.lane.b32.xlu0 %v17119_v28, %s12652_s18  ;;  %10092 = vmatmul.mubr.bf16.gmra.mxu1 %v12374_v41 }
 0x4c1   : > { %7248 = vrot.lane.b32.xlu1 %v17122_v15, %s12652_s18  ;;  %10101 = vmatprep.mubr.bf16.mxu1 %v12375_v3 }
 0x4c2   : > { %v12068_v35 = vpack.c.bf16 %v6522_v12, %v6520_v52  ;;  %10274 = vmatpush1.bf16.msra.mxu1 %v12096_v19  ;;  %v6341_v37 = vpop.permute.xlu0 %6340  ;;  %v12069_v53 = vpack.c.bf16 %v6523_v29, %v6521_v60  ;;  %v6403_v61 = vpop.permute.xlu1 %6402  ;;  %v12091_v52 = vpack.c.bf16 %v14871_v38, %v14860_v1 }
 0x4c3   : > { %10275 = vmatprep.subr.bf16.mxu1 %v12095_v36  ;;  %v6427_v26 = vsel %vm6418_vm11, %v6403_v61, %v6339_v56  ;;  %v6475_v2 = vsel %vm6418_vm11, %v6339_v56, %v6403_v61  ;;  %v12090_v36 = vpack.c.bf16 %v15033_v46, %v15019_v7 }
 0x4c4   : > { %7250 = vrot.lane.b32.xlu0 %v17120_v24, %s12652_s18  ;;  %10156 = vmatprep.subr.bf16.mxu0 %v12069_v53  ;;  %v6516_v56 = vmul.f32 %v15638_v40, %v6475_v2  ;;  %v6517_v45 = vmul.f32 %v15641_v23, %v6427_v26  ;;  %v12378_v2 = vld [vmem:[#allocation9 + $0x124] ss:$36 sps:$4 sm:$0xff]  }
 0x4c5   : > { %6700 = vrot.lane.b32.xlu1 %v17123_v22, %s12651_s17  ;;  %10157 = vmatpush1.bf16.msra.mxu0 %v12068_v35 }
 0x4c6   : > { %10276 = vmatpush1.bf16.msra.mxu1 %v12094_v54  ;;  %v6405_v9 = vpop.permute.xlu0 %6404  ;;  %v6335_v11 = vpop.permute.xlu1 %6334 }
 0x4c7   : > { %v6428_v63 = vsel %vm6418_vm11, %v6405_v9, %v6341_v37  ;;  %v6476_v51 = vsel %vm6418_vm11, %v6341_v37, %v6405_v9  ;;  %10277 = vmatprep.subr.bf16.mxu1 %v12093_v27 }
 0x4c8   : > { %v6518_v31 = vmul.f32 %v15638_v40, %v6476_v51  ;;  %v6519_v19 = vmul.f32 %v15641_v23, %v6428_v63  ;;  %6702 = vrot.lane.b32.xlu0 %v17124_v42, %s12651_s17  ;;  %10102 = vmatmul.mubr.bf16.gmra.mxu1 %v12377_v20 }
 0x4c9   : > { %6764 = vrot.lane.b32.xlu1 %v17125_v58, %s12651_s17  ;;  %10111 = vmatprep.mubr.bf16.mxu1 %v12378_v2 }
 0x4ca   : > { %v12066_v60 = vpack.c.bf16 %v6518_v31, %v6516_v56  ;;  %10278 = vmatpush1.bf16.msra.mxu1 %v12092_v0  ;;  %v6337_v12 = vpop.permute.xlu0 %6336  ;;  %v12067_v29 = vpack.c.bf16 %v6519_v19, %v6517_v45  ;;  %v6399_v41 = vpop.permute.xlu1 %6398 }
 0x4cb   : > { %10279 = vmatprep.subr.bf16.mxu1 %v12091_v52  ;;  %v6425_v35 = vsel %vm6418_vm11, %v6399_v41, %v6335_v11  ;;  %v6473_v37 = vsel %vm6418_vm11, %v6335_v11, %v6399_v41  ;;  %v12380_v11 = vld [vmem:[#allocation9 + $0x120] ss:$36 sps:$4 sm:$0xff]  }
 0x4cc   : > { %6766 = vrot.lane.b32.xlu0 %v17126_v49, %s12651_s17  ;;  %10158 = vmatprep.subr.bf16.mxu0 %v12067_v29  ;;  %v6512_v27 = vmul.f32 %v15638_v40, %v6473_v37  ;;  %v6513_v9 = vmul.f32 %v15641_v23, %v6425_v35  ;;  %v12381_v29 = vld [vmem:[#allocation9 + $0x16c] ss:$36 sps:$4 sm:$0xff]  }
 0x4cd   : > { %7236 = vrot.lane.b32.xlu1 %v17125_v58, %s12652_s18  ;;  %10159 = vmatpush1.bf16.msra.mxu0 %v12066_v60 }
 0x4ce   : > { %10280 = vmatpush1.bf16.msra.mxu1 %v12090_v36  ;;  %v6401_v53 = vpop.permute.xlu0 %6400  ;;  %v6331_v26 = vpop.permute.xlu1 %6330 }
 0x4cf   : > { %v6426_v61 = vsel %vm6418_vm11, %v6401_v53, %v6337_v12  ;;  %v6474_v54 = vsel %vm6418_vm11, %v6337_v12, %v6401_v53  ;;  %v12383_v53 = vld [vmem:[#allocation9 + $0x168] ss:$36 sps:$4 sm:$0xff]  }
 0x4d0   : > { %v6514_v63 = vmul.f32 %v15638_v40, %v6474_v54  ;;  %v6515_v51 = vmul.f32 %v15641_v23, %v6426_v61  ;;  %7238 = vrot.lane.b32.xlu0 %v17123_v22, %s12652_s18  ;;  %10112 = vmatmul.mubr.bf16.gmra.mxu1 %v12380_v11 }
 0x4d1   : > { %7240 = vrot.lane.b32.xlu1 %v17126_v49, %s12652_s18  ;;  %10121 = vmatprep.mubr.bf16.mxu1 %v12381_v29 }
 0x4d2   : > { %v12064_v0 = vpack.c.bf16 %v6514_v63, %v6512_v27  ;;  %v6333_v3 = vpop.permute.xlu0 %6332  ;;  %v12065_v56 = vpack.c.bf16 %v6515_v51, %v6513_v9  ;;  %v6395_v45 = vpop.permute.xlu1 %6394 }
 0x4d3   : > { %v6423_v31 = vsel %vm6418_vm11, %v6395_v45, %v6331_v26  ;;  %v6471_v19 = vsel %vm6418_vm11, %v6331_v26, %v6395_v45 }
 0x4d4   : > { %7242 = vrot.lane.b32.xlu0 %v17124_v42, %s12652_s18  ;;  %10160 = vmatprep.subr.bf16.mxu0 %v12065_v56  ;;  %v6508_v41 = vmul.f32 %v15638_v40, %v6471_v19  ;;  %v6509_v36 = vmul.f32 %v15641_v23, %v6423_v31 }
 0x4d5   : > { %6696 = vrot.lane.b32.xlu1 %v17127_v6, %s12651_s17  ;;  %10161 = vmatpush1.bf16.msra.mxu0 %v12064_v0 }
 0x4d6   : > { %v6397_v20 = vpop.permute.xlu0 %6396  ;;  %v6327_v12 = vpop.permute.xlu1 %6326 }
 0x4d7   : > { %v6424_v52 = vsel %vm6418_vm11, %v6397_v20, %v6333_v3  ;;  %v6472_v60 = vsel %vm6418_vm11, %v6333_v3, %v6397_v20  ;;  %v12384_v3 = vld [vmem:[#allocation9 + $0x1b4] ss:$36 sps:$4 sm:$0xff]  }
 0x4d8   : > { %v6510_v35 = vmul.f32 %v15638_v40, %v6472_v60  ;;  %v6511_v37 = vmul.f32 %v15641_v23, %v6424_v52  ;;  %6698 = vrot.lane.b32.xlu0 %v17128_v4, %s12651_s17  ;;  %10122 = vmatmul.mubr.bf16.gmra.mxu1 %v12383_v53  ;;  %v12386_v20 = vld [vmem:[#allocation9 + $0x1b0] ss:$36 sps:$4 sm:$0xff]  }
 0x4d9   : > { %6760 = vrot.lane.b32.xlu1 %v17129_v47, %s12651_s17  ;;  %10131 = vmatprep.mubr.bf16.mxu1 %v12384_v3 }
 0x4da   : > { %v12062_v61 = vpack.c.bf16 %v6510_v35, %v6508_v41  ;;  %v6329_v54 = vpop.permute.xlu0 %6328  ;;  %v12063_v26 = vpack.c.bf16 %v6511_v37, %v6509_v36  ;;  %v6391_v2 = vpop.permute.xlu1 %6390  ;;  %v12397_v41 = vld [vmem:[#allocation9 + $0x14] ss:$36 sps:$4 sm:$0xff]  }
 0x4db   : > { %v6421_v27 = vsel %vm6418_vm11, %v6391_v2, %v6327_v12  ;;  %v6469_v9 = vsel %vm6418_vm11, %v6327_v12, %v6391_v2  ;;  %v12391_v2 = vld [vmem:[#allocation9 + $0xc] ss:$36 sps:$4 sm:$0xff]  }
 0x4dc   : > { %6762 = vrot.lane.b32.xlu0 %v15061_v43, %s12651_s17  ;;  %10162 = vmatprep.subr.bf16.mxu0 %v12063_v26  ;;  %v6504_v56 = vmul.f32 %v15638_v40, %v6469_v9  ;;  %v6505_v45 = vmul.f32 %v15641_v23, %v6421_v27  ;;  %v12387_v26 = vld [vmem:[#allocation9 + $0x1fc] ss:$36 sps:$4 sm:$0xff]  }
 0x4dd   : > { %7228 = vrot.lane.b32.xlu1 %v17129_v47, %s12652_s18  ;;  %10163 = vmatpush1.bf16.msra.mxu0 %v12062_v61 }
 0x4de   : > { %v6393_v63 = vpop.permute.xlu0 %6392  ;;  %10184 = vmatprep.mubr.bf16.mxu0 %v12391_v2 }
 0x4df   : > { %v6422_v51 = vsel %vm6418_vm11, %v6393_v63, %v6329_v54  ;;  %v6470_v11 = vsel %vm6418_vm11, %v6329_v54, %v6393_v63  ;;  %v6323_v0 = vpop.permute.xlu1 %6322 }
 0x4e0   : > { %v6506_v31 = vmul.f32 %v15638_v40, %v6470_v11  ;;  %v6507_v19 = vmul.f32 %v15641_v23, %v6422_v51  ;;  %7230 = vrot.lane.b32.xlu0 %v17127_v6, %s12652_s18  ;;  %10132 = vmatmul.mubr.bf16.gmra.mxu1 %v12386_v20  ;;  %v12392_v11 = vld [vmem:[#allocation9 + $0x1f8] ss:$36 sps:$4 sm:$0xff]  }
 0x4e1   : > { %7232 = vrot.lane.b32.xlu1 %v15061_v43, %s12652_s18  ;;  %10141 = vmatprep.mubr.bf16.mxu1 %v12387_v26 }
 0x4e2   : > { %v12060_v52 = vpack.c.bf16 %v6506_v31, %v6504_v56  ;;  %v6325_v60 = vpop.permute.xlu0 %6324  ;;  %v12061_v12 = vpack.c.bf16 %v6507_v19, %v6505_v45 }
 0x4e3   : > { %v6387_v29 = vpop.permute.xlu1 %6386 }
 0x4e4   : > { %7234 = vrot.lane.b32.xlu0 %v17128_v4, %s12652_s18  ;;  %10164 = vmatprep.subr.bf16.mxu0 %v12061_v12  ;;  %v6419_v36 = vsel %vm6418_vm11, %v6387_v29, %v6323_v0  ;;  %v6467_v35 = vsel %vm6418_vm11, %v6323_v0, %v6387_v29  ;;  %v11270_v0 = vsel %vm6854_vm13, 1.0, %v17104_v44 }
 0x4e5   : > { %6692 = vrot.lane.b32.xlu1 %v14860_v1, %s12651_s17  ;;  %10165 = vmatpush1.bf16.msra.mxu0 %v12060_v52  ;;  %v6500_v27 = vmul.f32 %v15638_v40, %v6467_v35  ;;  %v6501_v9 = vmul.f32 %v15641_v23, %v6419_v36 }
 0x4e6   : > { %v6389_v37 = vpop.permute.xlu0 %6388 }
 0x4e7   : > { %v6420_v53 = vsel %vm6418_vm11, %v6389_v37, %v6325_v60  ;;  %v6468_v61 = vsel %vm6418_vm11, %v6325_v60, %v6389_v37  ;;  %v6721_v54 = vpop.permute.xlu1 %6720 }
 0x4e8   : > { %v6502_v63 = vmul.f32 %v15638_v40, %v6468_v61  ;;  %v6503_v51 = vmul.f32 %v15641_v23, %v6420_v53  ;;  %6694 = vrot.lane.b32.xlu0 %v14871_v38, %s12651_s17  ;;  %10142 = vmatmul.mubr.bf16.gmra.mxu1 %v12392_v11  ;;  %v15815_v40 = vrot.slane %v11270_v0, %v17106_v21  ;;  %v11303_v61 = vsel %vm7366_vm6, 1.0, %v17104_v44 }
 0x4e9   : > { %6756 = vrot.lane.b32.xlu1 %v15019_v7, %s12651_s17  ;;  %v15818_v23 = vrot.slane %v11270_v0, %v17105_v17  ;;  %10297 = vmatprep.mubr.bf16.mxu1 %v12397_v41 }
 0x4ea   : > { %v12058_v3 = vpack.c.bf16 %v6502_v63, %v6500_v27  ;;  %v6723_v56 = vpop.permute.xlu0 %6722  ;;  %v12059_v45 = vpack.c.bf16 %v6503_v51, %v6501_v9  ;;  %v15840_v9 = vrot.slane %v11303_v61, %v17106_v21  ;;  %v15843_v63 = vrot.slane %v11303_v61, %v17105_v17 }
 0x4eb   : > { %v6785_v31 = vpop.permute.xlu1 %6784 }
 0x4ec   : > { %6758 = vrot.lane.b32.xlu0 %v15033_v46, %s12651_s17  ;;  %10166 = vmatprep.subr.bf16.mxu0 %v12059_v45  ;;  %v6803_v19 = vsel %vm6788_vm15, %v6785_v31, %v6721_v54  ;;  %v6851_v20 = vsel %vm6788_vm15, %v6721_v54, %v6785_v31 }
 0x4ed   : > { %7220 = vrot.lane.b32.xlu1 %v15019_v7, %s12652_s18  ;;  %10167 = vmatpush1.bf16.msra.mxu0 %v12058_v3  ;;  %v6896_v36 = vmul.f32 %v15815_v40, %v6851_v20  ;;  %v6897_v35 = vmul.f32 %v15818_v23, %v6803_v19 }
 0x4ee   : > { %v6787_v52 = vpop.permute.xlu0 %6786 }
 0x4ef   : > { %v6804_v60 = vsel %vm6788_vm15, %v6787_v52, %v6723_v56  ;;  %v6852_v12 = vsel %vm6788_vm15, %v6723_v56, %v6787_v52  ;;  %v7277_v29 = vpop.permute.xlu1 %7276 }
 0x4f0   : > { %v6898_v37 = vmul.f32 %v15815_v40, %v6852_v12  ;;  %v6899_v53 = vmul.f32 %v15818_v23, %v6804_v60  ;;  %7222 = vrot.lane.b32.xlu0 %v14860_v1, %s12652_s18 }
 0x4f1   : > { %7224 = vrot.lane.b32.xlu1 %v15033_v46, %s12652_s18 }
 0x4f2   : > { %v12088_v54 = vpack.c.bf16 %v6898_v37, %v6896_v36  ;;  %v7279_v26 = vpop.permute.xlu0 %7278  ;;  %v12089_v2 = vpack.c.bf16 %v6899_v53, %v6897_v35 }
 0x4f3   : > { %v7281_v27 = vpop.permute.xlu1 %7280  ;;  %v7299_v51 = vsel %vm7284_vm2, %v7277_v29, %v7279_v26  ;;  %v7363_v11 = vsel %vm7284_vm2, %v7279_v26, %v7277_v29 }
 0x4f4   : > { %7226 = vrot.lane.b32.xlu0 %v14871_v38, %s12652_s18  ;;  %10168 = vmatprep.subr.bf16.mxu0 %v12089_v2  ;;  %v7408_v31 = vmul.f32 %v15840_v9, %v7299_v51  ;;  %v7409_v19 = vmul.f32 %v15843_v63, %v7363_v11 }
 0x4f5   : > { %7644 = vrot.lane.b32.xlu1 %v15126_v8, %s12653_s20  ;;  %10169 = vmatpush2.bf16.msra.mxu0 %v12088_v54 }
 0x4f6   : > { %v7283_v0 = vpop.permute.xlu0 %7282 }
 0x4f7   : > { %v7300_v3 = vsel %vm7284_vm2, %v7281_v27, %v7283_v0  ;;  %v7364_v56 = vsel %vm7284_vm2, %v7283_v0, %v7281_v27  ;;  %v6717_v45 = vpop.permute.xlu1 %6716 }
 0x4f8   : > { %v7410_v20 = vmul.f32 %v15840_v9, %v7300_v3  ;;  %v7411_v52 = vmul.f32 %v15843_v63, %v7364_v56  ;;  %7646 = vrot.lane.b32.xlu0 %v15037_v57, %s12653_s20 }
 0x4f9   : > { %7648 = vrot.lane.b32.xlu1 %v15132_v48, %s12653_s20 }
 0x4fa   : > { %v12120_v60 = vpack.c.bf16 %v7410_v20, %v7408_v31  ;;  %v6719_v12 = vpop.permute.xlu0 %6718  ;;  %v12121_v29 = vpack.c.bf16 %v7411_v52, %v7409_v19 }
 0x4fb   : > { %v6781_v41 = vpop.permute.xlu1 %6780 }
 0x4fc   : > { %7650 = vrot.lane.b32.xlu0 %v15051_v30, %s12653_s20  ;;  %10281 = vmatprep.subr.bf16.mxu1 %v12121_v29  ;;  %v6801_v36 = vsel %vm6788_vm15, %v6781_v41, %v6717_v45  ;;  %v6849_v35 = vsel %vm6788_vm15, %v6717_v45, %v6781_v41 }
 0x4fd   : > { %7636 = vrot.lane.b32.xlu1 %v15117_v5, %s12653_s20  ;;  %10282 = vmatpush2.bf16.msra.mxu1 %v12120_v60  ;;  %v6892_v26 = vmul.f32 %v15815_v40, %v6849_v35  ;;  %v6893_v2 = vmul.f32 %v15818_v23, %v6801_v36 }
 0x4fe   : > { %v6783_v37 = vpop.permute.xlu0 %6782 }
 0x4ff   : > { %v6802_v53 = vsel %vm6788_vm15, %v6783_v37, %v6719_v12  ;;  %v6850_v61 = vsel %vm6788_vm15, %v6719_v12, %v6783_v37  ;;  %v7269_v54 = vpop.permute.xlu1 %7268 }
 0x500   : > { %v6894_v27 = vmul.f32 %v15815_v40, %v6850_v61  ;;  %v6895_v51 = vmul.f32 %v15818_v23, %v6802_v53  ;;  %7638 = vrot.lane.b32.xlu0 %v15009_v10, %s12653_s20 }
 0x501   : > { %7640 = vrot.lane.b32.xlu1 %v15124_v14, %s12653_s20 }
 0x502   : > { %v12086_v11 = vpack.c.bf16 %v6894_v27, %v6892_v26  ;;  %v7271_v0 = vpop.permute.xlu0 %7270  ;;  %v12087_v3 = vpack.c.bf16 %v6895_v51, %v6893_v2 }
 0x503   : > { %v7273_v56 = vpop.permute.xlu1 %7272  ;;  %v7297_v45 = vsel %vm7284_vm2, %v7269_v54, %v7271_v0  ;;  %v7361_v31 = vsel %vm7284_vm2, %v7271_v0, %v7269_v54 }
 0x504   : > { %7642 = vrot.lane.b32.xlu0 %v15021_v55, %s12653_s20  ;;  %10170 = vmatprep.subr.bf16.mxu0 %v12087_v3  ;;  %v7404_v12 = vmul.f32 %v15840_v9, %v7297_v45  ;;  %v7405_v29 = vmul.f32 %v15843_v63, %v7361_v31 }
 0x505   : > { %7628 = vrot.lane.b32.xlu1 %v17110_v62, %s12653_s20  ;;  %10171 = vmatpush2.bf16.msra.mxu0 %v12086_v11 }
 0x506   : > { %v7275_v19 = vpop.permute.xlu0 %7274 }
 0x507   : > { %v7298_v20 = vsel %vm7284_vm2, %v7273_v56, %v7275_v19  ;;  %v7362_v52 = vsel %vm7284_vm2, %v7275_v19, %v7273_v56  ;;  %v6713_v60 = vpop.permute.xlu1 %6712 }
 0x508   : > { %v7406_v41 = vmul.f32 %v15840_v9, %v7298_v20  ;;  %v7407_v36 = vmul.f32 %v15843_v63, %v7362_v52  ;;  %7630 = vrot.lane.b32.xlu0 %v17108_v34, %s12653_s20 }
 0x509   : > { %7632 = vrot.lane.b32.xlu1 %v17111_v18, %s12653_s20 }
 0x50a   : > { %v12118_v35 = vpack.c.bf16 %v7406_v41, %v7404_v12  ;;  %v6715_v37 = vpop.permute.xlu0 %6714  ;;  %v12119_v53 = vpack.c.bf16 %v7407_v36, %v7405_v29 }
 0x50b   : > { %v6777_v61 = vpop.permute.xlu1 %6776 }
 0x50c   : > { %7634 = vrot.lane.b32.xlu0 %v17109_v59, %s12653_s20  ;;  %10283 = vmatprep.subr.bf16.mxu1 %v12119_v53  ;;  %v6799_v54 = vsel %vm6788_vm15, %v6777_v61, %v6713_v60  ;;  %v6847_v26 = vsel %vm6788_vm15, %v6713_v60, %v6777_v61 }
 0x50d   : > { %7620 = vrot.lane.b32.xlu1 %v17117_v13, %s12653_s20  ;;  %10284 = vmatpush2.bf16.msra.mxu1 %v12118_v35  ;;  %v6888_v0 = vmul.f32 %v15815_v40, %v6847_v26  ;;  %v6889_v3 = vmul.f32 %v15818_v23, %v6799_v54 }
 0x50e   : > { %v6779_v2 = vpop.permute.xlu0 %6778 }
 0x50f   : > { %v6800_v27 = vsel %vm6788_vm15, %v6779_v2, %v6715_v37  ;;  %v6848_v51 = vsel %vm6788_vm15, %v6715_v37, %v6779_v2  ;;  %v7261_v11 = vpop.permute.xlu1 %7260 }
 0x510   : > { %v6890_v56 = vmul.f32 %v15815_v40, %v6848_v51  ;;  %v6891_v45 = vmul.f32 %v15818_v23, %v6800_v27  ;;  %7622 = vrot.lane.b32.xlu0 %v17115_v16, %s12653_s20 }
 0x511   : > { %7624 = vrot.lane.b32.xlu1 %v17118_v50, %s12653_s20 }
 0x512   : > { %v12084_v31 = vpack.c.bf16 %v6890_v56, %v6888_v0  ;;  %v7263_v19 = vpop.permute.xlu0 %7262  ;;  %v12085_v20 = vpack.c.bf16 %v6891_v45, %v6889_v3 }
 0x513   : > { %v7265_v52 = vpop.permute.xlu1 %7264  ;;  %v7295_v60 = vsel %vm7284_vm2, %v7261_v11, %v7263_v19  ;;  %v7359_v12 = vsel %vm7284_vm2, %v7263_v19, %v7261_v11 }
 0x514   : > { %7626 = vrot.lane.b32.xlu0 %v17116_v25, %s12653_s20  ;;  %10172 = vmatprep.subr.bf16.mxu0 %v12085_v20  ;;  %v7400_v37 = vmul.f32 %v15840_v9, %v7295_v60  ;;  %v7401_v53 = vmul.f32 %v15843_v63, %v7359_v12 }
 0x515   : > { %7612 = vrot.lane.b32.xlu1 %v17121_v33, %s12653_s20  ;;  %10173 = vmatpush2.bf16.msra.mxu0 %v12084_v31 }
 0x516   : > { %v7267_v29 = vpop.permute.xlu0 %7266 }
 0x517   : > { %v7296_v41 = vsel %vm7284_vm2, %v7265_v52, %v7267_v29  ;;  %v7360_v36 = vsel %vm7284_vm2, %v7267_v29, %v7265_v52  ;;  %v6709_v35 = vpop.permute.xlu1 %6708 }
 0x518   : > { %v7402_v61 = vmul.f32 %v15840_v9, %v7296_v41  ;;  %v7403_v54 = vmul.f32 %v15843_v63, %v7360_v36  ;;  %7614 = vrot.lane.b32.xlu0 %v17119_v28, %s12653_s20 }
 0x519   : > { %7616 = vrot.lane.b32.xlu1 %v17122_v15, %s12653_s20 }
 0x51a   : > { %v12116_v26 = vpack.c.bf16 %v7402_v61, %v7400_v37  ;;  %v6711_v2 = vpop.permute.xlu0 %6710  ;;  %v12117_v27 = vpack.c.bf16 %v7403_v54, %v7401_v53 }
 0x51b   : > { %v6773_v51 = vpop.permute.xlu1 %6772 }
 0x51c   : > { %7618 = vrot.lane.b32.xlu0 %v17120_v24, %s12653_s20  ;;  %10285 = vmatprep.subr.bf16.mxu1 %v12117_v27  ;;  %v6797_v11 = vsel %vm6788_vm15, %v6773_v51, %v6709_v35  ;;  %v6845_v0 = vsel %vm6788_vm15, %v6709_v35, %v6773_v51 }
 0x51d   : > { %7604 = vrot.lane.b32.xlu1 %v17125_v58, %s12653_s20  ;;  %10286 = vmatpush2.bf16.msra.mxu1 %v12116_v26  ;;  %v6884_v19 = vmul.f32 %v15815_v40, %v6845_v0  ;;  %v6885_v20 = vmul.f32 %v15818_v23, %v6797_v11 }
 0x51e   : > { %v6775_v3 = vpop.permute.xlu0 %6774 }
 0x51f   : > { %v6798_v56 = vsel %vm6788_vm15, %v6775_v3, %v6711_v2  ;;  %v6846_v45 = vsel %vm6788_vm15, %v6711_v2, %v6775_v3  ;;  %v7253_v31 = vpop.permute.xlu1 %7252 }
 0x520   : > { %v6886_v52 = vmul.f32 %v15815_v40, %v6846_v45  ;;  %v6887_v60 = vmul.f32 %v15818_v23, %v6798_v56  ;;  %7606 = vrot.lane.b32.xlu0 %v17123_v22, %s12653_s20 }
 0x521   : > { %7608 = vrot.lane.b32.xlu1 %v17126_v49, %s12653_s20 }
 0x522   : > { %v12082_v12 = vpack.c.bf16 %v6886_v52, %v6884_v19  ;;  %v7255_v29 = vpop.permute.xlu0 %7254  ;;  %v12083_v41 = vpack.c.bf16 %v6887_v60, %v6885_v20 }
 0x523   : > { %v7257_v36 = vpop.permute.xlu1 %7256  ;;  %v7293_v35 = vsel %vm7284_vm2, %v7253_v31, %v7255_v29  ;;  %v7357_v37 = vsel %vm7284_vm2, %v7255_v29, %v7253_v31 }
 0x524   : > { %7610 = vrot.lane.b32.xlu0 %v17124_v42, %s12653_s20  ;;  %10174 = vmatprep.subr.bf16.mxu0 %v12083_v41  ;;  %v7396_v2 = vmul.f32 %v15840_v9, %v7293_v35  ;;  %v7397_v27 = vmul.f32 %v15843_v63, %v7357_v37 }
 0x525   : > { %7596 = vrot.lane.b32.xlu1 %v17129_v47, %s12653_s20  ;;  %10175 = vmatpush2.bf16.msra.mxu0 %v12082_v12 }
 0x526   : > { %v7259_v53 = vpop.permute.xlu0 %7258 }
 0x527   : > { %v7294_v61 = vsel %vm7284_vm2, %v7257_v36, %v7259_v53  ;;  %v7358_v54 = vsel %vm7284_vm2, %v7259_v53, %v7257_v36  ;;  %v6705_v26 = vpop.permute.xlu1 %6704 }
 0x528   : > { %v7398_v51 = vmul.f32 %v15840_v9, %v7294_v61  ;;  %v7399_v11 = vmul.f32 %v15843_v63, %v7358_v54  ;;  %7598 = vrot.lane.b32.xlu0 %v17127_v6, %s12653_s20 }
 0x529   : > { %7600 = vrot.lane.b32.xlu1 %v15061_v43, %s12653_s20 }
 0x52a   : > { %v12114_v0 = vpack.c.bf16 %v7398_v51, %v7396_v2  ;;  %v6707_v3 = vpop.permute.xlu0 %6706  ;;  %v12115_v56 = vpack.c.bf16 %v7399_v11, %v7397_v27 }
 0x52b   : > { %v6769_v45 = vpop.permute.xlu1 %6768 }
 0x52c   : > { %7602 = vrot.lane.b32.xlu0 %v17128_v4, %s12653_s20  ;;  %10287 = vmatprep.subr.bf16.mxu1 %v12115_v56  ;;  %v6795_v31 = vsel %vm6788_vm15, %v6769_v45, %v6705_v26  ;;  %v6843_v19 = vsel %vm6788_vm15, %v6705_v26, %v6769_v45 }
 0x52d   : > { %7588 = vrot.lane.b32.xlu1 %v15019_v7, %s12653_s20  ;;  %10288 = vmatpush2.bf16.msra.mxu1 %v12114_v0  ;;  %v6880_v29 = vmul.f32 %v15815_v40, %v6843_v19  ;;  %v6881_v41 = vmul.f32 %v15818_v23, %v6795_v31 }
 0x52e   : > { %v6771_v20 = vpop.permute.xlu0 %6770 }
 0x52f   : > { %v6796_v52 = vsel %vm6788_vm15, %v6771_v20, %v6707_v3  ;;  %v6844_v60 = vsel %vm6788_vm15, %v6707_v3, %v6771_v20  ;;  %v7245_v12 = vpop.permute.xlu1 %7244 }
 0x530   : > { %v6882_v36 = vmul.f32 %v15815_v40, %v6844_v60  ;;  %v6883_v35 = vmul.f32 %v15818_v23, %v6796_v52  ;;  %7590 = vrot.lane.b32.xlu0 %v14860_v1, %s12653_s20 }
 0x531   : > { %7592 = vrot.lane.b32.xlu1 %v15033_v46, %s12653_s20 }
 0x532   : > { %v12080_v37 = vpack.c.bf16 %v6882_v36, %v6880_v29  ;;  %v7247_v53 = vpop.permute.xlu0 %7246  ;;  %v12081_v61 = vpack.c.bf16 %v6883_v35, %v6881_v41 }
 0x533   : > { %v7249_v54 = vpop.permute.xlu1 %7248  ;;  %v7291_v26 = vsel %vm7284_vm2, %v7245_v12, %v7247_v53  ;;  %v7355_v2 = vsel %vm7284_vm2, %v7247_v53, %v7245_v12 }
 0x534   : > { %7594 = vrot.lane.b32.xlu0 %v14871_v38, %s12653_s20  ;;  %10176 = vmatprep.subr.bf16.mxu0 %v12081_v61  ;;  %v7392_v3 = vmul.f32 %v15840_v9, %v7291_v26  ;;  %v7393_v56 = vmul.f32 %v15843_v63, %v7355_v2 }
 0x535   : > { %8015 = vrot.lane.b32.xlu1 %v15126_v8, %s12654_s21  ;;  %10177 = vmatpush2.bf16.msra.mxu0 %v12080_v37 }
 0x536   : > { %v7251_v27 = vpop.permute.xlu0 %7250 }
 0x537   : > { %v7292_v51 = vsel %vm7284_vm2, %v7249_v54, %v7251_v27  ;;  %v7356_v11 = vsel %vm7284_vm2, %v7251_v27, %v7249_v54  ;;  %v6701_v0 = vpop.permute.xlu1 %6700 }
 0x538   : > { %v7394_v45 = vmul.f32 %v15840_v9, %v7292_v51  ;;  %v7395_v31 = vmul.f32 %v15843_v63, %v7356_v11  ;;  %8017 = vrot.lane.b32.xlu0 %v15037_v57, %s12654_s21 }
 0x539   : > { %8019 = vrot.lane.b32.xlu1 %v15132_v48, %s12654_s21 }
 0x53a   : > { %v12112_v19 = vpack.c.bf16 %v7394_v45, %v7392_v3  ;;  %v6703_v20 = vpop.permute.xlu0 %6702  ;;  %v12113_v52 = vpack.c.bf16 %v7395_v31, %v7393_v56 }
 0x53b   : > { %v6765_v60 = vpop.permute.xlu1 %6764 }
 0x53c   : > { %8021 = vrot.lane.b32.xlu0 %v15051_v30, %s12654_s21  ;;  %10289 = vmatprep.subr.bf16.mxu1 %v12113_v52  ;;  %v6793_v12 = vsel %vm6788_vm15, %v6765_v60, %v6701_v0  ;;  %v6841_v29 = vsel %vm6788_vm15, %v6701_v0, %v6765_v60 }
 0x53d   : > { %8383 = vrot.lane.b32.xlu1 %v15126_v8, %s12655_s22  ;;  %10290 = vmatpush2.bf16.msra.mxu1 %v12112_v19  ;;  %v6876_v53 = vmul.f32 %v15815_v40, %v6841_v29  ;;  %v6877_v61 = vmul.f32 %v15818_v23, %v6793_v12 }
 0x53e   : > { %v6767_v41 = vpop.permute.xlu0 %6766 }
 0x53f   : > { %v6794_v36 = vsel %vm6788_vm15, %v6767_v41, %v6703_v20  ;;  %v6842_v35 = vsel %vm6788_vm15, %v6703_v20, %v6767_v41  ;;  %v7237_v37 = vpop.permute.xlu1 %7236 }
 0x540   : > { %v6878_v54 = vmul.f32 %v15815_v40, %v6842_v35  ;;  %v6879_v26 = vmul.f32 %v15818_v23, %v6794_v36  ;;  %8385 = vrot.lane.b32.xlu0 %v15037_v57, %s12655_s22 }
 0x541   : > { %8387 = vrot.lane.b32.xlu1 %v15132_v48, %s12655_s22 }
 0x542   : > { %v12078_v8 = vpack.c.bf16 %v6878_v54, %v6876_v53  ;;  %v7239_v2 = vpop.permute.xlu0 %7238  ;;  %v12079_v27 = vpack.c.bf16 %v6879_v26, %v6877_v61 }
 0x543   : > { %v7241_v51 = vpop.permute.xlu1 %7240  ;;  %v7289_v11 = vsel %vm7284_vm2, %v7237_v37, %v7239_v2  ;;  %v7353_v0 = vsel %vm7284_vm2, %v7239_v2, %v7237_v37 }
 0x544   : > { %8389 = vrot.lane.b32.xlu0 %v15051_v30, %s12655_s22  ;;  %10178 = vmatprep.subr.bf16.mxu0 %v12079_v27  ;;  %v7388_v45 = vmul.f32 %v15840_v9, %v7289_v11  ;;  %v7389_v31 = vmul.f32 %v15843_v63, %v7353_v0 }
 0x545   : > { %8007 = vrot.lane.b32.xlu1 %v15117_v5, %s12654_s21  ;;  %10179 = vmatpush2.bf16.msra.mxu0 %v12078_v8 }
 0x546   : > { %v7243_v57 = vpop.permute.xlu0 %7242 }
 0x547   : > { %v7290_v3 = vsel %vm7284_vm2, %v7241_v51, %v7243_v57  ;;  %v7354_v48 = vsel %vm7284_vm2, %v7243_v57, %v7241_v51  ;;  %v6697_v56 = vpop.permute.xlu1 %6696 }
 0x548   : > { %v7390_v30 = vmul.f32 %v15840_v9, %v7290_v3  ;;  %v7391_v19 = vmul.f32 %v15843_v63, %v7354_v48  ;;  %8009 = vrot.lane.b32.xlu0 %v15009_v10, %s12654_s21 }
 0x549   : > { %8011 = vrot.lane.b32.xlu1 %v15124_v14, %s12654_s21 }
 0x54a   : > { %v12110_v20 = vpack.c.bf16 %v7390_v30, %v7388_v45  ;;  %v6699_v52 = vpop.permute.xlu0 %6698  ;;  %v12111_v60 = vpack.c.bf16 %v7391_v19, %v7389_v31 }
 0x54b   : > { %v6761_v12 = vpop.permute.xlu1 %6760 }
 0x54c   : > { %8013 = vrot.lane.b32.xlu0 %v15021_v55, %s12654_s21  ;;  %10291 = vmatprep.subr.bf16.mxu1 %v12111_v60  ;;  %v6791_v29 = vsel %vm6788_vm15, %v6761_v12, %v6697_v56  ;;  %v6839_v41 = vsel %vm6788_vm15, %v6697_v56, %v6761_v12 }
 0x54d   : > { %8375 = vrot.lane.b32.xlu1 %v15117_v5, %s12655_s22  ;;  %10292 = vmatpush2.bf16.msra.mxu1 %v12110_v20  ;;  %v6872_v61 = vmul.f32 %v15815_v40, %v6839_v41  ;;  %v6873_v54 = vmul.f32 %v15818_v23, %v6791_v29 }
 0x54e   : > { %v6763_v36 = vpop.permute.xlu0 %6762 }
 0x54f   : > { %v6792_v35 = vsel %vm6788_vm15, %v6763_v36, %v6699_v52  ;;  %v6840_v37 = vsel %vm6788_vm15, %v6699_v52, %v6763_v36  ;;  %v7229_v53 = vpop.permute.xlu1 %7228  ;;  %v12480_v52 = vld [vmem:[%s16833_s5] sm:$0x3] }
 0x550   : > { %v6874_v26 = vmul.f32 %v15815_v40, %v6840_v37  ;;  %v6875_v8 = vmul.f32 %v15818_v23, %v6792_v35  ;;  %8377 = vrot.lane.b32.xlu0 %v15009_v10, %s12655_s22  ;;  %vm7733_vm4 = vcmp.ge.s32.totalorder %v12480_v52, 4294967295  ;;  %vm7734_vm3 = vcmp.lt.s32.totalorder %v12480_v52, 15 }
 0x551   : > { %8379 = vrot.lane.b32.xlu1 %v15124_v14, %s12655_s22  ;;  %vm16064_vm9 = vmand %vm7733_vm4, %vm7734_vm3 }
 0x552   : > { %v12076_v5 = vpack.c.bf16 %v6874_v26, %v6872_v61  ;;  %v7231_v2 = vpop.permute.xlu0 %7230  ;;  %v12077_v27 = vpack.c.bf16 %v6875_v8, %v6873_v54  ;;  %vm7736_vm11 = vmand %vm16064_vm9, %vm5745_vm12  ;;  %vm7652_vm12 = vcmask 924672  }
 0x553   : > { %v7233_v51 = vpop.permute.xlu1 %7232  ;;  %v7287_v11 = vsel %vm7284_vm2, %v7229_v53, %v7231_v2  ;;  %v7351_v0 = vsel %vm7284_vm2, %v7231_v2, %v7229_v53  ;;  %vm7737_vm14 = vmand %vm7736_vm11, %vm5747_vm0 }
 0x554   : > { %8381 = vrot.lane.b32.xlu0 %v15021_v55, %s12655_s22  ;;  %10180 = vmatprep.subr.bf16.mxu0 %v12077_v27  ;;  %v7384_v48 = vmul.f32 %v15840_v9, %v7287_v11  ;;  %v7385_v56 = vmul.f32 %v15843_v63, %v7351_v0  ;;  %vm8104_vm0 = vmand %vm16064_vm9, %vm911_vm8  ;;  %vm8023_vm8 = vcmask 916480  }
 0x555   : > { %7999 = vrot.lane.b32.xlu1 %v17110_v62, %s12654_s21  ;;  %10181 = vmatpush2.bf16.msra.mxu0 %v12076_v5  ;;  %vm8105_vm13 = vmand %vm8104_vm0, %vm913_vm10 }
 0x556   : > { %v7235_v10 = vpop.permute.xlu0 %7234  ;;  %v11337_v39 = vsel %vm8105_vm13, 1.0, %v17104_v44  ;;  %vm8472_vm10 = vmand %vm16064_vm9, %vm6483_vm7 }
 0x557   : > { %v7288_v57 = vsel %vm7284_vm2, %v7233_v51, %v7235_v10  ;;  %v7352_v14 = vsel %vm7284_vm2, %v7235_v10, %v7233_v51  ;;  %v6693_v3 = vpop.permute.xlu1 %6692  ;;  %vm8473_vm7 = vmand %vm8472_vm10, %vm6485_vm5  ;;  %vm8391_vm5 = vcmask 908288  }
 0x558   : > { %v7386_v55 = vmul.f32 %v15840_v9, %v7288_v57  ;;  %v7387_v45 = vmul.f32 %v15843_v63, %v7352_v14  ;;  %8001 = vrot.lane.b32.xlu0 %v17108_v34, %s12654_s21 }
 0x559   : > { %8003 = vrot.lane.b32.xlu1 %v17111_v18, %s12654_s21 }
 0x55a   : > { %v12108_v31 = vpack.c.bf16 %v7386_v55, %v7384_v48  ;;  %v6695_v30 = vpop.permute.xlu0 %6694  ;;  %v12109_v19 = vpack.c.bf16 %v7387_v45, %v7385_v56 }
 0x55b   : > { %v6757_v20 = vpop.permute.xlu1 %6756 }
 0x55c   : > { %8005 = vrot.lane.b32.xlu0 %v17109_v59, %s12654_s21  ;;  %10293 = vmatprep.subr.bf16.mxu1 %v12109_v19  ;;  %v6789_v60 = vsel %vm6788_vm15, %v6757_v20, %v6693_v3  ;;  %v6837_v12 = vsel %vm6788_vm15, %v6693_v3, %v6757_v20  ;;  %v11320_v3 = vsel %vm7737_vm14, 1.0, %v17104_v44  ;;  %v12395_v20 = vld [vmem:[#allocation9 + $0x10] ss:$36 sps:$4 sm:$0xff]  }
 0x55d   : > { %8367 = vrot.lane.b32.xlu1 %v17110_v62, %s12655_s22  ;;  %10294 = vmatpush2.bf16.msra.mxu1 %v12108_v31  ;;  %v6868_v53 = vmul.f32 %v15815_v40, %v6837_v12  ;;  %v6869_v61 = vmul.f32 %v15818_v23, %v6789_v60  ;;  %v16100_v45 = vrot.slane %v11320_v3, %v17106_v21  ;;  %v12399_v60 = vld [vmem:[#allocation9 + $0x9c] ss:$36 sps:$4 sm:$0xff]  }
 0x55e   : > { %v6759_v29 = vpop.permute.xlu0 %6758  ;;  %v12401_v12 = vld [vmem:[#allocation9 + $0x5c] ss:$36 sps:$4 sm:$0xff]  }
 0x55f   : > { %v6790_v41 = vsel %vm6788_vm15, %v6759_v29, %v6695_v30  ;;  %v6838_v36 = vsel %vm6788_vm15, %v6695_v30, %v6759_v29  ;;  %v7221_v35 = vpop.permute.xlu1 %7220  ;;  %v12398_v30 = vld [vmem:[#allocation9 + $0x50] ss:$36 sps:$4 sm:$0xff]  }
 0x560   : > { %v6870_v54 = vmul.f32 %v15815_v40, %v6838_v36  ;;  %v6871_v26 = vmul.f32 %v15818_v23, %v6790_v41  ;;  %8369 = vrot.lane.b32.xlu0 %v17108_v34, %s12655_s22  ;;  %v12389_v40 = vld [vmem:[#allocation9 + $0x8] ss:$36 sps:$4 sm:$0xff]  }
 0x561   : > { %8371 = vrot.lane.b32.xlu1 %v17111_v18, %s12655_s22  ;;  %v12393_v18 = vld [vmem:[#allocation9 + $0x54] ss:$36 sps:$4 sm:$0xff]  }
 0x562   : > { %v12074_v62 = vpack.c.bf16 %v6870_v54, %v6868_v53  ;;  %v7223_v8 = vpop.permute.xlu0 %7222  ;;  %v12075_v5 = vpack.c.bf16 %v6871_v26, %v6869_v61 }
 0x563   : > { %v7225_v2 = vpop.permute.xlu1 %7224  ;;  %v7285_v27 = vsel %vm7284_vm2, %v7221_v35, %v7223_v8  ;;  %v7349_v34 = vsel %vm7284_vm2, %v7223_v8, %v7221_v35 }
 0x564   : > { %8373 = vrot.lane.b32.xlu0 %v17109_v59, %s12655_s22  ;;  %10182 = vmatprep.subr.bf16.mxu0 %v12075_v5  ;;  %v7380_v51 = vmul.f32 %v15840_v9, %v7285_v27  ;;  %v7381_v10 = vmul.f32 %v15843_v63, %v7349_v34  ;;  %v12407_v34 = vld [vmem:[#allocation9 + $0xa4] ss:$36 sps:$4 sm:$0xff]  }
 0x565   : > { %7991 = vrot.lane.b32.xlu1 %v17117_v13, %s12654_s21  ;;  %10183 = vmatpush2.bf16.msra.mxu0 %v12074_v62 }
 0x566   : > { %v7227_v23 = vpop.permute.xlu0 %7226 }
 0x567   : > { %v7286_v11 = vsel %vm7284_vm2, %v7225_v2, %v7227_v23  ;;  %v7350_v0 = vsel %vm7284_vm2, %v7227_v23, %v7225_v2  ;;  %v7645_v59 = vpop.permute.xlu1 %7644  ;;  %v12403_v2 = vld [vmem:[#allocation9 + $0x98] ss:$36 sps:$4 sm:$0xff]  }
 0x568   : > { %v7382_v57 = vmul.f32 %v15840_v9, %v7286_v11  ;;  %v7383_v14 = vmul.f32 %v15843_v63, %v7350_v0  ;;  %7993 = vrot.lane.b32.xlu0 %v17115_v16, %s12654_s21  ;;  %10185 = vmatmul.mubr.bf16.vlgmr.msra.gmra.mxu0 %v12389_v40  ;;  %v16103_v63 = vrot.slane %v11320_v3, %v17105_v17  ;;  %v12405_v40 = vld [vmem:[#allocation9 + $0xe4] ss:$36 sps:$4 sm:$0xff]  }
 0x569   : > { %7995 = vrot.lane.b32.xlu1 %v17118_v50, %s12654_s21  ;;  %10194 = vmatprep.mubr.bf16.mxu0 %v12393_v18 }
 0x56a   : > { %v12106_v48 = vpack.c.bf16 %v7382_v57, %v7380_v51  ;;  %v7647_v56 = vpop.permute.xlu0 %7646  ;;  %v12107_v55 = vpack.c.bf16 %v7383_v14, %v7381_v10 }
 0x56b   : > { %v7649_v9 = vpop.permute.xlu1 %7648  ;;  %v7667_v31 = vsel %vm7652_vm12, %v7645_v59, %v7647_v56  ;;  %v7731_v19 = vsel %vm7652_vm12, %v7647_v56, %v7645_v59  ;;  %v12409_v56 = vld [vmem:[#allocation9 + $0xe0] ss:$36 sps:$4 sm:$0xff]  }
 0x56c   : > { %7997 = vrot.lane.b32.xlu0 %v17116_v25, %s12654_s21  ;;  %10295 = vmatprep.subr.bf16.mxu1 %v12107_v55  ;;  %v7779_v29 = vmul.f32 %v16100_v45, %v7667_v31  ;;  %v7780_v53 = vmul.f32 %v16103_v63, %v7731_v19  ;;  %v12414_v19 = vld [vmem:[#allocation9 + $0xec] ss:$36 sps:$4 sm:$0xff]  }
 0x56d   : > { %8359 = vrot.lane.b32.xlu1 %v17117_v13, %s12655_s22  ;;  %10296 = vmatpush2.bf16.msra.mxu1 %v12106_v48 }
 0x56e   : > { %v7651_v52 = vpop.permute.xlu0 %7650 }
 0x56f   : > { %v7668_v41 = vsel %vm7652_vm12, %v7649_v9, %v7651_v52  ;;  %v7732_v36 = vsel %vm7652_vm12, %v7651_v52, %v7649_v9  ;;  %v7637_v35 = vpop.permute.xlu1 %7636  ;;  %v12410_v9 = vld [vmem:[#allocation9 + $0xa0] ss:$36 sps:$4 sm:$0xff]  }
 0x570   : > { %v7781_v61 = vmul.f32 %v16100_v45, %v7668_v41  ;;  %v7782_v54 = vmul.f32 %v16103_v63, %v7732_v36  ;;  %8361 = vrot.lane.b32.xlu0 %v17115_v16, %s12655_s22  ;;  %10195 = vmatmul.mubr.bf16.gmra.mxu0 %v12398_v30  ;;  %v12413_v30 = vld [vmem:[#allocation9 + $0x12c] ss:$36 sps:$4 sm:$0xff]  }
 0x571   : > { %8363 = vrot.lane.b32.xlu1 %v17118_v50, %s12655_s22  ;;  %10298 = vmatmul.mubr.bf16.vlgmr.msra.gmra.mxu1 %v12395_v20  ;;  %v12404_v50 = vld [vmem:[#allocation9 + $0x58] ss:$36 sps:$4 sm:$0xff]  }
 0x572   : > { %v12136_v13 = vpack.c.bf16 %v7781_v61, %v7779_v29  ;;  %v7639_v26 = vpop.permute.xlu0 %7638  ;;  %v12137_v62 = vpack.c.bf16 %v7782_v54, %v7780_v53  ;;  %10204 = vmatprep.mubr.bf16.mxu0 %v12399_v60  ;;  %10307 = vmatprep.mubr.bf16.mxu1 %v12401_v12 }
 0x573   : > { %v7641_v8 = vpop.permute.xlu1 %7640  ;;  %v7665_v5 = vsel %vm7652_vm12, %v7637_v35, %v7639_v26  ;;  %v7729_v16 = vsel %vm7652_vm12, %v7639_v26, %v7637_v35 }
 0x574   : > { %8365 = vrot.lane.b32.xlu0 %v17116_v25, %s12655_s22  ;;  %10378 = vmatprep.subr.bf16.mxu0 %v12137_v62  ;;  %v7775_v18 = vmul.f32 %v16100_v45, %v7665_v5  ;;  %v7776_v25 = vmul.f32 %v16103_v63, %v7729_v16  ;;  %v12419_v62 = vld [vmem:[#allocation9 + $0x174] ss:$36 sps:$4 sm:$0xff]  }
 0x575   : > { %7983 = vrot.lane.b32.xlu1 %v17121_v33, %s12654_s21  ;;  %10379 = vmatpush1.bf16.msra.mxu0 %v12136_v13  ;;  %v12411_v13 = vld [vmem:[#allocation9 + $0x128] ss:$36 sps:$4 sm:$0xff]  }
 0x576   : > { %v7643_v27 = vpop.permute.xlu0 %7642 }
 0x577   : > { %v7666_v23 = vsel %vm7652_vm12, %v7641_v8, %v7643_v27  ;;  %v7730_v51 = vsel %vm7652_vm12, %v7643_v27, %v7641_v8  ;;  %v7629_v11 = vpop.permute.xlu1 %7628  ;;  %v12422_v8 = vld [vmem:[#allocation9 + $0x134] ss:$36 sps:$4 sm:$0xff]  }
 0x578   : > { %v7777_v0 = vmul.f32 %v16100_v45, %v7666_v23  ;;  %v7778_v59 = vmul.f32 %v16103_v63, %v7730_v51  ;;  %7985 = vrot.lane.b32.xlu0 %v17119_v28, %s12654_s21  ;;  %10205 = vmatmul.mubr.bf16.gmra.mxu0 %v12403_v2 }
 0x579   : > { %7987 = vrot.lane.b32.xlu1 %v17122_v15, %s12654_s21  ;;  %10308 = vmatmul.mubr.bf16.gmra.mxu1 %v12404_v50 }
 0x57a   : > { %v12134_v10 = vpack.c.bf16 %v7777_v0, %v7775_v18  ;;  %v7631_v57 = vpop.permute.xlu0 %7630  ;;  %v12135_v14 = vpack.c.bf16 %v7778_v59, %v7776_v25  ;;  %10214 = vmatprep.mubr.bf16.mxu0 %v12405_v40  ;;  %10317 = vmatprep.mubr.bf16.mxu1 %v12407_v34  ;;  %v12417_v25 = vld [vmem:[#allocation9 + $0x170] ss:$36 sps:$4 sm:$0xff]  }
 0x57b   : > { %v7633_v3 = vpop.permute.xlu1 %7632  ;;  %v7663_v48 = vsel %vm7652_vm12, %v7629_v11, %v7631_v57  ;;  %v7727_v55 = vsel %vm7652_vm12, %v7631_v57, %v7629_v11  ;;  %v12420_v59 = vld [vmem:[#allocation9 + $0x130] ss:$36 sps:$4 sm:$0xff]   ;;  %v12425_v57 = vld [vmem:[#allocation9 + $0x1bc] ss:$36 sps:$4 sm:$0xff]  }
 0x57c   : > { %7989 = vrot.lane.b32.xlu0 %v17120_v24, %s12654_s21  ;;  %10380 = vmatprep.subr.bf16.mxu0 %v12135_v14  ;;  %v7771_v20 = vmul.f32 %v16100_v45, %v7663_v48  ;;  %v7772_v29 = vmul.f32 %v16103_v63, %v7727_v55  ;;  %v12428_v14 = vld [vmem:[#allocation9 + $0x17c] ss:$36 sps:$4 sm:$0xff]  }
 0x57d   : > { %8351 = vrot.lane.b32.xlu1 %v17121_v33, %s12655_s22  ;;  %10381 = vmatpush1.bf16.msra.mxu0 %v12134_v10 }
 0x57e   : > { %v7635_v31 = vpop.permute.xlu0 %7634 }
 0x57f   : > { %v7664_v52 = vsel %vm7652_vm12, %v7633_v3, %v7635_v31  ;;  %v7728_v60 = vsel %vm7652_vm12, %v7635_v31, %v7633_v3  ;;  %v7621_v12 = vpop.permute.xlu1 %7620 }
 0x580   : > { %v7773_v41 = vmul.f32 %v16100_v45, %v7664_v52  ;;  %v7774_v36 = vmul.f32 %v16103_v63, %v7728_v60  ;;  %8353 = vrot.lane.b32.xlu0 %v17119_v28, %s12655_s22  ;;  %10215 = vmatmul.mubr.bf16.gmra.mxu0 %v12409_v56 }
 0x581   : > { %8355 = vrot.lane.b32.xlu1 %v17122_v15, %s12655_s22  ;;  %10318 = vmatmul.mubr.bf16.gmra.mxu1 %v12410_v9  ;;  %v12416_v15 = vld [vmem:[#allocation9 + $0xe8] ss:$36 sps:$4 sm:$0xff]  }
 0x582   : > { %v12132_v33 = vpack.c.bf16 %v7773_v41, %v7771_v20  ;;  %v7623_v35 = vpop.permute.xlu0 %7622  ;;  %v12133_v53 = vpack.c.bf16 %v7774_v36, %v7772_v29  ;;  %10224 = vmatprep.mubr.bf16.mxu0 %v12413_v30  ;;  %10327 = vmatprep.mubr.bf16.mxu1 %v12414_v19  ;;  %v12431_v41 = vld [vmem:[#allocation9 + $0x204] ss:$36 sps:$4 sm:$0xff]  }
 0x583   : > { %v7625_v61 = vpop.permute.xlu1 %7624  ;;  %v7661_v54 = vsel %vm7652_vm12, %v7621_v12, %v7623_v35  ;;  %v7725_v28 = vsel %vm7652_vm12, %v7623_v35, %v7621_v12  ;;  %v12423_v12 = vld [vmem:[#allocation9 + $0x1b8] ss:$36 sps:$4 sm:$0xff]   ;;  %v12434_v36 = vld [vmem:[#allocation9 + $0x1c4] ss:$36 sps:$4 sm:$0xff]  }
 0x584   : > { %8357 = vrot.lane.b32.xlu0 %v17120_v24, %s12655_s22  ;;  %10382 = vmatprep.subr.bf16.mxu0 %v12133_v53  ;;  %v7767_v5 = vmul.f32 %v16100_v45, %v7661_v54  ;;  %v7768_v24 = vmul.f32 %v16103_v63, %v7725_v28 }
 0x585   : > { %7975 = vrot.lane.b32.xlu1 %v17125_v58, %s12654_s21  ;;  %10383 = vmatpush1.bf16.msra.mxu0 %v12132_v33 }
 0x586   : > { %v7627_v26 = vpop.permute.xlu0 %7626 }
 0x587   : > { %v7662_v2 = vsel %vm7652_vm12, %v7625_v61, %v7627_v26  ;;  %v7726_v16 = vsel %vm7652_vm12, %v7627_v26, %v7625_v61  ;;  %v7613_v50 = vpop.permute.xlu1 %7612 }
 0x588   : > { %v7769_v27 = vmul.f32 %v16100_v45, %v7662_v2  ;;  %v7770_v40 = vmul.f32 %v16103_v63, %v7726_v16  ;;  %7977 = vrot.lane.b32.xlu0 %v17123_v22, %s12654_s21  ;;  %10225 = vmatmul.mubr.bf16.gmra.mxu0 %v12411_v13  ;;  %v12432_v16 = vld [vmem:[#allocation9 + $0x1c0] ss:$36 sps:$4 sm:$0xff]  }
 0x589   : > { %7979 = vrot.lane.b32.xlu1 %v17126_v49, %s12654_s21  ;;  %10328 = vmatmul.mubr.bf16.gmra.mxu1 %v12416_v15 }
 0x58a   : > { %v12130_v34 = vpack.c.bf16 %v7769_v27, %v7767_v5  ;;  %v7615_v18 = vpop.permute.xlu0 %7614  ;;  %v12131_v23 = vpack.c.bf16 %v7770_v40, %v7768_v24  ;;  %10234 = vmatprep.mubr.bf16.mxu0 %v12419_v62  ;;  %10337 = vmatprep.mubr.bf16.mxu1 %v12422_v8  ;;  %v12429_v5 = vld [vmem:[#allocation9 + $0x200] ss:$36 sps:$4 sm:$0xff]   ;;  %v12437_v24 = vld [vmem:[#allocation9 + $0x20c] ss:$36 sps:$4 sm:$0xff]  }
 0x58b   : > { %v7617_v51 = vpop.permute.xlu1 %7616  ;;  %v7659_v11 = vsel %vm7652_vm12, %v7613_v50, %v7615_v18  ;;  %v7723_v0 = vsel %vm7652_vm12, %v7615_v18, %v7613_v50 }
 0x58c   : > { %7981 = vrot.lane.b32.xlu0 %v17124_v42, %s12654_s21  ;;  %10384 = vmatprep.subr.bf16.mxu0 %v12131_v23  ;;  %v7763_v3 = vmul.f32 %v16100_v45, %v7659_v11  ;;  %v7764_v9 = vmul.f32 %v16103_v63, %v7723_v0 }
 0x58d   : > { %8343 = vrot.lane.b32.xlu1 %v17125_v58, %s12655_s22  ;;  %10385 = vmatpush1.bf16.msra.mxu0 %v12130_v34 }
 0x58e   : > { %v7619_v10 = vpop.permute.xlu0 %7618 }
 0x58f   : > { %v7660_v48 = vsel %vm7652_vm12, %v7617_v51, %v7619_v10  ;;  %v7724_v56 = vsel %vm7652_vm12, %v7619_v10, %v7617_v51  ;;  %v7605_v55 = vpop.permute.xlu1 %7604 }
 0x590   : > { %v7765_v31 = vmul.f32 %v16100_v45, %v7660_v48  ;;  %v7766_v30 = vmul.f32 %v16103_v63, %v7724_v56  ;;  %8345 = vrot.lane.b32.xlu0 %v17123_v22, %s12655_s22  ;;  %10235 = vmatmul.mubr.bf16.gmra.mxu0 %v12417_v25 }
 0x591   : > { %8347 = vrot.lane.b32.xlu1 %v17126_v49, %s12655_s22  ;;  %10338 = vmatmul.mubr.bf16.gmra.mxu1 %v12420_v59  ;;  %v12426_v49 = vld [vmem:[#allocation9 + $0x178] ss:$36 sps:$4 sm:$0xff]  }
 0x592   : > { %v12128_v58 = vpack.c.bf16 %v7765_v31, %v7763_v3  ;;  %v7607_v19 = vpop.permute.xlu0 %7606  ;;  %v12129_v20 = vpack.c.bf16 %v7766_v30, %v7764_v9  ;;  %10244 = vmatprep.mubr.bf16.mxu0 %v12425_v57  ;;  %10347 = vmatprep.mubr.bf16.mxu1 %v12428_v14 }
 0x593   : > { %v7609_v52 = vpop.permute.xlu1 %7608  ;;  %v7657_v60 = vsel %vm7652_vm12, %v7605_v55, %v7607_v19  ;;  %v7721_v22 = vsel %vm7652_vm12, %v7607_v19, %v7605_v55 }
 0x594   : > { %8349 = vrot.lane.b32.xlu0 %v17124_v42, %s12655_s22  ;;  %10386 = vmatprep.subr.bf16.mxu0 %v12129_v20  ;;  %v7759_v33 = vmul.f32 %v16100_v45, %v7657_v60  ;;  %v7760_v42 = vmul.f32 %v16103_v63, %v7721_v22  ;;  %v17133_v20 = vmov 0  }
 0x595   : > { %7967 = vrot.lane.b32.xlu1 %v17129_v47, %s12654_s21  ;;  %10387 = vmatpush1.bf16.msra.mxu0 %v12128_v58 }
 0x596   : > { %v7611_v29 = vpop.permute.xlu0 %7610 }
 0x597   : > { %v7658_v35 = vsel %vm7652_vm12, %v7609_v52, %v7611_v29  ;;  %v7722_v53 = vsel %vm7652_vm12, %v7611_v29, %v7609_v52  ;;  %v7597_v61 = vpop.permute.xlu1 %7596 }
 0x598   : > { %v7761_v54 = vmul.f32 %v16100_v45, %v7658_v35  ;;  %v7762_v13 = vmul.f32 %v16103_v63, %v7722_v53  ;;  %7969 = vrot.lane.b32.xlu0 %v17127_v6, %s12654_s21  ;;  %10245 = vmatmul.mubr.bf16.gmra.mxu0 %v12423_v12 }
 0x599   : > { %7971 = vrot.lane.b32.xlu1 %v15061_v43, %s12654_s21  ;;  %10348 = vmatmul.mubr.bf16.gmra.mxu1 %v12426_v49 }
 0x59a   : > { %v12126_v28 = vpack.c.bf16 %v7761_v54, %v7759_v33  ;;  %v7599_v15 = vpop.permute.xlu0 %7598  ;;  %v12127_v26 = vpack.c.bf16 %v7762_v13, %v7760_v42  ;;  %10254 = vmatprep.mubr.bf16.mxu0 %v12431_v41  ;;  %10357 = vmatprep.mubr.bf16.mxu1 %v12434_v36 }
 0x59b   : > { %v7601_v62 = vpop.permute.xlu1 %7600  ;;  %v7655_v8 = vsel %vm7652_vm12, %v7597_v61, %v7599_v15  ;;  %v7719_v2 = vsel %vm7652_vm12, %v7599_v15, %v7597_v61  ;;  %v8855_v61 = vld [vmem:[%s16832_s4] sm:$0xff] }
 0x59c   : > { %7973 = vrot.lane.b32.xlu0 %v17128_v4, %s12654_s21  ;;  %10388 = vmatprep.subr.bf16.mxu0 %v12127_v26  ;;  %v7755_v27 = vmul.f32 %v16100_v45, %v7655_v8  ;;  %v7756_v23 = vmul.f32 %v16103_v63, %v7719_v2 }
 0x59d   : > { %8335 = vrot.lane.b32.xlu1 %v17129_v47, %s12655_s22  ;;  %10389 = vmatpush1.bf16.msra.mxu0 %v12126_v28 }
 0x59e   : > { %v7603_v50 = vpop.permute.xlu0 %7602 }
 0x59f   : > { %v7656_v40 = vsel %vm7652_vm12, %v7601_v62, %v7603_v50  ;;  %v7720_v34 = vsel %vm7652_vm12, %v7603_v50, %v7601_v62  ;;  %v7589_v18 = vpop.permute.xlu1 %7588 }
 0x5a0   : > { %v7757_v51 = vmul.f32 %v16100_v45, %v7656_v40  ;;  %v7758_v11 = vmul.f32 %v16103_v63, %v7720_v34  ;;  %8337 = vrot.lane.b32.xlu0 %v17127_v6, %s12655_s22  ;;  %10255 = vmatmul.mubr.bf16.gmra.mxu0 %v12429_v5 }
 0x5a1   : > { %8339 = vrot.lane.b32.xlu1 %v15061_v43, %s12655_s22  ;;  %10358 = vmatmul.mubr.bf16.gmra.mxu1 %v12432_v16  ;;  %v12435_v43 = vld [vmem:[#allocation9 + $0x208] ss:$36 sps:$4 sm:$0xff]   ;;  %v8858_v16 = vld [vmem:[%s16832_s4 + $0x18] sm:$0xff] }
 0x5a2   : > { %v12124_v47 = vpack.c.bf16 %v7757_v51, %v7755_v27  ;;  %v7591_v25 = vpop.permute.xlu0 %7590  ;;  %v12125_v0 = vpack.c.bf16 %v7758_v11, %v7756_v23  ;;  %10367 = vmatprep.mubr.bf16.mxu1 %v12437_v24  ;;  %v8859_v27 = vld [vmem:[%s16832_s4 + $0x20] sm:$0xff]  ;;  %v8860_v51 = vld [vmem:[%s16832_s4 + $0x28] sm:$0xff] }
 0x5a3   : > { %v7593_v59 = vpop.permute.xlu1 %7592  ;;  %v7653_v6 = vsel %vm7652_vm12, %v7589_v18, %v7591_v25  ;;  %v7717_v10 = vsel %vm7652_vm12, %v7591_v25, %v7589_v18 }
 0x5a4   : > { %8341 = vrot.lane.b32.xlu0 %v17128_v4, %s12655_s22  ;;  %10390 = vmatprep.subr.bf16.mxu0 %v12125_v0  ;;  %v12440_v4 = vld [vmem:[#allocation9 + $0x1c] ss:$36 sps:$4 sm:$0xff]   ;;  %v7751_v56 = vmul.f32 %v16100_v45, %v7653_v6  ;;  %v7752_v55 = vmul.f32 %v16103_v63, %v7717_v10 }
 0x5a5   : > { %7959 = vrot.lane.b32.xlu1 %v15019_v7, %s12654_s21  ;;  %10391 = vmatpush1.bf16.msra.mxu0 %v12124_v47  ;;  %v8861_v47 = vld [vmem:[%s16832_s4 + $0x30] sm:$0xff] }
 0x5a6   : > { %v7595_v57 = vpop.permute.xlu0 %7594  ;;  %10410 = vmatprep.mubr.bf16.mxu0 %v12440_v4  ;;  %v8863_v4 = vld [vmem:[%s16832_s4 + $0x40] sm:$0xff] }
 0x5a7   : > { %v7654_v14 = vsel %vm7652_vm12, %v7593_v59, %v7595_v57  ;;  %v7718_v3 = vsel %vm7652_vm12, %v7595_v57, %v7593_v59  ;;  %v8016_v48 = vpop.permute.xlu1 %8015 }
 0x5a8   : > { %v7753_v9 = vmul.f32 %v16100_v45, %v7654_v14  ;;  %v7754_v31 = vmul.f32 %v16103_v63, %v7718_v3  ;;  %7961 = vrot.lane.b32.xlu0 %v14860_v1, %s12654_s21  ;;  %v16246_v45 = vrot.slane %v11337_v39, %v17106_v21  ;;  %v16249_v63 = vrot.slane %v11337_v39, %v17105_v17  ;;  %v8862_v14 = vld [vmem:[%s16832_s4 + $0x38] sm:$0xff]  ;;  %v8864_v39 = vld [vmem:[%s16832_s4 + $0x48] sm:$0xff] }
 0x5a9   : > { %7963 = vrot.lane.b32.xlu1 %v15033_v46, %s12654_s21  ;;  %10368 = vmatmul.mubr.bf16.gmra.mxu1 %v12435_v43 }
 0x5aa   : > { %v12122_v30 = vpack.c.bf16 %v7753_v9, %v7751_v56  ;;  %v8018_v58 = vpop.permute.xlu0 %8017  ;;  %v12123_v19 = vpack.c.bf16 %v7754_v31, %v7752_v55  ;;  %10523 = vmatprep.mubr.bf16.mxu1 %v17133_v20 }
 0x5ab   : > { %v8020_v52 = vpop.permute.xlu1 %8019  ;;  %v8038_v60 = vsel %vm8023_vm8, %v8016_v48, %v8018_v58  ;;  %v8102_v12 = vsel %vm8023_vm8, %v8018_v58, %v8016_v48  ;;  %v8865_v58 = vld [vmem:[%s16832_s4 + $0x50] sm:$0xff] }
 0x5ac   : > { %7965 = vrot.lane.b32.xlu0 %v14871_v38, %s12654_s21  ;;  %10392 = vmatprep.subr.bf16.mxu0 %v12123_v19  ;;  %v8147_v41 = vmul.f32 %v16246_v45, %v8038_v60  ;;  %v8148_v36 = vmul.f32 %v16249_v63, %v8102_v12  ;;  %s16667_s21 = scalar_lea.vmem [#allocation10], %s10847_s1  ;;  %s11881_s1 = sshll.u32 %s12719_s28, 12 }
 0x5ad   : > { %8327 = vrot.lane.b32.xlu1 %v15019_v7, %s12655_s22  ;;  %10393 = vmatpush1.bf16.msra.mxu0 %v12122_v30  ;;  %v11354_v7 = vsel %vm8473_vm7, 1.0, %v17104_v44  ;;  %v8856_v44 = vld [vmem:[%s16832_s4 + $0x8] sm:$0xff]  ;;  %s16780_s29 = scalar_lea.hbm %s16835_s7, %s11881_s1  ;;  %s10733_s28 = scalar_lea.sflag [#allocation6], %s12825_s15 }
 0x5ae   : > { %v8022_v37 = vpop.permute.xlu0 %8021  ;;  %v16274_v13 = vrot.slane %v11354_v7, %v17106_v21  ;;  %v16277_v28 = vrot.slane %v11354_v7, %v17105_v17  ;;  %v8857_v17 = vld [vmem:[%s16832_s4 + $0x10] sm:$0xff] }
 0x5af   : > { %v8039_v22 = vsel %vm8023_vm8, %v8020_v52, %v8022_v37  ;;  %v8103_v49 = vsel %vm8023_vm8, %v8022_v37, %v8020_v52  ;;  %v8384_v29 = vpop.permute.xlu1 %8383 }
 0x5b0   : > { %v8149_v33 = vmul.f32 %v16246_v45, %v8039_v22  ;;  %v8150_v35 = vmul.f32 %v16249_v63, %v8103_v49  ;;  %8329 = vrot.lane.b32.xlu0 %v14860_v1, %s12655_s22 }
 0x5b1   : > { %8331 = vrot.lane.b32.xlu1 %v15033_v46, %s12655_s22 }
 0x5b2   : > { %v12152_v32 = vpack.c.bf16 %v8149_v33, %v8147_v41  ;;  %v8386_v53 = vpop.permute.xlu0 %8385  ;;  %v12153_v42 = vpack.c.bf16 %v8150_v35, %v8148_v36  ;;  %v8867_v33 = vld [vmem:[%s16832_s4 + $0x60] sm:$0xff] }
 0x5b3   : > { %v8388_v54 = vpop.permute.xlu1 %8387  ;;  %v8406_v1 = vsel %vm8391_vm5, %v8384_v29, %v8386_v53  ;;  %v8470_v46 = vsel %vm8391_vm5, %v8386_v53, %v8384_v29  ;;  %v8866_v29 = vld [vmem:[%s16832_s4 + $0x58] sm:$0xff] }
 0x5b4   : > { %8333 = vrot.lane.b32.xlu0 %v14871_v38, %s12655_s22  ;;  %10394 = vmatprep.subr.bf16.mxu0 %v12153_v42  ;;  %v8515_v62 = vmul.f32 %v16274_v13, %v8406_v1  ;;  %v8516_v8 = vmul.f32 %v16277_v28, %v8470_v46  ;;  %s10746_s22 = sshll.u32 %s16667_s21, 4  ;;  %s16783_s22 = int_to_ptr.vmem [resolvable:$true] %s10746_s22 }
 0x5b5   : > { %8873 = vperm.xlu1 %12261, %v8855_v61   ;;  %10395 = vmatpush2.bf16.msra.mxu0 %v12152_v32  ;;  %v8868_v61 = vld [vmem:[%s16832_s4 + $0x68] sm:$0xff]  ;;  %s12561_s14 = scalar_lea.vmem %s16783_s22, 4096  ;;  %p12568_p6 = scmp.lt.s32.totalorder %s16783_s22, %s12566_s30 }
 0x5b6   : > { %v8390_v15 = vpop.permute.xlu0 %8389  ;;  %p12562_p11 = scmp.ne.s32.totalorder %s16783_s22, %s12561_s14  ;;  %p12569_p12 = scmp.lt.s32.totalorder %s12567_s9, %s12561_s14 }
 0x5b7   : > { %v8407_v21 = vsel %vm8391_vm5, %v8388_v54, %v8390_v15  ;;  %v8471_v38 = vsel %vm8391_vm5, %v8390_v15, %v8388_v54  ;;  %v8008_v26 = vpop.permute.xlu1 %8007  ;;  %v8869_v54 = vld [vmem:[%s16832_s4 + $0x70] sm:$0xff] }
 0x5b8   : > { %v8517_v5 = vmul.f32 %v16274_v13, %v8407_v21  ;;  %v8518_v2 = vmul.f32 %v16277_v28, %v8471_v38  ;;  %8878 = vperm.xlu0 %12260, %v8856_v44   ;;  %p12563_p1 = pnand %p12562_p11, %p17228_p10  ;;  %p12570_p7 = por %p12569_p12, %p12568_p6 }
 0x5b9   : > { %8883 = vperm.xlu1 %12261, %v8857_v17  }
 0x5ba   : > { %v12168_v50 = vpack.c.bf16 %v8517_v5, %v8515_v62  ;;  %v8010_v24 = vpop.permute.xlu0 %8009  ;;  %v12169_v40 = vpack.c.bf16 %v8518_v2, %v8516_v8  ;;  %p12564_p2 = pneg %p12563_p1 }
 0x5bb   : > { %v8012_v34 = vpop.permute.xlu1 %8011  ;;  %v8036_v18 = vsel %vm8023_vm8, %v8008_v26, %v8010_v24  ;;  %v8100_v23 = vsel %vm8023_vm8, %v8010_v24, %v8008_v26  ;;  %v8870_v26 = vld [vmem:[%s16832_s4 + $0x78] sm:$0xff] }
 0x5bc   : > { %8888 = vperm.xlu0 %12260, %v8858_v16   ;;  %10491 = vmatprep.subr.bf16.mxu1 %v12169_v40  ;;  %v8143_v6 = vmul.f32 %v16246_v45, %v8036_v18  ;;  %v8144_v10 = vmul.f32 %v16249_v63, %v8100_v23  ;;  %p12571_p9 = pnand %p12570_p7, %p12564_p2 }
 0x5bd   : > { %8893 = vperm.xlu1 %12261, %v8859_v27   ;;  %10492 = vmatpush1.bf16.msra.mxu1 %v12168_v50 }
 0x5be   : > { %v8014_v11 = vpop.permute.xlu0 %8013 }
 0x5bf   : > { %v8037_v25 = vsel %vm8023_vm8, %v8012_v34, %v8014_v11  ;;  %v8101_v0 = vsel %vm8023_vm8, %v8014_v11, %v8012_v34  ;;  %v8376_v59 = vpop.permute.xlu1 %8375 }
 0x5c0   : > { %v8145_v43 = vmul.f32 %v16246_v45, %v8037_v25  ;;  %v8146_v57 = vmul.f32 %v16249_v63, %v8101_v0  ;;  %8898 = vperm.xlu0 %12260, %v8860_v51  }
 0x5c1   : > { %8903 = vperm.xlu1 %12261, %v8861_v47  }
 0x5c2   : > { %v12150_v3 = vpack.c.bf16 %v8145_v43, %v8143_v6  ;;  %v8378_v48 = vpop.permute.xlu0 %8377  ;;  %v12151_v56 = vpack.c.bf16 %v8146_v57, %v8144_v10 }
 0x5c3   : > { %v8380_v55 = vpop.permute.xlu1 %8379  ;;  %v8404_v9 = vsel %vm8391_vm5, %v8376_v59, %v8378_v48  ;;  %v8468_v31 = vsel %vm8391_vm5, %v8378_v48, %v8376_v59 }
 0x5c4   : > { %8908 = vperm.xlu0 %12260, %v8862_v14   ;;  %10396 = vmatprep.subr.bf16.mxu0 %v12151_v56  ;;  %v8511_v12 = vmul.f32 %v16274_v13, %v8404_v9  ;;  %v8512_v37 = vmul.f32 %v16277_v28, %v8468_v31 }
 0x5c5   : > { %8913 = vperm.xlu1 %12261, %v8863_v4   ;;  %10397 = vmatpush2.bf16.msra.mxu0 %v12150_v3 }
 0x5c6   : > { %v8382_v30 = vpop.permute.xlu0 %8381 }
 0x5c7   : > { %v8405_v19 = vsel %vm8391_vm5, %v8380_v55, %v8382_v30  ;;  %v8469_v52 = vsel %vm8391_vm5, %v8382_v30, %v8380_v55  ;;  %v8000_v60 = vpop.permute.xlu1 %7999 }
 0x5c8   : > { %v8513_v22 = vmul.f32 %v16274_v13, %v8405_v19  ;;  %v8514_v49 = vmul.f32 %v16277_v28, %v8469_v52  ;;  %8918 = vperm.xlu0 %12260, %v8864_v39  }
 0x5c9   : > { %8923 = vperm.xlu1 %12261, %v8865_v58  }
 0x5ca   : > { %v12166_v41 = vpack.c.bf16 %v8513_v22, %v8511_v12  ;;  %v8002_v36 = vpop.permute.xlu0 %8001  ;;  %v12167_v35 = vpack.c.bf16 %v8514_v49, %v8512_v37 }
 0x5cb   : > { %v8004_v7 = vpop.permute.xlu1 %8003  ;;  %v8034_v32 = vsel %vm8023_vm8, %v8000_v60, %v8002_v36  ;;  %v8098_v53 = vsel %vm8023_vm8, %v8002_v36, %v8000_v60 }
 0x5cc   : > { %8928 = vperm.xlu0 %12260, %v8866_v29   ;;  %10493 = vmatprep.subr.bf16.mxu1 %v12167_v35  ;;  %v8139_v15 = vmul.f32 %v16246_v45, %v8034_v32  ;;  %v8140_v17 = vmul.f32 %v16249_v63, %v8098_v53 }
 0x5cd   : > { %8933 = vperm.xlu1 %12261, %v8867_v33   ;;  %10494 = vmatpush1.bf16.msra.mxu1 %v12166_v41 }
 0x5ce   : > { %v8006_v42 = vpop.permute.xlu0 %8005 }
 0x5cf   : > { %v8035_v1 = vsel %vm8023_vm8, %v8004_v7, %v8006_v42  ;;  %v8099_v46 = vsel %vm8023_vm8, %v8006_v42, %v8004_v7  ;;  %v8368_v44 = vpop.permute.xlu1 %8367 }
 0x5d0   : > { %v8141_v21 = vmul.f32 %v16246_v45, %v8035_v1  ;;  %v8142_v38 = vmul.f32 %v16249_v63, %v8099_v46  ;;  %8938 = vperm.xlu0 %12260, %v8868_v61  }
 0x5d1   : > { %8943 = vperm.xlu1 %12261, %v8869_v54  }
 0x5d2   : > { %v12148_v62 = vpack.c.bf16 %v8141_v21, %v8139_v15  ;;  %v8370_v8 = vpop.permute.xlu0 %8369  ;;  %v12149_v5 = vpack.c.bf16 %v8142_v38, %v8140_v17  ;;  %v16390_v21 = vpop.f32.mrf.mxu1 }
 0x5d3   : > { %v8372_v2 = vpop.permute.xlu1 %8371  ;;  %v8402_v16 = vsel %vm8391_vm5, %v8368_v44, %v8370_v8  ;;  %v8466_v50 = vsel %vm8391_vm5, %v8370_v8, %v8368_v44 }
 0x5d4   : > { %8948 = vperm.xlu0 %12260, %v8870_v26   ;;  %10398 = vmatprep.subr.bf16.mxu0 %v12149_v5  ;;  %v8507_v18 = vmul.f32 %v16274_v13, %v8402_v16  ;;  %v8508_v23 = vmul.f32 %v16277_v28, %v8466_v50  ;;  %v16394_v16 = vpop.f32.mrf.mxu1 }
 0x5d5   : > { %10399 = vmatpush2.bf16.msra.mxu0 %v12148_v62 }
 0x5d6   : > { %v8374_v24 = vpop.permute.xlu0 %8373 }
 0x5d7   : > { %v8403_v27 = vsel %vm8391_vm5, %v8372_v2, %v8374_v24  ;;  %v8467_v40 = vsel %vm8391_vm5, %v8374_v24, %v8372_v2  ;;  %v7992_v34 = vpop.permute.xlu1 %7991 }
 0x5d8   : > { %v8509_v51 = vmul.f32 %v16274_v13, %v8403_v27  ;;  %v8510_v11 = vmul.f32 %v16277_v28, %v8467_v40 }
 0x5da   : > { %v12164_v47 = vpack.c.bf16 %v8509_v51, %v8507_v18  ;;  %v7994_v25 = vpop.permute.xlu0 %7993  ;;  %v12165_v0 = vpack.c.bf16 %v8510_v11, %v8508_v23  ;;  %v16402_v11 = vpop.f32.mrf.mxu1 }
 0x5db   : > { %v7996_v59 = vpop.permute.xlu1 %7995  ;;  %v8032_v6 = vsel %vm8023_vm8, %v7992_v34, %v7994_v25  ;;  %v8096_v10 = vsel %vm8023_vm8, %v7994_v25, %v7992_v34 }
 0x5dc   : > { %10495 = vmatprep.subr.bf16.mxu1 %v12165_v0  ;;  %v8135_v48 = vmul.f32 %v16246_v45, %v8032_v6  ;;  %v8136_v4 = vmul.f32 %v16249_v63, %v8096_v10  ;;  %v16404_v6 = vpop.f32.mrf.mxu1 }
 0x5dd   : > { %10496 = vmatpush1.bf16.msra.mxu1 %v12164_v47 }
 0x5de   : > { %v7998_v43 = vpop.permute.xlu0 %7997 }
 0x5df   : > { %v8033_v57 = vsel %vm8023_vm8, %v7996_v59, %v7998_v43  ;;  %v8097_v14 = vsel %vm8023_vm8, %v7998_v43, %v7996_v59  ;;  %v8360_v3 = vpop.permute.xlu1 %8359 }
 0x5e0   : > { %v8137_v56 = vmul.f32 %v16246_v45, %v8033_v57  ;;  %v8138_v55 = vmul.f32 %v16249_v63, %v8097_v14 }
 0x5e2   : > { %v12146_v9 = vpack.c.bf16 %v8137_v56, %v8135_v48  ;;  %v8362_v31 = vpop.permute.xlu0 %8361  ;;  %v12147_v39 = vpack.c.bf16 %v8138_v55, %v8136_v4 }
 0x5e3   : > { %v8364_v30 = vpop.permute.xlu1 %8363  ;;  %v8400_v58 = vsel %vm8391_vm5, %v8360_v3, %v8362_v31  ;;  %v8464_v19 = vsel %vm8391_vm5, %v8362_v31, %v8360_v3  ;;  %v16414_v31 = vpop.f32.mrf.mxu1 }
 0x5e4   : > { %10400 = vmatprep.subr.bf16.mxu0 %v12147_v39  ;;  %v8503_v22 = vmul.f32 %v16274_v13, %v8400_v58  ;;  %v8504_v49 = vmul.f32 %v16277_v28, %v8464_v19 }
 0x5e5   : > { %10401 = vmatpush2.bf16.msra.mxu0 %v12146_v9 }
 0x5e6   : > { %v8366_v52 = vpop.permute.xlu0 %8365 }
 0x5e7   : > { %v8401_v60 = vsel %vm8391_vm5, %v8364_v30, %v8366_v52  ;;  %v8465_v12 = vsel %vm8391_vm5, %v8366_v52, %v8364_v30  ;;  %v7984_v37 = vpop.permute.xlu1 %7983  ;;  %v16416_v52 = vpop.f32.mrf.mxu1 }
 0x5e8   : > { %v8505_v29 = vmul.f32 %v16274_v13, %v8401_v60  ;;  %v8506_v41 = vmul.f32 %v16277_v28, %v8465_v12 }
 0x5ea   : > { %v12162_v36 = vpack.c.bf16 %v8505_v29, %v8503_v22  ;;  %v7986_v33 = vpop.permute.xlu0 %7985  ;;  %v12163_v35 = vpack.c.bf16 %v8506_v41, %v8504_v49 }
 0x5eb   : > { %v7988_v7 = vpop.permute.xlu1 %7987  ;;  %v8030_v32 = vsel %vm8023_vm8, %v7984_v37, %v7986_v33  ;;  %v8094_v53 = vsel %vm8023_vm8, %v7986_v33, %v7984_v37 }
 0x5ec   : > { %10497 = vmatprep.subr.bf16.mxu1 %v12163_v35  ;;  %v8131_v46 = vmul.f32 %v16246_v45, %v8030_v32  ;;  %v8132_v44 = vmul.f32 %v16249_v63, %v8094_v53 }
 0x5ed   : > { %10498 = vmatpush1.bf16.msra.mxu1 %v12162_v36 }
 0x5ee   : > { %v7990_v61 = vpop.permute.xlu0 %7989 }
 0x5ef   : > { %v8031_v42 = vsel %vm8023_vm8, %v7988_v7, %v7990_v61  ;;  %v8095_v54 = vsel %vm8023_vm8, %v7990_v61, %v7988_v7  ;;  %v8352_v1 = vpop.permute.xlu1 %8351  ;;  %v16426_v7 = vpop.f32.mrf.mxu1 }
 0x5f0   : > { %v8133_v15 = vmul.f32 %v16246_v45, %v8031_v42  ;;  %v8134_v17 = vmul.f32 %v16249_v63, %v8095_v54 }
 0x5f1   : > { %v16428_v54 = vpop.f32.mrf.mxu1 }
 0x5f2   : > { %v12144_v38 = vpack.c.bf16 %v8133_v15, %v8131_v46  ;;  %v8354_v26 = vpop.permute.xlu0 %8353  ;;  %v12145_v62 = vpack.c.bf16 %v8134_v17, %v8132_v44 }
 0x5f3   : > { %v8356_v8 = vpop.permute.xlu1 %8355  ;;  %v8398_v5 = vsel %vm8391_vm5, %v8352_v1, %v8354_v26  ;;  %v8462_v2 = vsel %vm8391_vm5, %v8354_v26, %v8352_v1 }
 0x5f4   : > { %10402 = vmatprep.subr.bf16.mxu0 %v12145_v62  ;;  %v8499_v34 = vmul.f32 %v16274_v13, %v8398_v5  ;;  %v8500_v18 = vmul.f32 %v16277_v28, %v8462_v2  ;;  %v16438_v2 = vpop.f32.mrf.mxu1 }
 0x5f5   : > { %10403 = vmatpush2.bf16.msra.mxu0 %v12144_v38 }
 0x5f6   : > { %v8358_v50 = vpop.permute.xlu0 %8357 }
 0x5f7   : > { %v8399_v24 = vsel %vm8391_vm5, %v8356_v8, %v8358_v50  ;;  %v8463_v27 = vsel %vm8391_vm5, %v8358_v50, %v8356_v8  ;;  %v7976_v40 = vpop.permute.xlu1 %7975 }
 0x5f8   : > { %v8501_v23 = vmul.f32 %v16274_v13, %v8399_v24  ;;  %v8502_v51 = vmul.f32 %v16277_v28, %v8463_v27 }
 0x5fa   : > { %v12160_v47 = vpack.c.bf16 %v8501_v23, %v8499_v34  ;;  %v7978_v25 = vpop.permute.xlu0 %7977  ;;  %v12161_v0 = vpack.c.bf16 %v8502_v51, %v8500_v18  ;;  %v16440_v34 = vpop.f32.mrf.mxu1 }
 0x5fb   : > { %v7980_v59 = vpop.permute.xlu1 %7979  ;;  %v8028_v10 = vsel %vm8023_vm8, %v7976_v40, %v7978_v25  ;;  %v8092_v43 = vsel %vm8023_vm8, %v7978_v25, %v7976_v40 }
 0x5fc   : > { %10499 = vmatprep.subr.bf16.mxu1 %v12161_v0  ;;  %v8127_v4 = vmul.f32 %v16246_v45, %v8028_v10  ;;  %v8128_v56 = vmul.f32 %v16249_v63, %v8092_v43 }
 0x5fd   : > { %10500 = vmatpush1.bf16.msra.mxu1 %v12160_v47 }
 0x5fe   : > { %v7982_v57 = vpop.permute.xlu0 %7981 }
 0x5ff   : > { %v8029_v14 = vsel %vm8023_vm8, %v7980_v59, %v7982_v57  ;;  %v8093_v3 = vsel %vm8023_vm8, %v7982_v57, %v7980_v59  ;;  %v8344_v48 = vpop.permute.xlu1 %8343 }
 0x600   : > { %v8129_v55 = vmul.f32 %v16246_v45, %v8029_v14  ;;  %v8130_v9 = vmul.f32 %v16249_v63, %v8093_v3  ;;  %v16450_v14 = vpop.f32.mrf.mxu1 }
 0x602   : > { %v12142_v39 = vpack.c.bf16 %v8129_v55, %v8127_v4  ;;  %v8346_v30 = vpop.permute.xlu0 %8345  ;;  %v12143_v58 = vpack.c.bf16 %v8130_v9, %v8128_v56  ;;  %v16452_v55 = vpop.f32.mrf.mxu1 }
 0x603   : > { %v8348_v19 = vpop.permute.xlu1 %8347  ;;  %v8396_v60 = vsel %vm8391_vm5, %v8344_v48, %v8346_v30  ;;  %v8460_v12 = vsel %vm8391_vm5, %v8346_v30, %v8344_v48 }
 0x604   : > { %10404 = vmatprep.subr.bf16.mxu0 %v12143_v58  ;;  %v8495_v41 = vmul.f32 %v16274_v13, %v8396_v60  ;;  %v8496_v36 = vmul.f32 %v16277_v28, %v8460_v12 }
 0x605   : > { %10405 = vmatpush2.bf16.msra.mxu0 %v12142_v39 }
 0x606   : > { %v8350_v37 = vpop.permute.xlu0 %8349 }
 0x607   : > { %v8397_v22 = vsel %vm8391_vm5, %v8348_v19, %v8350_v37  ;;  %v8461_v49 = vsel %vm8391_vm5, %v8350_v37, %v8348_v19  ;;  %v7968_v29 = vpop.permute.xlu1 %7967 }
 0x608   : > { %v8497_v33 = vmul.f32 %v16274_v13, %v8397_v22  ;;  %v8498_v35 = vmul.f32 %v16277_v28, %v8461_v49 }
 0x60a   : > { %v12158_v32 = vpack.c.bf16 %v8497_v33, %v8495_v41  ;;  %v7970_v53 = vpop.permute.xlu0 %7969  ;;  %v12159_v61 = vpack.c.bf16 %v8498_v35, %v8496_v36  ;;  %v12438_v35 = vld [vmem:[#allocation9 + $0x18] ss:$36 sps:$4 sm:$0xff]  }
 0x60b   : > { %v7972_v42 = vpop.permute.xlu1 %7971  ;;  %v8026_v1 = vsel %vm8023_vm8, %v7968_v29, %v7970_v53  ;;  %v8090_v46 = vsel %vm8023_vm8, %v7970_v53, %v7968_v29  ;;  %v16462_v29 = vpop.f32.mrf.mxu1 }
 0x60c   : > { %10501 = vmatprep.subr.bf16.mxu1 %v12159_v61  ;;  %v8123_v26 = vmul.f32 %v16246_v45, %v8026_v1  ;;  %v8124_v62 = vmul.f32 %v16249_v63, %v8090_v46 }
 0x60d   : > { %10502 = vmatpush1.bf16.msra.mxu1 %v12158_v32  ;;  %v16464_v32 = vpop.f32.mrf.mxu1 }
 0x60e   : > { %v7974_v44 = vpop.permute.xlu0 %7973 }
 0x60f   : > { %v8027_v15 = vsel %vm8023_vm8, %v7972_v42, %v7974_v44  ;;  %v8091_v17 = vsel %vm8023_vm8, %v7974_v44, %v7972_v42  ;;  %v8336_v38 = vpop.permute.xlu1 %8335  ;;  %v12443_v42 = vld [vmem:[#allocation9 + $0x64] ss:$36 sps:$4 sm:$0xff]  }
 0x610   : > { %v8125_v8 = vmul.f32 %v16246_v45, %v8027_v15  ;;  %v8126_v5 = vmul.f32 %v16249_v63, %v8091_v17 }
 0x612   : > { %v12140_v50 = vpack.c.bf16 %v8125_v8, %v8123_v26  ;;  %v8338_v24 = vpop.permute.xlu0 %8337  ;;  %v12141_v27 = vpack.c.bf16 %v8126_v5, %v8124_v62  ;;  %v16474_v26 = vpop.f32.mrf.mxu1  ;;  %v12441_v5 = vld [vmem:[#allocation9 + $0x60] ss:$36 sps:$4 sm:$0xff]  }
 0x613   : > { %v8340_v40 = vpop.permute.xlu1 %8339  ;;  %v8394_v18 = vsel %vm8391_vm5, %v8336_v38, %v8338_v24  ;;  %v8458_v23 = vsel %vm8391_vm5, %v8338_v24, %v8336_v38  ;;  %v12447_v24 = vld [vmem:[#allocation9 + $0xac] ss:$36 sps:$4 sm:$0xff]  }
 0x614   : > { %10406 = vmatprep.subr.bf16.mxu0 %v12141_v27  ;;  %v8491_v59 = vmul.f32 %v16274_v13, %v8394_v18  ;;  %v8492_v10 = vmul.f32 %v16277_v28, %v8458_v23  ;;  %v16476_v27 = vpop.f32.mrf.mxu1  ;;  %v12451_v18 = vld [vmem:[#allocation9 + $0xf4] ss:$36 sps:$4 sm:$0xff]  }
 0x615   : > { %10407 = vmatpush2.bf16.msra.mxu0 %v12140_v50  ;;  %v12444_v50 = vld [vmem:[#allocation9 + $0x20] ss:$36 sps:$4 sm:$0xff]  }
 0x616   : > { %v8342_v51 = vpop.permute.xlu0 %8341 }
 0x617   : > { %v8395_v47 = vsel %vm8391_vm5, %v8340_v40, %v8342_v51  ;;  %v8459_v25 = vsel %vm8391_vm5, %v8342_v51, %v8340_v40  ;;  %v7960_v0 = vpop.permute.xlu1 %7959  ;;  %v12448_v40 = vld [vmem:[#allocation9 + $0x68] ss:$36 sps:$4 sm:$0xff]  }
 0x618   : > { %v8493_v43 = vmul.f32 %v16274_v13, %v8395_v47  ;;  %v8494_v57 = vmul.f32 %v16277_v28, %v8459_v25  ;;  %v12449_v47 = vld [vmem:[#allocation9 + $0xf0] ss:$36 sps:$4 sm:$0xff]  }
 0x619   : > { %v12452_v25 = vld [vmem:[#allocation9 + $0xb0] ss:$36 sps:$4 sm:$0xff]  }
 0x61a   : > { %v12156_v3 = vpack.c.bf16 %v8493_v43, %v8491_v59  ;;  %v7962_v48 = vpop.permute.xlu0 %7961  ;;  %v12157_v4 = vpack.c.bf16 %v8494_v57, %v8492_v10  ;;  %v12453_v43 = vld [vmem:[#allocation9 + $0x138] ss:$36 sps:$4 sm:$0xff]  }
 0x61b   : > { %v7964_v56 = vpop.permute.xlu1 %7963  ;;  %v8024_v9 = vsel %vm8023_vm8, %v7960_v0, %v7962_v48  ;;  %v8088_v39 = vsel %vm8023_vm8, %v7962_v48, %v7960_v0  ;;  %v12455_v0 = vld [vmem:[#allocation9 + $0x13c] ss:$36 sps:$4 sm:$0xff]  }
 0x61c   : > { %10503 = vmatprep.subr.bf16.mxu1 %v12157_v4  ;;  %v8119_v60 = vmul.f32 %v16246_v45, %v8024_v9  ;;  %v8120_v12 = vmul.f32 %v16249_v63, %v8088_v39  ;;  %v12456_v57 = vld [vmem:[#allocation9 + $0xf8] ss:$36 sps:$4 sm:$0xff]   ;;  %v12460_v9 = vld [vmem:[#allocation9 + $0x140] ss:$36 sps:$4 sm:$0xff]   ;;  %v12463_v39 = vld [vmem:[#allocation9 + $0x1cc] ss:$36 sps:$4 sm:$0xff]  }
 0x61d   : > { %10504 = vmatpush1.bf16.msra.mxu1 %v12156_v3  ;;  %v12459_v3 = vld [vmem:[#allocation9 + $0x184] ss:$36 sps:$4 sm:$0xff]  }
 0x61e   : > { %v7966_v30 = vpop.permute.xlu0 %7965 }
 0x61f   : > { %v8025_v58 = vsel %vm8023_vm8, %v7964_v56, %v7966_v30  ;;  %v8089_v19 = vsel %vm8023_vm8, %v7966_v30, %v7964_v56  ;;  %v8328_v49 = vpop.permute.xlu1 %8327  ;;  %v12457_v56 = vld [vmem:[#allocation9 + $0x180] ss:$36 sps:$4 sm:$0xff]  }
 0x620   : > { %v8121_v37 = vmul.f32 %v16246_v45, %v8025_v58  ;;  %v8122_v22 = vmul.f32 %v16249_v63, %v8089_v19  ;;  %v12461_v19 = vld [vmem:[#allocation9 + $0x1c8] ss:$36 sps:$4 sm:$0xff]  }
 0x622   : > { %v12138_v41 = vpack.c.bf16 %v8121_v37, %v8119_v60  ;;  %v8330_v36 = vpop.permute.xlu0 %8329  ;;  %v12139_v33 = vpack.c.bf16 %v8122_v22, %v8120_v12  ;;  %v12464_v60 = vld [vmem:[#allocation9 + $0x188] ss:$36 sps:$4 sm:$0xff]   ;;  %v12467_v12 = vld [vmem:[#allocation9 + $0x214] ss:$36 sps:$4 sm:$0xff]  }
 0x623   : > { %v8392_v53 = vsel %vm8391_vm5, %v8328_v49, %v8330_v36  ;;  %v8456_v61 = vsel %vm8391_vm5, %v8330_v36, %v8328_v49  ;;  %v8332_v1 = vpop.permute.xlu1 %8331  ;;  %v12465_v49 = vld [vmem:[#allocation9 + $0x210] ss:$36 sps:$4 sm:$0xff]  }
 0x624   : > { %10408 = vmatprep.subr.bf16.mxu0 %v12139_v33  ;;  %v8487_v44 = vmul.f32 %v16274_v13, %v8392_v53  ;;  %v8488_v15 = vmul.f32 %v16277_v28, %v8456_v61 }
 0x625   : > { %10409 = vmatpush2.bf16.msra.mxu0 %v12138_v41  ;;  %v12468_v41 = vld [vmem:[#allocation9 + $0x1d0] ss:$36 sps:$4 sm:$0xff]  }
 0x626   : > { %v8334_v45 = vpop.permute.xlu0 %8333 }
 0x627   : > { %v8393_v63 = vsel %vm8391_vm5, %v8332_v1, %v8334_v45  ;;  %v8457_v46 = vsel %vm8391_vm5, %v8334_v45, %v8332_v1 }
 0x628   : > { %v8489_v17 = vmul.f32 %v16274_v13, %v8393_v63  ;;  %v8490_v38 = vmul.f32 %v16277_v28, %v8457_v46  ;;  %10411 = vmatmul.mubr.bf16.vlgmr.msra.gmra.mxu0 %v12438_v35  ;;  %v16479_v13 = vpop.f32.mrf.mxu1  ;;  %v12445_v28 = vld [vmem:[#allocation9 + $0xa8] ss:$36 sps:$4 sm:$0xff]   ;;  %v12469_v35 = vld [vmem:[#allocation9 + $0x218] ss:$36 sps:$4 sm:$0xff]   ;;  %v16513_v61 = vpop.f32.mrf.mxu0 }
 0x629   : > { %10420 = vmatprep.mubr.bf16.mxu0 %v12443_v42 }
 0x62a   : > { %v12154_v62 = vpack.c.bf16 %v8489_v17, %v8487_v44  ;;  %v12155_v8 = vpack.c.bf16 %v8490_v38, %v8488_v15  ;;  %v16481_v23 = vpop.f32.mrf.mxu1  ;;  %v16517_v1 = vpop.f32.mrf.mxu0 }
 0x62b   : > { %17134 = vst [vmem:[#allocation18_spill] sm:$0xff] %v16481_v23 }
 0x62c   : > { %10505 = vmatprep.subr.bf16.mxu1 %v12155_v8  ;;  %v16483_v51 = vpop.f32.mrf.mxu1  ;;  %v16521_v63 = vpop.f32.mrf.mxu0 }
 0x62d   : > { %10506 = vmatpush1.bf16.msra.mxu1 %v12154_v62  ;;  %17135 = vst [vmem:[#allocation16_spill] sm:$0xff] %v16483_v51 }
 0x62e   : > { %v16486_v59 = vpop.f32.mrf.mxu1  ;;  %v16525_v44 = vpop.f32.mrf.mxu0 }
 0x62f   : > { %17136 = vst [vmem:[#allocation15_spill] sm:$0xff] %v16486_v59 }
 0x630   : > { %10421 = vmatmul.mubr.bf16.gmra.mxu0 %v12441_v5  ;;  %10524 = vmatmul.mubr.bf16.vlgmr.msra.gmra.mxu1 %v12444_v50  ;;  %v16488_v10 = vpop.f32.mrf.mxu1 }
 0x631   : > { %10430 = vmatprep.mubr.bf16.mxu0 %v12447_v24  ;;  %10533 = vmatprep.mubr.bf16.mxu1 %v17133_v20  ;;  %17137 = vst [vmem:[#allocation26_spill] sm:$0xff] %v16488_v10 }
 0x632   : > { %v16491_v48 = vpop.f32.mrf.mxu1 }
 0x633   : > { %17138 = vst [vmem:[#allocation21_spill] sm:$0xff] %v16491_v48 }
 0x634   : > { %v16493_v4 = vpop.f32.mrf.mxu1 }
 0x635   : > { %17139 = vst [vmem:[#allocation32_spill] sm:$0xff] %v16493_v4 }
 0x636   : > { %v16496_v30 = vpop.f32.mrf.mxu1 }
 0x637   : > { %17140 = vst [vmem:[#allocation35_spill] sm:$0xff] %v16496_v30 }
 0x638   : > { %10431 = vmatmul.mubr.bf16.gmra.mxu0 %v12445_v28  ;;  %10534 = vmatmul.mubr.bf16.gmra.mxu1 %v12448_v40  ;;  %v16498_v58 = vpop.f32.mrf.mxu1 }
 0x639   : > { %10440 = vmatprep.mubr.bf16.mxu0 %v12451_v18  ;;  %10543 = vmatprep.mubr.bf16.mxu1 %v17133_v20  ;;  %17141 = vst [vmem:[#allocation37_spill] sm:$0xff] %v16498_v58 }
 0x63a   : > { %v16501_v37 = vpop.f32.mrf.mxu1 }
 0x63b   : > { %17142 = vst [vmem:[#allocation40_spill] sm:$0xff] %v16501_v37 }
 0x63c   : > { %v16503_v22 = vpop.f32.mrf.mxu1 }
 0x63d   : > { %17143 = vst [vmem:[#allocation41_spill] sm:$0xff] %v16503_v22 }
 0x63e   : > { %v16506_v36 = vpop.f32.mrf.mxu1 }
 0x63f   : > { %17144 = vst [vmem:[#allocation43_spill] sm:$0xff] %v16506_v36 }
 0x640   : > { %10441 = vmatmul.mubr.bf16.gmra.mxu0 %v12449_v47  ;;  %10544 = vmatmul.mubr.bf16.gmra.mxu1 %v12452_v25  ;;  %v16508_v33 = vpop.f32.mrf.mxu1 }
 0x641   : > { %10450 = vmatprep.mubr.bf16.mxu0 %v12455_v0  ;;  %10553 = vmatprep.mubr.bf16.mxu1 %v17133_v20  ;;  %17145 = vst [vmem:[#allocation45_spill] sm:$0xff] %v16508_v33 }
 0x642   : > { %v16511_v53 = vpop.f32.mrf.mxu1 }
 0x643   : > { %17146 = vst [vmem:[#allocation46_spill] sm:$0xff] %v16511_v53 }
 0x644   : > { %v16515_v42 = vpop.f32.mrf.mxu1 }
 0x645   : > { %17147 = vst [vmem:[#allocation22_spill] sm:$0xff] %v16515_v42 }
 0x646   : > { %v16519_v45 = vpop.f32.mrf.mxu1 }
 0x647   : > { %17148 = vst [vmem:[#allocation23_spill] sm:$0xff] %v16519_v45 }
 0x648   : > { %10451 = vmatmul.mubr.bf16.gmra.mxu0 %v12453_v43  ;;  %10554 = vmatmul.mubr.bf16.gmra.mxu1 %v12456_v57  ;;  %v16523_v46 = vpop.f32.mrf.mxu1 }
 0x649   : > { %10460 = vmatprep.mubr.bf16.mxu0 %v12459_v3  ;;  %10563 = vmatprep.mubr.bf16.mxu1 %v17133_v20 }
 0x64a   : > { %v16527_v15 = vpop.f32.mrf.mxu1 }
 0x64c   : > { %v16531_v17 = vpop.f32.mrf.mxu1 }
 0x64e   : > { %v16535_v62 = vpop.f32.mrf.mxu1 }
 0x650   : > { %10461 = vmatmul.mubr.bf16.gmra.mxu0 %v12457_v56  ;;  %10564 = vmatmul.mubr.bf16.gmra.mxu1 %v12460_v9  ;;  %v16539_v5 = vpop.f32.mrf.mxu1 }
 0x651   : > { %10470 = vmatprep.mubr.bf16.mxu0 %v12463_v39  ;;  %10573 = vmatprep.mubr.bf16.mxu1 %v17133_v20 }
 0x652   : > { %v16543_v24 = vpop.f32.mrf.mxu1 }
 0x654   : > { %v16547_v40 = vpop.f32.mrf.mxu1 }
 0x656   : > { %v16551_v47 = vpop.f32.mrf.mxu1 }
 0x658   : > { %10471 = vmatmul.mubr.bf16.gmra.mxu0 %v12461_v19  ;;  %10574 = vmatmul.mubr.bf16.gmra.mxu1 %v12464_v60  ;;  %v16555_v0 = vpop.f32.mrf.mxu1 }
 0x659   : > { %10480 = vmatprep.mubr.bf16.mxu0 %v12467_v12  ;;  %10583 = vmatprep.mubr.bf16.mxu1 %v17133_v20 }
 0x65a   : > { %v16559_v57 = vpop.f32.mrf.mxu1 }
 0x65c   : > { %v16563_v56 = vpop.f32.mrf.mxu1 }
 0x65e   : > { %v16567_v39 = vpop.f32.mrf.mxu1 }
 0x660   : > { %10481 = vmatmul.mubr.bf16.gmra.mxu0 %v12465_v49  ;;  %10584 = vmatmul.mubr.bf16.gmra.mxu1 %v12468_v41  ;;  %v16571_v60 = vpop.f32.mrf.mxu1 }
 0x661   : > { %10593 = vmatprep.mubr.bf16.mxu1 %v17133_v20  ;;  %v16529_v20 = vpop.f32.mrf.mxu0 }
 0x662   : > { %v16575_v49 = vpop.f32.mrf.mxu1 }
 0x663   : > { %v16533_v38 = vpop.f32.mrf.mxu0 }
 0x665   : > { %v16537_v8 = vpop.f32.mrf.mxu0 }
 0x667   : > { %v16541_v50 = vpop.f32.mrf.mxu0 }
 0x668   : > { %10594 = vmatmul.mubr.bf16.gmra.mxu1 %v12469_v35  ;;  %v16579_v35 = vpop.f32.mrf.mxu1 }
 0x669   : > { %v16545_v28 = vpop.f32.mrf.mxu0 }
 0x66a   : > { %v16583_v42 = vpop.f32.mrf.mxu1 }
 0x66b   : > { %v16549_v18 = vpop.f32.mrf.mxu0  ;;  %17151 = vst [vmem:[#allocation24_spill] sm:$0xff] %v16583_v42 }
 0x66c   : > { %v16587_v33 = vpop.f32.mrf.mxu1 }
 0x66d   : > { %v16553_v25 = vpop.f32.mrf.mxu0  ;;  %17153 = vst [vmem:[#allocation44_spill] sm:$0xff] %v16587_v33 }
 0x66e   : > { %v16591_v22 = vpop.f32.mrf.mxu1 }
 0x66f   : > { %v16557_v43 = vpop.f32.mrf.mxu0  ;;  %17155 = vst [vmem:[#allocation38_spill] sm:$0xff] %v16591_v22 }
 0x670   : > { %v16595_v58 = vpop.f32.mrf.mxu1 }
 0x671   : > { %v16561_v3 = vpop.f32.mrf.mxu0  ;;  %17157 = vst [vmem:[#allocation28_spill] sm:$0xff] %v16595_v58 }
 0x672   : > { %v16599_v4 = vpop.f32.mrf.mxu1 }
 0x673   : > { %v16565_v9 = vpop.f32.mrf.mxu0  ;;  %17159 = vst [vmem:[#allocation33_spill] sm:$0xff] %v16599_v4 }
 0x674   : > { %v16603_v10 = vpop.f32.mrf.mxu1 }
 0x675   : > { %v16569_v19 = vpop.f32.mrf.mxu0  ;;  %17161 = vst [vmem:[#allocation42_spill] sm:$0xff] %v16603_v10 }
 0x677   : > { %v16573_v12 = vpop.f32.mrf.mxu0 }
 0x679   : > { %v16577_v41 = vpop.f32.mrf.mxu0 }
 0x67a   : > { %17149 = vst [vmem:[#allocation20_spill] sm:$0xff] %v16577_v41 }
 0x67b   : > { %v16581_v45 = vpop.f32.mrf.mxu0 }
 0x67c   : > { %17150 = vst [vmem:[#allocation30_spill] sm:$0xff] %v16581_v45 }
 0x67d   : > { %v16585_v53 = vpop.f32.mrf.mxu0 }
 0x67e   : > { %17152 = vst [vmem:[#allocation14_spill] sm:$0xff] %v16585_v53  ;;  %v16607_v53 = vpop.f32.mrf.mxu1 }
 0x67f   : > { %v16589_v36 = vpop.f32.mrf.mxu0  ;;  %17163 = vst [vmem:[#allocation49_spill] sm:$0xff] %v16607_v53 }
 0x680   : > { %17154 = vst [vmem:[#allocation31_spill] sm:$0xff] %v16589_v36  ;;  %v16611_v36 = vpop.f32.mrf.mxu1 }
 0x681   : > { %v16593_v37 = vpop.f32.mrf.mxu0  ;;  %17165 = vst [vmem:[#allocation39_spill] sm:$0xff] %v16611_v36  ;;  %v8874_v36 = vpop.permute.xlu1 %8873 }
 0x682   : > { %17156 = vst [vmem:[#allocation34_spill] sm:$0xff] %v16593_v37  ;;  %v16615_v37 = vpop.f32.mrf.mxu1 }
 0x683   : > { %v16597_v30 = vpop.f32.mrf.mxu0  ;;  %17167 = vst [vmem:[#allocation47_spill] sm:$0xff] %v16615_v37 }
 0x684   : > { %17158 = vst [vmem:[#allocation17_spill] sm:$0xff] %v16597_v30  ;;  %v16619_v30 = vpop.f32.mrf.mxu1 }
 0x685   : > { %v16601_v48 = vpop.f32.mrf.mxu0  ;;  %17169 = vst [vmem:[#allocation27_spill] sm:$0xff] %v16619_v30 }
 0x686   : > { %17160 = vst [vmem:[#allocation19_spill] sm:$0xff] %v16601_v48  ;;  %v16623_v48 = vpop.f32.mrf.mxu1 }
 0x687   : > { %v16605_v59 = vpop.f32.mrf.mxu0  ;;  %17171 = vst [vmem:[#allocation51_spill] sm:$0xff] %v16623_v48  ;;  %v10076_v48 = vadd.f32 %v16394_v16, %v8874_v36 }
 0x688   : > { %17162 = vst [vmem:[#allocation29_spill] sm:$0xff] %v16605_v59  ;;  %v16627_v59 = vpop.f32.mrf.mxu1 }
 0x689   : > { %v16609_v33 = vpop.f32.mrf.mxu0  ;;  %17173 = vst [vmem:[#allocation53_spill] sm:$0xff] %v16627_v59 }
 0x68a   : > { %17164 = vst [vmem:[#allocation50_spill] sm:$0xff] %v16609_v33  ;;  %v16631_v33 = vpop.f32.mrf.mxu1 }
 0x68b   : > { %v16613_v22 = vpop.f32.mrf.mxu0  ;;  %17175 = vst [vmem:[#allocation55_spill] sm:$0xff] %v16631_v33 }
 0x68c   : > { %17166 = vst [vmem:[#allocation25_spill] sm:$0xff] %v16613_v22  ;;  %v16635_v37 = vpop.f32.mrf.mxu1 }
 0x68d   : > { %v16617_v58 = vpop.f32.mrf.mxu0  ;;  %17177 = vst [vmem:[#allocation57_spill] sm:$0xff] %v16635_v37 }
 0x68e   : > { %17168 = vst [vmem:[#allocation48_spill] sm:$0xff] %v16617_v58  ;;  %v10074_v58 = vadd.f32 %v16390_v21, %v8874_v36  ;;  %v8884_v21 = vpop.permute.xlu1 %8883 }
 0x68f   : > { %v16621_v4 = vpop.f32.mrf.mxu0  ;;  %v10086_v23 = vadd.f32 %v16416_v52, %v8884_v21 }
 0x690   : > { %17170 = vst [vmem:[#allocation36_spill] sm:$0xff] %v16621_v4  ;;  %v16640_v4 = vpop.f32.mrf.mxu1  ;;  %v10187_v59 = vadd.f32 %v16513_v61, %v10074_v58 }
 0x691   : > { %v16625_v10 = vpop.f32.mrf.mxu0  ;;  %17179 = vst [vmem:[#allocation59_spill] sm:$0xff] %v16640_v4  ;;  %v10084_v4 = vadd.f32 %v16414_v31, %v8884_v21 }
 0x692   : > { %17172 = vst [vmem:[#allocation52_spill] sm:$0xff] %v16625_v10  ;;  %v8879_v10 = vpop.permute.xlu0 %8878  ;;  %v16645_v33 = vpop.f32.mrf.mxu1 }
 0x693   : > { %v16629_v53 = vpop.f32.mrf.mxu0  ;;  %17180 = vst [vmem:[#allocation60_spill] sm:$0xff] %v16645_v33  ;;  %v10080_v37 = vadd.f32 %v16404_v6, %v8879_v10 }
 0x694   : > { %17174 = vst [vmem:[#allocation54_spill] sm:$0xff] %v16629_v53  ;;  %v10078_v53 = vadd.f32 %v16402_v11, %v8879_v10  ;;  %v16652_v36 = vpop.f32.mrf.mxu1 }
 0x695   : > { %v16633_v22 = vpop.f32.mrf.mxu0  ;;  %v10193_v61 = vadd.f32 %v16525_v44, %v10080_v37  ;;  %v8894_v37 = vpop.permute.xlu1 %8893 }
 0x696   : > { %17176 = vst [vmem:[#allocation56_spill] sm:$0xff] %v16633_v22  ;;  %v10189_v22 = vadd.f32 %v16517_v1, %v10076_v48  ;;  %v10191_v16 = vadd.f32 %v16521_v63, %v10078_v53  ;;  %v8889_v33 = vpop.permute.xlu0 %8888  ;;  %v10197_v53 = vadd.f32 %v16529_v20, %v10084_v4  ;;  %v10199_v20 = vadd.f32 %v16533_v38, %v10086_v23 }
 0x697   : > { %v16638_v30 = vpop.f32.mrf.mxu0  ;;  %v10088_v31 = vadd.f32 %v16426_v7, %v8889_v33  ;;  %v10094_v21 = vadd.f32 %v16438_v2, %v8894_v37 }
 0x698   : > { %17178 = vst [vmem:[#allocation58_spill] sm:$0xff] %v16638_v30  ;;  %v10300_v30 = vadd.f32 %v16523_v46, %v10187_v59  ;;  %v10302_v11 = vadd.f32 %v16527_v15, %v10189_v22  ;;  %v10304_v59 = vadd.f32 %v16531_v17, %v10191_v16  ;;  %v10306_v22 = vadd.f32 %v16535_v62, %v10193_v61 }
 0x699   : > { %v10310_v4 = vadd.f32 %v16539_v5, %v10197_v53  ;;  %v10201_v62 = vadd.f32 %v16537_v8, %v10088_v31  ;;  %v10096_v8 = vadd.f32 %v16440_v34, %v8894_v37 }
 0x69a   : > { %v8899_v5 = vpop.permute.xlu0 %8898 }
 0x69b   : > { %v10314_v2 = vadd.f32 %v16547_v40, %v10201_v62 }
 0x6e8   : > { %v10412_v45 = vpop.f32.mrf.mxu0 }
 0x6e9   : > { %v10413_v41 = vadd.f32 %v10412_v45, %v10300_v30 }
 0x6ea   : > { %v10414_v51 = vpop.f32.mrf.mxu0 }
 0x6eb   : > { %v10415_v6 = vadd.f32 %v10414_v51, %v10302_v11  ;;  %v10090_v51 = vadd.f32 %v16428_v54, %v8889_v33  ;;  %v10312_v11 = vadd.f32 %v16543_v24, %v10199_v20 }
 0x6ec   : > { %v10416_v42 = vpop.f32.mrf.mxu0 }
 0x6ed   : > { %v10417_v44 = vadd.f32 %v10416_v42, %v10304_v59 }
 0x6ee   : > { %v10418_v58 = vpop.f32.mrf.mxu0 }
 0x6f0   : > { %v10422_v48 = vpop.f32.mrf.mxu0  ;;  %v10525_v1 = vpop.f32.mrf.mxu1 }
 0x6f1   : > { %v10526_v10 = vadd.f32 %v10525_v1, %v10413_v41  ;;  %v10419_v41 = vadd.f32 %v10418_v58, %v10306_v22  ;;  %v10423_v61 = vadd.f32 %v10422_v48, %v10310_v4  ;;  %v10203_v1 = vadd.f32 %v16541_v50, %v10090_v51 }
 0x6f2   : > { %v10424_v63 = vpop.f32.mrf.mxu0  ;;  %v10527_v46 = vpop.f32.mrf.mxu1  ;;  %v10207_v48 = vadd.f32 %v16545_v28, %v10094_v21  ;;  %v10100_v51 = vadd.f32 %v16452_v55, %v8899_v5 }
 0x6f3   : > { %vm10604_vm15 = vcmp.ge.f32.partialorder %v10526_v10, 0.0  ;;  %v10636_v30 = vmul.f32 0.2, %v10526_v10  ;;  %v10528_v45 = vadd.f32 %v10527_v46, %v10415_v6  ;;  %v10425_v59 = vadd.f32 %v10424_v63, %v10312_v11 }
 0x6f4   : > { %v10426_v15 = vpop.f32.mrf.mxu0  ;;  %v10529_v52 = vpop.f32.mrf.mxu1  ;;  %v10098_v46 = vadd.f32 %v16450_v14, %v8899_v5  ;;  %v10316_v22 = vadd.f32 %v16551_v47, %v10203_v1  ;;  %v10209_v63 = vadd.f32 %v16549_v18, %v10096_v8  ;;  %v10320_v28 = vadd.f32 %v16555_v0, %v10207_v48 }
 0x6f5   : > { %v10668_v17 = vsel %vm10604_vm15, %v10526_v10, %v10636_v30  ;;  %vm10605_vm1 = vcmp.ge.f32.partialorder %v10528_v45, 0.0  ;;  %v10637_v7 = vmul.f32 0.2, %v10528_v45  ;;  %v10530_v54 = vadd.f32 %v10529_v52, %v10417_v44  ;;  %v8904_v52 = vpop.permute.xlu1 %8903 }
 0x6f6   : > { %10700 = vst [vmem:[%s16667_s21] sm:$0xff] %v10668_v17  ;;  %v10428_v33 = vpop.f32.mrf.mxu0  ;;  %v10531_v42 = vpop.f32.mrf.mxu1  ;;  %v10427_v50 = vadd.f32 %v10426_v15, %v10314_v2  ;;  %v10322_v4 = vadd.f32 %v16559_v57, %v10209_v63 }
 0x6f7   : > { %v10669_v16 = vsel %vm10605_vm1, %v10528_v45, %v10637_v7  ;;  %v10532_v58 = vadd.f32 %v10531_v42, %v10419_v41  ;;  %vm10606_vm6 = vcmp.ge.f32.partialorder %v10530_v54, 0.0  ;;  %v10638_v23 = vmul.f32 0.2, %v10530_v54 }
 0x6f8   : > { %10701 = vst [vmem:[%s16667_s21 + $0x8] sm:$0xff] %v10669_v16  ;;  %v10432_v38 = vpop.f32.mrf.mxu0  ;;  %v10535_v10 = vpop.f32.mrf.mxu1  ;;  %v10429_v44 = vadd.f32 %v10428_v33, %v10316_v22  ;;  %v10211_v7 = vadd.f32 %v16553_v25, %v10098_v46  ;;  %v10104_v33 = vadd.f32 %v16462_v29, %v8904_v52  ;;  %v10213_v42 = vadd.f32 %v16557_v43, %v10100_v51 }
 0x6f9   : > { %vm10607_vm2 = vcmp.ge.f32.partialorder %v10532_v58, 0.0  ;;  %v10639_v6 = vmul.f32 0.2, %v10532_v58  ;;  %v10670_v31 = vsel %vm10606_vm6, %v10530_v54, %v10638_v23  ;;  %v10536_v24 = vadd.f32 %v10535_v10, %v10423_v61 }
 0x6fa   : > { %v10434_v53 = vpop.f32.mrf.mxu0  ;;  %10702 = vst [vmem:[%s16667_s21 + $0x10] sm:$0xff] %v10670_v31  ;;  %v10537_v37 = vpop.f32.mrf.mxu1  ;;  %v10433_v20 = vadd.f32 %v10432_v38, %v10320_v28  ;;  %v10324_v21 = vadd.f32 %v16563_v56, %v10211_v7  ;;  %v10106_v23 = vadd.f32 %v16464_v32, %v8904_v52  ;;  %v10217_v38 = vadd.f32 %v16561_v3, %v10104_v33 }
 0x6fb   : > { %v10671_v34 = vsel %vm10607_vm2, %v10532_v58, %v10639_v6  ;;  %vm10608_vm4 = vcmp.ge.f32.partialorder %v10536_v24, 0.0  ;;  %v10640_v30 = vmul.f32 0.2, %v10536_v24  ;;  %v10538_v45 = vadd.f32 %v10537_v37, %v10425_v59  ;;  %v8909_v58 = vpop.permute.xlu0 %8908 }
 0x6fc   : > { %10703 = vst [vmem:[%s16667_s21 + $0x18] sm:$0xff] %v10671_v34  ;;  %v10436_v40 = vpop.f32.mrf.mxu0  ;;  %v10539_v14 = vpop.f32.mrf.mxu1  ;;  %v10435_v16 = vadd.f32 %v10434_v53, %v10322_v4  ;;  %v10326_v29 = vadd.f32 %v16567_v39, %v10213_v42  ;;  %v10108_v2 = vadd.f32 %v16474_v26, %v8909_v58  ;;  %v10219_v59 = vadd.f32 %v16565_v9, %v10106_v23  ;;  %v17186_v42 = vld [vmem:[#allocation44_spill] sm:$0xff]  ;;  %v17187_v23 = vld [vmem:[#allocation15_spill] sm:$0xff] }
 0x6fd   : > { %v10672_v47 = vsel %vm10608_vm4, %v10536_v24, %v10640_v30  ;;  %vm10609_vm3 = vcmp.ge.f32.partialorder %v10538_v45, 0.0  ;;  %v10641_v41 = vmul.f32 0.2, %v10538_v45  ;;  %v10540_v17 = vadd.f32 %v10539_v14, %v10427_v50  ;;  %v8914_v24 = vpop.permute.xlu1 %8913 }
 0x6fe   : > { %v10438_v15 = vpop.f32.mrf.mxu0  ;;  %10704 = vst [vmem:[%s16667_s21 + $0x20] sm:$0xff] %v10672_v47  ;;  %v10541_v18 = vpop.f32.mrf.mxu1  ;;  %v10437_v8 = vadd.f32 %v10436_v40, %v10324_v21  ;;  %v10330_v31 = vadd.f32 %v16571_v60, %v10217_v38  ;;  %v10110_v22 = vadd.f32 %v16476_v27, %v8909_v58  ;;  %v10221_v34 = vadd.f32 %v16569_v19, %v10108_v2  ;;  %v17181_v47 = vld [vmem:[#allocation18_spill] sm:$0xff] }
 0x6ff   : > { %v10673_v62 = vsel %vm10609_vm3, %v10538_v45, %v10641_v41  ;;  %vm10610_vm9 = vcmp.ge.f32.partialorder %v10540_v17, 0.0  ;;  %v10642_v55 = vmul.f32 0.2, %v10540_v17  ;;  %v10542_v0 = vadd.f32 %v10541_v18, %v10429_v44  ;;  %v8919_v28 = vpop.permute.xlu0 %8918 }
 0x700   : > { %v10442_v54 = vpop.f32.mrf.mxu0  ;;  %10705 = vst [vmem:[%s16667_s21 + $0x28] sm:$0xff] %v10673_v62  ;;  %v10545_v25 = vpop.f32.mrf.mxu1  ;;  %v10439_v32 = vadd.f32 %v10438_v15, %v10326_v29  ;;  %v10332_v26 = vadd.f32 %v16575_v49, %v10219_v59  ;;  %v10114_v40 = vadd.f32 %v16479_v13, %v8914_v24  ;;  %v10223_v63 = vadd.f32 %v16573_v12, %v10110_v22  ;;  %v17183_v13 = vld [vmem:[#allocation24_spill] sm:$0xff]  ;;  %v17188_v29 = vld [vmem:[#allocation14_spill] sm:$0xff] }
 0x701   : > { %v10674_v57 = vsel %vm10610_vm9, %v10540_v17, %v10642_v55  ;;  %vm10611_vm11 = vcmp.ge.f32.partialorder %v10542_v0, 0.0  ;;  %v10643_v11 = vmul.f32 0.2, %v10542_v0  ;;  %v10546_v5 = vadd.f32 %v10545_v25, %v10433_v20  ;;  %v17182_v17 = vld [vmem:[#allocation20_spill] sm:$0xff]  ;;  %v8924_v58 = vpop.permute.xlu1 %8923 }
 0x702   : > { %v10444_v61 = vpop.f32.mrf.mxu0  ;;  %10706 = vst [vmem:[%s16667_s21 + $0x30] sm:$0xff] %v10674_v57  ;;  %v10547_v43 = vpop.f32.mrf.mxu1  ;;  %v10443_v37 = vadd.f32 %v10442_v54, %v10330_v31  ;;  %v10334_v51 = vadd.f32 %v16579_v35, %v10221_v34  ;;  %v10116_v41 = vadd.f32 %v17181_v47, %v8914_v24  ;;  %v10227_v15 = vadd.f32 %v17182_v17, %v10114_v40  ;;  %v17184_v55 = vld [vmem:[#allocation16_spill] sm:$0xff]  ;;  %v17185_v54 = vld [vmem:[#allocation30_spill] sm:$0xff]  ;;  %v17191_v24 = vld [vmem:[#allocation31_spill] sm:$0xff] }
 0x703   : > { %v10675_v56 = vsel %vm10611_vm11, %v10542_v0, %v10643_v11  ;;  %vm10612_vm14 = vcmp.ge.f32.partialorder %v10546_v5, 0.0  ;;  %v10644_v1 = vmul.f32 0.2, %v10546_v5  ;;  %v10548_v6 = vadd.f32 %v10547_v43, %v10435_v16  ;;  %v17189_v43 = vld [vmem:[#allocation38_spill] sm:$0xff]  ;;  %v8929_v34 = vpop.permute.xlu0 %8928 }
 0x704   : > { %v10446_v10 = vpop.f32.mrf.mxu0  ;;  %10707 = vst [vmem:[%s16667_s21 + $0x38] sm:$0xff] %v10675_v56  ;;  %v10549_v3 = vpop.f32.mrf.mxu1  ;;  %v10445_v27 = vadd.f32 %v10444_v61, %v10332_v26  ;;  %v10336_v7 = vadd.f32 %v17183_v13, %v10223_v63  ;;  %v10118_v0 = vadd.f32 %v17184_v55, %v8919_v28  ;;  %v10229_v33 = vadd.f32 %v17185_v54, %v10116_v41  ;;  %v17195_v63 = vld [vmem:[#allocation33_spill] sm:$0xff]  ;;  %v17199_v55 = vld [vmem:[#allocation35_spill] sm:$0xff] }
 0x705   : > { %v10676_v39 = vsel %vm10612_vm14, %v10546_v5, %v10644_v1  ;;  %vm10613_vm12 = vcmp.ge.f32.partialorder %v10548_v6, 0.0  ;;  %v10645_v53 = vmul.f32 0.2, %v10548_v6  ;;  %v10550_v48 = vadd.f32 %v10549_v3, %v10437_v8  ;;  %v17197_v41 = vld [vmem:[#allocation17_spill] sm:$0xff]  ;;  %v17200_v54 = vld [vmem:[#allocation19_spill] sm:$0xff] }
 0x706   : > { %v10448_v46 = vpop.f32.mrf.mxu0  ;;  %10708 = vst [vmem:[%s16667_s21 + $0x40] sm:$0xff] %v10676_v39  ;;  %v10551_v9 = vpop.f32.mrf.mxu1  ;;  %v10447_v4 = vadd.f32 %v10446_v10, %v10334_v51  ;;  %v10340_v21 = vadd.f32 %v17186_v42, %v10227_v15  ;;  %v10120_v38 = vadd.f32 %v17187_v23, %v8919_v28  ;;  %v10231_v8 = vadd.f32 %v17188_v29, %v10118_v0  ;;  %v17198_v15 = vld [vmem:[#allocation42_spill] sm:$0xff]  ;;  %v17201_v42 = vld [vmem:[#allocation49_spill] sm:$0xff] }
 0x707   : > { %v10677_v60 = vsel %vm10613_vm12, %v10548_v6, %v10645_v53  ;;  %vm10614_vm0 = vcmp.ge.f32.partialorder %v10550_v48, 0.0  ;;  %v10646_v50 = vmul.f32 0.2, %v10550_v48  ;;  %v10552_v30 = vadd.f32 %v10551_v9, %v10439_v32  ;;  %v17190_v32 = vld [vmem:[#allocation26_spill] sm:$0xff]  ;;  %v17192_v53 = vld [vmem:[#allocation28_spill] sm:$0xff] }
 0x708   : > { %v10452_v45 = vpop.f32.mrf.mxu0  ;;  %10709 = vst [vmem:[%s16667_s21 + $0x48] sm:$0xff] %v10677_v60  ;;  %v10555_v19 = vpop.f32.mrf.mxu1  ;;  %v10449_v16 = vadd.f32 %v10448_v46, %v10336_v7  ;;  %v10342_v56 = vadd.f32 %v17189_v43, %v10229_v33  ;;  %v10124_v3 = vadd.f32 %v17190_v32, %v8924_v58  ;;  %v10233_v39 = vadd.f32 %v17191_v24, %v10120_v38  ;;  %v17203_v38 = vld [vmem:[#allocation29_spill] sm:$0xff]  ;;  %v17205_v32 = vld [vmem:[#allocation40_spill] sm:$0xff]  ;;  %v17206_v24 = vld [vmem:[#allocation50_spill] sm:$0xff] }
 0x709   : > { %v10678_v49 = vsel %vm10614_vm0, %v10550_v48, %v10646_v50  ;;  %vm10615_vm13 = vcmp.ge.f32.partialorder %v10552_v30, 0.0  ;;  %v10647_v44 = vmul.f32 0.2, %v10552_v30  ;;  %v10556_v14 = vadd.f32 %v10555_v19, %v10443_v37  ;;  %v17193_v50 = vld [vmem:[#allocation21_spill] sm:$0xff] }
 0x70a   : > { %v10454_v52 = vpop.f32.mrf.mxu0  ;;  %10710 = vst [vmem:[%s16667_s21 + $0x50] sm:$0xff] %v10678_v49  ;;  %v10557_v12 = vpop.f32.mrf.mxu1  ;;  %v10453_v1 = vadd.f32 %v10452_v45, %v10340_v21  ;;  %v10344_v48 = vadd.f32 %v17192_v53, %v10231_v8  ;;  %v17194_v45 = vld [vmem:[#allocation34_spill] sm:$0xff]  ;;  %v10346_v51 = vadd.f32 %v17195_v63, %v10233_v39  ;;  %v10130_v0 = vadd.f32 %v17199_v55, %v8929_v34  ;;  %v17204_v8 = vld [vmem:[#allocation39_spill] sm:$0xff] }
 0x70b   : > { %v10679_v35 = vsel %vm10615_vm13, %v10552_v30, %v10647_v44  ;;  %vm10616_vm8 = vcmp.ge.f32.partialorder %v10556_v14, 0.0  ;;  %v10648_v20 = vmul.f32 0.2, %v10556_v14  ;;  %v10558_v18 = vadd.f32 %v10557_v12, %v10445_v27  ;;  %v8934_v12 = vpop.permute.xlu1 %8933  ;;  %v17207_v53 = vld [vmem:[#allocation47_spill] sm:$0xff] }
 0x70c   : > { %v10456_v62 = vpop.f32.mrf.mxu0  ;;  %10711 = vst [vmem:[%s16667_s21 + $0x58] sm:$0xff] %v10679_v35  ;;  %v10559_v25 = vpop.f32.mrf.mxu1  ;;  %v10455_v46 = vadd.f32 %v10454_v52, %v10342_v56  ;;  %v10126_v30 = vadd.f32 %v17193_v50, %v8924_v58  ;;  %v10237_v40 = vadd.f32 %v17194_v45, %v10124_v3  ;;  %v17196_v52 = vld [vmem:[#allocation32_spill] sm:$0xff]  ;;  %v10243_v29 = vadd.f32 %v17203_v38, %v10130_v0 }
 0x70d   : > { %v10680_v57 = vsel %vm10616_vm8, %v10556_v14, %v10648_v20  ;;  %vm10617_vm10 = vcmp.ge.f32.partialorder %v10558_v18, 0.0  ;;  %v10649_v11 = vmul.f32 0.2, %v10558_v18  ;;  %v10560_v5 = vadd.f32 %v10559_v25, %v10447_v4  ;;  %v17215_v0 = vld [vmem:[#allocation36_spill] sm:$0xff] }
 0x70e   : > { %v10458_v61 = vpop.f32.mrf.mxu0  ;;  %10712 = vst [vmem:[%s16667_s21 + $0x60] sm:$0xff] %v10680_v57  ;;  %v10561_v6 = vpop.f32.mrf.mxu1  ;;  %v10457_v27 = vadd.f32 %v10456_v62, %v10344_v48  ;;  %v10128_v47 = vadd.f32 %v17196_v52, %v8929_v34  ;;  %v10239_v17 = vadd.f32 %v17197_v41, %v10126_v30  ;;  %v10350_v13 = vadd.f32 %v17198_v15, %v10237_v40  ;;  %v17209_v30 = vld [vmem:[#allocation25_spill] sm:$0xff]  ;;  %v17210_v40 = vld [vmem:[#allocation27_spill] sm:$0xff]  ;;  %v17212_v41 = vld [vmem:[#allocation48_spill] sm:$0xff] }
 0x70f   : > { %v10681_v10 = vsel %vm10617_vm10, %v10558_v18, %v10649_v11  ;;  %vm10618_vm7 = vcmp.ge.f32.partialorder %v10560_v5, 0.0  ;;  %v10650_v2 = vmul.f32 0.2, %v10560_v5  ;;  %v10562_v59 = vadd.f32 %v10561_v6, %v10449_v16  ;;  %v8939_v6 = vpop.permute.xlu0 %8938  ;;  %v17211_v52 = vld [vmem:[#allocation43_spill] sm:$0xff]  ;;  %v17218_v38 = vld [vmem:[#allocation52_spill] sm:$0xff] }
 0x710   : > { %v10462_v31 = vpop.f32.mrf.mxu0  ;;  %10713 = vst [vmem:[%s16667_s21 + $0x68] sm:$0xff] %v10681_v10  ;;  %v10565_v22 = vpop.f32.mrf.mxu1  ;;  %v10459_v7 = vadd.f32 %v10458_v61, %v10346_v51  ;;  %v10241_v33 = vadd.f32 %v17200_v54, %v10128_v47  ;;  %v10352_v21 = vadd.f32 %v17201_v42, %v10239_v17  ;;  %v17202_v61 = vld [vmem:[#allocation37_spill] sm:$0xff]  ;;  %v10136_v3 = vadd.f32 %v17205_v32, %v8934_v12  ;;  %v17213_v15 = vld [vmem:[#allocation51_spill] sm:$0xff]  ;;  %v17221_v32 = vld [vmem:[#allocation54_spill] sm:$0xff] }
 0x711   : > { %v10682_v26 = vsel %vm10618_vm7, %v10560_v5, %v10650_v2  ;;  %vm10619_vm5 = vcmp.ge.f32.partialorder %v10562_v59, 0.0  ;;  %v10651_v37 = vmul.f32 0.2, %v10562_v59  ;;  %v10566_v9 = vadd.f32 %v10565_v22, %v10453_v1 }
 0x712   : > { %v10464_v60 = vpop.f32.mrf.mxu0  ;;  %10714 = vst [vmem:[%s16667_s21 + $0x70] sm:$0xff] %v10682_v26  ;;  %v10567_v19 = vpop.f32.mrf.mxu1  ;;  %v10463_v16 = vadd.f32 %v10462_v31, %v10350_v13  ;;  %v10134_v23 = vadd.f32 %v17202_v61, %v8934_v12  ;;  %v10354_v43 = vadd.f32 %v17204_v8, %v10241_v33  ;;  %v10356_v48 = vadd.f32 %v17207_v53, %v10243_v29  ;;  %v17216_v33 = vld [vmem:[#allocation53_spill] sm:$0xff]  ;;  %v17217_v61 = vld [vmem:[#allocation46_spill] sm:$0xff]  ;;  %v17219_v8 = vld [vmem:[#allocation55_spill] sm:$0xff] }
 0x713   : > { %v10683_v28 = vsel %vm10619_vm5, %v10562_v59, %v10651_v37  ;;  %vm10620_vm15 = vcmp.ge.f32.partialorder %v10566_v9, 0.0  ;;  %v10652_v49 = vmul.f32 0.2, %v10566_v9  ;;  %v10568_v44 = vadd.f32 %v10567_v19, %v10455_v46  ;;  %v8944_v19 = vpop.permute.xlu1 %8943 }
 0x714   : > { %v10466_v14 = vpop.f32.mrf.mxu0  ;;  %10715 = vst [vmem:[%s16667_s21 + $0x78] sm:$0xff] %v10683_v28  ;;  %v10569_v4 = vpop.f32.mrf.mxu1  ;;  %v10465_v56 = vadd.f32 %v10464_v60, %v10352_v21  ;;  %v10247_v39 = vadd.f32 %v17206_v24, %v10134_v23  ;;  %v17208_v60 = vld [vmem:[#allocation41_spill] sm:$0xff]  ;;  %v10249_v45 = vadd.f32 %v17209_v30, %v10136_v3  ;;  %v10140_v47 = vadd.f32 %v17211_v52, %v8939_v6  ;;  %v17225_v30 = vld [vmem:[#allocation59_spill] sm:$0xff] }
 0x715   : > { %v10684_v35 = vsel %vm10620_vm15, %v10566_v9, %v10652_v49  ;;  %vm10621_vm1 = vcmp.ge.f32.partialorder %v10568_v44, 0.0  ;;  %v10653_v20 = vmul.f32 0.2, %v10568_v44  ;;  %v10570_v18 = vadd.f32 %v10569_v4, %v10457_v27  ;;  %v17222_v24 = vld [vmem:[#allocation57_spill] sm:$0xff] }
 0x716   : > { %v10468_v62 = vpop.f32.mrf.mxu0  ;;  %10716 = vst [vmem:[%s16667_s21 + $0x80] sm:$0xff] %v10684_v35  ;;  %v10571_v25 = vpop.f32.mrf.mxu1  ;;  %v10467_v46 = vadd.f32 %v10466_v14, %v10354_v43  ;;  %v10138_v50 = vadd.f32 %v17208_v60, %v8939_v6  ;;  %v10360_v63 = vadd.f32 %v17210_v40, %v10247_v39  ;;  %v10362_v13 = vadd.f32 %v17213_v15, %v10249_v45  ;;  %v17224_v60 = vld [vmem:[#allocation56_spill] sm:$0xff] }
 0x717   : > { %v10685_v58 = vsel %vm10621_vm1, %v10568_v44, %v10653_v20  ;;  %vm10622_vm6 = vcmp.ge.f32.partialorder %v10570_v18, 0.0  ;;  %v10654_v57 = vmul.f32 0.2, %v10570_v18  ;;  %v10572_v11 = vadd.f32 %v10571_v25, %v10459_v7  ;;  %v8949_v25 = vpop.permute.xlu0 %8948 }
 0x718   : > { %v10472_v5 = vpop.f32.mrf.mxu0  ;;  %10717 = vst [vmem:[%s16667_s21 + $0x88] sm:$0xff] %v10685_v58  ;;  %v10575_v1 = vpop.f32.mrf.mxu1  ;;  %v10469_v51 = vadd.f32 %v10468_v62, %v10356_v48  ;;  %v10251_v17 = vadd.f32 %v17212_v41, %v10138_v50  ;;  %v17214_v62 = vld [vmem:[#allocation45_spill] sm:$0xff]  ;;  %v10253_v54 = vadd.f32 %v17215_v0, %v10140_v47  ;;  %v10146_v23 = vadd.f32 %v17217_v61, %v8944_v19 }
 0x719   : > { %v10686_v10 = vsel %vm10622_vm6, %v10570_v18, %v10654_v57  ;;  %vm10623_vm2 = vcmp.ge.f32.partialorder %v10572_v11, 0.0  ;;  %v10655_v2 = vmul.f32 0.2, %v10572_v11  ;;  %v10576_v59 = vadd.f32 %v10575_v1, %v10463_v16 }
 0x71a   : > { %v10474_v31 = vpop.f32.mrf.mxu0  ;;  %10718 = vst [vmem:[%s16667_s21 + $0x90] sm:$0xff] %v10686_v10  ;;  %v10577_v22 = vpop.f32.mrf.mxu1  ;;  %v10473_v7 = vadd.f32 %v10472_v5, %v10360_v63  ;;  %v10144_v55 = vadd.f32 %v17214_v62, %v8944_v19  ;;  %v10364_v42 = vadd.f32 %v17216_v33, %v10251_v17  ;;  %v10366_v43 = vadd.f32 %v17219_v8, %v10253_v54 }
 0x71b   : > { %v10687_v34 = vsel %vm10623_vm2, %v10572_v11, %v10655_v2  ;;  %vm10624_vm4 = vcmp.ge.f32.partialorder %v10576_v59, 0.0  ;;  %v10656_v26 = vmul.f32 0.2, %v10576_v59  ;;  %v10578_v37 = vadd.f32 %v10577_v22, %v10465_v56 }
 0x71c   : > { %v10476_v9 = vpop.f32.mrf.mxu0  ;;  %10719 = vst [vmem:[%s16667_s21 + $0x98] sm:$0xff] %v10687_v34  ;;  %v10579_v27 = vpop.f32.mrf.mxu1  ;;  %v10475_v21 = vadd.f32 %v10474_v31, %v10362_v13  ;;  %v10257_v29 = vadd.f32 %v17218_v38, %v10144_v55  ;;  %v10259_v3 = vadd.f32 %v17221_v32, %v10146_v23 }
 0x71d   : > { %v10688_v28 = vsel %vm10624_vm4, %v10576_v59, %v10656_v26  ;;  %vm10625_vm3 = vcmp.ge.f32.partialorder %v10578_v37, 0.0  ;;  %v10657_v49 = vmul.f32 0.2, %v10578_v37  ;;  %v10580_v44 = vadd.f32 %v10579_v27, %v10467_v46  ;;  %v17220_v59 = vld [vmem:[#allocation22_spill] sm:$0xff] }
 0x71e   : > { %v10478_v14 = vpop.f32.mrf.mxu0  ;;  %10720 = vst [vmem:[%s16667_s21 + $0xa0] sm:$0xff] %v10688_v28  ;;  %v10581_v4 = vpop.f32.mrf.mxu1  ;;  %v10477_v56 = vadd.f32 %v10476_v9, %v10364_v42  ;;  %v10148_v31 = vadd.f32 %v17220_v59, %v8949_v25  ;;  %v10370_v39 = vadd.f32 %v17222_v24, %v10257_v29  ;;  %v10372_v45 = vadd.f32 %v17225_v30, %v10259_v3  ;;  %v17226_v28 = vld [vmem:[#allocation58_spill] sm:$0xff] }
 0x71f   : > { %v10689_v12 = vsel %vm10625_vm3, %v10578_v37, %v10657_v49  ;;  %vm10626_vm9 = vcmp.ge.f32.partialorder %v10580_v44, 0.0  ;;  %v10658_v35 = vmul.f32 0.2, %v10580_v44  ;;  %v10582_v20 = vadd.f32 %v10581_v4, %v10469_v51  ;;  %v17223_v37 = vld [vmem:[#allocation23_spill] sm:$0xff] }
 0x720   : > { %v10482_v18 = vpop.f32.mrf.mxu0  ;;  %10721 = vst [vmem:[%s16667_s21 + $0xa8] sm:$0xff] %v10689_v12  ;;  %v10585_v16 = vpop.f32.mrf.mxu1  ;;  %v10479_v53 = vadd.f32 %v10478_v14, %v10366_v43  ;;  %v10150_v9 = vadd.f32 %v17223_v37, %v8949_v25  ;;  %v10261_v50 = vadd.f32 %v17224_v60, %v10148_v31 }
 0x721   : > { %v10690_v58 = vsel %vm10626_vm9, %v10580_v44, %v10658_v35  ;;  %vm10627_vm11 = vcmp.ge.f32.partialorder %v10582_v20, 0.0  ;;  %v10659_v57 = vmul.f32 0.2, %v10582_v20  ;;  %v10586_v11 = vadd.f32 %v10585_v16, %v10473_v7  ;;  %v17227_v44 = vld [vmem:[#allocation60_spill] sm:$0xff] }
 0x722   : > { %v10484_v5 = vpop.f32.mrf.mxu0  ;;  %10722 = vst [vmem:[%s16667_s21 + $0xb0] sm:$0xff] %v10690_v58  ;;  %v10587_v1 = vpop.f32.mrf.mxu1  ;;  %v10483_v40 = vadd.f32 %v10482_v18, %v10370_v39  ;;  %v10263_v49 = vadd.f32 %v17226_v28, %v10150_v9  ;;  %v10374_v14 = vadd.f32 %v17227_v44, %v10261_v50 }
 0x723   : > { %v10691_v6 = vsel %vm10627_vm11, %v10582_v20, %v10659_v57  ;;  %vm10628_vm14 = vcmp.ge.f32.partialorder %v10586_v11, 0.0  ;;  %v10660_v10 = vmul.f32 0.2, %v10586_v11  ;;  %v10588_v2 = vadd.f32 %v10587_v1, %v10475_v21 }
 0x724   : > { %10723 = vst [vmem:[%s16667_s21 + $0xb8] sm:$0xff] %v10691_v6  ;;  %v10589_v48 = vpop.f32.mrf.mxu1  ;;  %v10486_v34 = vpop.f32.mrf.mxu0  ;;  %v10485_v52 = vadd.f32 %v10484_v5, %v10372_v45  ;;  %v10376_v7 = vadd.f32 %v16652_v36, %v10263_v49 }
 0x725   : > { %v10692_v46 = vsel %vm10628_vm14, %v10586_v11, %v10660_v10  ;;  %vm10629_vm12 = vcmp.ge.f32.partialorder %v10588_v2, 0.0  ;;  %v10661_v22 = vmul.f32 0.2, %v10588_v2  ;;  %v10590_v26 = vadd.f32 %v10589_v48, %v10477_v56 }
 0x726   : > { %10724 = vst [vmem:[%s16667_s21 + $0xc0] sm:$0xff] %v10692_v46  ;;  %v10591_v63 = vpop.f32.mrf.mxu1  ;;  %v10488_v17 = vpop.f32.mrf.mxu0  ;;  %v10487_v4 = vadd.f32 %v10486_v34, %v10374_v14 }
 0x727   : > { %v10693_v51 = vsel %vm10629_vm12, %v10588_v2, %v10661_v22  ;;  %vm10630_vm0 = vcmp.ge.f32.partialorder %v10590_v26, 0.0  ;;  %v10662_v27 = vmul.f32 0.2, %v10590_v26  ;;  %v10592_v19 = vadd.f32 %v10591_v63, %v10479_v53 }
 0x728   : > { %10725 = vst [vmem:[%s16667_s21 + $0xc8] sm:$0xff] %v10693_v51  ;;  %v10595_v47 = vpop.f32.mrf.mxu1  ;;  %v10489_v62 = vadd.f32 %v10488_v17, %v10376_v7 }
 0x729   : > { %v10694_v41 = vsel %vm10630_vm0, %v10590_v26, %v10662_v27  ;;  %vm10631_vm13 = vcmp.ge.f32.partialorder %v10592_v19, 0.0  ;;  %v10663_v15 = vmul.f32 0.2, %v10592_v19  ;;  %v10596_v13 = vadd.f32 %v10595_v47, %v10483_v40 }
 0x72a   : > { %10726 = vst [vmem:[%s16667_s21 + $0xd0] sm:$0xff] %v10694_v41  ;;  %v10597_v12 = vpop.f32.mrf.mxu1 }
 0x72b   : > { %v10695_v35 = vsel %vm10631_vm13, %v10592_v19, %v10663_v15  ;;  %vm10632_vm8 = vcmp.ge.f32.partialorder %v10596_v13, 0.0  ;;  %v10664_v20 = vmul.f32 0.2, %v10596_v13  ;;  %v10598_v18 = vadd.f32 %v10597_v12, %v10485_v52 }
 0x72c   : > { %10727 = vst [vmem:[%s16667_s21 + $0xd8] sm:$0xff] %v10695_v35  ;;  %v10599_v55 = vpop.f32.mrf.mxu1 }
 0x72d   : > { %v10696_v0 = vsel %vm10632_vm8, %v10596_v13, %v10664_v20  ;;  %vm10633_vm10 = vcmp.ge.f32.partialorder %v10598_v18, 0.0  ;;  %v10665_v54 = vmul.f32 0.2, %v10598_v18  ;;  %v10600_v33 = vadd.f32 %v10599_v55, %v10487_v4 }
 0x72e   : > { %10728 = vst [vmem:[%s16667_s21 + $0xe0] sm:$0xff] %v10696_v0  ;;  %v10601_v36 = vpop.f32.mrf.mxu1 }
 0x72f   : > { %v10697_v42 = vsel %vm10633_vm10, %v10598_v18, %v10665_v54  ;;  %vm10634_vm7 = vcmp.ge.f32.partialorder %v10600_v33, 0.0  ;;  %v10666_v21 = vmul.f32 0.2, %v10600_v33  ;;  %v10602_v16 = vadd.f32 %v10601_v36, %v10489_v62 }
 0x730   : > { %10729 = vst [vmem:[%s16667_s21 + $0xe8] sm:$0xff] %v10697_v42 }
 0x731   : > { %v10698_v25 = vsel %vm10634_vm7, %v10600_v33, %v10666_v21  ;;  %vm10635_vm5 = vcmp.ge.f32.partialorder %v10602_v16, 0.0  ;;  %v10667_v58 = vmul.f32 0.2, %v10602_v16 }
 0x732   : > { %10730 = vst [vmem:[%s16667_s21 + $0xf0] sm:$0xff] %v10698_v25 }
 0x733   : > { %v10699_v57 = vsel %vm10635_vm5, %v10602_v16, %v10667_v58 }
 0x734   : > { %10731 = vst [vmem:[%s16667_s21 + $0xf8] sm:$0xff] %v10699_v57 }
 0x735   : > { %12574 = shalt.err (!%p12571_p9)
}
 0x736   : > { %s12575_s17 = scalar_lea.hbm %s16780_s29, 4096  ;;  %s12579_s21 = scalar_lea.hbm %s16835_s7, 8192 }
 0x737   : > { %p12576_p13 = scmp.ne.s32.totalorder %s16780_s29, %s12575_s17  ;;  %p12580_p4 = scmp.lt.s32.totalorder %s16780_s29, %s16835_s7 }
 0x738   : > { %p12581_p8 = scmp.lt.s32.totalorder %s12579_s21, %s12575_s17 }
 0x739   : > { %p12577_p5 = pnand %p12576_p13, %p17228_p10 }
 0x73a   : > { %p12582_p3 = por %p12581_p8, %p12580_p4 }
 0x73b   : > { %p12578_p0 = pneg %p12577_p5 }
 0x73d   : > { %p12583_p11 = pnand %p12582_p3, %p12578_p0 }
 0x73f   : > { %12586 = shalt.err (!%p12583_p11)
}
 0x740   : > { %s12657_s19 = smov 256  }
 0x741   : > { %12180 = dma.vmem_to_hbm [thread:$0]  (%p17228_p10), %s16783_s22, 4096, %s16780_s29, %s10733_s28, %s12657_s19, %s12657_s19, %s12649_s10  }
 0x742 PF: > { %s10761_s14 = sand.u32 1, %s12617_s24   ;;  %p17229_p1 = scmp.ne.s32.totalorder %s16941_s8, 0 }
 0x743   : > { %p17230_p2 = scmp.ge.s32.totalorder %s12629_s27, 2  ;;  %s10762_s16 = scalar_lea.sflag [#allocation6], %s10761_s14 }
 0x745   : > { %p12194_p6 = pnand %p17230_p2, %p17229_p1 }
 0x747   : > { %p12195_p12 = pneg %p12194_p6 }
 0x749   : > { %12612 = dma.done.wait (%p12195_p12), %s10762_s16, 4096  }
 0x74a   : > { %12614 = vsyncadd (%p12195_p12), %s10762_s16, 4294963200  ;;  %p21_p7 = scmp.ge.s32.totalorder %s12770_s23, 4   ;;  %s17231_s24 = smov %s12621_s25 }
 0x74b   : > { %s17232_s25 = smov %s12625_s26  ;;  %s17233_s26 = smov %s12786_s12 }
 0x74c   : > { %s17234_s27 = smov %s12770_s23  ;;  %23 = sbr.rel (!%p21_p7) target bundleno = 8 (0x8), region = 101 }
 0x751   :  { %10767 = vsyncpa [#allocation5], 1 }
 0x752   :  { %10769 = vsyncpa [#allocation5 + $0x1], 1 }
 0x753   :  { %10770 = vsyncpa [#allocation8], 1 }
 0x754   :  { %10771 = vsyncpa [#allocation6], 1 }
 0x755   :  { %10773 = vsyncpa [#allocation6 + $0x1], 1 }

</bundles_post_ra>
